<compile_context>
chip_gen: v7x
topology: tpu7x:2x2x1
jax: 0.10.0
libtpu: 0.0.40
codegen_flags: <defaults>
</compile_context>

<pallas_src>
import functools

import jax
import jax.numpy as jnp
from jax import lax
from jax.experimental import pallas as pl
from jax.experimental.pallas import tpu as pltpu

_K = 4                                       # every Conv1d: kernel 4, stride 1, pad 0
_POOL = ((2, 2), (2, 2), (2, 2), (4, 1))     # (pool_width, pool_stride) per stage


def _stage_lengths(nt):
    """Per-stage (L_conv, L_pool), mirroring the PyTorch module's arithmetic."""
    dims, L = [], nt
    for (pf, ps) in _POOL:
        Lc = L - _K + 1
        Lp = (Lc - pf) // ps + 1
        dims.append((Lc, Lp))
        L = Lp
    return tuple(dims)


def _time_encoder_kernel(x_ref, w1_ref, b1_ref, w2_ref, b2_ref, w3_ref, b3_ref,
                         w4_ref, b4_ref, scat_ref, o_ref, s1, s2, s3, s4, *, cfg):
    """Fused Conv1d/ReLU/MaxPool x4 + channel-major Flatten for BB elements.

    Flat activation layout: row = b*S_stage + t, lane = channel.  Per-element
    strides S1..S4 halve at every stride-2 pool; S1 is a multiple of 8 so the
    even/odd phase of the strided pool reads is identical for every element.
    Rows past each element's valid length only ever feed rows that are
    themselves discarded downstream (scratch tails are zeroed for hygiene).
    """
    BB, S1, S2, S3, S4, L4p = cfg

    # ---- stage 1: rebuild the flat time-major column from the lane-dense
    # (BB, S1) input block: one 2-D transpose + BB single-lane slices.
    xT = jnp.transpose(x_ref[...])                                   # (S1, BB)
    xcol = jnp.concatenate([xT[:, b:b + 1] for b in range(BB)], axis=0)  # (BB*S1, 1)

    # Conv1d(1->32) + bias + ReLU.  C_in == 1, so 4 broadcast multiply-adds on
    # the VPU (trivial work; the MXU is kept for the wide stages).
    M1 = BB * S1 - (_K - 1)
    w1 = w1_ref[...]                                                 # (4, C1)
    y1 = xcol[0:M1, :] * w1[0:1, :]
    for k in range(1, _K):
        y1 = y1 + xcol[k:k + M1, :] * w1[k:k + 1, :]
    y1 = jnp.maximum(y1 + b1_ref[...], 0.0)                          # (M1, C1)
    s1[0:M1, :] = y1
    s1[M1:, :] = jnp.zeros((BB * S1 - M1, s1.shape[1]), jnp.float32)

    def pool2(s_ref, n_out):
        # MaxPool1d(2, stride 2) for all BB elements at once: element b's
        # pooled row t' lands at flat row b*(S_in/2) + t'.
        return jnp.maximum(s_ref[pl.ds(0, n_out, stride=2), :],
                           s_ref[pl.ds(1, n_out, stride=2), :])

    def conv_relu(a, w_ref, b_ref, n_rows):
        # Conv1d(k=4, stride 1, valid) as 4 accumulating matmuls (K = C_in);
        # LHS rows cover all BB elements, so M = BB*S - 3.
        acc = jnp.dot(a[0:n_rows, :], w_ref[0],
                      preferred_element_type=jnp.float32)
        for k in range(1, _K):
            acc = acc + jnp.dot(a[k:k + n_rows, :], w_ref[k],
                                preferred_element_type=jnp.float32)
        return jnp.maximum(acc + b_ref[...], 0.0)

    # ---- stage 2
    a1 = pool2(s1, BB * S2)                                          # (BB*S2, C1)
    M2 = BB * S2 - (_K - 1)
    s2[0:M2, :] = conv_relu(a1, w2_ref, b2_ref, M2)
    s2[M2:, :] = jnp.zeros((BB * S2 - M2, s2.shape[1]), jnp.float32)

    # ---- stage 3
    a2 = pool2(s2, BB * S3)                                          # (BB*S3, C2)
    M3 = BB * S3 - (_K - 1)
    s3[0:M3, :] = conv_relu(a2, w3_ref, b3_ref, M3)
    s3[M3:, :] = jnp.zeros((BB * S3 - M3, s3.shape[1]), jnp.float32)

    # ---- stage 4
    a3 = pool2(s3, BB * S4)                                          # (BB*S4, C3)
    M4 = BB * S4 - (_K - 1)
    s4[0:M4, :] = conv_relu(a3, w4_ref, b4_ref, M4)
    s4[M4:, :] = jnp.zeros((BB * S4 - M4, s4.shape[1]), jnp.float32)

    # ---- MaxPool1d(4, stride 1) + channel-major Flatten, written lane-dense:
    # out[b, c*L4p + l] = max_{j<4} y4[b*S4 + l + j, c].  The gather over b is
    # a stride-S4 sublane read, the (c, l) -> lane scatter is a 0/1 matmul.
    out = jnp.zeros(o_ref.shape, jnp.float32)
    for l in range(L4p):
        g = s4[pl.ds(l, BB, stride=S4), :]                           # (BB, C4)
        for j in range(1, 4):
            g = jnp.maximum(g, s4[pl.ds(l + j, BB, stride=S4), :])
        out = out + jnp.dot(g, scat_ref[l], preferred_element_type=jnp.float32)
    o_ref[...] = out                                                 # (BB, C4*L4p)


def prepare_params(params, nt):
    """One-time re-layout of PyTorch-shaped weights for the kernel."""
    dims = _stage_lengths(nt)
    L4p = dims[3][1]
    assert L4p >= 1, "nt too small for the 4 conv/pool stages (need nt >= 77)"

    def tap_first(w):                       # (C_out, C_in, K) -> (K, C_in, C_out)
        return jnp.transpose(w, (2, 1, 0)).astype(jnp.float32)

    C4 = params['w4'].shape[0]
    # scat[l, c, j] = 1  iff  j == c*L4p + l   (PyTorch channel-major Flatten)
    ll = jnp.arange(L4p)[:, None, None]
    cc = jnp.arange(C4)[None, :, None]
    jj = jnp.arange(C4 * L4p)[None, None, :]
    scat = (jj == cc * L4p + ll).astype(jnp.float32)                 # (L4p, C4, C4*L4p)

    return {
        'w1': tap_first(params['w1']).reshape(_K, -1),               # (4, 32)
        'w2': tap_first(params['w2']),                               # (4, 32, 64)
        'w3': tap_first(params['w3']),                               # (4, 64, 64)
        'w4': tap_first(params['w4']),                               # (4, 64, 64)
        'b1': params['b1'].reshape(1, -1).astype(jnp.float32),
        'b2': params['b2'].reshape(1, -1).astype(jnp.float32),
        'b3': params['b3'].reshape(1, -1).astype(jnp.float32),
        'b4': params['b4'].reshape(1, -1).astype(jnp.float32),
        'scat': scat,
    }


def time_encoder_forward(x_ncl, prep, *, batch_block=8):
    """Fused forward pass.  x_ncl: (B, 1, nt) NCW like the PyTorch module;
    prep: output of prepare_params(params, nt).  Returns (B, 64*L4p)."""
    B, c_in, nt = x_ncl.shape
    assert c_in == 1
    dims = _stage_lengths(nt)
    L4p = dims[3][1]
    assert L4p >= 1, "nt too small for the 4 conv/pool stages"
    C1 = prep['w1'].shape[-1]
    C2 = prep['w2'].shape[-1]
    C3 = prep['w3'].shape[-1]
    C4 = prep['w4'].shape[-1]
    assert prep['scat'].shape == (L4p, C4, C4 * L4p)

    # Per-element row strides of the flat activation layout.  S1 is rounded up
    # to a multiple of 8 so every stride-2 pool keeps the phase aligned.
    S1 = -(-nt // 8) * 8
    S2, S3, S4 = S1 // 2, S1 // 4, S1 // 8

    BB = max(1, min(batch_block, B))        # elements per grid step
    n_steps = -(-B // BB)                   # keep >= 2 steps for v7x's 2 TCs
    Bp = n_steps * BB

    x = x_ncl.reshape(B, nt).astype(jnp.float32)        # lane-dense (B, nt)
    if S1 != nt or Bp != B:
        x = jnp.pad(x, ((0, Bp - B), (0, S1 - nt)))

    def const_spec(a):
        nd = a.ndim
        return pl.BlockSpec(a.shape, lambda i, nd=nd: (0,) * nd)

    kernel = functools.partial(_time_encoder_kernel,
                               cfg=(BB, S1, S2, S3, S4, L4p))

    out = pl.pallas_call(
        kernel,
        out_shape=jax.ShapeDtypeStruct((Bp, C4 * L4p), jnp.float32),
        grid_spec=pltpu.PrefetchScalarGridSpec(
            num_scalar_prefetch=0,
            grid=(n_steps,),
            in_specs=[
                pl.BlockSpec((BB, S1), lambda i: (i, 0)),
                const_spec(prep['w1']), const_spec(prep['b1']),
                const_spec(prep['w2']), const_spec(prep['b2']),
                const_spec(prep['w3']), const_spec(prep['b3']),
                const_spec(prep['w4']), const_spec(prep['b4']),
                const_spec(prep['scat']),
            ],
            out_specs=pl.BlockSpec((BB, C4 * L4p), lambda i: (i, 0)),
            scratch_shapes=[
                pltpu.VMEM((BB * S1, C1), jnp.float32),
                pltpu.VMEM((BB * S2, C2), jnp.float32),
                pltpu.VMEM((BB * S3, C3), jnp.float32),
                pltpu.VMEM((BB * S4, C4), jnp.float32),
            ],
        ),
        compiler_params=pltpu.CompilerParams(
            dimension_semantics=("parallel",)),
    )(x, prep['w1'], prep['b1'], prep['w2'], prep['b2'],
      prep['w3'], prep['b3'], prep['w4'], prep['b4'], prep['scat'])

    return out[:B] if Bp != B else out


def init_params(key):
    """Deterministic init matching PyTorch Conv1d default shapes/scales."""
    def conv_init(k, c_out, c_in, ksz):
        fan_in = c_in * ksz
        bound = 1.0 / (fan_in ** 0.5)
        kw, kb = jax.random.split(k)
        w = jax.random.uniform(kw, (c_out, c_in, ksz), jnp.float32, -bound, bound)
        b = jax.random.uniform(kb, (c_out,), jnp.float32, -bound, bound)
        return w, b

    keys = jax.random.split(key, 4)
    p = {}
    p['w1'], p['b1'] = conv_init(keys[0], 32, 1, 4)
    p['w2'], p['b2'] = conv_init(keys[1], 64, 32, 4)
    p['w3'], p['b3'] = conv_init(keys[2], 64, 64, 4)
    p['w4'], p['b4'] = conv_init(keys[3], 64, 64, 4)
    return p


def reference_forward(x_ncl, params):
    """Pure-JAX f32 reference of the PyTorch network (NCW throughout)."""
    def conv1d(x, w, b):
        y = lax.conv_general_dilated(
            x, w, window_strides=(1,), padding='VALID',
            dimension_numbers=('NCH', 'OIH', 'NCH'))
        return y + b[None, :, None]

    def maxpool(x, f, s):
        return lax.reduce_window(x, -jnp.inf, lax.max,
                                 (1, 1, f), (1, 1, s), 'VALID')

    x = x_ncl
    x = maxpool(jax.nn.relu(conv1d(x, params['w1'], params['b1'])), 2, 2)
    x = maxpool(jax.nn.relu(conv1d(x, params['w2'], params['b2'])), 2, 2)
    x = maxpool(jax.nn.relu(conv1d(x, params['w3'], params['b3'])), 2, 2)
    x = maxpool(jax.nn.relu(conv1d(x, params['w4'], params['b4'])), 4, 1)
    return x.reshape(x.shape[0], -1)


if __name__ == "__main__":
    key = jax.random.PRNGKey(0)
    k_params, k_x = jax.random.split(key)

    # nt must be >= 77 for the 4 conv/pool stages; B=16 with BB=8 gives a
    # 2-step grid (keeps both v7x TensorCores busy).
    B, nt = 16, 96
    params = init_params(k_params)
    x = jax.random.normal(k_x, (B, 1, nt), jnp.float32)       # NCW like PyTorch

    prep = prepare_params(params, nt)                         # one-time weight re-layout
    fwd = jax.jit(time_encoder_forward)
    out = jax.block_until_ready(fwd(x, prep))

    ref = reference_forward(x, params)
    assert out.shape == ref.shape, (out.shape, ref.shape)
    # Everything is f32 now; the conservative tolerance only covers the TPU's
    # default (reduced-precision) MXU passes used by both kernel and reference.
    assert jnp.allclose(out, ref, rtol=2e-2, atol=2e-2), (
        float(jnp.max(jnp.abs(out - ref))))

    print("KERNEL_OK")
</pallas_src>

<mosaic_0001>
module attributes {stable_mosaic.version = 11 : i64} {
  func.func @_time_encoder_kernel(%arg0: i32, %arg1: memref<8x96xf32, #tpu.memory_space<vmem>>, %arg2: memref<4x32xf32, #tpu.memory_space<vmem>>, %arg3: memref<1x32xf32, #tpu.memory_space<vmem>>, %arg4: memref<4x32x64xf32, #tpu.memory_space<vmem>>, %arg5: memref<1x64xf32, #tpu.memory_space<vmem>>, %arg6: memref<4x64x64xf32, #tpu.memory_space<vmem>>, %arg7: memref<1x64xf32, #tpu.memory_space<vmem>>, %arg8: memref<4x64x64xf32, #tpu.memory_space<vmem>>, %arg9: memref<1x64xf32, #tpu.memory_space<vmem>>, %arg10: memref<3x64x192xf32, #tpu.memory_space<vmem>>, %arg11: memref<8x192xf32, #tpu.memory_space<vmem>>, %arg12: memref<768x32xf32, #tpu.memory_space<vmem>>, %arg13: memref<384x64xf32, #tpu.memory_space<vmem>>, %arg14: memref<192x64xf32, #tpu.memory_space<vmem>>, %arg15: memref<96x64xf32, #tpu.memory_space<vmem>>) attributes {dimension_semantics = [#tpu.dimension_semantics<parallel>], iteration_bounds = array<i64: 2>, scalar_prefetch = 0 : i64, scratch_operands = 4 : i64, tpu.core_type = #tpu.core_type<tc>, window_params = [{transform_indices = @transform_0, window_bounds = array<i64: 8, 96>}, {pipeline_mode = #tpu.pipeline_mode<synchronous>, transform_indices = @transform_1, window_bounds = array<i64: 4, 32>}, {pipeline_mode = #tpu.pipeline_mode<synchronous>, transform_indices = @transform_2, window_bounds = array<i64: 1, 32>}, {pipeline_mode = #tpu.pipeline_mode<synchronous>, transform_indices = @transform_3, window_bounds = array<i64: 4, 32, 64>}, {pipeline_mode = #tpu.pipeline_mode<synchronous>, transform_indices = @transform_4, window_bounds = array<i64: 1, 64>}, {pipeline_mode = #tpu.pipeline_mode<synchronous>, transform_indices = @transform_5, window_bounds = array<i64: 4, 64, 64>}, {pipeline_mode = #tpu.pipeline_mode<synchronous>, transform_indices = @transform_6, window_bounds = array<i64: 1, 64>}, {pipeline_mode = #tpu.pipeline_mode<synchronous>, transform_indices = @transform_7, window_bounds = array<i64: 4, 64, 64>}, {pipeline_mode = #tpu.pipeline_mode<synchronous>, transform_indices = @transform_8, window_bounds = array<i64: 1, 64>}, {pipeline_mode = #tpu.pipeline_mode<synchronous>, transform_indices = @transform_9, window_bounds = array<i64: 3, 64, 192>}, {transform_indices = @transform_10, window_bounds = array<i64: 8, 192>}]} {
    %c0 = arith.constant 0 : index
    %c0_0 = arith.constant 0 : index
    %0 = vector.load %arg1[%c0, %c0_0] : memref<8x96xf32, #tpu.memory_space<vmem>>, vector<8x96xf32>
    %1 = tpu.transpose %0, [1, 0] : vector<8x96xf32> -> vector<96x8xf32>
    %2 = vector.extract_strided_slice %1 {offsets = [0, 0], sizes = [96, 1], strides = [1, 1]} : vector<96x8xf32> to vector<96x1xf32>
    %3 = vector.extract_strided_slice %1 {offsets = [0, 1], sizes = [96, 1], strides = [1, 1]} : vector<96x8xf32> to vector<96x1xf32>
    %4 = vector.extract_strided_slice %1 {offsets = [0, 2], sizes = [96, 1], strides = [1, 1]} : vector<96x8xf32> to vector<96x1xf32>
    %5 = vector.extract_strided_slice %1 {offsets = [0, 3], sizes = [96, 1], strides = [1, 1]} : vector<96x8xf32> to vector<96x1xf32>
    %6 = vector.extract_strided_slice %1 {offsets = [0, 4], sizes = [96, 1], strides = [1, 1]} : vector<96x8xf32> to vector<96x1xf32>
    %7 = vector.extract_strided_slice %1 {offsets = [0, 5], sizes = [96, 1], strides = [1, 1]} : vector<96x8xf32> to vector<96x1xf32>
    %8 = vector.extract_strided_slice %1 {offsets = [0, 6], sizes = [96, 1], strides = [1, 1]} : vector<96x8xf32> to vector<96x1xf32>
    %9 = vector.extract_strided_slice %1 {offsets = [0, 7], sizes = [96, 1], strides = [1, 1]} : vector<96x8xf32> to vector<96x1xf32>
    %10 = tpu.concatenate %2, %3, %4, %5, %6, %7, %8, %9 in 0 : vector<96x1xf32>, vector<96x1xf32>, vector<96x1xf32>, vector<96x1xf32>, vector<96x1xf32>, vector<96x1xf32>, vector<96x1xf32>, vector<96x1xf32> -> vector<768x1xf32>
    %c0_1 = arith.constant 0 : index
    %c0_2 = arith.constant 0 : index
    %11 = vector.load %arg2[%c0_1, %c0_2] : memref<4x32xf32, #tpu.memory_space<vmem>>, vector<4x32xf32>
    %12 = vector.extract_strided_slice %10 {offsets = [0, 0], sizes = [765, 1], strides = [1, 1]} : vector<768x1xf32> to vector<765x1xf32>
    %13 = vector.extract_strided_slice %11 {offsets = [0, 0], sizes = [1, 32], strides = [1, 1]} : vector<4x32xf32> to vector<1x32xf32>
    %14 = vector.broadcast %12 : vector<765x1xf32> to vector<765x32xf32>
    %15 = vector.broadcast %13 : vector<1x32xf32> to vector<765x32xf32>
    %16 = arith.mulf %14, %15 : vector<765x32xf32>
    %17 = vector.extract_strided_slice %10 {offsets = [1, 0], sizes = [765, 1], strides = [1, 1]} : vector<768x1xf32> to vector<765x1xf32>
    %18 = vector.extract_strided_slice %11 {offsets = [1, 0], sizes = [1, 32], strides = [1, 1]} : vector<4x32xf32> to vector<1x32xf32>
    %19 = vector.broadcast %17 : vector<765x1xf32> to vector<765x32xf32>
    %20 = vector.broadcast %18 : vector<1x32xf32> to vector<765x32xf32>
    %21 = arith.mulf %19, %20 : vector<765x32xf32>
    %22 = arith.addf %16, %21 : vector<765x32xf32>
    %23 = vector.extract_strided_slice %10 {offsets = [2, 0], sizes = [765, 1], strides = [1, 1]} : vector<768x1xf32> to vector<765x1xf32>
    %24 = vector.extract_strided_slice %11 {offsets = [2, 0], sizes = [1, 32], strides = [1, 1]} : vector<4x32xf32> to vector<1x32xf32>
    %25 = vector.broadcast %23 : vector<765x1xf32> to vector<765x32xf32>
    %26 = vector.broadcast %24 : vector<1x32xf32> to vector<765x32xf32>
    %27 = arith.mulf %25, %26 : vector<765x32xf32>
    %28 = arith.addf %22, %27 : vector<765x32xf32>
    %29 = vector.extract_strided_slice %10 {offsets = [3, 0], sizes = [765, 1], strides = [1, 1]} : vector<768x1xf32> to vector<765x1xf32>
    %30 = vector.extract_strided_slice %11 {offsets = [3, 0], sizes = [1, 32], strides = [1, 1]} : vector<4x32xf32> to vector<1x32xf32>
    %31 = vector.broadcast %29 : vector<765x1xf32> to vector<765x32xf32>
    %32 = vector.broadcast %30 : vector<1x32xf32> to vector<765x32xf32>
    %33 = arith.mulf %31, %32 : vector<765x32xf32>
    %34 = arith.addf %28, %33 : vector<765x32xf32>
    %c0_3 = arith.constant 0 : index
    %c0_4 = arith.constant 0 : index
    %35 = vector.load %arg3[%c0_3, %c0_4] : memref<1x32xf32, #tpu.memory_space<vmem>>, vector<1x32xf32>
    %36 = vector.broadcast %35 : vector<1x32xf32> to vector<765x32xf32>
    %37 = arith.addf %34, %36 : vector<765x32xf32>
    %cst = arith.constant 0.000000e+00 : f32
    %38 = vector.broadcast %cst : f32 to vector<765x32xf32>
    %39 = arith.maximumf %37, %38 : vector<765x32xf32>
    %c0_5 = arith.constant 0 : index
    %c0_6 = arith.constant 0 : index
    %40 = vector.load %arg12[%c0_5, %c0_6] : memref<768x32xf32, #tpu.memory_space<vmem>>, vector<765x32xf32>
    tpu.vector_store %arg12[%c0_5, %c0_6], %39 {strides = array<i32>} : memref<768x32xf32, #tpu.memory_space<vmem>>, vector<765x32xf32>,
    %cst_7 = arith.constant 0.000000e+00 : f32
    %41 = vector.broadcast %cst_7 : f32 to vector<3x32xf32>
    %c765 = arith.constant 765 : index
    %c0_8 = arith.constant 0 : index
    %42 = vector.load %arg12[%c765, %c0_8] : memref<768x32xf32, #tpu.memory_space<vmem>>, vector<3x32xf32>
    tpu.vector_store %arg12[%c765, %c0_8], %41 {strides = array<i32>} : memref<768x32xf32, #tpu.memory_space<vmem>>, vector<3x32xf32>,
    %c0_9 = arith.constant 0 : index
    %c0_10 = arith.constant 0 : index
    %43 = tpu.strided_load %arg12[%c0_9, %c0_10] {strides = array<i32: 2, 1>} : memref<768x32xf32, #tpu.memory_space<vmem>>, vector<384x32xf32>
    %c1 = arith.constant 1 : index
    %c0_11 = arith.constant 0 : index
    %44 = tpu.strided_load %arg12[%c1, %c0_11] {strides = array<i32: 2, 1>} : memref<768x32xf32, #tpu.memory_space<vmem>>, vector<384x32xf32>
    %45 = arith.maximumf %43, %44 : vector<384x32xf32>
    %46 = vector.extract_strided_slice %45 {offsets = [0, 0], sizes = [381, 32], strides = [1, 1]} : vector<384x32xf32> to vector<381x32xf32>
    %c0_12 = arith.constant 0 : index
    %c0_13 = arith.constant 0 : index
    %c0_14 = arith.constant 0 : index
    %47 = vector.load %arg4[%c0_12, %c0_13, %c0_14] : memref<4x32x64xf32, #tpu.memory_space<vmem>>, vector<1x32x64xf32>
    %48 = vector.shape_cast %47 : vector<1x32x64xf32> to vector<32x64xf32>
    %cst_15 = arith.constant dense<0.000000e+00> : vector<381x64xf32>
    %49 = tpu.matmul %46, %48, %cst_15 {dimension_numbers = #tpu.dot_dimension_numbers<[1], [0], [0], [1], [0, 0, 1, 1], [], []>} : vector<381x32xf32>, vector<32x64xf32>, vector<381x64xf32> -> vector<381x64xf32>
    %50 = vector.extract_strided_slice %45 {offsets = [1, 0], sizes = [381, 32], strides = [1, 1]} : vector<384x32xf32> to vector<381x32xf32>
    %c1_16 = arith.constant 1 : index
    %c0_17 = arith.constant 0 : index
    %c0_18 = arith.constant 0 : index
    %51 = vector.load %arg4[%c1_16, %c0_17, %c0_18] : memref<4x32x64xf32, #tpu.memory_space<vmem>>, vector<1x32x64xf32>
    %52 = vector.shape_cast %51 : vector<1x32x64xf32> to vector<32x64xf32>
    %cst_19 = arith.constant dense<0.000000e+00> : vector<381x64xf32>
    %53 = tpu.matmul %50, %52, %cst_19 {dimension_numbers = #tpu.dot_dimension_numbers<[1], [0], [0], [1], [0, 0, 1, 1], [], []>} : vector<381x32xf32>, vector<32x64xf32>, vector<381x64xf32> -> vector<381x64xf32>
    %54 = arith.addf %49, %53 : vector<381x64xf32>
    %55 = vector.extract_strided_slice %45 {offsets = [2, 0], sizes = [381, 32], strides = [1, 1]} : vector<384x32xf32> to vector<381x32xf32>
    %c2 = arith.constant 2 : index
    %c0_20 = arith.constant 0 : index
    %c0_21 = arith.constant 0 : index
    %56 = vector.load %arg4[%c2, %c0_20, %c0_21] : memref<4x32x64xf32, #tpu.memory_space<vmem>>, vector<1x32x64xf32>
    %57 = vector.shape_cast %56 : vector<1x32x64xf32> to vector<32x64xf32>
    %cst_22 = arith.constant dense<0.000000e+00> : vector<381x64xf32>
    %58 = tpu.matmul %55, %57, %cst_22 {dimension_numbers = #tpu.dot_dimension_numbers<[1], [0], [0], [1], [0, 0, 1, 1], [], []>} : vector<381x32xf32>, vector<32x64xf32>, vector<381x64xf32> -> vector<381x64xf32>
    %59 = arith.addf %54, %58 : vector<381x64xf32>
    %60 = vector.extract_strided_slice %45 {offsets = [3, 0], sizes = [381, 32], strides = [1, 1]} : vector<384x32xf32> to vector<381x32xf32>
    %c3 = arith.constant 3 : index
    %c0_23 = arith.constant 0 : index
    %c0_24 = arith.constant 0 : index
    %61 = vector.load %arg4[%c3, %c0_23, %c0_24] : memref<4x32x64xf32, #tpu.memory_space<vmem>>, vector<1x32x64xf32>
    %62 = vector.shape_cast %61 : vector<1x32x64xf32> to vector<32x64xf32>
    %cst_25 = arith.constant dense<0.000000e+00> : vector<381x64xf32>
    %63 = tpu.matmul %60, %62, %cst_25 {dimension_numbers = #tpu.dot_dimension_numbers<[1], [0], [0], [1], [0, 0, 1, 1], [], []>} : vector<381x32xf32>, vector<32x64xf32>, vector<381x64xf32> -> vector<381x64xf32>
    %64 = arith.addf %59, %63 : vector<381x64xf32>
    %c0_26 = arith.constant 0 : index
    %c0_27 = arith.constant 0 : index
    %65 = vector.load %arg5[%c0_26, %c0_27] : memref<1x64xf32, #tpu.memory_space<vmem>>, vector<1x64xf32>
    %66 = vector.broadcast %65 : vector<1x64xf32> to vector<381x64xf32>
    %67 = arith.addf %64, %66 : vector<381x64xf32>
    %cst_28 = arith.constant 0.000000e+00 : f32
    %68 = vector.broadcast %cst_28 : f32 to vector<381x64xf32>
    %69 = arith.maximumf %67, %68 : vector<381x64xf32>
    %c0_29 = arith.constant 0 : index
    %c0_30 = arith.constant 0 : index
    %70 = vector.load %arg13[%c0_29, %c0_30] : memref<384x64xf32, #tpu.memory_space<vmem>>, vector<381x64xf32>
    tpu.vector_store %arg13[%c0_29, %c0_30], %69 {strides = array<i32>} : memref<384x64xf32, #tpu.memory_space<vmem>>, vector<381x64xf32>,
    %cst_31 = arith.constant 0.000000e+00 : f32
    %71 = vector.broadcast %cst_31 : f32 to vector<3x64xf32>
    %c381 = arith.constant 381 : index
    %c0_32 = arith.constant 0 : index
    %72 = vector.load %arg13[%c381, %c0_32] : memref<384x64xf32, #tpu.memory_space<vmem>>, vector<3x64xf32>
    tpu.vector_store %arg13[%c381, %c0_32], %71 {strides = array<i32>} : memref<384x64xf32, #tpu.memory_space<vmem>>, vector<3x64xf32>,
    %c0_33 = arith.constant 0 : index
    %c0_34 = arith.constant 0 : index
    %73 = tpu.strided_load %arg13[%c0_33, %c0_34] {strides = array<i32: 2, 1>} : memref<384x64xf32, #tpu.memory_space<vmem>>, vector<192x64xf32>
    %c1_35 = arith.constant 1 : index
    %c0_36 = arith.constant 0 : index
    %74 = tpu.strided_load %arg13[%c1_35, %c0_36] {strides = array<i32: 2, 1>} : memref<384x64xf32, #tpu.memory_space<vmem>>, vector<192x64xf32>
    %75 = arith.maximumf %73, %74 : vector<192x64xf32>
    %76 = vector.extract_strided_slice %75 {offsets = [0, 0], sizes = [189, 64], strides = [1, 1]} : vector<192x64xf32> to vector<189x64xf32>
    %c0_37 = arith.constant 0 : index
    %c0_38 = arith.constant 0 : index
    %c0_39 = arith.constant 0 : index
    %77 = vector.load %arg6[%c0_37, %c0_38, %c0_39] : memref<4x64x64xf32, #tpu.memory_space<vmem>>, vector<1x64x64xf32>
    %78 = vector.shape_cast %77 : vector<1x64x64xf32> to vector<64x64xf32>
    %cst_40 = arith.constant dense<0.000000e+00> : vector<189x64xf32>
    %79 = tpu.matmul %76, %78, %cst_40 {dimension_numbers = #tpu.dot_dimension_numbers<[1], [0], [0], [1], [0, 0, 1, 1], [], []>} : vector<189x64xf32>, vector<64x64xf32>, vector<189x64xf32> -> vector<189x64xf32>
    %80 = vector.extract_strided_slice %75 {offsets = [1, 0], sizes = [189, 64], strides = [1, 1]} : vector<192x64xf32> to vector<189x64xf32>
    %c1_41 = arith.constant 1 : index
    %c0_42 = arith.constant 0 : index
    %c0_43 = arith.constant 0 : index
    %81 = vector.load %arg6[%c1_41, %c0_42, %c0_43] : memref<4x64x64xf32, #tpu.memory_space<vmem>>, vector<1x64x64xf32>
    %82 = vector.shape_cast %81 : vector<1x64x64xf32> to vector<64x64xf32>
    %cst_44 = arith.constant dense<0.000000e+00> : vector<189x64xf32>
    %83 = tpu.matmul %80, %82, %cst_44 {dimension_numbers = #tpu.dot_dimension_numbers<[1], [0], [0], [1], [0, 0, 1, 1], [], []>} : vector<189x64xf32>, vector<64x64xf32>, vector<189x64xf32> -> vector<189x64xf32>
    %84 = arith.addf %79, %83 : vector<189x64xf32>
    %85 = vector.extract_strided_slice %75 {offsets = [2, 0], sizes = [189, 64], strides = [1, 1]} : vector<192x64xf32> to vector<189x64xf32>
    %c2_45 = arith.constant 2 : index
    %c0_46 = arith.constant 0 : index
    %c0_47 = arith.constant 0 : index
    %86 = vector.load %arg6[%c2_45, %c0_46, %c0_47] : memref<4x64x64xf32, #tpu.memory_space<vmem>>, vector<1x64x64xf32>
    %87 = vector.shape_cast %86 : vector<1x64x64xf32> to vector<64x64xf32>
    %cst_48 = arith.constant dense<0.000000e+00> : vector<189x64xf32>
    %88 = tpu.matmul %85, %87, %cst_48 {dimension_numbers = #tpu.dot_dimension_numbers<[1], [0], [0], [1], [0, 0, 1, 1], [], []>} : vector<189x64xf32>, vector<64x64xf32>, vector<189x64xf32> -> vector<189x64xf32>
    %89 = arith.addf %84, %88 : vector<189x64xf32>
    %90 = vector.extract_strided_slice %75 {offsets = [3, 0], sizes = [189, 64], strides = [1, 1]} : vector<192x64xf32> to vector<189x64xf32>
    %c3_49 = arith.constant 3 : index
    %c0_50 = arith.constant 0 : index
    %c0_51 = arith.constant 0 : index
    %91 = vector.load %arg6[%c3_49, %c0_50, %c0_51] : memref<4x64x64xf32, #tpu.memory_space<vmem>>, vector<1x64x64xf32>
    %92 = vector.shape_cast %91 : vector<1x64x64xf32> to vector<64x64xf32>
    %cst_52 = arith.constant dense<0.000000e+00> : vector<189x64xf32>
    %93 = tpu.matmul %90, %92, %cst_52 {dimension_numbers = #tpu.dot_dimension_numbers<[1], [0], [0], [1], [0, 0, 1, 1], [], []>} : vector<189x64xf32>, vector<64x64xf32>, vector<189x64xf32> -> vector<189x64xf32>
    %94 = arith.addf %89, %93 : vector<189x64xf32>
    %c0_53 = arith.constant 0 : index
    %c0_54 = arith.constant 0 : index
    %95 = vector.load %arg7[%c0_53, %c0_54] : memref<1x64xf32, #tpu.memory_space<vmem>>, vector<1x64xf32>
    %96 = vector.broadcast %95 : vector<1x64xf32> to vector<189x64xf32>
    %97 = arith.addf %94, %96 : vector<189x64xf32>
    %cst_55 = arith.constant 0.000000e+00 : f32
    %98 = vector.broadcast %cst_55 : f32 to vector<189x64xf32>
    %99 = arith.maximumf %97, %98 : vector<189x64xf32>
    %c0_56 = arith.constant 0 : index
    %c0_57 = arith.constant 0 : index
    %100 = vector.load %arg14[%c0_56, %c0_57] : memref<192x64xf32, #tpu.memory_space<vmem>>, vector<189x64xf32>
    tpu.vector_store %arg14[%c0_56, %c0_57], %99 {strides = array<i32>} : memref<192x64xf32, #tpu.memory_space<vmem>>, vector<189x64xf32>,
    %cst_58 = arith.constant 0.000000e+00 : f32
    %101 = vector.broadcast %cst_58 : f32 to vector<3x64xf32>
    %c189 = arith.constant 189 : index
    %c0_59 = arith.constant 0 : index
    %102 = vector.load %arg14[%c189, %c0_59] : memref<192x64xf32, #tpu.memory_space<vmem>>, vector<3x64xf32>
    tpu.vector_store %arg14[%c189, %c0_59], %101 {strides = array<i32>} : memref<192x64xf32, #tpu.memory_space<vmem>>, vector<3x64xf32>,
    %c0_60 = arith.constant 0 : index
    %c0_61 = arith.constant 0 : index
    %103 = tpu.strided_load %arg14[%c0_60, %c0_61] {strides = array<i32: 2, 1>} : memref<192x64xf32, #tpu.memory_space<vmem>>, vector<96x64xf32>
    %c1_62 = arith.constant 1 : index
    %c0_63 = arith.constant 0 : index
    %104 = tpu.strided_load %arg14[%c1_62, %c0_63] {strides = array<i32: 2, 1>} : memref<192x64xf32, #tpu.memory_space<vmem>>, vector<96x64xf32>
    %105 = arith.maximumf %103, %104 : vector<96x64xf32>
    %106 = vector.extract_strided_slice %105 {offsets = [0, 0], sizes = [93, 64], strides = [1, 1]} : vector<96x64xf32> to vector<93x64xf32>
    %c0_64 = arith.constant 0 : index
    %c0_65 = arith.constant 0 : index
    %c0_66 = arith.constant 0 : index
    %107 = vector.load %arg8[%c0_64, %c0_65, %c0_66] : memref<4x64x64xf32, #tpu.memory_space<vmem>>, vector<1x64x64xf32>
    %108 = vector.shape_cast %107 : vector<1x64x64xf32> to vector<64x64xf32>
    %cst_67 = arith.constant dense<0.000000e+00> : vector<93x64xf32>
    %109 = tpu.matmul %106, %108, %cst_67 {dimension_numbers = #tpu.dot_dimension_numbers<[1], [0], [0], [1], [0, 0, 1, 1], [], []>} : vector<93x64xf32>, vector<64x64xf32>, vector<93x64xf32> -> vector<93x64xf32>
    %110 = vector.extract_strided_slice %105 {offsets = [1, 0], sizes = [93, 64], strides = [1, 1]} : vector<96x64xf32> to vector<93x64xf32>
    %c1_68 = arith.constant 1 : index
    %c0_69 = arith.constant 0 : index
    %c0_70 = arith.constant 0 : index
    %111 = vector.load %arg8[%c1_68, %c0_69, %c0_70] : memref<4x64x64xf32, #tpu.memory_space<vmem>>, vector<1x64x64xf32>
    %112 = vector.shape_cast %111 : vector<1x64x64xf32> to vector<64x64xf32>
    %cst_71 = arith.constant dense<0.000000e+00> : vector<93x64xf32>
    %113 = tpu.matmul %110, %112, %cst_71 {dimension_numbers = #tpu.dot_dimension_numbers<[1], [0], [0], [1], [0, 0, 1, 1], [], []>} : vector<93x64xf32>, vector<64x64xf32>, vector<93x64xf32> -> vector<93x64xf32>
    %114 = arith.addf %109, %113 : vector<93x64xf32>
    %115 = vector.extract_strided_slice %105 {offsets = [2, 0], sizes = [93, 64], strides = [1, 1]} : vector<96x64xf32> to vector<93x64xf32>
    %c2_72 = arith.constant 2 : index
    %c0_73 = arith.constant 0 : index
    %c0_74 = arith.constant 0 : index
    %116 = vector.load %arg8[%c2_72, %c0_73, %c0_74] : memref<4x64x64xf32, #tpu.memory_space<vmem>>, vector<1x64x64xf32>
    %117 = vector.shape_cast %116 : vector<1x64x64xf32> to vector<64x64xf32>
    %cst_75 = arith.constant dense<0.000000e+00> : vector<93x64xf32>
    %118 = tpu.matmul %115, %117, %cst_75 {dimension_numbers = #tpu.dot_dimension_numbers<[1], [0], [0], [1], [0, 0, 1, 1], [], []>} : vector<93x64xf32>, vector<64x64xf32>, vector<93x64xf32> -> vector<93x64xf32>
    %119 = arith.addf %114, %118 : vector<93x64xf32>
    %120 = vector.extract_strided_slice %105 {offsets = [3, 0], sizes = [93, 64], strides = [1, 1]} : vector<96x64xf32> to vector<93x64xf32>
    %c3_76 = arith.constant 3 : index
    %c0_77 = arith.constant 0 : index
    %c0_78 = arith.constant 0 : index
    %121 = vector.load %arg8[%c3_76, %c0_77, %c0_78] : memref<4x64x64xf32, #tpu.memory_space<vmem>>, vector<1x64x64xf32>
    %122 = vector.shape_cast %121 : vector<1x64x64xf32> to vector<64x64xf32>
    %cst_79 = arith.constant dense<0.000000e+00> : vector<93x64xf32>
    %123 = tpu.matmul %120, %122, %cst_79 {dimension_numbers = #tpu.dot_dimension_numbers<[1], [0], [0], [1], [0, 0, 1, 1], [], []>} : vector<93x64xf32>, vector<64x64xf32>, vector<93x64xf32> -> vector<93x64xf32>
    %124 = arith.addf %119, %123 : vector<93x64xf32>
    %c0_80 = arith.constant 0 : index
    %c0_81 = arith.constant 0 : index
    %125 = vector.load %arg9[%c0_80, %c0_81] : memref<1x64xf32, #tpu.memory_space<vmem>>, vector<1x64xf32>
    %126 = vector.broadcast %125 : vector<1x64xf32> to vector<93x64xf32>
    %127 = arith.addf %124, %126 : vector<93x64xf32>
    %cst_82 = arith.constant 0.000000e+00 : f32
    %128 = vector.broadcast %cst_82 : f32 to vector<93x64xf32>
    %129 = arith.maximumf %127, %128 : vector<93x64xf32>
    %c0_83 = arith.constant 0 : index
    %c0_84 = arith.constant 0 : index
    %130 = vector.load %arg15[%c0_83, %c0_84] : memref<96x64xf32, #tpu.memory_space<vmem>>, vector<93x64xf32>
    tpu.vector_store %arg15[%c0_83, %c0_84], %129 {strides = array<i32>} : memref<96x64xf32, #tpu.memory_space<vmem>>, vector<93x64xf32>,
    %cst_85 = arith.constant 0.000000e+00 : f32
    %131 = vector.broadcast %cst_85 : f32 to vector<3x64xf32>
    %c93 = arith.constant 93 : index
    %c0_86 = arith.constant 0 : index
    %132 = vector.load %arg15[%c93, %c0_86] : memref<96x64xf32, #tpu.memory_space<vmem>>, vector<3x64xf32>
    tpu.vector_store %arg15[%c93, %c0_86], %131 {strides = array<i32>} : memref<96x64xf32, #tpu.memory_space<vmem>>, vector<3x64xf32>,
    %cst_87 = arith.constant 0.000000e+00 : f32
    %133 = vector.broadcast %cst_87 : f32 to vector<8x192xf32>
    %c0_88 = arith.constant 0 : index
    %c0_89 = arith.constant 0 : index
    %134 = tpu.strided_load %arg15[%c0_88, %c0_89] {strides = array<i32: 12, 1>} : memref<96x64xf32, #tpu.memory_space<vmem>>, vector<8x64xf32>
    %c1_90 = arith.constant 1 : index
    %c0_91 = arith.constant 0 : index
    %135 = tpu.strided_load %arg15[%c1_90, %c0_91] {strides = array<i32: 12, 1>} : memref<96x64xf32, #tpu.memory_space<vmem>>, vector<8x64xf32>
    %136 = arith.maximumf %134, %135 : vector<8x64xf32>
    %c2_92 = arith.constant 2 : index
    %c0_93 = arith.constant 0 : index
    %137 = tpu.strided_load %arg15[%c2_92, %c0_93] {strides = array<i32: 12, 1>} : memref<96x64xf32, #tpu.memory_space<vmem>>, vector<8x64xf32>
    %138 = arith.maximumf %136, %137 : vector<8x64xf32>
    %c3_94 = arith.constant 3 : index
    %c0_95 = arith.constant 0 : index
    %139 = tpu.strided_load %arg15[%c3_94, %c0_95] {strides = array<i32: 12, 1>} : memref<96x64xf32, #tpu.memory_space<vmem>>, vector<8x64xf32>
    %140 = arith.maximumf %138, %139 : vector<8x64xf32>
    %c0_96 = arith.constant 0 : index
    %c0_97 = arith.constant 0 : index
    %c0_98 = arith.constant 0 : index
    %141 = vector.load %arg10[%c0_96, %c0_97, %c0_98] : memref<3x64x192xf32, #tpu.memory_space<vmem>>, vector<1x64x192xf32>
    %142 = vector.shape_cast %141 : vector<1x64x192xf32> to vector<64x192xf32>
    %cst_99 = arith.constant dense<0.000000e+00> : vector<8x192xf32>
    %143 = tpu.matmul %140, %142, %cst_99 {dimension_numbers = #tpu.dot_dimension_numbers<[1], [0], [0], [1], [0, 0, 1, 1], [], []>} : vector<8x64xf32>, vector<64x192xf32>, vector<8x192xf32> -> vector<8x192xf32>
    %144 = arith.addf %133, %143 : vector<8x192xf32>
    %c1_100 = arith.constant 1 : index
    %c0_101 = arith.constant 0 : index
    %145 = tpu.strided_load %arg15[%c1_100, %c0_101] {strides = array<i32: 12, 1>} : memref<96x64xf32, #tpu.memory_space<vmem>>, vector<8x64xf32>
    %c2_102 = arith.constant 2 : index
    %c0_103 = arith.constant 0 : index
    %146 = tpu.strided_load %arg15[%c2_102, %c0_103] {strides = array<i32: 12, 1>} : memref<96x64xf32, #tpu.memory_space<vmem>>, vector<8x64xf32>
    %147 = arith.maximumf %145, %146 : vector<8x64xf32>
    %c3_104 = arith.constant 3 : index
    %c0_105 = arith.constant 0 : index
    %148 = tpu.strided_load %arg15[%c3_104, %c0_105] {strides = array<i32: 12, 1>} : memref<96x64xf32, #tpu.memory_space<vmem>>, vector<8x64xf32>
    %149 = arith.maximumf %147, %148 : vector<8x64xf32>
    %c4 = arith.constant 4 : index
    %c0_106 = arith.constant 0 : index
    %150 = tpu.strided_load %arg15[%c4, %c0_106] {strides = array<i32: 12, 1>} : memref<96x64xf32, #tpu.memory_space<vmem>>, vector<8x64xf32>
    %151 = arith.maximumf %149, %150 : vector<8x64xf32>
    %c1_107 = arith.constant 1 : index
    %c0_108 = arith.constant 0 : index
    %c0_109 = arith.constant 0 : index
    %152 = vector.load %arg10[%c1_107, %c0_108, %c0_109] : memref<3x64x192xf32, #tpu.memory_space<vmem>>, vector<1x64x192xf32>
    %153 = vector.shape_cast %152 : vector<1x64x192xf32> to vector<64x192xf32>
    %cst_110 = arith.constant dense<0.000000e+00> : vector<8x192xf32>
    %154 = tpu.matmul %151, %153, %cst_110 {dimension_numbers = #tpu.dot_dimension_numbers<[1], [0], [0], [1], [0, 0, 1, 1], [], []>} : vector<8x64xf32>, vector<64x192xf32>, vector<8x192xf32> -> vector<8x192xf32>
    %155 = arith.addf %144, %154 : vector<8x192xf32>
    %c2_111 = arith.constant 2 : index
    %c0_112 = arith.constant 0 : index
    %156 = tpu.strided_load %arg15[%c2_111, %c0_112] {strides = array<i32: 12, 1>} : memref<96x64xf32, #tpu.memory_space<vmem>>, vector<8x64xf32>
    %c3_113 = arith.constant 3 : index
    %c0_114 = arith.constant 0 : index
    %157 = tpu.strided_load %arg15[%c3_113, %c0_114] {strides = array<i32: 12, 1>} : memref<96x64xf32, #tpu.memory_space<vmem>>, vector<8x64xf32>
    %158 = arith.maximumf %156, %157 : vector<8x64xf32>
    %c4_115 = arith.constant 4 : index
    %c0_116 = arith.constant 0 : index
    %159 = tpu.strided_load %arg15[%c4_115, %c0_116] {strides = array<i32: 12, 1>} : memref<96x64xf32, #tpu.memory_space<vmem>>, vector<8x64xf32>
    %160 = arith.maximumf %158, %159 : vector<8x64xf32>
    %c5 = arith.constant 5 : index
    %c0_117 = arith.constant 0 : index
    %161 = tpu.strided_load %arg15[%c5, %c0_117] {strides = array<i32: 12, 1>} : memref<96x64xf32, #tpu.memory_space<vmem>>, vector<8x64xf32>
    %162 = arith.maximumf %160, %161 : vector<8x64xf32>
    %c2_118 = arith.constant 2 : index
    %c0_119 = arith.constant 0 : index
    %c0_120 = arith.constant 0 : index
    %163 = vector.load %arg10[%c2_118, %c0_119, %c0_120] : memref<3x64x192xf32, #tpu.memory_space<vmem>>, vector<1x64x192xf32>
    %164 = vector.shape_cast %163 : vector<1x64x192xf32> to vector<64x192xf32>
    %cst_121 = arith.constant dense<0.000000e+00> : vector<8x192xf32>
    %165 = tpu.matmul %162, %164, %cst_121 {dimension_numbers = #tpu.dot_dimension_numbers<[1], [0], [0], [1], [0, 0, 1, 1], [], []>} : vector<8x64xf32>, vector<64x192xf32>, vector<8x192xf32> -> vector<8x192xf32>
    %166 = arith.addf %155, %165 : vector<8x192xf32>
    %c0_122 = arith.constant 0 : index
    %c0_123 = arith.constant 0 : index
    %167 = vector.load %arg11[%c0_122, %c0_123] : memref<8x192xf32, #tpu.memory_space<vmem>>, vector<8x192xf32>
    tpu.vector_store %arg11[%c0_122, %c0_123], %166 {strides = array<i32>} : memref<8x192xf32, #tpu.memory_space<vmem>>, vector<8x192xf32>,
    return
  }
  func.func @transform_0(%arg0: i32) -> (i32, i32) {
    %c0_i32 = arith.constant 0 : i32
    %c0_i32_0 = arith.constant 0 : i32
    return %arg0, %c0_i32 : i32, i32
  }
  func.func @transform_1(%arg0: i32) -> (i32, i32) {
    %c0_i32 = arith.constant 0 : i32
    %c0_i32_0 = arith.constant 0 : i32
    %c0_i32_1 = arith.constant 0 : i32
    return %c0_i32, %c0_i32_0 : i32, i32
  }
  func.func @transform_2(%arg0: i32) -> (i32, i32) {
    %c0_i32 = arith.constant 0 : i32
    %c0_i32_0 = arith.constant 0 : i32
    %c0_i32_1 = arith.constant 0 : i32
    return %c0_i32, %c0_i32_0 : i32, i32
  }
  func.func @transform_3(%arg0: i32) -> (i32, i32, i32) {
    %c0_i32 = arith.constant 0 : i32
    %c0_i32_0 = arith.constant 0 : i32
    %c0_i32_1 = arith.constant 0 : i32
    %c0_i32_2 = arith.constant 0 : i32
    return %c0_i32, %c0_i32_0, %c0_i32_1 : i32, i32, i32
  }
  func.func @transform_4(%arg0: i32) -> (i32, i32) {
    %c0_i32 = arith.constant 0 : i32
    %c0_i32_0 = arith.constant 0 : i32
    %c0_i32_1 = arith.constant 0 : i32
    return %c0_i32, %c0_i32_0 : i32, i32
  }
  func.func @transform_5(%arg0: i32) -> (i32, i32, i32) {
    %c0_i32 = arith.constant 0 : i32
    %c0_i32_0 = arith.constant 0 : i32
    %c0_i32_1 = arith.constant 0 : i32
    %c0_i32_2 = arith.constant 0 : i32
    return %c0_i32, %c0_i32_0, %c0_i32_1 : i32, i32, i32
  }
  func.func @transform_6(%arg0: i32) -> (i32, i32) {
    %c0_i32 = arith.constant 0 : i32
    %c0_i32_0 = arith.constant 0 : i32
    %c0_i32_1 = arith.constant 0 : i32
    return %c0_i32, %c0_i32_0 : i32, i32
  }
  func.func @transform_7(%arg0: i32) -> (i32, i32, i32) {
    %c0_i32 = arith.constant 0 : i32
    %c0_i32_0 = arith.constant 0 : i32
    %c0_i32_1 = arith.constant 0 : i32
    %c0_i32_2 = arith.constant 0 : i32
    return %c0_i32, %c0_i32_0, %c0_i32_1 : i32, i32, i32
  }
  func.func @transform_8(%arg0: i32) -> (i32, i32) {
    %c0_i32 = arith.constant 0 : i32
    %c0_i32_0 = arith.constant 0 : i32
    %c0_i32_1 = arith.constant 0 : i32
    return %c0_i32, %c0_i32_0 : i32, i32
  }
  func.func @transform_9(%arg0: i32) -> (i32, i32, i32) {
    %c0_i32 = arith.constant 0 : i32
    %c0_i32_0 = arith.constant 0 : i32
    %c0_i32_1 = arith.constant 0 : i32
    %c0_i32_2 = arith.constant 0 : i32
    return %c0_i32, %c0_i32_0, %c0_i32_1 : i32, i32, i32
  }
  func.func @transform_10(%arg0: i32) -> (i32, i32) {
    %c0_i32 = arith.constant 0 : i32
    %c0_i32_0 = arith.constant 0 : i32
    return %arg0, %c0_i32 : i32, i32
  }
}

</mosaic_0001>

<bundles_post_ra>
// kernel: time_encoder_forward.1
= control target key start
LH: loop header
LB: loop body
LE: loop exit
PB: predicated region body
PF: predicated region fallthrough
CT: control target
= control target key end

     0   :  { %s14960_s0 = inlined_call_operand.hbm [shape: f32[16,96], index: 0, kind: input, shape index: {}]   ;;  %s14961_s1 = inlined_call_operand.vmem [shape: f32[4,32], index: 1, kind: input, shape index: {}]   ;;  %s14962_s2 = inlined_call_operand.vmem [shape: f32[1,32], index: 2, kind: input, shape index: {}]   ;;  %s14963_s3 = inlined_call_operand.hbm [shape: f32[4,32,64], index: 3, kind: input, shape index: {}]   ;;  %s14964_s4 = inlined_call_operand.vmem [shape: f32[1,64], index: 4, kind: input, shape index: {}]   ;;  %s14965_s5 = inlined_call_operand.hbm [shape: f32[4,64,64], index: 5, kind: input, shape index: {}]   ;;  %s14966_s6 = inlined_call_operand.vmem [shape: f32[1,64], index: 6, kind: input, shape index: {}]   ;;  %s14967_s7 = inlined_call_operand.hbm [shape: f32[4,64,64], index: 7, kind: input, shape index: {}]   ;;  %s14968_s8 = inlined_call_operand.vmem [shape: f32[1,64], index: 8, kind: input, shape index: {}]   ;;  %s14969_s9 = inlined_call_operand.hbm [shape: f32[3,64,192], index: 9, kind: input, shape index: {}]   ;;  %s14970_s10 = inlined_call_operand.hbm [shape: f32[16,192], index: 10, kind: output, shape index: {}]  }
   0x1   :  { %15069 = sst [smem:[#allocation46_spill]] %s14963_s3 }
   0x2   :  { %15070 = sst [smem:[#allocation47_spill]] %s14968_s8 }
   0x3   :  { %15071 = sst [smem:[#allocation48_spill]] %s14970_s10 }
   0x4   :  { %15 = vsyncpa [#allocation7], 0 }
   0x5   :  { %17 = vsyncpa [#allocation7 + $0x1], 0 }
   0x6   :  { %18 = vsyncpa [#allocation10], 0 }
   0x7   :  { %19 = vsyncpa [#allocation13], 0 }
   0x8   :  { %20 = vsyncpa [#allocation8], 0 }
   0x9   :  { %22 = vsyncpa [#allocation8 + $0x1], 0  ;;  %s10563_s13 = smov 0   ;;  %s10565_s14 = smov 0  }
   0xa   :  { %s10567_s15 = smov 0   ;;  %s10569_s16 = smov 0  }
   0xb LB: > { %s10489_s17 = smov [#allocation9]   ;;  %s10584_s19 = sadd.s32 4294967295, %s10487_s16   ;;  %s10487_s16 = sphi %s10569_s16, %s15444_s16   ;;  %s10483_s15 = sphi %s10567_s15, %s15443_s15   ;;  %s10479_s14 = sphi %s10565_s14, %s15442_s14   ;;  %s10475_s13 = sphi %s10563_s13, %s15441_s13  }
   0xc   : > { %s292_s18 = sshll.u32 %s10489_s17, 4  ;;  %p8254_p0 = scmp.ge.s32.totalorder %s10487_s16, 1  ;;  %s10589_s18 = int_to_ptr.vmem [resolvable:$true] %s292_s18 }
   0xd   : > { %p14972_p1 = scmp.eq.s32.totalorder %s10584_s19, 0  ;;  %p274_p2 = scmp.lt.s32.totalorder %s10487_s16, 3 }
   0xe   : > { %s10490_s21 = smov [#allocation12]   ;;  %s10491_s24 = smov [#allocation11]  }
   0xf   : > { %p10591_p3 = pnand %p8254_p0, %p274_p2  ;;  %s324_s22 = sshll.u32 %s10490_s21, 4  ;;  %s10604_s22 = int_to_ptr.vmem [resolvable:$true] %s324_s22 }
  0x10   : > { %s308_s25 = sshll.u32 %s10491_s24, 4  ;;  %s15074_s3 = sld [smem:[#allocation46_spill]]  ;;  %s10606_s25 = int_to_ptr.vmem [resolvable:$true] %s308_s25 }
  0x11   : > { %s15072_s20 = scalar_select %p10591_p3, 1, 0 }
  0x12   : > { %p10186_p5 = pneg %p10591_p3 }
  0x14   : > { %p10600_p6 = pnand %p10186_p5, %p14972_p1 }
  0x16   : > { %s10271_s28 = scalar_lea.hbm %s15074_s3, 2048  ;;  %p10616_p8 = pneg %p10600_p6 }
  0x17   : > { %p10272_p7 = scmp.ne.s32.totalorder %s15074_s3, %s10271_s28  ;;  %p10278_p11 = scmp.lt.u32.totalorder %s10271_s28, %s15074_s3 }
  0x19   : > { %p10274_p9 = pnand %p10616_p8, %p10272_p7 }
  0x1b   : > { %p10275_p10 = pneg %p10274_p9 }
  0x1d   : > { %p10280_p12 = pnand %p10278_p11, %p10275_p10 }
  0x1f   : > { %10283 = shalt.err (!%p10280_p12)
}
  0x20   : > { %s10284_s21 = scalar_lea.vmem %s10589_s18, 2048  ;;  %p10292_p5 = scmp.lt.s32.totalorder %s10589_s18, %s10589_s18 }
  0x21   : > { %p10285_p13 = scmp.ne.s32.totalorder %s10589_s18, %s10284_s21  ;;  %p10293_p4 = scmp.lt.s32.totalorder %s10284_s21, %s10284_s21 }
  0x23   : > { %p10287_p0 = pnand %p10285_p13, %p10616_p8  ;;  %p10294_p7 = por %p10293_p4, %p10292_p5 }
  0x25   : > { %p10288_p2 = pneg %p10287_p0 }
  0x27   : > { %p10295_p9 = pnand %p10294_p7, %p10288_p2 }
  0x29   : > { %10298 = shalt.err (!%p10295_p9)
}
  0x2a   : > { %s10492_s24 = smov 128   ;;  %s10493_s26 = smov 8  }
  0x2b   : > { %10189 = dma.hbm_to_vmem [thread:$0]  (!%p10600_p6), %s15074_s3, 2048, %s10589_s18, [#allocation10], %s10492_s24, %s10492_s24, %s10493_s26  }
  0x2c   : > { %s10299_s12 = scalar_lea.hbm %s14967_s7, 4096 }
  0x2d   : > { %p10300_p4 = scmp.ne.s32.totalorder %s14967_s7, %s10299_s12  ;;  %p10306_p12 = scmp.lt.u32.totalorder %s10299_s12, %s14967_s7 }
  0x2f   : > { %p10302_p10 = pnand %p10300_p4, %p10616_p8 }
  0x31   : > { %p10303_p11 = pneg %p10302_p10 }
  0x33   : > { %p10308_p13 = pnand %p10306_p12, %p10303_p11 }
  0x35   : > { %10311 = shalt.err (!%p10308_p13)
}
  0x36   : > { %s10312_s18 = scalar_lea.vmem %s10604_s22, 4096  ;;  %p10320_p7 = scmp.lt.s32.totalorder %s10604_s22, %s10604_s22 }
  0x37   : > { %p10313_p0 = scmp.ne.s32.totalorder %s10604_s22, %s10312_s18  ;;  %p10321_p9 = scmp.lt.s32.totalorder %s10312_s18, %s10312_s18 }
  0x39   : > { %p10315_p2 = pnand %p10313_p0, %p10616_p8  ;;  %p10322_p4 = por %p10321_p9, %p10320_p7 }
  0x3b   : > { %p10316_p5 = pneg %p10315_p2 }
  0x3d   : > { %p10323_p10 = pnand %p10322_p4, %p10316_p5 }
  0x3f   : > { %10326 = shalt.err (!%p10323_p10)
}
  0x40   : > { %10195 = dma.hbm_to_vmem [thread:$0]  (!%p10600_p6), %s14967_s7, 4096, %s10604_s22, [#allocation13], %s10492_s24, %s10492_s24, %s10493_s26  }
  0x41   : > { %s10327_s29 = scalar_lea.hbm %s14965_s5, 4096 }
  0x42   : > { %p10328_p11 = scmp.ne.s32.totalorder %s14965_s5, %s10327_s29  ;;  %p10334_p0 = scmp.lt.u32.totalorder %s10327_s29, %s14965_s5 }
  0x44   : > { %p10330_p12 = pnand %p10328_p11, %p10616_p8 }
  0x46   : > { %p10331_p13 = pneg %p10330_p12 }
  0x48   : > { %p10336_p2 = pnand %p10334_p0, %p10331_p13 }
  0x4a   : > { %10339 = shalt.err (!%p10336_p2)
}
  0x4b   : > { %s10340_s22 = scalar_lea.vmem %s10606_s25, 4096  ;;  %p10348_p4 = scmp.lt.s32.totalorder %s10606_s25, %s10606_s25 }
  0x4c   : > { %p10341_p5 = scmp.ne.s32.totalorder %s10606_s25, %s10340_s22  ;;  %p10349_p10 = scmp.lt.s32.totalorder %s10340_s22, %s10340_s22 }
  0x4e   : > { %p10343_p7 = pnand %p10341_p5, %p10616_p8  ;;  %p10350_p11 = por %p10349_p10, %p10348_p4 }
  0x50   : > { %p10344_p9 = pneg %p10343_p7 }
  0x52   : > { %p10351_p12 = pnand %p10350_p11, %p10344_p9 }
  0x54   : > { %10354 = shalt.err (!%p10351_p12)
}
  0x55   : > { %10192 = dma.hbm_to_vmem [thread:$0]  (!%p10600_p6), %s14965_s5, 4096, %s10606_s25, [#allocation10], %s10492_s24, %s10492_s24, %s10493_s26  }
  0x56   : > { %s10494_s10 = smov [#allocation14]   ;;  %s10355_s30 = scalar_lea.hbm %s14969_s9, 6144 }
  0x57   : > { %s340_s27 = sshll.u32 %s10494_s10, 4  ;;  %p10356_p13 = scmp.ne.s32.totalorder %s14969_s9, %s10355_s30  ;;  %s341_s27 = int_to_ptr.vmem [resolvable:$true] %s340_s27 }
  0x58   : > { %p10362_p5 = scmp.lt.u32.totalorder %s10355_s30, %s14969_s9 }
  0x59   : > { %p10358_p0 = pnand %p10356_p13, %p10616_p8 }
  0x5b   : > { %p10359_p2 = pneg %p10358_p0 }
  0x5d   : > { %p10364_p7 = pnand %p10362_p5, %p10359_p2 }
  0x5f   : > { %10367 = shalt.err (!%p10364_p7)
}
  0x60   : > { %s10368_s25 = scalar_lea.vmem %s341_s27, 6144  ;;  %p10376_p11 = scmp.lt.s32.totalorder %s341_s27, %s341_s27 }
  0x61   : > { %p10369_p9 = scmp.ne.s32.totalorder %s341_s27, %s10368_s25  ;;  %p10377_p12 = scmp.lt.s32.totalorder %s10368_s25, %s10368_s25 }
  0x63   : > { %p10371_p4 = pnand %p10369_p9, %p10616_p8  ;;  %p10378_p1 = por %p10377_p12, %p10376_p11 }
  0x65   : > { %p10372_p10 = pneg %p10371_p4 }
  0x67   : > { %p10379_p3 = pnand %p10378_p1, %p10372_p10 }
  0x69   : > { %10382 = shalt.err (!%p10379_p3)
}
  0x6a   : > { %s10495_s24 = smov 256   ;;  %s10496_s11 = smov 16  }
  0x6b   : > { %10198 = dma.hbm_to_vmem [thread:$0]  (!%p10600_p6), %s14969_s9, 6144, %s341_s27, [#allocation13], %s10495_s24, %s10495_s24, %s10496_s11  }
  0x6c   : > { %s8253_s8 = sadd.s32 4294967294, %s10487_s16   ;;  %s10712_s10 = sadd.s32 1, %s10487_s16  }
  0x6d   : > { %s32_s28 = ssub.s32 %s10487_s16, %s10712_s10  ;;  %s35_s29 = sadd.s32 1, %s10483_s15 }
  0x6e   : > { %p33_p1 = scmp.eq.s32.totalorder %s32_s28, 0  ;;  %p42_p3 = scmp.ne.s32.totalorder %s10483_s15, %s10479_s14 }
  0x6f   : > { %p43_p8 = scmp.eq.s32.totalorder %s10487_s16, 0  ;;  %p48_p13 = scmp.ne.s32.totalorder %s10479_s14, %s10475_s13 }
  0x70   : > { %s10723_s30 = scalar_select %p33_p1, %s10483_s15, %s35_s29  }
  0x71   : > { %p10725_p0 = por %p43_p8, %p42_p3  ;;  %p15077_p2 = scmp.eq.s32.totalorder %s10584_s19, 0 }
  0x72   : > { %p261_p5 = scmp.eq.s32.totalorder %s10584_s19, 1  ;;  %p267_p7 = scmp.eq.s32.totalorder %s8253_s8, 1 }
  0x73   : > { %p10731_p6 = por %p15077_p2, %p48_p13  ;;  %p10211_p9 = scmp.lt.s32.totalorder %s10487_s16, 2 }
  0x74   : > { %s354_s12 = sand.u32 1, %s10483_s15   ;;  %p10738_p4 = por %p261_p5, %p42_p3 }
  0x75   : > { %p10742_p10 = por %p267_p7, %p48_p13  ;;  %s8260_s22 = sshll.u32 %s354_s12, 3 }
  0x76   : > { %s15079_s17 = scalar_select %p10738_p4, 1, 0 }
  0x77   : > { %s15080_s21 = scalar_select %p10742_p10, 1, 0 }
  0x78   : > { %s8261_s25 = sshll.u32 %s10487_s16, 7  ;;  %s358_s18 = scalar_lea.vmem [#allocation6], %s8260_s22 }
  0x79   : > { %s10750_s26 = scalar_lea.hbm %s14960_s0, %s8261_s25  ;;  %s365_s8 = sshll.u32 %s358_s18, 4  ;;  %s10752_s8 = int_to_ptr.vmem [resolvable:$true] %s365_s8 }
  0x7a   : > { %p10756_p11 = pnand %p10211_p9, %p10725_p0  ;;  %s355_s29 = scalar_lea.sflag [#allocation7], %s354_s12 }
  0x7b   : > { %s10383_s3 = scalar_lea.hbm %s10750_s26, 128  ;;  %s10388_s24 = scalar_lea.hbm %s14960_s0, 256 }
  0x7c   : > { %p10384_p12 = scmp.ne.s32.totalorder %s10750_s26, %s10383_s3  ;;  %p10385_p1 = pneg %p10756_p11 }
  0x7d   : > { %p10389_p13 = scmp.lt.u32.totalorder %s10750_s26, %s14960_s0  ;;  %p10390_p0 = scmp.lt.u32.totalorder %s10388_s24, %s10383_s3 }
  0x7e   : > { %p10386_p3 = pnand %p10385_p1, %p10384_p12  ;;  %p10392_p5 = scmp.lt.u32.totalorder %s10383_s3, %s10750_s26 }
  0x7f   : > { %p10391_p2 = por %p10390_p0, %p10389_p13 }
  0x80   : > { %p10387_p8 = pneg %p10386_p3 }
  0x81   : > { %p10393_p7 = por %p10392_p5, %p10391_p2 }
  0x83   : > { %p10394_p9 = pnand %p10393_p7, %p10387_p8 }
  0x85   : > { %10397 = shalt.err (!%p10394_p9)
}
  0x86   : > { %s10398_s12 = scalar_lea.vmem %s10752_s8, 128  ;;  %s10497_s18 = smov [#allocation6]  }
  0x87   : > { %p10399_p12 = scmp.ne.s32.totalorder %s10752_s8, %s10398_s12  ;;  %s10403_s22 = sshll.u32 %s10497_s18, 4  ;;  %s10404_s22 = int_to_ptr.vmem [resolvable:$false] %s10403_s22 }
  0x88   : > { %s10405_s25 = scalar_lea.vmem %s10404_s22, 256  ;;  %p10406_p4 = scmp.lt.s32.totalorder %s10752_s8, %s10404_s22 }
  0x89   : > { %p10401_p3 = pnand %p10399_p12, %p10385_p1  ;;  %p10407_p13 = scmp.lt.s32.totalorder %s10405_s25, %s10398_s12 }
  0x8b   : > { %p10402_p10 = pneg %p10401_p3  ;;  %p10408_p0 = por %p10407_p13, %p10406_p4 }
  0x8d   : > { %p10409_p2 = pnand %p10408_p0, %p10402_p10 }
  0x8f   : > { %10412 = shalt.err (!%p10409_p2)
}
  0x90   : > { %10202 = dma.hbm_to_vmem [thread:$0]  (!%p10756_p11), %s10750_s26, 128, %s10752_s8, %s355_s29  }
  0x91   : > { %p15082_p8 = scmp.ne.s32.totalorder %s15072_s20, 0 }
  0x93   : > { %374 = sbr.rel (%p15082_p8) target bundleno = 2380 (0x94c), region = 60 }
  0x9a   : > { %s10788_s3 = sand.u32 1, %s10479_s14  }
  0x9b   : > { %s8263_s24 = sshll.u32 %s10788_s3, 3  ;;  %s377_s23 = scalar_lea.sflag [#allocation7], %s10788_s3 }
  0x9c   : > { %s380_s11 = scalar_lea.vmem [#allocation6], %s8263_s24 }
  0x9d   : > { %10458 = dma.done.wait (%p10731_p6), %s377_s23, 128  }
  0x9e   : > { %10460 = vsyncadd (%p10731_p6), %s377_s23, 4294967168  ;;  %p15083_p4 = scmp.eq.s32.totalorder %s10584_s19, 0 }
  0xa0   : > { %10462 = dma.done.wait (%p15083_p4), [#allocation10], 6144   ;;  %p15084_p10 = pmov %p15083_p4 }
  0xa1   : > { %p15085_p11 = pmov %p15083_p4 }
  0xa2   : > { %10464 = vsyncadd (%p15084_p10), [#allocation10], 4294961152 }
  0xa3   : > { %10466 = dma.done.wait (%p15085_p11), [#allocation13], 10240   ;;  %p15086_p1 = pmov %p15083_p4 }
  0xa4   : > { %v433_v0 = vld [vmem:[%s380_s11] sm:$0xff]  ;;  %v10498_v1 = vmov 0   ;;  %s10499_s20 = smov 126   ;;  %s10500_s27 = smov 127   ;;  %v3414_v43 = vld [vmem:[#allocation9 + $0x20] sm:$0xff]  ;;  %v3415_v44 = vld [vmem:[#allocation9 + $0x28] sm:$0xff] }
  0xa5   : > { %10468 = vsyncadd (%p15086_p1), [#allocation13], 4294957056  ;;  %434 = vxpose.xlu0.b32.start.end [1/1] (short) (narrow) %v433_v0, 96  ;;  %10266 = vset.pattern.permute.xlu1 %v10498_v1  ;;  %s10501_s26 = smov 125   ;;  %s10502_s8 = smov 124   ;;  %v9698_v46 = vpack.c.bf16 %v3415_v44, %v3414_v43  ;;  %v3416_v48 = vld [vmem:[#allocation9 + $0x30] sm:$0xff] }
  0xa6   : > { %s10503_s28 = smov 123   ;;  %v3417_v49 = vld [vmem:[#allocation9 + $0x38] sm:$0xff]  ;;  %vm1327_vm0 = vcmask 1046528   ;;  %vm1907_vm1 = vcmask 1045504   ;;  %vm2487_vm2 = vcmask 1044480   ;;  %vm3070_vm3 = vcmask 261120  }
  0xa7   : > { %9699 = vmatprep.subr.bf16.mxu0 %v9698_v46  ;;  %9906 = vmatprep.subr.bf16.mxu1 %v9698_v46  ;;  %v9702_v50 = vpack.c.bf16 %v3417_v49, %v3416_v48  ;;  %s10504_s25 = smov 122   ;;  %s10505_s24 = smov 121   ;;  %vm3168_vm4 = vcmask 256000   ;;  %vm3166_vm5 = vcmask 258048   ;;  %vm5614_vm6 = vcmask 518144  }
  0xa8   : > { %9701 = vmatpush3.bf16.msra.mxu0 %v9698_v46  ;;  %9908 = vmatpush3.bf16.msra.mxu1 %v9698_v46  ;;  %vm5564_vm7 = vcmask 523264   ;;  %vm5612_vm8 = vcmask 520192   ;;  %s8268_s23 = sshll.u32 %s10788_s3, 4  ;;  %s8131_s12 = scalar_lea.sflag [#allocation8], %s10788_s3 }
  0xa9   : > { %9703 = vmatprep.subr.bf16.mxu0 %v9702_v50  ;;  %9907 = vmatprep.subr.bf16.mxu1 %v9702_v50  ;;  %s432_s11 = scalar_lea.vmem [#allocation15], %s8268_s23  ;;  %p15438_p5 = scmp.ne.s32.totalorder %s15079_s17, 0 }
  0xac   : > { %9705 = vmatpush3.bf16.msra.mxu0 %v9702_v50  ;;  %9909 = vmatpush3.bf16.msra.mxu1 %v9702_v50 }
  0xce   : > { %10267 = vset.pattern.permute.xlu0 %v10498_v1 }
 0x125   : > { %v10804_v2 = vpop.trf.xlu0 }
 0x126   : > { %502 = vrot.lane.b32.xlu1 %v10804_v2, %s10499_s20  ;;  %478 = vrot.lane.b32.xlu0 %v10804_v2, %s10500_s27 }
 0x129   : > { %v10810_v3 = vpop.trf.xlu0 }
 0x12a   : > { %526 = vrot.lane.b32.xlu0 %v10804_v2, %s10501_s26  ;;  %480 = vrot.lane.b32.xlu1 %v10810_v3, %s10500_s27 }
 0x12d   : > { %v10816_v4 = vpop.trf.xlu0 }
 0x12e   : > { %504 = vrot.lane.b32.xlu1 %v10810_v3, %s10499_s20  ;;  %530 = vrot.lane.b32.xlu0 %v10816_v4, %s10501_s26 }
 0x131   : > { %v10822_v5 = vpop.trf.xlu0 }
 0x132   : > { %15087 = vst [vmem:[#allocation20_spill] sm:$0xff] %v10822_v5  ;;  %528 = vrot.lane.b32.xlu1 %v10810_v3, %s10501_s26 }
 0x135   : > { %v10826_v6 = vpop.trf.xlu0 }
 0x136   : > { %482 = vrot.lane.b32.xlu1 %v10816_v4, %s10500_s27  ;;  %534 = vrot.lane.b32.xlu0 %v10826_v6, %s10501_s26 }
 0x139   : > { %v10832_v7 = vpop.trf.xlu0 }
 0x13a   : > { %15088 = vst [vmem:[#allocation21_spill] sm:$0xff] %v10832_v7  ;;  %506 = vrot.lane.b32.xlu1 %v10816_v4, %s10499_s20 }
 0x13d   : > { %v10836_v8 = vpop.trf.xlu0 }
 0x13e   : > { %484 = vrot.lane.b32.xlu1 %v10822_v5, %s10500_s27  ;;  %538 = vrot.lane.b32.xlu0 %v10836_v8, %s10501_s26 }
 0x141   : > { %v10842_v9 = vpop.trf.xlu0 }
 0x142   : > { %15089 = vst [vmem:[#allocation22_spill] sm:$0xff] %v10842_v9  ;;  %508 = vrot.lane.b32.xlu1 %v10822_v5, %s10499_s20  ;;  %550 = vrot.lane.b32.xlu0 %v10804_v2, %s10502_s8 }
 0x145   : > { %v10848_v10 = vpop.trf.xlu0 }
 0x146   : > { %532 = vrot.lane.b32.xlu1 %v10822_v5, %s10501_s26  ;;  %542 = vrot.lane.b32.xlu0 %v10848_v10, %s10501_s26 }
 0x149   : > { %v10854_v11 = vpop.trf.xlu0 }
 0x14a   : > { %15090 = vst [vmem:[#allocation23_spill] sm:$0xff] %v10854_v11  ;;  %486 = vrot.lane.b32.xlu1 %v10826_v6, %s10500_s27  ;;  %554 = vrot.lane.b32.xlu0 %v10816_v4, %s10502_s8 }
 0x14d   : > { %v10860_v12 = vpop.trf.xlu0 }
 0x14e   : > { %15091 = vst [vmem:[#allocation24_spill] sm:$0xff] %v10860_v12  ;;  %510 = vrot.lane.b32.xlu1 %v10826_v6, %s10499_s20  ;;  %546 = vrot.lane.b32.xlu0 %v10860_v12, %s10501_s26 }
 0x151   : > { %v10925_v13 = vpop.trf.xlu0 }
 0x152   : > { %488 = vrot.lane.b32.xlu1 %v10832_v7, %s10500_s27  ;;  %558 = vrot.lane.b32.xlu0 %v10826_v6, %s10502_s8 }
 0x156   : > { %512 = vrot.lane.b32.xlu1 %v10832_v7, %s10499_s20  ;;  %562 = vrot.lane.b32.xlu0 %v10836_v8, %s10502_s8 }
 0x15a   : > { %536 = vrot.lane.b32.xlu1 %v10832_v7, %s10501_s26  ;;  %566 = vrot.lane.b32.xlu0 %v10848_v10, %s10502_s8 }
 0x15e   : > { %490 = vrot.lane.b32.xlu1 %v10836_v8, %s10500_s27  ;;  %570 = vrot.lane.b32.xlu0 %v10860_v12, %s10502_s8 }
 0x162   : > { %514 = vrot.lane.b32.xlu1 %v10836_v8, %s10499_s20  ;;  %574 = vrot.lane.b32.xlu0 %v10804_v2, %s10503_s28 }
 0x166   : > { %552 = vrot.lane.b32.xlu1 %v10810_v3, %s10502_s8  ;;  %578 = vrot.lane.b32.xlu0 %v10816_v4, %s10503_s28 }
 0x16a   : > { %492 = vrot.lane.b32.xlu1 %v10842_v9, %s10500_s27  ;;  %652 = vperm.xlu0 %10267, %v10810_v3  }
 0x16e   : > { %516 = vrot.lane.b32.xlu1 %v10842_v9, %s10499_s20  ;;  %664 = vperm.xlu0 %10267, %v10826_v6  }
 0x172   : > { %540 = vrot.lane.b32.xlu1 %v10842_v9, %s10501_s26  ;;  %672 = vperm.xlu0 %10267, %v10836_v8  }
 0x176   : > { %494 = vrot.lane.b32.xlu1 %v10848_v10, %s10500_s27  ;;  %582 = vrot.lane.b32.xlu0 %v10826_v6, %s10503_s28 }
 0x17a   : > { %518 = vrot.lane.b32.xlu1 %v10848_v10, %s10499_s20  ;;  %586 = vrot.lane.b32.xlu0 %v10836_v8, %s10503_s28 }
 0x17e   : > { %556 = vrot.lane.b32.xlu1 %v10822_v5, %s10502_s8  ;;  %680 = vperm.xlu0 %10267, %v10848_v10  }
 0x182   : > { %496 = vrot.lane.b32.xlu1 %v10854_v11, %s10500_s27  ;;  %688 = vperm.xlu0 %10267, %v10860_v12  }
 0x186   : > { %520 = vrot.lane.b32.xlu1 %v10854_v11, %s10499_s20  ;;  %590 = vrot.lane.b32.xlu0 %v10848_v10, %s10503_s28 }
 0x18a   : > { %544 = vrot.lane.b32.xlu1 %v10854_v11, %s10501_s26  ;;  %594 = vrot.lane.b32.xlu0 %v10860_v12, %s10503_s28 }
 0x18e   : > { %498 = vrot.lane.b32.xlu1 %v10860_v12, %s10500_s27 }
 0x192   : > { %522 = vrot.lane.b32.xlu1 %v10860_v12, %s10499_s20 }
 0x196   : > { %500 = vrot.lane.b32.xlu1 %v10925_v13, %s10500_s27  ;;  %s8617_s27 = sshll.u32 %s10584_s19, 8  ;;  %s10507_s19 = smov [#allocation15]  }
 0x197   : > { %s10417_s22 = sshll.u32 %s10507_s19, 4  ;;  %s10418_s22 = int_to_ptr.vmem [resolvable:$false] %s10417_s22 }
 0x198   : > { %v503_v14 = vpop.permute.xlu1 %502  ;;  %v479_v15 = vpop.permute.xlu0 %478 }
 0x199   : > { %696 = vperm.xlu0 %10267, %v479_v15  }
 0x19a   : > { %524 = vrot.lane.b32.xlu1 %v10925_v13, %s10499_s20  ;;  %s8145_s20 = sshll.u32 %s432_s11, 4  ;;  %s14912_s20 = int_to_ptr.vmem [resolvable:$true] %s8145_s20 }
 0x19b   : > { %s10413_s18 = scalar_lea.vmem %s14912_s20, 256  ;;  %p10420_p12 = scmp.lt.s32.totalorder %s14912_s20, %s10418_s22 }
 0x19c   : > { %v10931_v16 = vpop.permute.xlu1 %480  ;;  %v10939_v18 = vpop.permute.xlu0 %526  ;;  %p10414_p6 = scmp.ne.s32.totalorder %s14912_s20, %s10413_s18 }
 0x19d   : > { %744 = vperm.xlu0 %10267, %v503_v14  }
 0x19e   : > { %548 = vrot.lane.b32.xlu1 %v10925_v13, %s10501_s26  ;;  %p10415_p7 = pnand %p10414_p6, %p15438_p5 }
 0x1a0   : > { %v10935_v17 = vpop.permute.xlu1 %504  ;;  %v10945_v20 = vpop.permute.xlu0 %530  ;;  %p10416_p9 = pneg %p10415_p7 }
 0x1a2   : > { %560 = vrot.lane.b32.xlu1 %v10832_v7, %s10502_s8 }
 0x1a4   : > { %v10941_v19 = vpop.permute.xlu1 %528 }
 0x1a6   : > { %564 = vrot.lane.b32.xlu1 %v10842_v9, %s10502_s8 }
 0x1a8   : > { %v483_v21 = vpop.permute.xlu1 %482  ;;  %v10949_v23 = vpop.permute.xlu0 %534 }
 0x1a9   : > { %704 = vperm.xlu0 %10267, %v483_v21  }
 0x1aa   : > { %568 = vrot.lane.b32.xlu1 %v10854_v11, %s10502_s8 }
 0x1ac   : > { %v507_v22 = vpop.permute.xlu1 %506 }
 0x1ad   : > { %752 = vperm.xlu0 %10267, %v507_v22  }
 0x1ae   : > { %572 = vrot.lane.b32.xlu1 %v10925_v13, %s10502_s8 }
 0x1b0   : > { %v485_v24 = vpop.permute.xlu1 %484  ;;  %v10955_v25 = vpop.permute.xlu0 %538 }
 0x1b2   : > { %576 = vrot.lane.b32.xlu1 %v10810_v3, %s10503_s28 }
 0x1b4   : > { %v509_v26 = vpop.permute.xlu1 %508  ;;  %v10960_v28 = vpop.permute.xlu0 %550 }
 0x1b6   : > { %648 = vperm.xlu1 %10266, %v10804_v2  }
 0x1b8   : > { %v10958_v27 = vpop.permute.xlu1 %532  ;;  %v10964_v30 = vpop.permute.xlu0 %542 }
 0x1ba   : > { %656 = vperm.xlu1 %10266, %v10816_v4  }
 0x1bc   : > { %v487_v29 = vpop.permute.xlu1 %486  ;;  %v10967_v33 = vpop.permute.xlu0 %554 }
 0x1bd   : > { %712 = vperm.xlu0 %10267, %v487_v29  }
 0x1be   : > { %660 = vperm.xlu1 %10266, %v10822_v5  }
 0x1c0   : > { %v511_v31 = vpop.permute.xlu1 %510  ;;  %v10973_v35 = vpop.permute.xlu0 %546 }
 0x1c1   : > { %760 = vperm.xlu0 %10267, %v511_v31  }
 0x1c2   : > { %668 = vperm.xlu1 %10266, %v10832_v7  }
 0x1c4   : > { %v489_v32 = vpop.permute.xlu1 %488  ;;  %v10978_v38 = vpop.permute.xlu0 %558 }
 0x1c6   : > { %580 = vrot.lane.b32.xlu1 %v10822_v5, %s10503_s28 }
 0x1c8   : > { %v513_v34 = vpop.permute.xlu1 %512  ;;  %v10983_v40 = vpop.permute.xlu0 %562 }
 0x1ca   : > { %584 = vrot.lane.b32.xlu1 %v10832_v7, %s10503_s28 }
 0x1cc   : > { %v10975_v36 = vpop.permute.xlu1 %536  ;;  %v10989_v45 = vpop.permute.xlu0 %566 }
 0x1ce   : > { %676 = vperm.xlu1 %10266, %v10842_v9  }
 0x1d0   : > { %v491_v37 = vpop.permute.xlu1 %490  ;;  %v10993_v51 = vpop.permute.xlu0 %570 }
 0x1d1   : > { %720 = vperm.xlu0 %10267, %v491_v37  }
 0x1d2   : > { %684 = vperm.xlu1 %10266, %v10854_v11  }
 0x1d4   : > { %v515_v39 = vpop.permute.xlu1 %514  ;;  %v10996_v54 = vpop.permute.xlu0 %574 }
 0x1d5   : > { %768 = vperm.xlu0 %10267, %v515_v39  }
 0x1d6   : > { %588 = vrot.lane.b32.xlu1 %v10842_v9, %s10503_s28 }
 0x1d8   : > { %v10985_v41 = vpop.permute.xlu1 %552  ;;  %v10998_v56 = vpop.permute.xlu0 %578 }
 0x1da   : > { %592 = vrot.lane.b32.xlu1 %v10854_v11, %s10503_s28 }
 0x1dc   : > { %v493_v42 = vpop.permute.xlu1 %492 }
 0x1de   : > { %692 = vperm.xlu1 %10266, %v10925_v13  }
 0x1e0   : > { %v517_v47 = vpop.permute.xlu1 %516 }
 0x1e2   : > { %700 = vperm.xlu1 %10266, %v10931_v16  }
 0x1e4   : > { %v541_v52 = vpop.permute.xlu1 %540 }
 0x1e6   : > { %748 = vperm.xlu1 %10266, %v10935_v17  }
 0x1e8   : > { %v495_v53 = vpop.permute.xlu1 %494 }
 0x1e9   : > { %728 = vperm.xlu0 %10267, %v495_v53   ;;  %v11002_v58 = vpop.permute.xlu0 %652 }
 0x1ea   : > { %708 = vperm.xlu1 %10266, %v485_v24  }
 0x1ec   : > { %v519_v55 = vpop.permute.xlu1 %518 }
 0x1ed   : > { %776 = vperm.xlu0 %10267, %v519_v55   ;;  %v11004_v61 = vpop.permute.xlu0 %664 }
 0x1ee   : > { %756 = vperm.xlu1 %10266, %v509_v26  }
 0x1f0   : > { %v11000_v57 = vpop.permute.xlu1 %556 }
 0x1f1   : > { %v11006_v63 = vpop.permute.xlu0 %672 }
 0x1f2   : > { %716 = vperm.xlu1 %10266, %v489_v32  }
 0x1f4   : > { %v497_v59 = vpop.permute.xlu1 %496 }
 0x1f5   : > { %v11008_v14 = vpop.permute.xlu0 %582 }
 0x1f6   : > { %764 = vperm.xlu1 %10266, %v513_v34  }
 0x1f8   : > { %v521_v60 = vpop.permute.xlu1 %520 }
 0x1f9   : > { %v11012_v16 = vpop.permute.xlu0 %586 }
 0x1fa   : > { %724 = vperm.xlu1 %10266, %v493_v42  }
 0x1fc   : > { %v545_v62 = vpop.permute.xlu1 %544 }
 0x1fd   : > { %v11015_v21 = vpop.permute.xlu0 %680 }
 0x1fe   : > { %772 = vperm.xlu1 %10266, %v517_v47  }
 0x200   : > { %v499_v0 = vpop.permute.xlu1 %498 }
 0x201   : > { %736 = vperm.xlu0 %10267, %v499_v0   ;;  %v11020_v24 = vpop.permute.xlu0 %688 }
 0x202   : > { %732 = vperm.xlu1 %10266, %v497_v59  }
 0x204   : > { %v523_v1 = vpop.permute.xlu1 %522 }
 0x205   : > { %784 = vperm.xlu0 %10267, %v523_v1   ;;  %v11026_v26 = vpop.permute.xlu0 %590 }
 0x206   : > { %780 = vperm.xlu1 %10266, %v521_v60  }
 0x208   : > { %v501_v15 = vpop.permute.xlu1 %500 }
 0x209   : > { %792 = vperm.xlu0 %10267, %v10939_v18   ;;  %v1031_v18 = vlaneseq }
 0x20a   : > { %796 = vperm.xlu1 %10266, %v10941_v19  }
 0x20c   : > { %v525_v17 = vpop.permute.xlu1 %524 }
 0x20d   : > { %800 = vperm.xlu0 %10267, %v10945_v20   ;;  %v1032_v20 = vshrl.u32 %v1031_v18, 7 }
 0x20e   : > { %740 = vperm.xlu1 %10266, %v501_v15  }
 0x20f   : > { %v1713_v29 = vsub.s32 2, %v1032_v20  ;;  %v2293_v31 = vsub.s32 3, %v1032_v20  ;;  %v1033_v32 = vsub.s32 0, %v1032_v20 }
 0x210   : > { %v549_v22 = vpop.permute.xlu1 %548 }
 0x211   : > { %808 = vperm.xlu0 %10267, %v10949_v23  }
 0x212   : > { %788 = vperm.xlu1 %10266, %v525_v17  }
 0x214   : > { %v11022_v19 = vpop.permute.xlu1 %560 }
 0x215   : > { %816 = vperm.xlu0 %10267, %v10955_v25   ;;  %v1133_v25 = vsub.s32 1, %v1032_v20 }
 0x216   : > { %804 = vperm.xlu1 %10266, %v10958_v27   ;;  %v646_v27 = vld [vmem:[%s14961_s1] sm:$0xf] }
 0x217   : > { %v11037_v34 = vrot.slane %v646_v27, %v1133_v25  ;;  %v11044_v37 = vrot.slane %v646_v27, %v2293_v31  ;;  %v11046_v39 = vrot.slane %v646_v27, %v1033_v32 }
 0x218   : > { %v11029_v23 = vpop.permute.xlu1 %564 }
 0x219   : > { %824 = vperm.xlu0 %10267, %v10964_v30   ;;  %v11035_v30 = vpop.permute.xlu0 %594  ;;  %v11050_v42 = vmul.f32 %v11037_v34, %v11002_v58  ;;  %v11064_v44 = vmul.f32 %v11037_v34, %v11004_v61  ;;  %v11078_v48 = vmul.f32 %v11046_v39, %v11002_v58  ;;  %v11083_v49 = vmul.f32 %v11037_v34, %v11006_v63 }
 0x21a   : > { %812 = vperm.xlu1 %10266, %v10975_v36   ;;  %v11098_v59 = vmul.f32 %v11037_v34, %v11015_v21  ;;  %v11103_v60 = vmul.f32 %v11046_v39, %v11004_v61  ;;  %v11114_v15 = vmul.f32 %v11046_v39, %v11006_v63  ;;  %v11160_v31 = vmul.f32 %v11046_v39, %v11020_v24 }
 0x21c   : > { %v11039_v36 = vpop.permute.xlu1 %568 }
 0x21d   : > { %832 = vperm.xlu0 %10267, %v10973_v35   ;;  %v11042_v35 = vrot.slane %v646_v27, %v1713_v29  ;;  %v11140_v29 = vmul.f32 %v11046_v39, %v11015_v21 }
 0x21e   : > { %820 = vperm.xlu1 %10266, %v541_v52  }
 0x21f   : > { %v11055_v43 = vmul.f32 %v11042_v35, %v11002_v58  ;;  %v11068_v46 = vmul.f32 %v11042_v35, %v11004_v61  ;;  %v11087_v50 = vmul.f32 %v11042_v35, %v11006_v63  ;;  %v11109_v0 = vmul.f32 %v11042_v35, %v11015_v21 }
 0x220   : > { %v11070_v47 = vpop.permute.xlu1 %572  ;;  %v11128_v18 = vmul.f32 %v11042_v35, %v11020_v24 }
 0x221   : > { %840 = vperm.xlu0 %10267, %v10960_v28   ;;  %v697_v28 = vpop.permute.xlu0 %696 }
 0x222   : > { %828 = vperm.xlu1 %10266, %v545_v62   ;;  %v11144_v32 = vmul.f32 %v11037_v34, %v697_v28  ;;  %v11149_v17 = vmul.f32 %v11042_v35, %v697_v28 }
 0x224   : > { %v11134_v20 = vpop.permute.xlu1 %576  ;;  %15092 = vst [vmem:[#allocation25_spill] sm:$0xff] %v11149_v17 }
 0x225   : > { %848 = vperm.xlu0 %10267, %v10967_v33   ;;  %v11059_v33 = vmul.f32 %v11044_v37, %v11002_v58  ;;  %v745_v52 = vpop.permute.xlu0 %744  ;;  %v11094_v58 = vmul.f32 %v11044_v37, %v11006_v63  ;;  %v11132_v63 = vmul.f32 %v11044_v37, %v11020_v24 }
 0x226   : > { %836 = vperm.xlu1 %10266, %v549_v22   ;;  %v11155_v27 = vmul.f32 %v11037_v34, %v745_v52  ;;  %v11164_v22 = vmul.f32 %v11042_v35, %v745_v52  ;;  %v11172_v55 = vmul.f32 %v11044_v37, %v745_v52  ;;  %v11183_v1 = vmul.f32 %v11046_v39, %v745_v52 }
 0x228   : > { %15094 = vst [vmem:[#allocation27_spill] sm:$0xff] %v11155_v27  ;;  %15095 = vst [vmem:[#allocation28_spill] sm:$0xff] %v11164_v22 }
 0x229   : > { %856 = vperm.xlu0 %10267, %v10978_v38   ;;  %v11074_v38 = vmul.f32 %v11044_v37, %v11004_v61  ;;  %v11122_v61 = vmul.f32 %v11037_v34, %v11020_v24  ;;  %v705_v25 = vpop.permute.xlu0 %704  ;;  %15097 = vst [vmem:[#allocation30_spill] sm:$0xff] %v11172_v55  ;;  %15098 = vst [vmem:[#allocation31_spill] sm:$0xff] %v11183_v1 }
 0x22a   : > { %844 = vperm.xlu1 %10266, %v10985_v41   ;;  %v11188_v9 = vmul.f32 %v11037_v34, %v705_v25  ;;  %v11215_v1 = vmul.f32 %v11046_v39, %v705_v25 }
 0x22c   : > { %15100 = vst [vmem:[#allocation32_spill] sm:$0xff] %v11215_v1 }
 0x22d   : > { %864 = vperm.xlu0 %10267, %v10983_v40   ;;  %v11169_v40 = vmul.f32 %v11046_v39, %v697_v28 }
 0x22e   : > { %852 = vperm.xlu1 %10266, %v11000_v57   ;;  %v11118_v57 = vmul.f32 %v11044_v37, %v11015_v21 }
 0x22f   : > { %15096 = vst [vmem:[#allocation29_spill] sm:$0xff] %v11169_v40 }
 0x231   : > { %872 = vperm.xlu0 %10267, %v10989_v45   ;;  %v11152_v45 = vmul.f32 %v11044_v37, %v697_v28  ;;  %v11195_v28 = vmul.f32 %v11044_v37, %v705_v25 }
 0x232   : > { %860 = vperm.xlu1 %10266, %v11022_v19  }
 0x233   : > { %15093 = vst [vmem:[#allocation26_spill] sm:$0xff] %v11152_v45 }
 0x235   : > { %v649_v21 = vpop.permute.xlu1 %648  ;;  %880 = vperm.xlu0 %10267, %v10993_v51   ;;  %v753_v51 = vpop.permute.xlu0 %752 }
 0x236   : > { %v1135_v19 = vmul.f32 %v11037_v34, %v649_v21  ;;  %v1715_v53 = vmul.f32 %v11042_v35, %v649_v21  ;;  %v2295_v41 = vmul.f32 %v11044_v37, %v649_v21  ;;  %868 = vperm.xlu1 %10266, %v11029_v23   ;;  %v11192_v23 = vmul.f32 %v11042_v35, %v705_v25 }
 0x237   : > { %v1035_v52 = vmul.f32 %v11046_v39, %v649_v21  ;;  %v11200_v24 = vmul.f32 %v11037_v34, %v753_v51  ;;  %v11203_v11 = vmul.f32 %v11042_v35, %v753_v51  ;;  %v11219_v45 = vmul.f32 %v11044_v37, %v753_v51 }
 0x238   : > { %v1328_v7 = vrot.slane %v1135_v19, 1  ;;  %v1908_v40 = vrot.slane %v1715_v53, 2  ;;  %v15099_v53 = vrot.slane %v11050_v42, 1  ;;  %v2488_v5 = vrot.slane %v2295_v41, 3 }
 0x239   : > { %v657_v62 = vpop.permute.xlu1 %656  ;;  %888 = vperm.xlu0 %10267, %v10996_v54   ;;  %15101 = vst [vmem:[#allocation33_spill] sm:$0xff] %v11219_v45  ;;  %v11228_v27 = vmul.f32 %v11046_v39, %v753_v51 }
 0x23a   : > { %v1330_v19 = vsel %vm1327_vm0, %v1328_v7, %v15099_v53  ;;  %876 = vperm.xlu1 %10266, %v11039_v36   ;;  %v1137_v21 = vmul.f32 %v11037_v34, %v657_v62  ;;  %v1717_v22 = vmul.f32 %v11042_v35, %v657_v62  ;;  %v11212_v54 = vmul.f32 %v11044_v37, %v657_v62 }
 0x23b   : > { %v1615_v55 = vadd.f32 %v1330_v19, %v1035_v52  ;;  %v15102_v7 = vrot.slane %v11055_v43, 2  ;;  %15103 = vst [vmem:[#allocation34_spill] sm:$0xff] %v11228_v27 }
 0x23c   : > { %v1331_v53 = vrot.slane %v1137_v21, 1  ;;  %v1911_v19 = vrot.slane %v1717_v22, 2  ;;  %v713_v12 = vpop.permute.xlu0 %712 }
 0x23d   : > { %v1910_v36 = vsel %vm1907_vm1, %v1908_v40, %v15102_v7  ;;  %v661_v17 = vpop.permute.xlu1 %660  ;;  %896 = vperm.xlu0 %10267, %v10998_v56   ;;  %v11234_v40 = vld [vmem:[%s14962_s2] ss:$0 sm:$0xff]  ;;  %v15105_v7 = vrot.slane %v11050_v42, 1  ;;  %v11248_v41 = vmul.f32 %v11037_v34, %v713_v12 }
 0x23e   : > { %v2195_v52 = vadd.f32 %v1910_v36, %v1615_v55  ;;  %v15104_v55 = vrot.slane %v11059_v33, 3  ;;  %884 = vperm.xlu1 %10266, %v11070_v47   ;;  %v2491_v36 = vrot.slane %v11212_v54, 3  ;;  %v1718_v54 = vmul.f32 %v11042_v35, %v661_v17 }
 0x23f   : > { %v1332_v51 = vsel %vm1327_vm0, %v15105_v7, %v1331_v53  ;;  %v2298_v1 = vmul.f32 %v11044_v37, %v661_v17 }
 0x240   : > { %v2490_v22 = vsel %vm2487_vm2, %v2488_v5, %v15104_v55  ;;  %v1616_v25 = vadd.f32 %v1332_v51, %v11078_v48  ;;  %v11251_v5 = vmul.f32 %v11042_v35, %v713_v12  ;;  %v1138_v55 = vmul.f32 %v11037_v34, %v661_v17 }
 0x241   : > { %v2775_v21 = vadd.f32 %v2490_v22, %v2195_v52  ;;  %v15106_v52 = vrot.slane %v11055_v43, 2  ;;  %v669_v22 = vpop.permute.xlu1 %668  ;;  %904 = vperm.xlu0 %10267, %v11008_v14   ;;  %v1037_v48 = vmul.f32 %v11046_v39, %v657_v62  ;;  %v11262_v51 = vmul.f32 %v11044_v37, %v713_v12 }
 0x242   : > { %892 = vperm.xlu1 %10266, %v11134_v20   ;;  %v1333_v56 = vrot.slane %v1138_v55, 1  ;;  %v1913_v27 = vrot.slane %v1718_v54, 2  ;;  %v11270_v14 = vmul.f32 %v11046_v39, %v713_v12  ;;  %v2493_v54 = vrot.slane %v2298_v1, 3 }
 0x243   : > { %v2878_v47 = vadd.f32 %v11234_v40, %v2775_v21  ;;  %v1912_v42 = vsel %vm1907_vm1, %v15106_v52, %v1911_v19  ;;  %v15107_v21 = vrot.slane %v11059_v33, 3  ;;  %v15108_v33 = vrot.slane %v11064_v44, 1 }
 0x244   : > { %v2196_v7 = vadd.f32 %v1912_v42, %v1616_v25  ;;  %v1038_v25 = vmul.f32 %v11046_v39, %v661_v17  ;;  %v761_v42 = vpop.permute.xlu0 %760  ;;  %v15109_v20 = vrot.slane %v11068_v46, 2 }
 0x245   : > { %v2974_v43 = vmax.f32 %v2878_v47, 0.0  ;;  %v2492_v52 = vsel %vm2487_vm2, %v15107_v21, %v2491_v36  ;;  %v1334_v47 = vsel %vm1327_vm0, %v1331_v53, %v1333_v56  ;;  %v1336_v55 = vsel %vm1327_vm0, %v1333_v56, %v15108_v33  ;;  %912 = vperm.xlu0 %10267, %v11012_v16  }
 0x246   : > { %v2776_v45 = vadd.f32 %v2492_v52, %v2196_v7  ;;  %v581_v7 = vpop.permute.xlu1 %580  ;;  %v1617_v17 = vadd.f32 %v1334_v47, %v1037_v48  ;;  %v1618_v52 = vadd.f32 %v1336_v55, %v1038_v25  ;;  %v1916_v53 = vsel %vm1907_vm1, %v1913_v27, %v15109_v20 }
 0x247   : > { %3071 = vst.msk [vmem:[#allocation2] sm:$0xff] %vm3070_vm3, %v2974_v43  ;;  %900 = vperm.xlu1 %10266, %v581_v7   ;;  %v1914_v43 = vsel %vm1907_vm1, %v1911_v19, %v1913_v27  ;;  %v11288_v62 = vmul.f32 %v11037_v34, %v761_v42  ;;  %v11291_v1 = vmul.f32 %v11042_v35, %v761_v42  ;;  %v15110_v25 = vrot.slane %v11074_v38, 3 }
 0x248   : > { %v2879_v12 = vadd.f32 %v11234_v40, %v2776_v45  ;;  %v2197_v56 = vadd.f32 %v1914_v43, %v1617_v17  ;;  %v2198_v45 = vadd.f32 %v1916_v53, %v1618_v52  ;;  %v1140_v33 = vmul.f32 %v11037_v34, %v669_v22 }
 0x249   : > { %v2494_v48 = vsel %vm2487_vm2, %v2491_v36, %v2493_v54  ;;  %v2496_v19 = vsel %vm2487_vm2, %v2493_v54, %v15110_v25  ;;  %v1720_v47 = vmul.f32 %v11042_v35, %v669_v22  ;;  %v2300_v27 = vmul.f32 %v11044_v37, %v669_v22  ;;  %920 = vperm.xlu0 %10267, %v11026_v26  }
 0x24a   : > { %v2975_v16 = vmax.f32 %v2879_v12, 0.0  ;;  %v585_v20 = vpop.permute.xlu1 %584  ;;  %v2777_v55 = vadd.f32 %v2494_v48, %v2197_v56  ;;  %v2778_v7 = vadd.f32 %v2496_v19, %v2198_v45  ;;  %v11303_v12 = vmul.f32 %v11046_v39, %v761_v42 }
 0x24b   : > { %v1337_v17 = vrot.slane %v1140_v33, 1  ;;  %908 = vperm.xlu1 %10266, %v585_v20   ;;  %v11306_v36 = vmul.f32 %v11044_v37, %v761_v42  ;;  %v1040_v54 = vmul.f32 %v11046_v39, %v669_v22  ;;  %v1917_v52 = vrot.slane %v1720_v47, 2 }
 0x24c   : > { %3072 = vst.msk [vmem:[#allocation2 + $0x8] sm:$0xff] %vm3070_vm3, %v2975_v16  ;;  %v2497_v43 = vrot.slane %v2300_v27, 3  ;;  %v2880_v53 = vadd.f32 %v11234_v40, %v2777_v55  ;;  %v2881_v26 = vadd.f32 %v11234_v40, %v2778_v7  ;;  %v15111_v16 = vrot.slane %v11064_v44, 1 }
 0x24d   : > { %v15112_v45 = vrot.slane %v11083_v49, 1  ;;  %928 = vperm.xlu0 %10267, %v11035_v30   ;;  %v15113_v44 = vrot.slane %v11068_v46, 2  ;;  %v15114_v55 = vrot.slane %v11087_v50, 2  ;;  %v15115_v30 = vrot.slane %v11074_v38, 3 }
 0x24e   : > { %v1338_v56 = vsel %vm1327_vm0, %v15111_v16, %v1337_v17  ;;  %v677_v19 = vpop.permute.xlu1 %676  ;;  %v2976_v47 = vmax.f32 %v2880_v53, 0.0  ;;  %v2977_v27 = vmax.f32 %v2881_v26, 0.0  ;;  %v15127_v48 = vrot.slane %v11118_v57, 3 }
 0x24f   : > { %v1340_v33 = vsel %vm1327_vm0, %v1337_v17, %v15112_v45  ;;  %v1619_v22 = vadd.f32 %v1338_v56, %v11103_v60  ;;  %v1918_v20 = vsel %vm1907_vm1, %v15113_v44, %v1917_v52  ;;  %v1920_v7 = vsel %vm1907_vm1, %v1917_v52, %v15114_v55 }
 0x250   : > { %v1620_v25 = vadd.f32 %v1340_v33, %v1040_v54  ;;  %v1142_v60 = vmul.f32 %v11037_v34, %v677_v19  ;;  %3073 = vst.msk [vmem:[#allocation2 + $0x10] sm:$0xff] %vm3070_vm3, %v2976_v47  ;;  %3074 = vst.msk [vmem:[#allocation2 + $0x18] sm:$0xff] %vm3070_vm3, %v2977_v27  ;;  %v2498_v46 = vsel %vm2487_vm2, %v15115_v30, %v2497_v43  ;;  %v15116_v54 = vrot.slane %v11094_v58, 3  ;;  %v721_v56 = vpop.permute.xlu0 %720 }
 0x251   : > { %v2199_v16 = vadd.f32 %v1918_v20, %v1619_v22  ;;  %v1722_v52 = vmul.f32 %v11042_v35, %v677_v19  ;;  %v2302_v26 = vmul.f32 %v11044_v37, %v677_v19  ;;  %598 = vrot.lane.b32.xlu0 %v10804_v2, %s10504_s25  ;;  %v11343_v20 = vmul.f32 %v11037_v34, %v721_v56 }
 0x252   : > { %v2200_v45 = vadd.f32 %v1920_v7, %v1620_v25  ;;  %v2500_v53 = vsel %vm2487_vm2, %v2497_v43, %v15116_v54  ;;  %v1042_v25 = vmul.f32 %v11046_v39, %v677_v19  ;;  %v1341_v47 = vrot.slane %v1142_v60, 1  ;;  %v685_v44 = vpop.permute.xlu1 %684 }
 0x253   : > { %v2779_v33 = vadd.f32 %v2498_v46, %v2199_v16  ;;  %v1921_v38 = vrot.slane %v1722_v52, 2  ;;  %v2501_v27 = vrot.slane %v2302_v26, 3  ;;  %v11346_v43 = vmul.f32 %v11042_v35, %v721_v56 }
 0x254   : > { %v2780_v22 = vadd.f32 %v2500_v53, %v2200_v45  ;;  %v15117_v19 = vrot.slane %v11083_v49, 1  ;;  %v15118_v45 = vrot.slane %v11098_v59, 1  ;;  %v15119_v54 = vrot.slane %v11087_v50, 2 }
 0x255   : > { %v2882_v55 = vadd.f32 %v11234_v40, %v2779_v33  ;;  %v11361_v52 = vmul.f32 %v11046_v39, %v721_v56  ;;  %v15120_v49 = vrot.slane %v11109_v0, 2  ;;  %602 = vrot.lane.b32.xlu0 %v10816_v4, %s10504_s25 }
 0x256   : > { %v2883_v7 = vadd.f32 %v11234_v40, %v2780_v22  ;;  %v1342_v16 = vsel %vm1327_vm0, %v15117_v19, %v1341_v47  ;;  %v1344_v60 = vsel %vm1327_vm0, %v1341_v47, %v15118_v45  ;;  %v1922_v53 = vsel %vm1907_vm1, %v15119_v54, %v1921_v38  ;;  %v589_v45 = vpop.permute.xlu1 %588 }
 0x257   : > { %v1621_v30 = vadd.f32 %v1342_v16, %v11114_v15  ;;  %v1622_v46 = vadd.f32 %v1344_v60, %v1042_v25  ;;  %v2978_v26 = vmax.f32 %v2882_v55, 0.0  ;;  %v1924_v22 = vsel %vm1907_vm1, %v1921_v38, %v15120_v49  ;;  %916 = vperm.xlu1 %10266, %v589_v45   ;;  %v3268_v42 = vld [vmem:[#allocation2 + $0x11] ss:$2 sm:$0xff] }
 0x258   : > { %v2979_v33 = vmax.f32 %v2883_v7, 0.0  ;;  %v15121_v19 = vrot.slane %v11094_v58, 3  ;;  %v15122_v25 = vrot.slane %v11118_v57, 3  ;;  %v769_v7 = vpop.permute.xlu0 %768  ;;  %v11379_v38 = vmul.f32 %v11044_v37, %v721_v56 }
 0x259   : > { %v2201_v50 = vadd.f32 %v1922_v53, %v1621_v30  ;;  %v2202_v15 = vadd.f32 %v1924_v22, %v1622_v46  ;;  %3075 = vst.msk [vmem:[#allocation2 + $0x20] sm:$0xff] %vm3070_vm3, %v2978_v26  ;;  %v1144_v60 = vmul.f32 %v11037_v34, %v685_v44  ;;  %v1724_v30 = vmul.f32 %v11042_v35, %v685_v44 }
 0x25a   : > { %v2502_v47 = vsel %vm2487_vm2, %v15121_v19, %v2501_v27  ;;  %v2504_v16 = vsel %vm2487_vm2, %v2501_v27, %v15122_v25  ;;  %3076 = vst.msk [vmem:[#allocation2 + $0x28] sm:$0xff] %vm3070_vm3, %v2979_v33  ;;  %v1044_v27 = vmul.f32 %v11046_v39, %v685_v44  ;;  %v2304_v53 = vmul.f32 %v11044_v37, %v685_v44  ;;  %v593_v56 = vpop.permute.xlu1 %592  ;;  %v3172_v44 = vld [vmem:[#allocation2 + $0x10] ss:$2 sm:$0xff] }
 0x25b   : > { %v2781_v46 = vadd.f32 %v2502_v47, %v2201_v50  ;;  %v2782_v54 = vadd.f32 %v2504_v16, %v2202_v15  ;;  %v1345_v49 = vrot.slane %v1144_v60, 1  ;;  %v1925_v22 = vrot.slane %v1724_v30, 2  ;;  %606 = vrot.lane.b32.xlu0 %v10826_v6, %s10504_s25  ;;  %924 = vperm.xlu1 %10266, %v593_v56  }
 0x25c   : > { %v11386_v26 = vmul.f32 %v11046_v39, %v769_v7  ;;  %v11389_v33 = vmul.f32 %v11037_v34, %v769_v7  ;;  %v2505_v45 = vrot.slane %v2304_v53, 3  ;;  %v11396_v50 = vmul.f32 %v11042_v35, %v769_v7  ;;  %v3266_v53 = vld [vmem:[#allocation2 + $0x1] ss:$2 sm:$0xff] }
 0x25d   : > { %v2884_v19 = vadd.f32 %v11234_v40, %v2781_v46  ;;  %v2885_v47 = vadd.f32 %v11234_v40, %v2782_v54  ;;  %v15123_v15 = vrot.slane %v11098_v59, 1  ;;  %v15124_v16 = vrot.slane %v11122_v61, 1  ;;  %v3170_v54 = vld [vmem:[#allocation2] ss:$2 sm:$0xff] }
 0x25e   : > { %v15125_v30 = vrot.slane %v11109_v0, 2  ;;  %v15126_v59 = vrot.slane %v11128_v18, 2  ;;  %v15128_v0 = vrot.slane %v11132_v63, 3 }
 0x25f   : > { %v1346_v25 = vsel %vm1327_vm0, %v15123_v15, %v1345_v49  ;;  %v1348_v60 = vsel %vm1327_vm0, %v1345_v49, %v15124_v16  ;;  %v2980_v58 = vmax.f32 %v2884_v19, 0.0  ;;  %v2981_v55 = vmax.f32 %v2885_v47, 0.0  ;;  %v693_v47 = vpop.permute.xlu1 %692  ;;  %610 = vrot.lane.b32.xlu0 %v10836_v8, %s10504_s25  ;;  %596 = vrot.lane.b32.xlu1 %v10925_v13, %s10503_s28  ;;  %s15437_s28 = sld [smem:[#allocation48_spill]] }
 0x260   : > { %v1926_v46 = vsel %vm1907_vm1, %v15125_v30, %v1925_v22  ;;  %v1623_v56 = vadd.f32 %v1346_v25, %v11140_v29  ;;  %v1624_v17 = vadd.f32 %v1348_v60, %v1044_v27  ;;  %v1928_v15 = vsel %vm1907_vm1, %v1925_v22, %v15126_v59 }
 0x261   : > { %v2506_v49 = vsel %vm2487_vm2, %v15127_v48, %v2505_v45  ;;  %v2508_v16 = vsel %vm2487_vm2, %v2505_v45, %v15128_v0  ;;  %3077 = vst.msk [vmem:[#allocation2 + $0x30] sm:$0xff] %vm3070_vm3, %v2980_v58  ;;  %3078 = vst.msk [vmem:[#allocation2 + $0x38] sm:$0xff] %vm3070_vm3, %v2981_v55  ;;  %v11424_v22 = vmax.f32 %v3170_v54, %v3266_v53  ;;  %v3174_v60 = vld [vmem:[#allocation2 + $0x20] ss:$2 sm:$0xff]  ;;  %v3270_v55 = vld [vmem:[#allocation2 + $0x21] ss:$2 sm:$0xff] }
 0x262   : > { %v2203_v29 = vadd.f32 %v1926_v46, %v1623_v56  ;;  %v2204_v27 = vadd.f32 %v1928_v15, %v1624_v17  ;;  %v11429_v48 = vmul.f32 %v11044_v37, %v769_v7  ;;  %v11431_v45 = vmax.f32 %v3172_v44, %v3268_v42 }
 0x263   : > { %15129 = vst [vmem:[#allocation35_spill] sm:$0xff] %v11424_v22  ;;  %v1146_v25 = vmul.f32 %v11037_v34, %v693_v47  ;;  %v1726_v58 = vmul.f32 %v11042_v35, %v693_v47  ;;  %v3466_v46 = vrot.slane %v11424_v22, 1  ;;  %v1046_v54 = vmul.f32 %v11046_v39, %v693_v47  ;;  %v701_v42 = vpop.permute.xlu1 %700  ;;  %614 = vrot.lane.b32.xlu0 %v10848_v10, %s10504_s25  ;;  %v15158_v22 = vld [vmem:[#allocation30_spill] sm:$0xff] }
 0x264   : > { %15130 = vst [vmem:[#allocation36_spill] sm:$0xff] %v11431_v45  ;;  %v2783_v30 = vadd.f32 %v2506_v49, %v2203_v29  ;;  %v2784_v17 = vadd.f32 %v2508_v16, %v2204_v27  ;;  %v3467_v53 = vrot.slane %v11431_v45, 1  ;;  %v2306_v7 = vmul.f32 %v11044_v37, %v693_v47  ;;  %600 = vrot.lane.b32.xlu1 %v10810_v3, %s10504_s25 }
 0x265   : > { %v1349_v56 = vrot.slane %v1146_v25, 1  ;;  %v1929_v59 = vrot.slane %v1726_v58, 2  ;;  %v11443_v49 = vmax.f32 %v3174_v60, %v3270_v55  ;;  %v1048_v0 = vmul.f32 %v11046_v39, %v701_v42  ;;  %s14917_s29 = scalar_lea.hbm %s15437_s28, %s8617_s27 }
 0x266   : > { %v2886_v44 = vadd.f32 %v11234_v40, %v2783_v30  ;;  %v2887_v15 = vadd.f32 %v11234_v40, %v2784_v17  ;;  %v3468_v16 = vsel %vm1327_vm0, %v3466_v46, %v3467_v53  ;;  %v15132_v29 = vrot.slane %v11122_v61, 1  ;;  %v15135_v46 = vld [vmem:[#allocation25_spill] sm:$0xff] }
 0x267   : > { %15131 = vst [vmem:[#allocation37_spill] sm:$0xff] %v11443_v49  ;;  %v15133_v27 = vrot.slane %v11144_v32, 1  ;;  %v15134_v58 = vrot.slane %v11128_v18, 2  ;;  %9042 = vmatprep.mubr.msk.f32.mxu0 %vm3070_vm3, %v3468_v16  ;;  %v15136_v19 = vrot.slane %v15135_v46, 2  ;;  %v14997_v21 = vrot.slane %v11443_v49, 1  ;;  %v15137_v18 = vld [vmem:[#allocation24_spill] sm:$0xff] }
 0x268   : > { %v1350_v47 = vsel %vm1327_vm0, %v15132_v29, %v1349_v56  ;;  %v2982_v55 = vmax.f32 %v2886_v44, 0.0  ;;  %v2983_v30 = vmax.f32 %v2887_v15, 0.0  ;;  %v2509_v29 = vrot.slane %v2306_v7, 3  ;;  %618 = vrot.lane.b32.xlu0 %v15137_v18, %s10504_s25  ;;  %v15140_v16 = vld [vmem:[#allocation26_spill] sm:$0xff] }
 0x269   : > { %v1352_v25 = vsel %vm1327_vm0, %v1349_v56, %v15133_v27  ;;  %v1930_v60 = vsel %vm1907_vm1, %v15134_v58, %v1929_v59  ;;  %v1625_v17 = vadd.f32 %v1350_v47, %v11160_v31  ;;  %v1932_v61 = vsel %vm1907_vm1, %v1929_v59, %v15136_v19  ;;  %v749_v27 = vpop.permute.xlu1 %748  ;;  %v15138_v19 = vld [vmem:[#allocation20_spill] sm:$0xff] }
 0x26a   : > { %v1626_v57 = vadd.f32 %v1352_v25, %v1046_v54  ;;  %v1148_v56 = vmul.f32 %v11037_v34, %v701_v42  ;;  %3079 = vst.msk [vmem:[#allocation2 + $0x40] sm:$0xff] %vm3070_vm3, %v2982_v55  ;;  %3080 = vst.msk [vmem:[#allocation2 + $0x48] sm:$0xff] %vm3070_vm3, %v2983_v30  ;;  %v1728_v54 = vmul.f32 %v11042_v35, %v701_v42  ;;  %604 = vrot.lane.b32.xlu1 %v15138_v19, %s10504_s25 }
 0x26b   : > { %v2205_v44 = vadd.f32 %v1930_v60, %v1625_v17  ;;  %v2308_v15 = vmul.f32 %v11044_v37, %v701_v42  ;;  %v15139_v59 = vrot.slane %v11132_v63, 3  ;;  %v15141_v47 = vrot.slane %v15140_v16, 3 }
 0x26c   : > { %v2206_v31 = vadd.f32 %v1932_v61, %v1626_v57  ;;  %v3470_v58 = vsel %vm1327_vm0, %v3467_v53, %v14997_v21  ;;  %v1353_v57 = vrot.slane %v1148_v56, 1  ;;  %v1933_v42 = vrot.slane %v1728_v54, 2  ;;  %622 = vrot.lane.b32.xlu0 %v10804_v2, %s10505_s24 }
 0x26d   : > { %v2510_v7 = vsel %vm2487_vm2, %v15139_v59, %v2509_v29  ;;  %v2512_v25 = vsel %vm2487_vm2, %v2509_v29, %v15141_v47  ;;  %9043 = vmatmul.mubr.msk.f32.vlgmr.msra.gmra.mrb[0].mxu0 %vm3070_vm3, %v3470_v58  ;;  %v2513_v30 = vrot.slane %v2308_v15, 3  ;;  %v15142_v63 = vrot.slane %v11144_v32, 1  ;;  %v11491_v53 = vpop.permute.xlu1 %708  ;;  %v15145_v15 = vld [vmem:[#allocation21_spill] sm:$0xff] }
 0x26e   : > { %v2785_v60 = vadd.f32 %v2510_v7, %v2205_v44  ;;  %v2786_v55 = vadd.f32 %v2512_v25, %v2206_v31  ;;  %v15143_v59 = vrot.slane %v11188_v9, 1  ;;  %v1160_v47 = vmul.f32 %v11037_v34, %v749_v27  ;;  %v15144_v31 = vld [vmem:[#allocation29_spill] sm:$0xff]  ;;  %608 = vrot.lane.b32.xlu1 %v15145_v15, %s10504_s25 }
 0x26f   : > { %v1354_v61 = vsel %vm1327_vm0, %v15142_v63, %v1353_v57  ;;  %v15146_v7 = vrot.slane %v15135_v46, 2  ;;  %v15147_v58 = vrot.slane %v11192_v23, 2  ;;  %v15148_v2 = vrot.slane %v15140_v16, 3  ;;  %v729_v63 = vpop.permute.xlu0 %728 }
 0x270   : > { %v1356_v29 = vsel %vm1327_vm0, %v1353_v57, %v15143_v59  ;;  %v2888_v56 = vadd.f32 %v11234_v40, %v2785_v60  ;;  %v2889_v44 = vadd.f32 %v11234_v40, %v2786_v55  ;;  %v1627_v32 = vadd.f32 %v1354_v61, %v15144_v31  ;;  %626 = vrot.lane.b32.xlu0 %v10816_v4, %s10505_s24 }
 0x271   : > { %v1628_v54 = vadd.f32 %v1356_v29, %v1048_v0  ;;  %v1934_v25 = vsel %vm1907_vm1, %v15146_v7, %v1933_v42  ;;  %v1936_v57 = vsel %vm1907_vm1, %v1933_v42, %v15147_v58  ;;  %v2514_v60 = vsel %vm2487_vm2, %v15148_v2, %v2513_v30  ;;  %v11515_v58 = vpop.permute.xlu1 %756 }
 0x272   : > { %v1060_v55 = vmul.f32 %v11046_v39, %v749_v27  ;;  %v2984_v61 = vmax.f32 %v2888_v56, 0.0  ;;  %v2985_v0 = vmax.f32 %v2889_v44, 0.0  ;;  %v2207_v59 = vadd.f32 %v1934_v25, %v1627_v32 }
 0x273   : > { %v2208_v29 = vadd.f32 %v1936_v57, %v1628_v54  ;;  %v15149_v31 = vrot.slane %v11195_v28, 3  ;;  %v1377_v7 = vrot.slane %v1160_v47, 1  ;;  %v1740_v17 = vmul.f32 %v11042_v35, %v749_v27  ;;  %v15150_v47 = vld [vmem:[#allocation22_spill] sm:$0xff] }
 0x274   : > { %v2320_v42 = vmul.f32 %v11044_v37, %v749_v27  ;;  %3081 = vst.msk [vmem:[#allocation2 + $0x50] sm:$0xff] %vm3070_vm3, %v2984_v61  ;;  %3082 = vst.msk [vmem:[#allocation2 + $0x58] sm:$0xff] %vm3070_vm3, %v2985_v0  ;;  %v2787_v16 = vadd.f32 %v2514_v60, %v2207_v59  ;;  %v11522_v44 = vmul.f32 %v11037_v34, %v729_v63  ;;  %612 = vrot.lane.b32.xlu1 %v15150_v47, %s10504_s25  ;;  %v15151_v27 = vld [vmem:[#allocation27_spill] sm:$0xff] }
 0x275   : > { %v2516_v46 = vsel %vm2487_vm2, %v2513_v30, %v15149_v31  ;;  %v11525_v30 = vmul.f32 %v11042_v35, %v729_v63  ;;  %v15152_v32 = vrot.slane %v15151_v27, 1  ;;  %v15153_v4 = vrot.slane %v11200_v24, 1  ;;  %v15154_v0 = vld [vmem:[#allocation31_spill] sm:$0xff]  ;;  %v15155_v31 = vld [vmem:[#allocation28_spill] sm:$0xff]  ;;  %630 = vrot.lane.b32.xlu0 %v10826_v6, %s10505_s24 }
 0x276   : > { %v2788_v56 = vadd.f32 %v2516_v46, %v2208_v29  ;;  %v1957_v57 = vrot.slane %v1740_v17, 2  ;;  %v2537_v2 = vrot.slane %v2320_v42, 3  ;;  %v2890_v60 = vadd.f32 %v11234_v40, %v2787_v16  ;;  %v11550_v42 = vpop.permute.xlu1 %716 }
 0x277   : > { %v1378_v54 = vsel %vm1327_vm0, %v15152_v32, %v1377_v7  ;;  %v1380_v25 = vsel %vm1327_vm0, %v1377_v7, %v15153_v4  ;;  %v15156_v46 = vrot.slane %v15155_v31, 2  ;;  %v15157_v45 = vrot.slane %v11203_v11, 2  ;;  %v3176_v4 = vld [vmem:[#allocation2 + $0x30] ss:$2 sm:$0xff] }
 0x278   : > { %v2891_v61 = vadd.f32 %v11234_v40, %v2788_v56  ;;  %v1639_v59 = vadd.f32 %v1378_v54, %v15154_v0  ;;  %v1640_v29 = vadd.f32 %v1380_v25, %v1060_v55  ;;  %v15159_v27 = vrot.slane %v15158_v22, 3  ;;  %v3272_v25 = vld [vmem:[#allocation2 + $0x31] ss:$2 sm:$0xff] }
 0x279   : > { %v1958_v21 = vsel %vm1907_vm1, %v15156_v46, %v1957_v57  ;;  %v1960_v32 = vsel %vm1907_vm1, %v1957_v57, %v15157_v45  ;;  %v11548_v7 = vmul.f32 %v11046_v39, %v729_v63  ;;  %v2986_v55 = vmax.f32 %v2890_v60, 0.0  ;;  %v15161_v45 = vld [vmem:[#allocation23_spill] sm:$0xff]  ;;  %v15162_v57 = vld [vmem:[#allocation33_spill] sm:$0xff]  ;;  %634 = vrot.lane.b32.xlu0 %v10836_v8, %s10505_s24 }
 0x27a   : > { %v2538_v17 = vsel %vm2487_vm2, %v15159_v27, %v2537_v2  ;;  %v2987_v16 = vmax.f32 %v2891_v61, 0.0  ;;  %v2219_v56 = vadd.f32 %v1958_v21, %v1639_v59  ;;  %v2220_v54 = vadd.f32 %v1960_v32, %v1640_v29  ;;  %616 = vrot.lane.b32.xlu1 %v15161_v45, %s10504_s25  ;;  %v15167_v59 = vld [vmem:[#allocation32_spill] sm:$0xff] }
 0x27b   : > { %15160 = vst [vmem:[#allocation25_spill] sm:$0xff] %v11548_v7  ;;  %v15163_v0 = vrot.slane %v15162_v57, 3  ;;  %v11562_v31 = vmul.f32 %v11044_v37, %v729_v63  ;;  %3083 = vst.msk [vmem:[#allocation2 + $0x60] sm:$0xff] %vm3070_vm3, %v2986_v55  ;;  %v1150_v60 = vmul.f32 %v11037_v34, %v11491_v53  ;;  %v1730_v61 = vmul.f32 %v11042_v35, %v11491_v53  ;;  %v11577_v55 = vpop.permute.xlu1 %764 }
 0x27c   : > { %3084 = vst.msk [vmem:[#allocation2 + $0x68] sm:$0xff] %vm3070_vm3, %v2987_v16  ;;  %v2799_v6 = vadd.f32 %v2538_v17, %v2219_v56  ;;  %v1050_v29 = vmul.f32 %v11046_v39, %v11491_v53  ;;  %v2310_v63 = vmul.f32 %v11044_v37, %v11491_v53  ;;  %v11575_v32 = vmax.f32 %v3176_v4, %v3272_v25 }
 0x27d   : > { %v2540_v27 = vsel %vm2487_vm2, %v2537_v2, %v15163_v0  ;;  %v777_v2 = vpop.permute.xlu0 %776  ;;  %v1357_v56 = vrot.slane %v1150_v60, 1  ;;  %v15166_v60 = vrot.slane %v11248_v41, 1  ;;  %v15168_v46 = vrot.slane %v11192_v23, 2  ;;  %638 = vrot.lane.b32.xlu0 %v10848_v10, %s10505_s24 }
 0x27e   : > { %v2800_v21 = vadd.f32 %v2540_v27, %v2220_v54  ;;  %15164 = vst [vmem:[#allocation24_spill] sm:$0xff] %v11575_v32  ;;  %v2902_v17 = vadd.f32 %v11234_v40, %v2799_v6  ;;  %v1937_v54 = vrot.slane %v1730_v61, 2  ;;  %620 = vrot.lane.b32.xlu1 %v10925_v13, %s10504_s25  ;;  %v2517_v0 = vrot.slane %v2310_v63, 3  ;;  %s10419_s25 = scalar_lea.vmem %s10418_s22, 512 }
 0x27f   : > { %v3471_v27 = vrot.slane %v11575_v32, 1  ;;  %v11587_v53 = vmul.f32 %v11037_v34, %v777_v2  ;;  %v11590_v4 = vmul.f32 %v11042_v35, %v777_v2  ;;  %v15165_v6 = vrot.slane %v11188_v9, 1  ;;  %p10421_p3 = scmp.lt.s32.totalorder %s10419_s25, %s10413_s18 }
 0x280   : > { %v2903_v16 = vadd.f32 %v11234_v40, %v2800_v21  ;;  %v2998_v25 = vmax.f32 %v2902_v17, 0.0  ;;  %v1360_v61 = vsel %vm1327_vm0, %v1357_v56, %v15166_v60  ;;  %v1938_v32 = vsel %vm1907_vm1, %v15168_v46, %v1937_v54  ;;  %v11605_v17 = vpop.permute.xlu1 %724 }
 0x281   : > { %v1358_v21 = vsel %vm1327_vm0, %v15165_v6, %v1357_v56  ;;  %v1630_v22 = vadd.f32 %v1360_v61, %v1050_v29  ;;  %v11603_v7 = vmul.f32 %v11046_v39, %v777_v2  ;;  %v15169_v9 = vrot.slane %v11251_v5, 2  ;;  %v3178_v6 = vld [vmem:[#allocation2 + $0x40] ss:$2 sm:$0xff]  ;;  %642 = vrot.lane.b32.xlu0 %v15137_v18, %s10505_s24  ;;  %p10422_p13 = por %p10421_p3, %p10420_p12 }
 0x282   : > { %v2999_v8 = vmax.f32 %v2903_v16, 0.0  ;;  %v1629_v63 = vadd.f32 %v1358_v21, %v15167_v59  ;;  %3095 = vst.msk [vmem:[#allocation2 + $0xc0] sm:$0xff] %vm3070_vm3, %v2998_v25  ;;  %v15170_v23 = vrot.slane %v11195_v28, 3  ;;  %v15171_v29 = vrot.slane %v11262_v51, 3  ;;  %v3274_v25 = vld [vmem:[#allocation2 + $0x41] ss:$2 sm:$0xff]  ;;  %624 = vrot.lane.b32.xlu1 %v10810_v3, %s10505_s24 }
 0x283   : > { %v1940_v59 = vsel %vm1907_vm1, %v1937_v54, %v15169_v9  ;;  %v15172_v56 = vrot.slane %v11443_v49, 1  ;;  %v11628_v54 = vmul.f32 %v11044_v37, %v777_v2  ;;  %v1162_v60 = vmul.f32 %v11037_v34, %v11515_v58  ;;  %p10423_p0 = pnand %p10422_p13, %p10416_p9 }
 0x284   : > { %3096 = vst.msk [vmem:[#allocation2 + $0xc8] sm:$0xff] %vm3070_vm3, %v2999_v8  ;;  %v2518_v46 = vsel %vm2487_vm2, %v15170_v23, %v2517_v0  ;;  %v2520_v16 = vsel %vm2487_vm2, %v2517_v0, %v15171_v29  ;;  %v2209_v8 = vadd.f32 %v1938_v32, %v1629_v63  ;;  %v2210_v21 = vadd.f32 %v1940_v59, %v1630_v22  ;;  %v11641_v2 = vpop.permute.xlu1 %772 }
 0x285   : > { %v3472_v10 = vsel %vm1327_vm0, %v15172_v56, %v3471_v27  ;;  %v1742_v61 = vmul.f32 %v11042_v35, %v11515_v58  ;;  %v2322_v3 = vmul.f32 %v11044_v37, %v11515_v58  ;;  %v1062_v63 = vmul.f32 %v11046_v39, %v11515_v58 }
 0x286   : > { %9045 = vmatprep.mubr.msk.f32.mxu0 %vm3070_vm3, %v3472_v10  ;;  %v2789_v32 = vadd.f32 %v2518_v46, %v2209_v8  ;;  %v2790_v22 = vadd.f32 %v2520_v16, %v2210_v21  ;;  %v11639_v9 = vmax.f32 %v3178_v6, %v3274_v25  ;;  %v1381_v23 = vrot.slane %v1162_v60, 1  ;;  %628 = vrot.lane.b32.xlu1 %v15138_v19, %s10505_s24 }
 0x287   : > { %v1961_v29 = vrot.slane %v1742_v61, 2  ;;  %v2541_v56 = vrot.slane %v2322_v3, 3  ;;  %v1152_v10 = vmul.f32 %v11037_v34, %v11550_v42  ;;  %v15174_v6 = vrot.slane %v11200_v24, 1  ;;  %v11664_v61 = vpop.permute.xlu0 %736 }
 0x288   : > { %15173 = vst [vmem:[#allocation20_spill] sm:$0xff] %v11639_v9  ;;  %v2892_v46 = vadd.f32 %v11234_v40, %v2789_v32  ;;  %v2893_v16 = vadd.f32 %v11234_v40, %v2790_v22  ;;  %v3473_v58 = vrot.slane %v11639_v9, 1  ;;  %v15175_v25 = vrot.slane %v11288_v62, 1  ;;  %v15177_v22 = vld [vmem:[#allocation34_spill] sm:$0xff]  ;;  %v11667_v0 = vpop.permute.xlu1 %732 }
 0x289   : > { %v1382_v18 = vsel %vm1327_vm0, %v15174_v6, %v1381_v23  ;;  %v15176_v21 = vrot.slane %v11203_v11, 2  ;;  %v1052_v60 = vmul.f32 %v11046_v39, %v11550_v42  ;;  %v15178_v6 = vrot.slane %v11291_v1, 2 }
 0x28a   : > { %v1384_v8 = vsel %vm1327_vm0, %v1381_v23, %v15175_v25  ;;  %v2988_v3 = vmax.f32 %v2892_v46, 0.0  ;;  %v2989_v32 = vmax.f32 %v2893_v16, 0.0  ;;  %v1641_v59 = vadd.f32 %v1382_v18, %v15177_v22  ;;  %632 = vrot.lane.b32.xlu1 %v15145_v15, %s10505_s24 }
 0x28b   : > { %v1962_v19 = vsel %vm1907_vm1, %v15176_v21, %v1961_v29  ;;  %v1642_v24 = vadd.f32 %v1384_v8, %v1062_v63  ;;  %v1964_v23 = vsel %vm1907_vm1, %v1961_v29, %v15178_v6  ;;  %v15179_v11 = vrot.slane %v15162_v57, 3 }
 0x28c   : > { %v3474_v21 = vsel %vm1327_vm0, %v3471_v27, %v3473_v58  ;;  %v1361_v28 = vrot.slane %v1152_v10, 1  ;;  %3085 = vst.msk [vmem:[#allocation2 + $0x70] sm:$0xff] %vm3070_vm3, %v2988_v3  ;;  %3086 = vst.msk [vmem:[#allocation2 + $0x78] sm:$0xff] %vm3070_vm3, %v2989_v32  ;;  %v2221_v63 = vadd.f32 %v1962_v19, %v1641_v59  ;;  %v1732_v57 = vmul.f32 %v11042_v35, %v11550_v42  ;;  %v11698_v19 = vpop.permute.xlu0 %784 }
 0x28d   : > { %v2542_v25 = vsel %vm2487_vm2, %v15179_v11, %v2541_v56  ;;  %v2222_v46 = vadd.f32 %v1964_v23, %v1642_v24  ;;  %9046 = vmatmul.mubr.msk.f32.gmra.mrb[2].mxu0 %vm3070_vm3, %v3474_v21  ;;  %v2312_v29 = vmul.f32 %v11044_v37, %v11550_v42  ;;  %v15180_v27 = vrot.slane %v11306_v36, 3  ;;  %v11701_v24 = vpop.permute.xlu1 %780 }
 0x28e   : > { %v15181_v15 = vrot.slane %v11248_v41, 1  ;;  %v15182_v18 = vrot.slane %v11343_v20, 1  ;;  %v1164_v8 = vmul.f32 %v11037_v34, %v11577_v55  ;;  %v2801_v3 = vadd.f32 %v2542_v25, %v2221_v63  ;;  %636 = vrot.lane.b32.xlu1 %v15150_v47, %s10505_s24 }
 0x28f   : > { %v2544_v16 = vsel %vm2487_vm2, %v2541_v56, %v15180_v27  ;;  %v1941_v56 = vrot.slane %v1732_v57, 2  ;;  %v2521_v41 = vrot.slane %v2312_v29, 3  ;;  %v1744_v23 = vmul.f32 %v11042_v35, %v11577_v55 }
 0x290   : > { %v1362_v10 = vsel %vm1327_vm0, %v15181_v15, %v1361_v28  ;;  %v1364_v59 = vsel %vm1327_vm0, %v1361_v28, %v15182_v18  ;;  %v2802_v32 = vadd.f32 %v2544_v16, %v2222_v46  ;;  %v1385_v6 = vrot.slane %v1164_v8, 1  ;;  %v11725_v16 = vpop.permute.xlu0 %792 }
 0x291   : > { %v1631_v42 = vadd.f32 %v1362_v10, %v11270_v14  ;;  %v1632_v22 = vadd.f32 %v1364_v59, %v1052_v60  ;;  %v2904_v28 = vadd.f32 %v11234_v40, %v2801_v3  ;;  %v1064_v25 = vmul.f32 %v11046_v39, %v11577_v55  ;;  %v11727_v18 = vpop.permute.xlu1 %796 }
 0x292   : > { %v2905_v11 = vadd.f32 %v11234_v40, %v2802_v32  ;;  %v2324_v14 = vmul.f32 %v11044_v37, %v11577_v55  ;;  %v15183_v60 = vrot.slane %v11251_v5, 2  ;;  %v15184_v63 = vrot.slane %v11346_v43, 2  ;;  %640 = vrot.lane.b32.xlu1 %v15161_v45, %s10505_s24 }
 0x293   : > { %v15185_v47 = vrot.slane %v11262_v51, 3  ;;  %v15186_v29 = vrot.slane %v11379_v38, 3  ;;  %v3000_v15 = vmax.f32 %v2904_v28, 0.0  ;;  %v15187_v59 = vrot.slane %v11288_v62, 1  ;;  %v3180_v28 = vld [vmem:[#allocation2 + $0x50] ss:$2 sm:$0xff] }
 0x294   : > { %v1942_v21 = vsel %vm1907_vm1, %v15183_v60, %v1941_v56  ;;  %v1944_v46 = vsel %vm1907_vm1, %v1941_v56, %v15184_v63  ;;  %v3001_v55 = vmax.f32 %v2905_v11, 0.0  ;;  %v15188_v51 = vrot.slane %v11389_v33, 1  ;;  %v3276_v11 = vld [vmem:[#allocation2 + $0x51] ss:$2 sm:$0xff] }
 0x295   : > { %v2522_v57 = vsel %vm2487_vm2, %v15185_v47, %v2521_v41  ;;  %v2524_v27 = vsel %vm2487_vm2, %v2521_v41, %v15186_v29  ;;  %v2211_v10 = vadd.f32 %v1942_v21, %v1631_v42  ;;  %v2212_v5 = vadd.f32 %v1944_v46, %v1632_v22  ;;  %3097 = vst.msk [vmem:[#allocation2 + $0xd0] sm:$0xff] %vm3070_vm3, %v3000_v15  ;;  %v11756_v29 = vpop.permute.xlu1 %740 }
 0x296   : > { %v1386_v8 = vsel %vm1327_vm0, %v15187_v59, %v1385_v6  ;;  %v1388_v3 = vsel %vm1327_vm0, %v1385_v6, %v15188_v51  ;;  %v1965_v32 = vrot.slane %v1744_v23, 2  ;;  %v2545_v56 = vrot.slane %v2324_v14, 3  ;;  %3098 = vst.msk [vmem:[#allocation2 + $0xd8] sm:$0xff] %vm3070_vm3, %v3001_v55  ;;  %644 = vrot.lane.b32.xlu1 %v10925_v13, %s10505_s24  ;;  %s15436_s24 = sld [smem:[#allocation47_spill]] }
 0x297   : > { %v2791_v42 = vadd.f32 %v2522_v57, %v2211_v10  ;;  %v2792_v22 = vadd.f32 %v2524_v27, %v2212_v5  ;;  %v1643_v41 = vadd.f32 %v1386_v8, %v11303_v12  ;;  %v1644_v62 = vadd.f32 %v1388_v3, %v1064_v25  ;;  %v11752_v12 = vpop.permute.xlu0 %800 }
 0x298   : > { %v15189_v60 = vrot.slane %v11291_v1, 2  ;;  %v15190_v23 = vrot.slane %v11396_v50, 2  ;;  %v15191_v45 = vrot.slane %v11306_v36, 3  ;;  %v15192_v63 = vrot.slane %v11429_v48, 3 }
 0x299   : > { %v2894_v25 = vadd.f32 %v11234_v40, %v2791_v42  ;;  %v2895_v1 = vadd.f32 %v11234_v40, %v2792_v22  ;;  %v1154_v27 = vmul.f32 %v11037_v34, %v11605_v17  ;;  %v1734_v36 = vmul.f32 %v11042_v35, %v11605_v17 }
 0x29a   : > { %v1966_v6 = vsel %vm1907_vm1, %v15189_v60, %v1965_v32  ;;  %v1968_v14 = vsel %vm1907_vm1, %v1965_v32, %v15190_v23  ;;  %v2546_v21 = vsel %vm2487_vm2, %v15191_v45, %v2545_v56  ;;  %v2548_v46 = vsel %vm2487_vm2, %v2545_v56, %v15192_v63 }
 0x29b   : > { %v2223_v47 = vadd.f32 %v1966_v6, %v1643_v41  ;;  %v2224_v57 = vadd.f32 %v1968_v14, %v1644_v62  ;;  %v2314_v15 = vmul.f32 %v11044_v37, %v11605_v17  ;;  %v11764_v55 = vmax.f32 %v3180_v28, %v3276_v11  ;;  %v11769_v42 = vpop.permute.xlu0 %808  ;;  %v11779_v28 = vpop.permute.xlu1 %788 }
 0x29c   : > { %v2990_v10 = vmax.f32 %v2894_v25, 0.0  ;;  %v2991_v5 = vmax.f32 %v2895_v1, 0.0  ;;  %v1365_v51 = vrot.slane %v1154_v27, 1  ;;  %v1945_v3 = vrot.slane %v1734_v36, 2  ;;  %v3182_v1 = vld [vmem:[#allocation2 + $0x60] ss:$2 sm:$0xff] }
 0x29d   : > { %15193 = vst [vmem:[#allocation26_spill] sm:$0xff] %v11764_v55  ;;  %v2803_v59 = vadd.f32 %v2546_v21, %v2223_v47  ;;  %v2804_v8 = vadd.f32 %v2548_v46, %v2224_v57  ;;  %v2525_v32 = vrot.slane %v2314_v15, 3  ;;  %v3475_v56 = vrot.slane %v11764_v55, 1 }
 0x29e   : > { %3087 = vst.msk [vmem:[#allocation2 + $0x80] sm:$0xff] %vm3070_vm3, %v2990_v10  ;;  %3088 = vst.msk [vmem:[#allocation2 + $0x88] sm:$0xff] %vm3070_vm3, %v2991_v5  ;;  %v1054_v13 = vmul.f32 %v11046_v39, %v11605_v17  ;;  %v1166_v62 = vmul.f32 %v11037_v34, %v11641_v2  ;;  %v15194_v11 = vrot.slane %v11343_v20, 1  ;;  %v15195_v6 = vrot.slane %v11522_v44, 1  ;;  %v3278_v20 = vld [vmem:[#allocation2 + $0x61] ss:$2 sm:$0xff] }
 0x29f   : > { %v2906_v22 = vadd.f32 %v11234_v40, %v2803_v59  ;;  %v2907_v41 = vadd.f32 %v11234_v40, %v2804_v8  ;;  %v15196_v14 = vrot.slane %v11346_v43, 2  ;;  %v1066_v17 = vmul.f32 %v11046_v39, %v11641_v2  ;;  %v11802_v10 = vpop.permute.xlu0 %816  ;;  %v11811_v8 = vpop.permute.xlu1 %804 }
 0x2a0   : > { %v1366_v60 = vsel %vm1327_vm0, %v15194_v11, %v1365_v51  ;;  %v1368_v23 = vsel %vm1327_vm0, %v1365_v51, %v15195_v6  ;;  %v15197_v47 = vrot.slane %v11525_v30, 2  ;;  %v15198_v27 = vrot.slane %v11379_v38, 3 }
 0x2a1   : > { %v1946_v45 = vsel %vm1907_vm1, %v15196_v14, %v1945_v3  ;;  %v3002_v21 = vmax.f32 %v2906_v22, 0.0  ;;  %v3003_v63 = vmax.f32 %v2907_v41, 0.0  ;;  %v1633_v46 = vadd.f32 %v1366_v60, %v11361_v52 }
 0x2a2   : > { %v1634_v25 = vadd.f32 %v1368_v23, %v1054_v13  ;;  %v1948_v57 = vsel %vm1907_vm1, %v1945_v3, %v15197_v47  ;;  %v2526_v43 = vsel %vm2487_vm2, %v15198_v27, %v2525_v32  ;;  %v3476_v36 = vsel %vm1327_vm0, %v3473_v58, %v3475_v56 }
 0x2a3   : > { %v1389_v15 = vrot.slane %v1166_v62, 1  ;;  %3099 = vst.msk [vmem:[#allocation2 + $0xe0] sm:$0xff] %vm3070_vm3, %v3002_v21  ;;  %3100 = vst.msk [vmem:[#allocation2 + $0xe8] sm:$0xff] %vm3070_vm3, %v3003_v63  ;;  %v2213_v52 = vadd.f32 %v1946_v45, %v1633_v46  ;;  %9048 = vmatprep.mubr.msk.f32.mxu0 %vm3070_vm3, %v3476_v36  ;;  %v1746_v38 = vmul.f32 %v11042_v35, %v11641_v2  ;;  %v15199_v58 = vrot.slane %v11562_v31, 3 }
 0x2a4   : > { %v2214_v5 = vadd.f32 %v1948_v57, %v1634_v25  ;;  %v2326_v59 = vmul.f32 %v11044_v37, %v11641_v2  ;;  %v15200_v3 = vrot.slane %v11389_v33, 1  ;;  %v15201_v41 = vrot.slane %v11587_v53, 1 }
 0x2a5   : > { %v2528_v51 = vsel %vm2487_vm2, %v2525_v32, %v15199_v58  ;;  %v11822_v62 = vmax.f32 %v3182_v1, %v3278_v20  ;;  %v2793_v11 = vadd.f32 %v2526_v43, %v2213_v52  ;;  %v1969_v23 = vrot.slane %v1746_v38, 2  ;;  %v11830_v32 = vpop.permute.xlu0 %824 }
 0x2a6   : > { %v1390_v22 = vsel %vm1327_vm0, %v15200_v3, %v1389_v15  ;;  %v1392_v13 = vsel %vm1327_vm0, %v1389_v15, %v15201_v41  ;;  %v2794_v60 = vadd.f32 %v2528_v51, %v2214_v5  ;;  %v2549_v14 = vrot.slane %v2326_v59, 3 }
 0x2a7   : > { %15202 = vst [vmem:[#allocation29_spill] sm:$0xff] %v11822_v62  ;;  %v1645_v2 = vadd.f32 %v1390_v22, %v11386_v26  ;;  %v1646_v6 = vadd.f32 %v1392_v13, %v1066_v17  ;;  %v3477_v45 = vrot.slane %v11822_v62, 1  ;;  %v11828_v33 = vmul.f32 %v11037_v34, %v11664_v61  ;;  %v11842_v17 = vpop.permute.xlu1 %812 }
 0x2a8   : > { %v2896_v21 = vadd.f32 %v11234_v40, %v2793_v11  ;;  %v2897_v63 = vadd.f32 %v11234_v40, %v2794_v60  ;;  %v11836_v46 = vmul.f32 %v11042_v35, %v11664_v61  ;;  %v11840_v26 = vmul.f32 %v11044_v37, %v11664_v61 }
 0x2a9   : > { %v15203_v25 = vrot.slane %v11396_v50, 2  ;;  %v15204_v20 = vrot.slane %v11590_v4, 2  ;;  %v15205_v57 = vrot.slane %v11429_v48, 3  ;;  %v11855_v43 = vmul.f32 %v11046_v39, %v11664_v61  ;;  %v11865_v51 = vpop.permute.xlu0 %832 }
 0x2aa   : > { %v2992_v36 = vmax.f32 %v2896_v21, 0.0  ;;  %v2993_v15 = vmax.f32 %v2897_v63, 0.0  ;;  %v15206_v50 = vrot.slane %v11628_v54, 3  ;;  %v3478_v59 = vsel %vm1327_vm0, %v3475_v56, %v3477_v45 }
 0x2ab   : > { %v1970_v1 = vsel %vm1907_vm1, %v15203_v25, %v1969_v23  ;;  %v1972_v47 = vsel %vm1907_vm1, %v1969_v23, %v15204_v20  ;;  %v2550_v27 = vsel %vm2487_vm2, %v15205_v57, %v2549_v14  ;;  %v15014_v48 = vrot.slane %v11828_v33, 1  ;;  %9049 = vmatmul.mubr.msk.f32.gmra.mrb[4].mxu0 %vm3070_vm3, %v3478_v59  ;;  %v11873_v56 = vpop.permute.xlu1 %820 }
 0x2ac   : > { %v2225_v52 = vadd.f32 %v1970_v1, %v1645_v2  ;;  %v2226_v5 = vadd.f32 %v1972_v47, %v1646_v6  ;;  %v2552_v38 = vsel %vm2487_vm2, %v2549_v14, %v15206_v50  ;;  %v15011_v58 = vrot.slane %v11836_v46, 2  ;;  %3089 = vst.msk [vmem:[#allocation2 + $0x90] sm:$0xff] %vm3070_vm3, %v2992_v36  ;;  %3090 = vst.msk [vmem:[#allocation2 + $0x98] sm:$0xff] %vm3070_vm3, %v2993_v15 }
 0x2ad   : > { %v15009_v22 = vrot.slane %v11840_v26, 3  ;;  %v1156_v41 = vmul.f32 %v11037_v34, %v11667_v0  ;;  %v1056_v13 = vmul.f32 %v11046_v39, %v11667_v0  ;;  %v1736_v11 = vmul.f32 %v11042_v35, %v11667_v0  ;;  %v11899_v20 = vpop.permute.xlu0 %840 }
 0x2ae   : > { %v2805_v61 = vadd.f32 %v2550_v27, %v2225_v52  ;;  %v2806_v3 = vadd.f32 %v2552_v38, %v2226_v5  ;;  %v2316_v60 = vmul.f32 %v11044_v37, %v11667_v0  ;;  %v11883_v2 = vmul.f32 %v11037_v34, %v11698_v19  ;;  %v15208_v52 = vld [vmem:[#allocation25_spill] sm:$0xff] }
 0x2af   : > { %v1369_v14 = vrot.slane %v1156_v41, 1  ;;  %v11889_v21 = vmul.f32 %v11042_v35, %v11698_v19  ;;  %v1949_v63 = vrot.slane %v1736_v11, 2  ;;  %v11893_v1 = vmul.f32 %v11046_v39, %v11698_v19  ;;  %v11907_v15 = vpop.permute.xlu1 %828 }
 0x2b0   : > { %v2908_v6 = vadd.f32 %v11234_v40, %v2805_v61  ;;  %v2909_v23 = vadd.f32 %v11234_v40, %v2806_v3  ;;  %v2529_v25 = vrot.slane %v2316_v60, 3  ;;  %v11897_v0 = vmul.f32 %v11044_v37, %v11698_v19  ;;  %v3184_v61 = vld [vmem:[#allocation2 + $0x70] ss:$2 sm:$0xff]  ;;  %v3280_v3 = vld [vmem:[#allocation2 + $0x71] ss:$2 sm:$0xff] }
 0x2b1   : > { %v15207_v40 = vrot.slane %v11522_v44, 1  ;;  %v1372_v36 = vsel %vm1327_vm0, %v1369_v14, %v15014_v48  ;;  %v15209_v19 = vrot.slane %v11525_v30, 2  ;;  %v15004_v59 = vrot.slane %v11883_v2, 1 }
 0x2b2   : > { %v3004_v47 = vmax.f32 %v2908_v6, 0.0  ;;  %v3005_v57 = vmax.f32 %v2909_v23, 0.0  ;;  %v1636_v50 = vadd.f32 %v1372_v36, %v1056_v13  ;;  %v1952_v44 = vsel %vm1907_vm1, %v1949_v63, %v15011_v58  ;;  %v3282_v58 = vld [vmem:[#allocation2 + $0x81] ss:$2 sm:$0xff] }
 0x2b3   : > { %v1370_v27 = vsel %vm1327_vm0, %v15207_v40, %v1369_v14  ;;  %v1950_v38 = vsel %vm1907_vm1, %v15209_v19, %v1949_v63  ;;  %v15210_v41 = vrot.slane %v11562_v31, 3  ;;  %v2532_v30 = vsel %vm2487_vm2, %v2529_v25, %v15009_v22  ;;  %v11939_v40 = vpop.permute.xlu1 %836 }
 0x2b4   : > { %v1635_v5 = vadd.f32 %v1370_v27, %v15208_v52  ;;  %3101 = vst.msk [vmem:[#allocation2 + $0xf0] sm:$0xff] %vm3070_vm3, %v3004_v47  ;;  %3102 = vst.msk [vmem:[#allocation2 + $0xf8] sm:$0xff] %vm3070_vm3, %v3005_v57  ;;  %v15006_v11 = vrot.slane %v11889_v21, 2  ;;  %v2216_v6 = vadd.f32 %v1952_v44, %v1636_v50  ;;  %v15005_v23 = vrot.slane %v11897_v0, 3  ;;  %v11929_v47 = vpop.permute.xlu0 %848 }
 0x2b5   : > { %v2530_v13 = vsel %vm2487_vm2, %v15210_v41, %v2529_v25  ;;  %v1168_v14 = vmul.f32 %v11037_v34, %v11701_v24  ;;  %v1068_v31 = vmul.f32 %v11046_v39, %v11701_v24  ;;  %v1748_v63 = vmul.f32 %v11042_v35, %v11701_v24 }
 0x2b6   : > { %v2215_v60 = vadd.f32 %v1950_v38, %v1635_v5  ;;  %v2328_v25 = vmul.f32 %v11044_v37, %v11701_v24  ;;  %v11937_v57 = vmax.f32 %v3184_v61, %v3280_v3  ;;  %v2796_v36 = vadd.f32 %v2532_v30, %v2216_v6  ;;  %v11953_v24 = vld [vmem:[%s14962_s2] ss:$0 sm:$0xff] }
 0x2b7   : > { %v1393_v52 = vrot.slane %v1168_v14, 1  ;;  %v11943_v5 = vmul.f32 %v11037_v34, %v11725_v16  ;;  %v1973_v50 = vrot.slane %v1748_v63, 2  ;;  %v11948_v44 = vmul.f32 %v11042_v35, %v11725_v16 }
 0x2b8   : > { %15211 = vst [vmem:[#allocation21_spill] sm:$0xff] %v11937_v57  ;;  %v2795_v27 = vadd.f32 %v2530_v13, %v2215_v60  ;;  %v2553_v19 = vrot.slane %v2328_v25, 3  ;;  %v15008_v38 = vrot.slane %v11937_v57, 1  ;;  %v2899_v3 = vadd.f32 %v11953_v24, %v2796_v36  ;;  %v11963_v60 = vpop.permute.xlu0 %856  ;;  %v11971_v36 = vpop.permute.xlu1 %844 }
 0x2b9   : > { %v15212_v41 = vrot.slane %v11587_v53, 1  ;;  %v1396_v30 = vsel %vm1327_vm0, %v1393_v52, %v15004_v59  ;;  %v15213_v63 = vrot.slane %v11590_v4, 2  ;;  %v15214_v59 = vrot.slane %v11628_v54, 3 }
 0x2ba   : > { %v2898_v61 = vadd.f32 %v11953_v24, %v2795_v27  ;;  %v1648_v14 = vadd.f32 %v1396_v30, %v1068_v31  ;;  %v1071_v27 = vmul.f32 %v11046_v39, %v11725_v16  ;;  %v2556_v4 = vsel %vm2487_vm2, %v2553_v19, %v15005_v23 }
 0x2bb   : > { %v1394_v13 = vsel %vm1327_vm0, %v15212_v41, %v1393_v52  ;;  %v1974_v25 = vsel %vm1907_vm1, %v15213_v63, %v1973_v50  ;;  %v2995_v41 = vmax.f32 %v2899_v3, 0.0  ;;  %v1976_v52 = vsel %vm1907_vm1, %v1973_v50, %v15006_v11 }
 0x2bc   : > { %v1647_v6 = vadd.f32 %v1394_v13, %v11603_v7  ;;  %v2994_v53 = vmax.f32 %v2898_v61, 0.0  ;;  %v2554_v7 = vsel %vm2487_vm2, %v15214_v59, %v2553_v19  ;;  %v2228_v13 = vadd.f32 %v1976_v52, %v1648_v14  ;;  %v11998_v3 = vpop.permute.xlu0 %864  ;;  %v12004_v63 = vpop.permute.xlu1 %852 }
 0x2bd   : > { %v3480_v61 = vsel %vm1327_vm0, %v3477_v45, %v15008_v38  ;;  %3092 = vst.msk [vmem:[#allocation2 + $0xa8] sm:$0xff] %vm3070_vm3, %v2995_v41  ;;  %v15007_v54 = vrot.slane %v11943_v5, 1  ;;  %v15010_v59 = vrot.slane %v11948_v44, 2  ;;  %v11994_v50 = vmul.f32 %v11044_v37, %v11725_v16 }
 0x2be   : > { %v2227_v31 = vadd.f32 %v1974_v25, %v1647_v6  ;;  %3091 = vst.msk [vmem:[#allocation2 + $0xa0] sm:$0xff] %vm3070_vm3, %v2994_v53  ;;  %9051 = vmatprep.mubr.msk.f32.mxu0 %vm3070_vm3, %v3480_v61  ;;  %v1172_v19 = vmul.f32 %v11037_v34, %v11727_v18  ;;  %v2808_v30 = vadd.f32 %v2556_v4, %v2228_v13 }
 0x2bf   : > { %v1752_v6 = vmul.f32 %v11042_v35, %v11727_v18  ;;  %v2332_v14 = vmul.f32 %v11044_v37, %v11727_v18  ;;  %v15013_v25 = vrot.slane %v11994_v50, 3  ;;  %v1072_v16 = vmul.f32 %v11046_v39, %v11727_v18 }
 0x2c0   : > { %v2807_v45 = vadd.f32 %v2554_v7, %v2227_v31  ;;  %v1401_v53 = vrot.slane %v1172_v19, 1  ;;  %v12011_v41 = vmul.f32 %v11037_v34, %v11752_v12  ;;  %v2911_v7 = vadd.f32 %v11953_v24, %v2808_v30  ;;  %v12027_v23 = vpop.permute.xlu0 %872  ;;  %v12033_v11 = vpop.permute.xlu1 %860 }
 0x2c1   : > { %v1981_v31 = vrot.slane %v1752_v6, 2  ;;  %v2561_v13 = vrot.slane %v2332_v14, 3  ;;  %v12021_v18 = vmul.f32 %v11042_v35, %v11752_v12  ;;  %v12025_v19 = vmul.f32 %v11044_v37, %v11752_v12 }
 0x2c2   : > { %v2910_v52 = vadd.f32 %v11953_v24, %v2807_v45  ;;  %v1402_v4 = vsel %vm1327_vm0, %v15007_v54, %v1401_v53  ;;  %v15012_v61 = vrot.slane %v12011_v41, 1  ;;  %v3007_v30 = vmax.f32 %v2911_v7, 0.0 }
 0x2c3   : > { %v1651_v6 = vadd.f32 %v1402_v4, %v1071_v27  ;;  %v12031_v14 = vmul.f32 %v11046_v39, %v11752_v12  ;;  %v1982_v54 = vsel %vm1907_vm1, %v15010_v59, %v1981_v31  ;;  %v15015_v22 = vrot.slane %v12021_v18, 2  ;;  %v3186_v59 = vld [vmem:[#allocation2 + $0x80] ss:$2 sm:$0xff] }
 0x2c4   : > { %v3006_v45 = vmax.f32 %v2910_v52, 0.0  ;;  %v1404_v38 = vsel %vm1327_vm0, %v1401_v53, %v15012_v61  ;;  %v15023_v52 = vrot.slane %v12025_v19, 3  ;;  %3104 = vst.msk [vmem:[#allocation2 + $0x108] sm:$0xff] %vm3070_vm3, %v3007_v30  ;;  %v2562_v27 = vsel %vm2487_vm2, %v15013_v25, %v2561_v13  ;;  %v12064_v48 = vpop.permute.xlu1 %868 }
 0x2c5   : > { %v2231_v12 = vadd.f32 %v1982_v54, %v1651_v6  ;;  %v1652_v7 = vadd.f32 %v1404_v38, %v1072_v16  ;;  %v1158_v4 = vmul.f32 %v11037_v34, %v11756_v29  ;;  %v1984_v53 = vsel %vm1907_vm1, %v1981_v31, %v15015_v22  ;;  %v12059_v6 = vpop.permute.xlu0 %880 }
 0x2c6   : > { %3103 = vst.msk [vmem:[#allocation2 + $0x100] sm:$0xff] %vm3070_vm3, %v3006_v45  ;;  %v1058_v45 = vmul.f32 %v11046_v39, %v11756_v29  ;;  %v1738_v54 = vmul.f32 %v11042_v35, %v11756_v29  ;;  %v2318_v30 = vmul.f32 %v11044_v37, %v11756_v29  ;;  %v2564_v61 = vsel %vm2487_vm2, %v2561_v13, %v15023_v52 }
 0x2c7   : > { %v2811_v38 = vadd.f32 %v2562_v27, %v2231_v12  ;;  %v2232_v16 = vadd.f32 %v1984_v53, %v1652_v7  ;;  %v1373_v25 = vrot.slane %v1158_v4, 1  ;;  %v12066_v62 = vmax.f32 %v3186_v59, %v3282_v58  ;;  %v15217_v7 = vld [vmem:[#allocation27_spill] sm:$0xff] }
 0x2c8   : > { %v1953_v31 = vrot.slane %v1738_v54, 2  ;;  %v2533_v22 = vrot.slane %v2318_v30, 3  ;;  %v12070_v55 = vmul.f32 %v11037_v34, %v11769_v42  ;;  %v15216_v12 = vrot.slane %v11828_v33, 1 }
 0x2c9   : > { %15215 = vst [vmem:[#allocation22_spill] sm:$0xff] %v12066_v62  ;;  %v2914_v29 = vadd.f32 %v11953_v24, %v2811_v38  ;;  %v2812_v9 = vadd.f32 %v2564_v61, %v2232_v16  ;;  %v15218_v13 = vrot.slane %v15217_v7, 1  ;;  %v15219_v58 = vrot.slane %v11836_v46, 2  ;;  %v12087_v61 = vpop.permute.xlu0 %888  ;;  %v15220_v16 = vld [vmem:[#allocation28_spill] sm:$0xff]  ;;  %v12096_v46 = vpop.permute.xlu1 %876 }
 0x2ca   : > { %v1374_v27 = vsel %vm1327_vm0, %v15216_v12, %v1373_v25  ;;  %v12085_v30 = vmul.f32 %v11046_v39, %v11769_v42  ;;  %v15221_v12 = vrot.slane %v15220_v16, 2 }
 0x2cb   : > { %v1376_v4 = vsel %vm1327_vm0, %v1373_v25, %v15218_v13  ;;  %v1637_v53 = vadd.f32 %v1374_v27, %v11855_v43  ;;  %v1954_v59 = vsel %vm1907_vm1, %v15219_v58, %v1953_v31  ;;  %v3010_v33 = vmax.f32 %v2914_v29, 0.0  ;;  %v15223_v13 = vld [vmem:[#allocation30_spill] sm:$0xff] }
 0x2cc   : > { %v1638_v54 = vadd.f32 %v1376_v4, %v1058_v45  ;;  %v2915_v38 = vadd.f32 %v11953_v24, %v2812_v9  ;;  %v1956_v25 = vsel %vm1907_vm1, %v1953_v31, %v15221_v12  ;;  %v15222_v43 = vrot.slane %v11840_v26, 3 }
 0x2cd   : > { %v2217_v27 = vadd.f32 %v1954_v59, %v1637_v53  ;;  %v15224_v4 = vrot.slane %v15223_v13, 3  ;;  %v15022_v29 = vrot.slane %v12066_v62, 1  ;;  %3107 = vst.msk [vmem:[#allocation2 + $0x120] sm:$0xff] %vm3070_vm3, %v3010_v33  ;;  %v12106_v26 = vmul.f32 %v11042_v35, %v11769_v42 }
 0x2ce   : > { %v2534_v45 = vsel %vm2487_vm2, %v15222_v43, %v2533_v22  ;;  %v2218_v7 = vadd.f32 %v1956_v25, %v1638_v54  ;;  %v3011_v9 = vmax.f32 %v2915_v38, 0.0  ;;  %v12110_v31 = vmul.f32 %v11044_v37, %v11769_v42  ;;  %v12119_v38 = vpop.permute.xlu0 %896 }
 0x2cf   : > { %v2536_v58 = vsel %vm2487_vm2, %v2533_v22, %v15224_v4  ;;  %v2797_v53 = vadd.f32 %v2534_v45, %v2217_v27  ;;  %v15225_v22 = vrot.slane %v11937_v57, 1  ;;  %v1170_v33 = vmul.f32 %v11037_v34, %v11779_v28 }
 0x2d0   : > { %v2798_v54 = vadd.f32 %v2536_v58, %v2218_v7  ;;  %3108 = vst.msk [vmem:[#allocation2 + $0x128] sm:$0xff] %vm3070_vm3, %v3011_v9  ;;  %v1070_v12 = vmul.f32 %v11046_v39, %v11779_v28  ;;  %v1750_v25 = vmul.f32 %v11042_v35, %v11779_v28  ;;  %v2330_v43 = vmul.f32 %v11044_v37, %v11779_v28 }
 0x2d1   : > { %v3482_v59 = vsel %vm1327_vm0, %v15225_v22, %v15022_v29  ;;  %v2900_v45 = vadd.f32 %v11953_v24, %v2797_v53  ;;  %v1397_v13 = vrot.slane %v1170_v33, 1  ;;  %v12135_v9 = vmul.f32 %v11037_v34, %v11802_v10 }
 0x2d2   : > { %9052 = vmatmul.mubr.msk.f32.gmra.mrb[6].mxu0 %vm3070_vm3, %v3482_v59  ;;  %v2901_v27 = vadd.f32 %v11953_v24, %v2798_v54  ;;  %v1977_v4 = vrot.slane %v1750_v25, 2  ;;  %v2557_v58 = vrot.slane %v2330_v43, 3  ;;  %v12139_v22 = vmul.f32 %v11042_v35, %v11802_v10  ;;  %v12141_v59 = vpop.permute.xlu1 %884  ;;  %v12149_v43 = vpop.permute.xlu0 %904 }
 0x2d3   : > { %v2996_v28 = vmax.f32 %v2900_v45, 0.0  ;;  %v15226_v53 = vrot.slane %v11883_v2, 1  ;;  %v15227_v33 = vrot.slane %v11943_v5, 1  ;;  %v15228_v42 = vrot.slane %v11889_v21, 2  ;;  %v3188_v2 = vld [vmem:[#allocation2 + $0x90] ss:$2 sm:$0xff] }
 0x2d4   : > { %v2997_v29 = vmax.f32 %v2901_v27, 0.0  ;;  %v12157_v45 = vmul.f32 %v11046_v39, %v11802_v10  ;;  %v3284_v27 = vld [vmem:[#allocation2 + $0x91] ss:$2 sm:$0xff]  ;;  %v15229_v5 = vrot.slane %v11948_v44, 2  ;;  %v1174_v44 = vmul.f32 %v11037_v34, %v11811_v8 }
 0x2d5   : > { %v1398_v54 = vsel %vm1327_vm0, %v15226_v53, %v1397_v13  ;;  %v1400_v25 = vsel %vm1327_vm0, %v1397_v13, %v15227_v33  ;;  %v1978_v16 = vsel %vm1907_vm1, %v15228_v42, %v1977_v4  ;;  %3093 = vst.msk [vmem:[#allocation2 + $0xb0] sm:$0xff] %vm3070_vm3, %v2996_v28  ;;  %v15231_v42 = vrot.slane %v11994_v50, 3 }
 0x2d6   : > { %v1649_v7 = vadd.f32 %v1398_v54, %v11893_v1  ;;  %v1650_v52 = vadd.f32 %v1400_v25, %v1070_v12  ;;  %3094 = vst.msk [vmem:[#allocation2 + $0xb8] sm:$0xff] %vm3070_vm3, %v2997_v29  ;;  %v1980_v13 = vsel %vm1907_vm1, %v1977_v4, %v15229_v5  ;;  %v15230_v1 = vrot.slane %v11897_v0, 3  ;;  %v12189_v25 = vpop.permute.xlu1 %892 }
 0x2d7   : > { %v2560_v12 = vsel %vm2487_vm2, %v2557_v58, %v15231_v42  ;;  %v12174_v29 = vmul.f32 %v11044_v37, %v11802_v10  ;;  %v1754_v0 = vmul.f32 %v11042_v35, %v11811_v8  ;;  %v2334_v50 = vmul.f32 %v11044_v37, %v11811_v8 }
 0x2d8   : > { %v2558_v21 = vsel %vm2487_vm2, %v15230_v1, %v2557_v58  ;;  %v2229_v54 = vadd.f32 %v1978_v16, %v1649_v7  ;;  %v2230_v33 = vadd.f32 %v1980_v13, %v1650_v52  ;;  %v12182_v4 = vmax.f32 %v3188_v2, %v3284_v27  ;;  %v12184_v58 = vpop.permute.xlu0 %912 }
 0x2d9   : > { %v1074_v10 = vmul.f32 %v11046_v39, %v11811_v8  ;;  %v1405_v5 = vrot.slane %v1174_v44, 1  ;;  %v1985_v13 = vrot.slane %v1754_v0, 2  ;;  %v2565_v1 = vrot.slane %v2334_v50, 3 }
 0x2da   : > { %v2809_v52 = vadd.f32 %v2558_v21, %v2229_v54  ;;  %v2810_v16 = vadd.f32 %v2560_v12, %v2230_v33  ;;  %v12196_v27 = vmul.f32 %v11046_v39, %v11830_v32  ;;  %v12200_v21 = vmul.f32 %v11037_v34, %v11830_v32 }
 0x2db   : > { %v15232_v8 = vrot.slane %v12011_v41, 1  ;;  %v15233_v54 = vrot.slane %v12070_v55, 1  ;;  %v15234_v44 = vrot.slane %v12021_v18, 2  ;;  %v12213_v50 = vmul.f32 %v11042_v35, %v11830_v32 }
 0x2dc   : > { %v2912_v28 = vadd.f32 %v11953_v24, %v2809_v52  ;;  %v2913_v2 = vadd.f32 %v11953_v24, %v2810_v16  ;;  %v12215_v52 = vpop.permute.xlu0 %920  ;;  %v15238_v57 = vrot.slane %v12182_v4, 1 }
 0x2dd   : > { %v1406_v12 = vsel %vm1327_vm0, %v15232_v8, %v1405_v5  ;;  %v1408_v33 = vsel %vm1327_vm0, %v1405_v5, %v15233_v54  ;;  %v1986_v0 = vsel %vm1907_vm1, %v15234_v44, %v1985_v13  ;;  %v15235_v8 = vrot.slane %v12106_v26, 2 }
 0x2de   : > { %v3008_v16 = vmax.f32 %v2912_v28, 0.0  ;;  %v3009_v7 = vmax.f32 %v2913_v2, 0.0  ;;  %v1653_v41 = vadd.f32 %v1406_v12, %v12031_v14  ;;  %v1654_v53 = vadd.f32 %v1408_v33, %v1074_v10 }
 0x2df   : > { %v1988_v42 = vsel %vm1907_vm1, %v1985_v13, %v15235_v8  ;;  %v15236_v5 = vrot.slane %v12025_v19, 3  ;;  %v15237_v54 = vrot.slane %v12110_v31, 3  ;;  %v15239_v28 = vrot.slane %v12066_v62, 1  ;;  %v3190_v62 = vld [vmem:[#allocation2 + $0xa0] ss:$2 sm:$0xff] }
 0x2e0   : > { %3105 = vst.msk [vmem:[#allocation2 + $0x110] sm:$0xff] %vm3070_vm3, %v3008_v16  ;;  %3106 = vst.msk [vmem:[#allocation2 + $0x118] sm:$0xff] %vm3070_vm3, %v3009_v7  ;;  %v2233_v14 = vadd.f32 %v1986_v0, %v1653_v41  ;;  %v2234_v10 = vadd.f32 %v1988_v42, %v1654_v53  ;;  %v12238_v13 = vmul.f32 %v11044_v37, %v11830_v32  ;;  %v12249_v42 = vpop.permute.xlu0 %928 }
 0x2e1   : > { %v2566_v18 = vsel %vm2487_vm2, %v15236_v5, %v2565_v1  ;;  %v2568_v44 = vsel %vm2487_vm2, %v2565_v1, %v15237_v54  ;;  %v3484_v2 = vsel %vm1327_vm0, %v15239_v28, %v15238_v57  ;;  %v12240_v1 = vpop.permute.xlu1 %900  ;;  %v1176_v57 = vmul.f32 %v11037_v34, %v11842_v17 }
 0x2e2   : > { %9054 = vmatprep.mubr.msk.f32.mxu0 %vm3070_vm3, %v3484_v2  ;;  %v1756_v7 = vmul.f32 %v11042_v35, %v11842_v17  ;;  %v2336_v53 = vmul.f32 %v11044_v37, %v11842_v17  ;;  %v2813_v33 = vadd.f32 %v2566_v18, %v2233_v14  ;;  %v2814_v0 = vadd.f32 %v2568_v44, %v2234_v10 }
 0x2e3   : > { %v1076_v16 = vmul.f32 %v11046_v39, %v11842_v17  ;;  %v1409_v41 = vrot.slane %v1176_v57, 1  ;;  %v12256_v54 = vmul.f32 %v11037_v34, %v11865_v51  ;;  %v12262_v18 = vmul.f32 %v11042_v35, %v11865_v51 }
 0x2e4   : > { %v1989_v8 = vrot.slane %v1756_v7, 2  ;;  %v2569_v5 = vrot.slane %v2336_v53, 3  ;;  %v2916_v28 = vadd.f32 %v11953_v24, %v2813_v33  ;;  %v2917_v2 = vadd.f32 %v11953_v24, %v2814_v0  ;;  %v599_v0 = vpop.permute.xlu0 %598 }
 0x2e5   : > { %v12266_v44 = vmul.f32 %v11044_v37, %v11865_v51  ;;  %v15240_v17 = vrot.slane %v12070_v55, 1  ;;  %v15241_v10 = vrot.slane %v12135_v9, 1  ;;  %v15242_v7 = vrot.slane %v12106_v26, 2  ;;  %v12282_v49 = vpop.permute.xlu1 %908  ;;  %936 = vperm.xlu1 %10266, %v599_v0  }
 0x2e6   : > { %v12279_v33 = vmul.f32 %v11046_v39, %v11865_v51  ;;  %v3012_v32 = vmax.f32 %v2916_v28, 0.0  ;;  %v3013_v12 = vmax.f32 %v2917_v2, 0.0 }
 0x2e7   : > { %v1410_v14 = vsel %vm1327_vm0, %v15240_v17, %v1409_v41  ;;  %v1412_v57 = vsel %vm1327_vm0, %v1409_v41, %v15241_v10  ;;  %v1990_v53 = vsel %vm1907_vm1, %v15242_v7, %v1989_v8  ;;  %v3286_v17 = vld [vmem:[#allocation2 + $0xa1] ss:$2 sm:$0xff]  ;;  %v15243_v41 = vrot.slane %v12139_v22, 2 }
 0x2e8   : > { %v1655_v19 = vadd.f32 %v1410_v14, %v12085_v30  ;;  %v1656_v55 = vadd.f32 %v1412_v57, %v1076_v16  ;;  %v15244_v10 = vrot.slane %v12110_v31, 3  ;;  %v15245_v7 = vrot.slane %v12174_v29, 3  ;;  %3109 = vst.msk [vmem:[#allocation2 + $0x130] sm:$0xff] %vm3070_vm3, %v3012_v32  ;;  %3110 = vst.msk [vmem:[#allocation2 + $0x138] sm:$0xff] %vm3070_vm3, %v3013_v12  ;;  %v603_v32 = vpop.permute.xlu0 %602 }
 0x2e9   : > { %v1992_v26 = vsel %vm1907_vm1, %v1989_v8, %v15243_v41  ;;  %v1178_v31 = vmul.f32 %v11037_v34, %v11873_v56  ;;  %v1758_v57 = vmul.f32 %v11042_v35, %v11873_v56  ;;  %v12304_v0 = vmax.f32 %v3190_v62, %v3286_v17  ;;  %944 = vperm.xlu1 %10266, %v603_v32  }
 0x2ea   : > { %v2570_v51 = vsel %vm2487_vm2, %v15244_v10, %v2569_v5  ;;  %v2572_v28 = vsel %vm2487_vm2, %v2569_v5, %v15245_v7  ;;  %v2235_v16 = vadd.f32 %v1990_v53, %v1655_v19  ;;  %v2236_v2 = vadd.f32 %v1992_v26, %v1656_v55  ;;  %v12312_v55 = vpop.permute.xlu1 %916 }
 0x2eb   : > { %v2338_v5 = vmul.f32 %v11044_v37, %v11873_v56  ;;  %v1078_v19 = vmul.f32 %v11046_v39, %v11873_v56  ;;  %v12310_v53 = vmul.f32 %v11037_v34, %v11899_v20  ;;  %15246 = vst [vmem:[#allocation31_spill] sm:$0xff] %v12312_v55  ;;  %v1413_v26 = vrot.slane %v1178_v31, 1 }
 0x2ec   : > { %v2815_v41 = vadd.f32 %v2570_v51, %v2235_v16  ;;  %v2816_v12 = vadd.f32 %v2572_v28, %v2236_v2  ;;  %v1993_v10 = vrot.slane %v1758_v57, 2  ;;  %v12319_v51 = vmul.f32 %v11046_v39, %v11899_v20 }
 0x2ed   : > { %v2573_v7 = vrot.slane %v2338_v5, 3  ;;  %v12323_v56 = vmul.f32 %v11042_v35, %v11899_v20  ;;  %v15247_v28 = vrot.slane %v12135_v9, 1  ;;  %v15248_v2 = vrot.slane %v12200_v21, 1 }
 0x2ee   : > { %v2918_v62 = vadd.f32 %v11953_v24, %v2815_v41  ;;  %v2919_v17 = vadd.f32 %v11953_v24, %v2816_v12  ;;  %v15249_v57 = vrot.slane %v12139_v22, 2  ;;  %v1423_v32 = vrot.slane %v12310_v53, 1  ;;  %v607_v41 = vpop.permute.xlu0 %606  ;;  %v12336_v55 = vpop.permute.xlu1 %924 }
 0x2ef   : > { %v1414_v16 = vsel %vm1327_vm0, %v15247_v28, %v1413_v26  ;;  %v1416_v31 = vsel %vm1327_vm0, %v1413_v26, %v15248_v2  ;;  %952 = vperm.xlu1 %10266, %v607_v41   ;;  %v15250_v9 = vrot.slane %v12213_v50, 2  ;;  %v15251_v26 = vrot.slane %v12174_v29, 3 }
 0x2f0   : > { %v1994_v5 = vsel %vm1907_vm1, %v15249_v57, %v1993_v10  ;;  %v3014_v12 = vmax.f32 %v2918_v62, 0.0  ;;  %v3015_v14 = vmax.f32 %v2919_v17, 0.0  ;;  %v1657_v30 = vadd.f32 %v1414_v16, %v12157_v45 }
 0x2f1   : > { %v1658_v8 = vadd.f32 %v1416_v31, %v1078_v19  ;;  %v1996_v28 = vsel %vm1907_vm1, %v1993_v10, %v15250_v9  ;;  %v2574_v22 = vsel %vm2487_vm2, %v15251_v26, %v2573_v7  ;;  %v15252_v2 = vrot.slane %v12238_v13, 3 }
 0x2f2   : > { %v15253_v62 = vrot.slane %v12304_v0, 1  ;;  %v15254_v45 = vrot.slane %v12182_v4, 1  ;;  %3111 = vst.msk [vmem:[#allocation2 + $0x140] sm:$0xff] %vm3070_vm3, %v3014_v12  ;;  %3112 = vst.msk [vmem:[#allocation2 + $0x148] sm:$0xff] %vm3070_vm3, %v3015_v14  ;;  %v2237_v17 = vadd.f32 %v1994_v5, %v1657_v30  ;;  %v12358_v16 = vmul.f32 %v11044_v37, %v11899_v20  ;;  %v611_v14 = vpop.permute.xlu0 %610  ;;  %v597_v9 = vpop.permute.xlu1 %596 }
 0x2f3   : > { %v2576_v57 = vsel %vm2487_vm2, %v2573_v7, %v15252_v2  ;;  %v2238_v10 = vadd.f32 %v1996_v28, %v1658_v8  ;;  %v1080_v7 = vmul.f32 %v11046_v39, %v11907_v15  ;;  %v1180_v31 = vmul.f32 %v11037_v34, %v11907_v15  ;;  %960 = vperm.xlu1 %10266, %v611_v14  }
 0x2f4   : > { %v3486_v19 = vsel %vm1327_vm0, %v15254_v45, %v15253_v62  ;;  %v1760_v41 = vmul.f32 %v11042_v35, %v11907_v15  ;;  %v2340_v30 = vmul.f32 %v11044_v37, %v11907_v15  ;;  %v2817_v8 = vadd.f32 %v2574_v22, %v2237_v17  ;;  %932 = vperm.xlu0 %10267, %v597_v9  }
 0x2f5   : > { %9055 = vmatmul.mubr.msk.f32.gmra.mrb[8].mxu0 %vm3070_vm3, %v3486_v19  ;;  %v2818_v5 = vadd.f32 %v2576_v57, %v2238_v10  ;;  %v12370_v12 = vmul.f32 %v11046_v39, %v11929_v47  ;;  %v12374_v20 = vmul.f32 %v11037_v34, %v11929_v47  ;;  %v1417_v28 = vrot.slane %v1180_v31, 1 }
 0x2f6   : > { %v1997_v26 = vrot.slane %v1760_v41, 2  ;;  %v2577_v2 = vrot.slane %v2340_v30, 3  ;;  %v12378_v62 = vmul.f32 %v11042_v35, %v11929_v47  ;;  %v2920_v15 = vadd.f32 %v11953_v24, %v2817_v8  ;;  %v615_v8 = vpop.permute.xlu0 %614  ;;  %v601_v29 = vpop.permute.xlu1 %600 }
 0x2f7   : > { %v2921_v22 = vadd.f32 %v11953_v24, %v2818_v5  ;;  %v12385_v45 = vmul.f32 %v11044_v37, %v11929_v47  ;;  %v15255_v19 = vrot.slane %v12200_v21, 1  ;;  %v15256_v10 = vrot.slane %v12256_v54, 1  ;;  %968 = vperm.xlu1 %10266, %v615_v8  }
 0x2f8   : > { %v15257_v41 = vrot.slane %v12213_v50, 2  ;;  %v3016_v5 = vmax.f32 %v2920_v15, 0.0  ;;  %v15258_v21 = vrot.slane %v12262_v18, 2  ;;  %940 = vperm.xlu0 %10267, %v601_v29   ;;  %v2342_v29 = vmul.f32 %v11044_v37, %v11939_v40 }
 0x2f9   : > { %v1418_v17 = vsel %vm1327_vm0, %v15255_v19, %v1417_v28  ;;  %v1420_v31 = vsel %vm1327_vm0, %v1417_v28, %v15256_v10  ;;  %v3017_v9 = vmax.f32 %v2921_v22, 0.0  ;;  %v15259_v28 = vrot.slane %v12238_v13, 3 }
 0x2fa   : > { %v1998_v30 = vsel %vm1907_vm1, %v15257_v41, %v1997_v26  ;;  %v1659_v47 = vadd.f32 %v1418_v17, %v12196_v27  ;;  %v1660_v57 = vadd.f32 %v1420_v31, %v1080_v7  ;;  %v2000_v19 = vsel %vm1907_vm1, %v1997_v26, %v15258_v21  ;;  %3113 = vst.msk [vmem:[#allocation2 + $0x150] sm:$0xff] %vm3070_vm3, %v3016_v5  ;;  %v619_v31 = vpop.permute.xlu0 %618 }
 0x2fb   : > { %v2578_v50 = vsel %vm2487_vm2, %v15259_v28, %v2577_v2  ;;  %v15260_v10 = vrot.slane %v12266_v44, 3  ;;  %3114 = vst.msk [vmem:[#allocation2 + $0x158] sm:$0xff] %vm3070_vm3, %v3017_v9  ;;  %v1182_v13 = vmul.f32 %v11037_v34, %v11939_v40  ;;  %v1082_v26 = vmul.f32 %v11046_v39, %v11939_v40  ;;  %v605_v9 = vpop.permute.xlu1 %604  ;;  %976 = vperm.xlu1 %10266, %v619_v31   ;;  %v3194_v31 = vld [vmem:[#allocation2 + $0xc0] ss:$2 sm:$0xff] }
 0x2fc   : > { %v2239_v27 = vadd.f32 %v1998_v30, %v1659_v47  ;;  %v2240_v7 = vadd.f32 %v2000_v19, %v1660_v57  ;;  %v12421_v17 = vmul.f32 %v11037_v34, %v11963_v60  ;;  %v12425_v5 = vmul.f32 %v11046_v39, %v11963_v60  ;;  %948 = vperm.xlu0 %10267, %v605_v9  }
 0x2fd   : > { %v2580_v41 = vsel %vm2487_vm2, %v2577_v2, %v15260_v10  ;;  %v1762_v2 = vmul.f32 %v11042_v35, %v11939_v40  ;;  %v1421_v8 = vrot.slane %v1182_v13, 1  ;;  %v2581_v21 = vrot.slane %v2342_v29, 3 }
 0x2fe   : > { %v2819_v57 = vadd.f32 %v2578_v50, %v2239_v27  ;;  %v2820_v30 = vadd.f32 %v2580_v41, %v2240_v7  ;;  %v12429_v19 = vmul.f32 %v11042_v35, %v11963_v60  ;;  %v12433_v40 = vmul.f32 %v11044_v37, %v11963_v60 }
 0x2ff   : > { %v2001_v47 = vrot.slane %v1762_v2, 2  ;;  %v15261_v10 = vrot.slane %v12256_v54, 1  ;;  %v1424_v27 = vsel %vm1327_vm0, %v1421_v8, %v1423_v32  ;;  %v15262_v2 = vrot.slane %v12262_v18, 2  ;;  %v609_v18 = vpop.permute.xlu1 %608 }
 0x300   : > { %v2922_v28 = vadd.f32 %v11953_v24, %v2819_v57  ;;  %v2923_v50 = vadd.f32 %v11953_v24, %v2820_v30  ;;  %v1662_v13 = vadd.f32 %v1424_v27, %v1082_v26  ;;  %v3290_v57 = vld [vmem:[#allocation2 + $0xc1] ss:$2 sm:$0xff]  ;;  %v623_v30 = vpop.permute.xlu0 %622  ;;  %v3192_v26 = vld [vmem:[#allocation2 + $0xb0] ss:$2 sm:$0xff]  ;;  %v15265_v29 = vrot.slane %v12358_v16, 3  ;;  %956 = vperm.xlu0 %10267, %v609_v18  }
 0x301   : > { %v1422_v41 = vsel %vm1327_vm0, %v15261_v10, %v1421_v8  ;;  %v2002_v60 = vsel %vm1907_vm1, %v15262_v2, %v2001_v47  ;;  %v15263_v10 = vrot.slane %v12323_v56, 2  ;;  %v15264_v8 = vrot.slane %v12266_v44, 3  ;;  %984 = vperm.xlu1 %10266, %v623_v30  }
 0x302   : > { %v1661_v7 = vadd.f32 %v1422_v41, %v12279_v33  ;;  %v3018_v9 = vmax.f32 %v2922_v28, 0.0  ;;  %v3019_v54 = vmax.f32 %v2923_v50, 0.0  ;;  %v3288_v41 = vld [vmem:[#allocation2 + $0xb1] ss:$2 sm:$0xff]  ;;  %v2584_v15 = vsel %vm2487_vm2, %v2581_v21, %v15265_v29 }
 0x303   : > { %v2004_v22 = vsel %vm1907_vm1, %v2001_v47, %v15263_v10  ;;  %v2582_v33 = vsel %vm2487_vm2, %v15264_v8, %v2581_v21  ;;  %v1184_v47 = vmul.f32 %v11037_v34, %v11971_v36  ;;  %v1764_v50 = vmul.f32 %v11042_v35, %v11971_v36  ;;  %v3292_v21 = vld [vmem:[#allocation2 + $0xd1] ss:$2 sm:$0xff]  ;;  %v613_v44 = vpop.permute.xlu1 %612 }
 0x304   : > { %v2241_v27 = vadd.f32 %v2002_v60, %v1661_v7  ;;  %v2242_v2 = vadd.f32 %v2004_v22, %v1662_v13  ;;  %3115 = vst.msk [vmem:[#allocation2 + $0x160] sm:$0xff] %vm3070_vm3, %v3018_v9  ;;  %3116 = vst.msk [vmem:[#allocation2 + $0x168] sm:$0xff] %vm3070_vm3, %v3019_v54  ;;  %v2344_v22 = vmul.f32 %v11044_v37, %v11971_v36  ;;  %v3196_v7 = vld [vmem:[#allocation2 + $0xd0] ss:$2 sm:$0xff]  ;;  %v627_v9 = vpop.permute.xlu0 %626  ;;  %964 = vperm.xlu0 %10267, %v613_v44  }
 0x305   : > { %v12467_v29 = vmax.f32 %v3192_v26, %v3288_v41  ;;  %v12469_v30 = vmax.f32 %v3194_v31, %v3290_v57  ;;  %v1084_v54 = vmul.f32 %v11046_v39, %v11971_v36  ;;  %v1425_v10 = vrot.slane %v1184_v47, 1  ;;  %992 = vperm.xlu1 %10266, %v627_v9  }
 0x306   : > { %v2821_v13 = vadd.f32 %v2582_v33, %v2241_v27  ;;  %v2822_v60 = vadd.f32 %v2584_v15, %v2242_v2  ;;  %v2005_v8 = vrot.slane %v1764_v50, 2  ;;  %v2585_v18 = vrot.slane %v2344_v22, 3 }
 0x307   : > { %v3487_v33 = vrot.slane %v12467_v29, 1  ;;  %v12476_v15 = vmax.f32 %v3196_v7, %v3292_v21  ;;  %v1426_v31 = vsel %vm1327_vm0, %v1423_v32, %v1425_v10  ;;  %v15266_v36 = vrot.slane %v12374_v20, 1 }
 0x308   : > { %v2924_v28 = vadd.f32 %v11953_v24, %v2821_v13  ;;  %v2925_v14 = vadd.f32 %v11953_v24, %v2822_v60  ;;  %v15267_v26 = vrot.slane %v12323_v56, 2  ;;  %v3489_v27 = vrot.slane %v12469_v30, 1  ;;  %v631_v44 = vpop.permute.xlu0 %630 }
 0x309   : > { %v1428_v57 = vsel %vm1327_vm0, %v1425_v10, %v15266_v36  ;;  %v1663_v50 = vadd.f32 %v1426_v31, %v12319_v51  ;;  %v15268_v53 = vrot.slane %v12378_v62, 2  ;;  %v15269_v7 = vrot.slane %v12358_v16, 3  ;;  %1000 = vperm.xlu1 %10266, %v631_v44   ;;  %v3198_v31 = vld [vmem:[#allocation2 + $0xe0] ss:$2 sm:$0xff] }
 0x30a   : > { %v2006_v41 = vsel %vm1907_vm1, %v15267_v26, %v2005_v8  ;;  %v3020_v2 = vmax.f32 %v2924_v28, 0.0  ;;  %v3021_v47 = vmax.f32 %v2925_v14, 0.0  ;;  %v1664_v22 = vadd.f32 %v1428_v57, %v1084_v54  ;;  %v617_v28 = vpop.permute.xlu1 %616 }
 0x30b   : > { %v2008_v32 = vsel %vm1907_vm1, %v2005_v8, %v15268_v53  ;;  %v2586_v21 = vsel %vm2487_vm2, %v15269_v7, %v2585_v18  ;;  %v15270_v56 = vrot.slane %v12304_v0, 1  ;;  %v3490_v60 = vsel %vm1327_vm0, %v3487_v33, %v3489_v27  ;;  %972 = vperm.xlu0 %10267, %v617_v28  }
 0x30c   : > { %3117 = vst.msk [vmem:[#allocation2 + $0x170] sm:$0xff] %vm3070_vm3, %v3020_v2  ;;  %3118 = vst.msk [vmem:[#allocation2 + $0x178] sm:$0xff] %vm3070_vm3, %v3021_v47  ;;  %v2243_v51 = vadd.f32 %v2006_v41, %v1663_v50  ;;  %v2244_v14 = vadd.f32 %v2008_v32, %v1664_v22  ;;  %v15271_v9 = vrot.slane %v12385_v45, 3  ;;  %v3491_v54 = vrot.slane %v12476_v15, 1  ;;  %v3294_v2 = vld [vmem:[#allocation2 + $0xe1] ss:$2 sm:$0xff]  ;;  %v635_v22 = vpop.permute.xlu0 %634 }
 0x30d   : > { %v3488_v13 = vsel %vm1327_vm0, %v15270_v56, %v3487_v33  ;;  %v12509_v10 = vmul.f32 %v11046_v39, %v11998_v3  ;;  %v12513_v8 = vmul.f32 %v11037_v34, %v11998_v3  ;;  %v12517_v33 = vmul.f32 %v11042_v35, %v11998_v3  ;;  %v3200_v47 = vld [vmem:[#allocation2 + $0xf0] ss:$2 sm:$0xff]  ;;  %v3296_v50 = vld [vmem:[#allocation2 + $0xf1] ss:$2 sm:$0xff]  ;;  %1008 = vperm.xlu1 %10266, %v635_v22  }
 0x30e   : > { %v2588_v16 = vsel %vm2487_vm2, %v2585_v18, %v15271_v9  ;;  %9057 = vmatprep.mubr.msk.f32.mxu0 %vm3070_vm3, %v3488_v13  ;;  %v12521_v18 = vmul.f32 %v11044_v37, %v11998_v3  ;;  %v2823_v36 = vadd.f32 %v2586_v21, %v2243_v51  ;;  %v3492_v26 = vsel %vm1327_vm0, %v3489_v27, %v3491_v54  ;;  %v621_v27 = vpop.permute.xlu1 %620 }
 0x30f   : > { %9058 = vmatmul.mubr.msk.f32.gmra.mrb[10].mxu0 %vm3070_vm3, %v3490_v60  ;;  %v2824_v57 = vadd.f32 %v2588_v16, %v2244_v14  ;;  %v1186_v41 = vmul.f32 %v11037_v34, %v12004_v63  ;;  %v1435_v44 = vrot.slane %v12513_v8, 1  ;;  %v2015_v53 = vrot.slane %v12517_v33, 2  ;;  %980 = vperm.xlu0 %10267, %v621_v27  }
 0x310   : > { %9060 = vmatprep.mubr.msk.f32.mxu0 %vm3070_vm3, %v3492_v26  ;;  %v1086_v3 = vmul.f32 %v11046_v39, %v12004_v63  ;;  %v1766_v32 = vmul.f32 %v11042_v35, %v12004_v63  ;;  %v2926_v7 = vadd.f32 %v11953_v24, %v2823_v36  ;;  %v2346_v13 = vmul.f32 %v11044_v37, %v12004_v63  ;;  %v639_v22 = vpop.permute.xlu0 %638 }
 0x311   : > { %v2927_v21 = vadd.f32 %v11953_v24, %v2824_v57  ;;  %v1429_v56 = vrot.slane %v1186_v41, 1  ;;  %v2595_v60 = vrot.slane %v12521_v18, 3  ;;  %v12538_v51 = vmax.f32 %v3198_v31, %v3294_v2  ;;  %1016 = vperm.xlu1 %10266, %v639_v22   ;;  %v3298_v22 = vld [vmem:[#allocation2 + $0x101] ss:$2 sm:$0xff] }
 0x312   : > { %v2009_v28 = vrot.slane %v1766_v32, 2  ;;  %v12540_v14 = vmax.f32 %v3200_v47, %v3296_v50  ;;  %v3022_v9 = vmax.f32 %v2926_v7, 0.0  ;;  %v15272_v26 = vrot.slane %v12374_v20, 1  ;;  %v625_v50 = vpop.permute.xlu1 %624 }
 0x313   : > { %v3023_v16 = vmax.f32 %v2927_v21, 0.0  ;;  %v15273_v57 = vrot.slane %v12421_v17, 1  ;;  %v15274_v32 = vrot.slane %v12378_v62, 2  ;;  %v15275_v2 = vrot.slane %v12429_v19, 2  ;;  %988 = vperm.xlu0 %10267, %v625_v50  }
 0x314   : > { %v1430_v36 = vsel %vm1327_vm0, %v15272_v26, %v1429_v56  ;;  %3119 = vst.msk [vmem:[#allocation2 + $0x180] sm:$0xff] %vm3070_vm3, %v3022_v9  ;;  %v2589_v20 = vrot.slane %v2346_v13, 3  ;;  %v3493_v7 = vrot.slane %v12538_v51, 1  ;;  %v12561_v62 = vmul.f32 %v11037_v34, %v12027_v23 }
 0x315   : > { %v1432_v41 = vsel %vm1327_vm0, %v1429_v56, %v15273_v57  ;;  %v1665_v63 = vadd.f32 %v1430_v36, %v12370_v12  ;;  %v2010_v31 = vsel %vm1907_vm1, %v15274_v32, %v2009_v28  ;;  %v2012_v47 = vsel %vm1907_vm1, %v2009_v28, %v15275_v2  ;;  %3120 = vst.msk [vmem:[#allocation2 + $0x188] sm:$0xff] %vm3070_vm3, %v3023_v16  ;;  %v3204_v2 = vld [vmem:[#allocation2 + $0x110] ss:$2 sm:$0xff] }
 0x316   : > { %v1666_v27 = vadd.f32 %v1432_v41, %v1086_v3  ;;  %v3495_v12 = vrot.slane %v12540_v14, 1  ;;  %v12565_v56 = vmul.f32 %v11042_v35, %v12027_v23  ;;  %v12569_v28 = vmul.f32 %v11044_v37, %v12027_v23  ;;  %v3202_v41 = vld [vmem:[#allocation2 + $0x100] ss:$2 sm:$0xff]  ;;  %v629_v50 = vpop.permute.xlu1 %628 }
 0x317   : > { %v2245_v3 = vadd.f32 %v2010_v31, %v1665_v63  ;;  %v15276_v13 = vrot.slane %v12385_v45, 3  ;;  %v15277_v16 = vrot.slane %v12433_v40, 3  ;;  %v3494_v36 = vsel %vm1327_vm0, %v3491_v54, %v3493_v7  ;;  %v643_v63 = vpop.permute.xlu0 %642  ;;  %996 = vperm.xlu0 %10267, %v629_v50  }
 0x318   : > { %v2246_v21 = vadd.f32 %v2012_v47, %v1666_v27  ;;  %v12580_v57 = vmul.f32 %v11046_v39, %v12027_v23  ;;  %9061 = vmatmul.mubr.msk.f32.gmra.mrb[12].mxu0 %vm3070_vm3, %v3494_v36  ;;  %v3496_v45 = vsel %vm1327_vm0, %v3493_v7, %v3495_v12  ;;  %v1439_v31 = vrot.slane %v12561_v62, 1  ;;  %v3300_v47 = vld [vmem:[#allocation2 + $0x111] ss:$2 sm:$0xff]  ;;  %1024 = vperm.xlu1 %10266, %v643_v63  }
 0x319   : > { %v2590_v9 = vsel %vm2487_vm2, %v15276_v13, %v2589_v20  ;;  %v2592_v26 = vsel %vm2487_vm2, %v2589_v20, %v15277_v16  ;;  %9063 = vmatprep.mubr.msk.f32.mxu0 %vm3070_vm3, %v3496_v45  ;;  %v1188_v20 = vmul.f32 %v11037_v34, %v12033_v11  ;;  %v2348_v13 = vmul.f32 %v11044_v37, %v12033_v11 }
 0x31a   : > { %v2825_v27 = vadd.f32 %v2590_v9, %v2245_v3  ;;  %v2826_v32 = vadd.f32 %v2592_v26, %v2246_v21  ;;  %v1768_v3 = vmul.f32 %v11042_v35, %v12033_v11  ;;  %v12596_v9 = vmax.f32 %v3202_v41, %v3298_v22 }
 0x31b   : > { %v1088_v16 = vmul.f32 %v11046_v39, %v12033_v11  ;;  %v1433_v26 = vrot.slane %v1188_v20, 1  ;;  %v12600_v63 = vmax.f32 %v3204_v2, %v3300_v47  ;;  %v2593_v23 = vrot.slane %v2348_v13, 3 }
 0x31c   : > { %v2928_v7 = vadd.f32 %v11953_v24, %v2825_v27  ;;  %v2929_v21 = vadd.f32 %v11953_v24, %v2826_v32  ;;  %15278 = vst [vmem:[#allocation23_spill] sm:$0xff] %v12596_v9  ;;  %v2013_v36 = vrot.slane %v1768_v3, 2  ;;  %v3497_v50 = vrot.slane %v12596_v9, 1  ;;  %v633_v27 = vpop.permute.xlu1 %632 }
 0x31d   : > { %v15279_v24 = vrot.slane %v12421_v17, 1  ;;  %v1436_v41 = vsel %vm1327_vm0, %v1433_v26, %v1435_v44  ;;  %v15280_v11 = vrot.slane %v12429_v19, 2  ;;  %v12614_v2 = vmul.f32 %v11046_v39, %v12059_v6  ;;  %1004 = vperm.xlu0 %10267, %v633_v27  }
 0x31e   : > { %v3024_v45 = vmax.f32 %v2928_v7, 0.0  ;;  %v3025_v54 = vmax.f32 %v2929_v21, 0.0  ;;  %v1668_v47 = vadd.f32 %v1436_v41, %v1088_v16  ;;  %v2016_v20 = vsel %vm1907_vm1, %v2013_v36, %v2015_v53 }
 0x31f   : > { %v1434_v32 = vsel %vm1327_vm0, %v15279_v24, %v1433_v26  ;;  %v2014_v22 = vsel %vm1907_vm1, %v15280_v11, %v2013_v36  ;;  %v15281_v19 = vrot.slane %v12433_v40, 3  ;;  %v3498_v7 = vsel %vm1327_vm0, %v3495_v12, %v3497_v50  ;;  %v3206_v26 = vld [vmem:[#allocation2 + $0x120] ss:$2 sm:$0xff]  ;;  %v3302_v36 = vld [vmem:[#allocation2 + $0x121] ss:$2 sm:$0xff] }
 0x320   : > { %3121 = vst.msk [vmem:[#allocation2 + $0x190] sm:$0xff] %vm3070_vm3, %v3024_v45  ;;  %3122 = vst.msk [vmem:[#allocation2 + $0x198] sm:$0xff] %vm3070_vm3, %v3025_v54  ;;  %v1667_v17 = vadd.f32 %v1434_v32, %v12425_v5  ;;  %v3499_v21 = vrot.slane %v12600_v63, 1  ;;  %v12629_v13 = vmul.f32 %v11037_v34, %v12059_v6  ;;  %v12633_v5 = vmul.f32 %v11042_v35, %v12059_v6  ;;  %v637_v45 = vpop.permute.xlu1 %636  ;;  %v3304_v11 = vld [vmem:[#allocation2 + $0x131] ss:$2 sm:$0xff] }
 0x321   : > { %v2594_v3 = vsel %vm2487_vm2, %v15281_v19, %v2593_v23  ;;  %v2248_v16 = vadd.f32 %v2016_v20, %v1668_v47  ;;  %v2596_v40 = vsel %vm2487_vm2, %v2593_v23, %v2595_v60  ;;  %9064 = vmatmul.mubr.msk.f32.gmra.mrb[14].mxu0 %vm3070_vm3, %v3498_v7  ;;  %v12641_v12 = vmul.f32 %v11044_v37, %v12059_v6  ;;  %v3208_v23 = vld [vmem:[#allocation2 + $0x130] ss:$2 sm:$0xff] }
 0x322   : > { %v2247_v54 = vadd.f32 %v2014_v22, %v1667_v17  ;;  %v3500_v27 = vsel %vm1327_vm0, %v3497_v50, %v3499_v21  ;;  %v1443_v24 = vrot.slane %v12629_v13, 1  ;;  %v1090_v32 = vmul.f32 %v11046_v39, %v12064_v48  ;;  %1012 = vperm.xlu0 %10267, %v637_v45  }
 0x323   : > { %v1190_v41 = vmul.f32 %v11037_v34, %v12064_v48  ;;  %v2828_v17 = vadd.f32 %v2596_v40, %v2248_v16  ;;  %9066 = vmatprep.mubr.msk.f32.mxu0 %vm3070_vm3, %v3500_v27  ;;  %v2023_v6 = vrot.slane %v12633_v5, 2  ;;  %v1770_v50 = vmul.f32 %v11042_v35, %v12064_v48 }
 0x324   : > { %v2827_v22 = vadd.f32 %v2594_v3, %v2247_v54  ;;  %v2350_v19 = vmul.f32 %v11044_v37, %v12064_v48  ;;  %v12656_v7 = vmax.f32 %v3206_v26, %v3302_v36  ;;  %v12661_v3 = vld [vmem:[%s14962_s2] ss:$0 sm:$0xff]  ;;  %v12665_v45 = vmax.f32 %v3208_v23, %v3304_v11  ;;  %v641_v27 = vpop.permute.xlu1 %640 }
 0x325   : > { %v1437_v20 = vrot.slane %v1190_v41, 1  ;;  %v2931_v16 = vadd.f32 %v12661_v3, %v2828_v17  ;;  %v2017_v40 = vrot.slane %v1770_v50, 2  ;;  %v15282_v8 = vrot.slane %v12565_v56, 2 }
 0x326   : > { %v2930_v54 = vadd.f32 %v12661_v3, %v2827_v22  ;;  %v2597_v26 = vrot.slane %v2350_v19, 3  ;;  %v3501_v36 = vrot.slane %v12656_v7, 1  ;;  %1020 = vperm.xlu0 %10267, %v641_v27  }
 0x327   : > { %v1438_v41 = vsel %vm1327_vm0, %v1435_v44, %v1437_v20  ;;  %v1440_v48 = vsel %vm1327_vm0, %v1437_v20, %v1439_v31  ;;  %v3027_v22 = vmax.f32 %v2931_v16, 0.0  ;;  %v2018_v23 = vsel %vm1907_vm1, %v2015_v53, %v2017_v40  ;;  %v3210_v16 = vld [vmem:[#allocation2 + $0x140] ss:$2 sm:$0xff] }
 0x328   : > { %v3026_v47 = vmax.f32 %v2930_v54, 0.0  ;;  %v1669_v17 = vadd.f32 %v1438_v41, %v12509_v10  ;;  %v1670_v50 = vadd.f32 %v1440_v48, %v1090_v32  ;;  %v2020_v44 = vsel %vm1907_vm1, %v2017_v40, %v15282_v8  ;;  %v645_v19 = vpop.permute.xlu1 %644 }
 0x329   : > { %v2598_v11 = vsel %vm2487_vm2, %v2595_v60, %v2597_v26  ;;  %v12686_v20 = vmul.f32 %v11046_v39, %v12087_v61  ;;  %3124 = vst.msk [vmem:[#allocation2 + $0x1a8] sm:$0xff] %vm3070_vm3, %v3027_v22  ;;  %v3502_v53 = vsel %vm1327_vm0, %v3499_v21, %v3501_v36  ;;  %v3503_v32 = vrot.slane %v12665_v45, 1  ;;  %v3212_v22 = vld [vmem:[#allocation2 + $0x150] ss:$2 sm:$0xff] }
 0x32a   : > { %3123 = vst.msk [vmem:[#allocation2 + $0x1a0] sm:$0xff] %vm3070_vm3, %v3026_v47  ;;  %v2249_v10 = vadd.f32 %v2018_v23, %v1669_v17  ;;  %v2250_v33 = vadd.f32 %v2020_v44, %v1670_v50  ;;  %v15283_v54 = vrot.slane %v12569_v28, 3  ;;  %9067 = vmatmul.mubr.msk.f32.gmra.mrb[16].mxu0 %vm3070_vm3, %v3502_v53  ;;  %v12698_v60 = vmul.f32 %v11037_v34, %v12087_v61  ;;  %v3308_v17 = vld [vmem:[#allocation2 + $0x151] ss:$2 sm:$0xff] }
 0x32b   : > { %v12702_v47 = vmul.f32 %v11042_v35, %v12087_v61  ;;  %v12706_v21 = vmul.f32 %v11044_v37, %v12087_v61  ;;  %v3504_v41 = vsel %vm1327_vm0, %v3501_v36, %v3503_v32  ;;  %v1192_v48 = vmul.f32 %v11037_v34, %v12096_v46  ;;  %1028 = vperm.xlu0 %10267, %v645_v19  }
 0x32c   : > { %v2600_v18 = vsel %vm2487_vm2, %v2597_v26, %v15283_v54  ;;  %v2829_v40 = vadd.f32 %v2598_v11, %v2249_v10  ;;  %v3306_v26 = vld [vmem:[#allocation2 + $0x141] ss:$2 sm:$0xff]  ;;  %9069 = vmatprep.mubr.msk.f32.mxu0 %vm3070_vm3, %v3504_v41  ;;  %v1447_v50 = vrot.slane %v12698_v60, 1  ;;  %v1092_v61 = vmul.f32 %v11046_v39, %v12096_v46 }
 0x32d   : > { %v2830_v27 = vadd.f32 %v2600_v18, %v2250_v33  ;;  %v1772_v8 = vmul.f32 %v11042_v35, %v12096_v46  ;;  %v1441_v11 = vrot.slane %v1192_v48, 1  ;;  %v2352_v10 = vmul.f32 %v11044_v37, %v12096_v46 }
 0x32e   : > { %v2932_v36 = vadd.f32 %v12661_v3, %v2829_v40  ;;  %v2607_v33 = vrot.slane %v12706_v21, 3  ;;  %v12723_v19 = vmax.f32 %v3210_v16, %v3306_v26  ;;  %v12725_v54 = vmax.f32 %v3212_v22, %v3308_v17 }
 0x32f   : > { %v2933_v44 = vadd.f32 %v12661_v3, %v2830_v27  ;;  %v2021_v53 = vrot.slane %v1772_v8, 2  ;;  %v1442_v23 = vsel %vm1327_vm0, %v1439_v31, %v1441_v11  ;;  %v1444_v40 = vsel %vm1327_vm0, %v1441_v11, %v1443_v24 }
 0x330   : > { %15284 = vst [vmem:[#allocation33_spill] sm:$0xff] %v12723_v19  ;;  %15285 = vst [vmem:[#allocation32_spill] sm:$0xff] %v12725_v54  ;;  %v3028_v18 = vmax.f32 %v2932_v36, 0.0  ;;  %v1671_v27 = vadd.f32 %v1442_v23, %v12580_v57  ;;  %v1672_v46 = vadd.f32 %v1444_v40, %v1092_v61  ;;  %v15286_v48 = vrot.slane %v12565_v56, 2 }
 0x331   : > { %v3029_v41 = vmax.f32 %v2933_v44, 0.0  ;;  %v2024_v26 = vsel %vm1907_vm1, %v2021_v53, %v2023_v6  ;;  %v2601_v62 = vrot.slane %v2352_v10, 3  ;;  %v3505_v31 = vrot.slane %v12723_v19, 1 }
 0x332   : > { %v2022_v16 = vsel %vm1907_vm1, %v15286_v48, %v2021_v53  ;;  %3125 = vst.msk [vmem:[#allocation2 + $0x1b0] sm:$0xff] %vm3070_vm3, %v3028_v18  ;;  %v3507_v22 = vrot.slane %v12725_v54, 1  ;;  %v12746_v57 = vmul.f32 %v11037_v34, %v12119_v38  ;;  %v2252_v17 = vadd.f32 %v2024_v26, %v1672_v46  ;;  %v3214_v18 = vld [vmem:[#allocation2 + $0x160] ss:$2 sm:$0xff] }
 0x333   : > { %3126 = vst.msk [vmem:[#allocation2 + $0x1b8] sm:$0xff] %vm3070_vm3, %v3029_v41  ;;  %v2251_v56 = vadd.f32 %v2022_v16, %v1671_v27  ;;  %v12750_v23 = vmul.f32 %v11042_v35, %v12119_v38  ;;  %v12754_v61 = vmul.f32 %v11044_v37, %v12119_v38  ;;  %v15287_v8 = vrot.slane %v12569_v28, 3  ;;  %v3310_v41 = vld [vmem:[#allocation2 + $0x161] ss:$2 sm:$0xff] }
 0x334   : > { %v15288_v44 = vrot.slane %v12641_v12, 3  ;;  %v3506_v10 = vsel %vm1327_vm0, %v3503_v32, %v3505_v31  ;;  %v12765_v53 = vmul.f32 %v11046_v39, %v12119_v38  ;;  %v3508_v28 = vsel %vm1327_vm0, %v3505_v31, %v3507_v22 }
 0x335   : > { %v2602_v36 = vsel %vm2487_vm2, %v15287_v8, %v2601_v62  ;;  %9070 = vmatmul.mubr.msk.f32.gmra.mrb[18].mxu0 %vm3070_vm3, %v3506_v10  ;;  %v1451_v46 = vrot.slane %v12746_v57, 1  ;;  %v2031_v48 = vrot.slane %v12750_v23, 2  ;;  %v2611_v32 = vrot.slane %v12754_v61, 3 }
 0x336   : > { %v2604_v11 = vsel %vm2487_vm2, %v2601_v62, %v15288_v44  ;;  %v2831_v40 = vadd.f32 %v2602_v36, %v2251_v56  ;;  %9072 = vmatprep.mubr.msk.f32.mxu0 %vm3070_vm3, %v3508_v28  ;;  %v1194_v38 = vmul.f32 %v11037_v34, %v12141_v59  ;;  %v1774_v16 = vmul.f32 %v11042_v35, %v12141_v59 }
 0x337   : > { %v2832_v27 = vadd.f32 %v2604_v11, %v2252_v17  ;;  %v2354_v31 = vmul.f32 %v11044_v37, %v12141_v59  ;;  %v12781_v56 = vmax.f32 %v3214_v18, %v3310_v41  ;;  %v1094_v17 = vmul.f32 %v11046_v39, %v12141_v59 }
 0x338   : > { %v2934_v26 = vadd.f32 %v12661_v3, %v2831_v40  ;;  %v1445_v8 = vrot.slane %v1194_v38, 1  ;;  %v2025_v36 = vrot.slane %v1774_v16, 2  ;;  %v12787_v44 = vmul.f32 %v11037_v34, %v12149_v43 }
 0x339   : > { %v2935_v62 = vadd.f32 %v12661_v3, %v2832_v27  ;;  %15289 = vst [vmem:[#allocation34_spill] sm:$0xff] %v12781_v56  ;;  %v2605_v28 = vrot.slane %v2354_v31, 3  ;;  %v3509_v40 = vrot.slane %v12781_v56, 1  ;;  %v12801_v41 = vmul.f32 %v11046_v39, %v12149_v43 }
 0x33a   : > { %v3030_v11 = vmax.f32 %v2934_v26, 0.0  ;;  %v1446_v27 = vsel %vm1327_vm0, %v1443_v24, %v1445_v8  ;;  %v1448_v18 = vsel %vm1327_vm0, %v1445_v8, %v1447_v50  ;;  %v2026_v59 = vsel %vm1907_vm1, %v2023_v6, %v2025_v36 }
 0x33b   : > { %v3031_v10 = vmax.f32 %v2935_v62, 0.0  ;;  %v1673_v13 = vadd.f32 %v1446_v27, %v12614_v2  ;;  %v1674_v38 = vadd.f32 %v1448_v18, %v1094_v17  ;;  %v15290_v24 = vrot.slane %v12702_v47, 2 }
 0x33c   : > { %3127 = vst.msk [vmem:[#allocation2 + $0x1c0] sm:$0xff] %vm3070_vm3, %v3030_v11  ;;  %v15291_v26 = vrot.slane %v12641_v12, 3  ;;  %v2608_v6 = vsel %vm2487_vm2, %v2605_v28, %v2607_v33  ;;  %v3510_v62 = vsel %vm1327_vm0, %v3507_v22, %v3509_v40  ;;  %v12818_v31 = vmul.f32 %v11042_v35, %v12149_v43  ;;  %v3216_v11 = vld [vmem:[#allocation2 + $0x170] ss:$2 sm:$0xff] }
 0x33d   : > { %3128 = vst.msk [vmem:[#allocation2 + $0x1c8] sm:$0xff] %vm3070_vm3, %v3031_v10  ;;  %v2028_v16 = vsel %vm1907_vm1, %v2025_v36, %v15290_v24  ;;  %v12822_v2 = vmul.f32 %v11044_v37, %v12149_v43  ;;  %v2253_v17 = vadd.f32 %v2026_v59, %v1673_v13  ;;  %9073 = vmatmul.mubr.msk.f32.gmra.mrb[20].mxu0 %vm3070_vm3, %v3510_v62  ;;  %v3312_v10 = vld [vmem:[#allocation2 + $0x171] ss:$2 sm:$0xff] }
 0x33e   : > { %v2606_v5 = vsel %vm2487_vm2, %v15291_v26, %v2605_v28  ;;  %v2254_v8 = vadd.f32 %v2028_v16, %v1674_v38  ;;  %v1196_v36 = vmul.f32 %v11037_v34, %v12189_v25  ;;  %v1096_v28 = vmul.f32 %v11046_v39, %v12189_v25 }
 0x33f   : > { %v1776_v43 = vmul.f32 %v11042_v35, %v12189_v25  ;;  %v2356_v27 = vmul.f32 %v11044_v37, %v12189_v25  ;;  %v2833_v18 = vadd.f32 %v2606_v5, %v2253_v17  ;;  %v2615_v13 = vrot.slane %v12822_v2, 3 }
 0x340   : > { %v2834_v59 = vadd.f32 %v2608_v6, %v2254_v8  ;;  %v1449_v38 = vrot.slane %v1196_v36, 1  ;;  %v12836_v26 = vmax.f32 %v3216_v11, %v3312_v10  ;;  %v12840_v62 = vmul.f32 %v11037_v34, %v12184_v58 }
 0x341   : > { %v2029_v24 = vrot.slane %v1776_v43, 2  ;;  %v2609_v16 = vrot.slane %v2356_v27, 3  ;;  %v2936_v22 = vadd.f32 %v12661_v3, %v2833_v18  ;;  %v15293_v8 = vrot.slane %v12702_v47, 2  ;;  %v3218_v18 = vld [vmem:[#allocation2 + $0x180] ss:$2 sm:$0xff] }
 0x342   : > { %15292 = vst [vmem:[#allocation25_spill] sm:$0xff] %v12836_v26  ;;  %v2937_v12 = vadd.f32 %v12661_v3, %v2834_v59  ;;  %v1450_v25 = vsel %vm1327_vm0, %v1447_v50, %v1449_v38  ;;  %v1452_v5 = vsel %vm1327_vm0, %v1449_v38, %v1451_v46  ;;  %v12856_v11 = vmul.f32 %v11046_v39, %v12184_v58  ;;  %v3314_v59 = vld [vmem:[#allocation2 + $0x181] ss:$2 sm:$0xff] }
 0x343   : > { %v1675_v6 = vadd.f32 %v1450_v25, %v12686_v20  ;;  %v1676_v17 = vadd.f32 %v1452_v5, %v1096_v28  ;;  %v2030_v36 = vsel %vm1907_vm1, %v15293_v8, %v2029_v24  ;;  %v3032_v10 = vmax.f32 %v2936_v22, 0.0 }
 0x344   : > { %v3033_v43 = vmax.f32 %v2937_v12, 0.0  ;;  %v2032_v60 = vsel %vm1907_vm1, %v2029_v24, %v2031_v48  ;;  %v2610_v50 = vsel %vm2487_vm2, %v2607_v33, %v2609_v16  ;;  %v2612_v47 = vsel %vm2487_vm2, %v2609_v16, %v2611_v32 }
 0x345   : > { %v2255_v20 = vadd.f32 %v2030_v36, %v1675_v6  ;;  %v2256_v28 = vadd.f32 %v2032_v60, %v1676_v17  ;;  %v3511_v27 = vrot.slane %v12836_v26, 1  ;;  %3129 = vst.msk [vmem:[#allocation2 + $0x1d0] sm:$0xff] %vm3070_vm3, %v3032_v10  ;;  %v1459_v12 = vrot.slane %v12840_v62, 1 }
 0x346   : > { %3130 = vst.msk [vmem:[#allocation2 + $0x1d8] sm:$0xff] %vm3070_vm3, %v3033_v43  ;;  %v12873_v22 = vmul.f32 %v11042_v35, %v12184_v58  ;;  %v12877_v21 = vmul.f32 %v11044_v37, %v12184_v58  ;;  %v1198_v33 = vmul.f32 %v11037_v34, %v12240_v1  ;;  %v1778_v25 = vmul.f32 %v11042_v35, %v12240_v1 }
 0x347   : > { %v2835_v38 = vadd.f32 %v2610_v50, %v2255_v20  ;;  %v2836_v24 = vadd.f32 %v2612_v47, %v2256_v28  ;;  %v3512_v16 = vsel %vm1327_vm0, %v3509_v40, %v3511_v27  ;;  %v1098_v58 = vmul.f32 %v11046_v39, %v12240_v1 }
 0x348   : > { %9075 = vmatprep.mubr.msk.f32.mxu0 %vm3070_vm3, %v3512_v16  ;;  %v2039_v5 = vrot.slane %v12873_v22, 2  ;;  %v1453_v6 = vrot.slane %v1198_v33, 1  ;;  %v2358_v17 = vmul.f32 %v11044_v37, %v12240_v1  ;;  %v2033_v10 = vrot.slane %v1778_v25, 2 }
 0x349   : > { %v2938_v8 = vadd.f32 %v12661_v3, %v2835_v38  ;;  %v2939_v36 = vadd.f32 %v12661_v3, %v2836_v24  ;;  %v12892_v40 = vmax.f32 %v3218_v18, %v3314_v59  ;;  %v2619_v43 = vrot.slane %v12877_v21, 3 }
 0x34a   : > { %v1454_v60 = vsel %vm1327_vm0, %v1451_v46, %v1453_v6  ;;  %v15295_v50 = vrot.slane %v12787_v44, 1  ;;  %v2613_v28 = vrot.slane %v2358_v17, 3  ;;  %v2034_v18 = vsel %vm1907_vm1, %v2031_v48, %v2033_v10  ;;  %v3316_v17 = vld [vmem:[#allocation2 + $0x191] ss:$2 sm:$0xff] }
 0x34b   : > { %15294 = vst [vmem:[#allocation27_spill] sm:$0xff] %v12892_v40  ;;  %v3034_v47 = vmax.f32 %v2938_v8, 0.0  ;;  %v3035_v1 = vmax.f32 %v2939_v36, 0.0  ;;  %v1677_v33 = vadd.f32 %v1454_v60, %v12765_v53  ;;  %v15296_v59 = vrot.slane %v12818_v31, 2 }
 0x34c   : > { %v1456_v20 = vsel %vm1327_vm0, %v1453_v6, %v15295_v50  ;;  %v2614_v46 = vsel %vm2487_vm2, %v2611_v32, %v2613_v28  ;;  %v12913_v24 = vmul.f32 %v11046_v39, %v12215_v52  ;;  %v3513_v48 = vrot.slane %v12892_v40, 1  ;;  %v3220_v6 = vld [vmem:[#allocation2 + $0x190] ss:$2 sm:$0xff] }
 0x34d   : > { %v1678_v38 = vadd.f32 %v1456_v20, %v1098_v58  ;;  %v2036_v57 = vsel %vm1907_vm1, %v2033_v10, %v15296_v59  ;;  %3131 = vst.msk [vmem:[#allocation2 + $0x1e0] sm:$0xff] %vm3070_vm3, %v3034_v47  ;;  %3132 = vst.msk [vmem:[#allocation2 + $0x1e8] sm:$0xff] %vm3070_vm3, %v3035_v1  ;;  %v2257_v53 = vadd.f32 %v2034_v18, %v1677_v33  ;;  %v15298_v18 = vrot.slane %v12787_v44, 1 }
 0x34e   : > { %v12920_v16 = vmul.f32 %v11037_v34, %v12215_v52  ;;  %v2616_v61 = vsel %vm2487_vm2, %v2613_v28, %v2615_v13  ;;  %v12927_v32 = vmul.f32 %v11042_v35, %v12215_v52  ;;  %v12931_v25 = vmul.f32 %v11044_v37, %v12215_v52 }
 0x34f   : > { %v2258_v23 = vadd.f32 %v2036_v57, %v1678_v38  ;;  %v1200_v58 = vmul.f32 %v11037_v34, %v12282_v49  ;;  %v2837_v8 = vadd.f32 %v2614_v46, %v2257_v53  ;;  %v3514_v10 = vsel %vm1327_vm0, %v3511_v27, %v3513_v48 }
 0x350   : > { %v1100_v60 = vmul.f32 %v11046_v39, %v12282_v49  ;;  %9076 = vmatmul.mubr.msk.f32.gmra.mrb[22].mxu0 %vm3070_vm3, %v3514_v10  ;;  %v1463_v50 = vrot.slane %v12920_v16, 1  ;;  %v15032_v20 = vrot.slane %v12927_v32, 2  ;;  %v1780_v28 = vmul.f32 %v11042_v35, %v12282_v49 }
 0x351   : > { %v2838_v36 = vadd.f32 %v2616_v61, %v2258_v23  ;;  %v1457_v52 = vrot.slane %v1200_v58, 1  ;;  %v2940_v47 = vadd.f32 %v12661_v3, %v2837_v8  ;;  %v2360_v27 = vmul.f32 %v11044_v37, %v12282_v49 }
 0x352   : > { %v12947_v33 = vmax.f32 %v3220_v6, %v3316_v17  ;;  %v15031_v38 = vrot.slane %v12931_v25, 3  ;;  %v2037_v46 = vrot.slane %v1780_v28, 2  ;;  %v15299_v49 = vrot.slane %v12818_v31, 2  ;;  %v3224_v28 = vld [vmem:[#allocation2 + $0x1b0] ss:$2 sm:$0xff] }
 0x353   : > { %v2941_v1 = vadd.f32 %v12661_v3, %v2838_v36  ;;  %v1458_v59 = vsel %vm1327_vm0, %v15298_v18, %v1457_v52  ;;  %v1460_v57 = vsel %vm1327_vm0, %v1457_v52, %v1459_v12  ;;  %v3036_v53 = vmax.f32 %v2940_v47, 0.0  ;;  %v3222_v36 = vld [vmem:[#allocation2 + $0x1a0] ss:$2 sm:$0xff]  ;;  %v3320_v47 = vld [vmem:[#allocation2 + $0x1b1] ss:$2 sm:$0xff] }
 0x354   : > { %15297 = vst [vmem:[#allocation28_spill] sm:$0xff] %v12947_v33  ;;  %v1679_v61 = vadd.f32 %v1458_v59, %v12801_v41  ;;  %v1680_v58 = vadd.f32 %v1460_v57, %v1100_v60  ;;  %v2038_v6 = vsel %vm1907_vm1, %v15299_v49, %v2037_v46  ;;  %v2040_v44 = vsel %vm1907_vm1, %v2037_v46, %v2039_v5  ;;  %v3318_v60 = vld [vmem:[#allocation2 + $0x1a1] ss:$2 sm:$0xff] }
 0x355   : > { %v3037_v23 = vmax.f32 %v2941_v1, 0.0  ;;  %v2617_v17 = vrot.slane %v2360_v27, 3  ;;  %v3515_v8 = vrot.slane %v12947_v33, 1  ;;  %3133 = vst.msk [vmem:[#allocation2 + $0x1f0] sm:$0xff] %vm3070_vm3, %v3036_v53  ;;  %v12968_v41 = vmul.f32 %v11037_v34, %v12249_v42 }
 0x356   : > { %v2259_v10 = vadd.f32 %v2038_v6, %v1679_v61  ;;  %v2260_v52 = vadd.f32 %v2040_v44, %v1680_v58  ;;  %v12972_v31 = vmul.f32 %v11042_v35, %v12249_v42  ;;  %v12983_v59 = vmul.f32 %v11044_v37, %v12249_v42 }
 0x357   : > { %3134 = vst.msk [vmem:[#allocation2 + $0x1f8] sm:$0xff] %vm3070_vm3, %v3037_v23  ;;  %v2618_v1 = vsel %vm2487_vm2, %v2615_v13, %v2617_v17  ;;  %v2620_v27 = vsel %vm2487_vm2, %v2617_v17, %v2619_v43  ;;  %v3516_v18 = vsel %vm1327_vm0, %v3513_v48, %v3515_v8  ;;  %v3226_v23 = vld [vmem:[#allocation2 + $0x1c0] ss:$2 sm:$0xff]  ;;  %v3322_v13 = vld [vmem:[#allocation2 + $0x1c1] ss:$2 sm:$0xff]  ;;  %v12989_v58 = vmax.f32 %v3222_v36, %v3318_v60 }
 0x358   : > { %v2839_v57 = vadd.f32 %v2618_v1, %v2259_v10  ;;  %v2840_v46 = vadd.f32 %v2620_v27, %v2260_v52  ;;  %9078 = vmatprep.mubr.msk.f32.mxu0 %vm3070_vm3, %v3516_v18  ;;  %v12991_v49 = vmax.f32 %v3224_v28, %v3320_v47  ;;  %v15302_v48 = vld [vmem:[#allocation31_spill] sm:$0xff]  ;;  %v13005_v28 = vmax.f32 %v3226_v23, %v3322_v13 }
 0x359   : > { %15300 = vst [vmem:[#allocation30_spill] sm:$0xff] %v12989_v58  ;;  %v1102_v6 = vmul.f32 %v11046_v39, %v15302_v48  ;;  %v1202_v10 = vmul.f32 %v11037_v34, %v15302_v48  ;;  %v1782_v52 = vmul.f32 %v11042_v35, %v15302_v48  ;;  %v3517_v1 = vrot.slane %v12989_v58, 1 }
 0x35a   : > { %15301 = vst [vmem:[#allocation38_spill] sm:$0xff] %v12991_v49  ;;  %v2942_v44 = vadd.f32 %v12661_v3, %v2839_v57  ;;  %v2943_v17 = vadd.f32 %v12661_v3, %v2840_v46  ;;  %v3519_v36 = vrot.slane %v12991_v49, 1  ;;  %v2362_v60 = vmul.f32 %v11044_v37, %v15302_v48  ;;  %15303 = vst [vmem:[#allocation31_spill] sm:$0xff] %v13005_v28 }
 0x35b   : > { %v1461_v18 = vrot.slane %v1202_v10, 1  ;;  %v2041_v57 = vrot.slane %v1782_v52, 2  ;;  %v3518_v46 = vsel %vm1327_vm0, %v3515_v8, %v3517_v1  ;;  %v3521_v53 = vrot.slane %v13005_v28, 1  ;;  %v3230_v10 = vld [vmem:[#allocation2 + $0x1e0] ss:$2 sm:$0xff] }
 0x35c   : > { %v3038_v47 = vmax.f32 %v2942_v44, 0.0  ;;  %v3039_v27 = vmax.f32 %v2943_v17, 0.0  ;;  %v3520_v61 = vsel %vm1327_vm0, %v3517_v1, %v3519_v36  ;;  %v2621_v2 = vrot.slane %v2362_v60, 3  ;;  %9079 = vmatmul.mubr.msk.f32.gmra.mrb[24].mxu0 %vm3070_vm3, %v3518_v46  ;;  %v3228_v44 = vld [vmem:[#allocation2 + $0x1d0] ss:$2 sm:$0xff] }
 0x35d   : > { %v1462_v23 = vsel %vm1327_vm0, %v1459_v12, %v1461_v18  ;;  %v1464_v13 = vsel %vm1327_vm0, %v1461_v18, %v1463_v50  ;;  %v2042_v8 = vsel %vm1907_vm1, %v2039_v5, %v2041_v57  ;;  %v2044_v48 = vsel %vm1907_vm1, %v2041_v57, %v15032_v20  ;;  %v3324_v17 = vld [vmem:[#allocation2 + $0x1d1] ss:$2 sm:$0xff]  ;;  %9081 = vmatprep.mubr.msk.f32.mxu0 %vm3070_vm3, %v3520_v61  ;;  %v3326_v5 = vld [vmem:[#allocation2 + $0x1e1] ss:$2 sm:$0xff] }
 0x35e   : > { %3135 = vst.msk [vmem:[#allocation2 + $0x200] sm:$0xff] %vm3070_vm3, %v3038_v47  ;;  %3136 = vst.msk [vmem:[#allocation2 + $0x208] sm:$0xff] %vm3070_vm3, %v3039_v27  ;;  %v1681_v62 = vadd.f32 %v1462_v23, %v12856_v11  ;;  %v1682_v12 = vadd.f32 %v1464_v13, %v1102_v6  ;;  %v2622_v52 = vsel %vm2487_vm2, %v2619_v43, %v2621_v2  ;;  %v3232_v1 = vld [vmem:[#allocation2 + $0x1f0] ss:$2 sm:$0xff]  ;;  %v3328_v60 = vld [vmem:[#allocation2 + $0x1f1] ss:$2 sm:$0xff] }
 0x35f   : > { %v2624_v22 = vsel %vm2487_vm2, %v2621_v2, %v15031_v38  ;;  %v3522_v47 = vsel %vm1327_vm0, %v3519_v36, %v3521_v53  ;;  %v1104_v27 = vmul.f32 %v11046_v39, %v12336_v55  ;;  %v1204_v11 = vmul.f32 %v11037_v34, %v12336_v55 }
 0x360   : > { %v1784_v21 = vmul.f32 %v11042_v35, %v12336_v55  ;;  %v2261_v61 = vadd.f32 %v2042_v8, %v1681_v62  ;;  %v2262_v43 = vadd.f32 %v2044_v48, %v1682_v12  ;;  %v2364_v6 = vmul.f32 %v11044_v37, %v12336_v55  ;;  %9082 = vmatmul.mubr.msk.f32.gmra.mrb[26].mxu0 %vm3070_vm3, %v3522_v47  ;;  %v3409_v12 = vld [vmem:[#allocation9] sm:$0xff] }
 0x361   : > { %v13042_v2 = vmax.f32 %v3228_v44, %v3324_v17  ;;  %v1465_v18 = vrot.slane %v1204_v11, 1  ;;  %v13045_v57 = vmax.f32 %v3230_v10, %v3326_v5  ;;  %v13047_v46 = vmax.f32 %v3232_v1, %v3328_v60  ;;  %v3410_v60 = vld [vmem:[#allocation9 + $0x8] sm:$0xff] }
 0x362   : > { %v2045_v36 = vrot.slane %v1784_v21, 2  ;;  %v2841_v23 = vadd.f32 %v2622_v52, %v2261_v61  ;;  %v2842_v13 = vadd.f32 %v2624_v22, %v2262_v43  ;;  %v2625_v38 = vrot.slane %v2364_v6, 3  ;;  %v3411_v6 = vld [vmem:[#allocation9 + $0x10] sm:$0xff] }
 0x363   : > { %15304 = vst [vmem:[#allocation39_spill] sm:$0xff] %v13042_v2  ;;  %15305 = vst [vmem:[#allocation40_spill] sm:$0xff] %v13045_v57  ;;  %v3523_v20 = vrot.slane %v13042_v2, 1  ;;  %v1466_v8 = vsel %vm1327_vm0, %v1463_v50, %v1465_v18  ;;  %v15307_v55 = vrot.slane %v12968_v41, 1  ;;  %v15308_v44 = vrot.slane %v12927_v32, 2 }
 0x364   : > { %15306 = vst [vmem:[#allocation41_spill] sm:$0xff] %v13047_v46  ;;  %v15309_v10 = vrot.slane %v12972_v31, 2  ;;  %v2944_v52 = vadd.f32 %v12661_v3, %v2841_v23  ;;  %v2945_v22 = vadd.f32 %v12661_v3, %v2842_v13  ;;  %v1683_v16 = vadd.f32 %v1466_v8, %v12913_v24 }
 0x365   : > { %v1468_v48 = vsel %vm1327_vm0, %v1465_v18, %v15307_v55  ;;  %v2046_v17 = vsel %vm1907_vm1, %v15308_v44, %v2045_v36  ;;  %v3234_v5 = vld [vmem:[#allocation2 + $0x200] ss:$2 sm:$0xff]  ;;  %v3330_v1 = vld [vmem:[#allocation2 + $0x201] ss:$2 sm:$0xff]  ;;  %v15310_v47 = vrot.slane %v12931_v25, 3  ;;  %v15311_v11 = vrot.slane %v12983_v59, 3 }
 0x366   : > { %v2048_v62 = vsel %vm1907_vm1, %v2045_v36, %v15309_v10  ;;  %v1684_v50 = vadd.f32 %v1468_v48, %v1104_v27  ;;  %v3524_v61 = vsel %vm1327_vm0, %v3521_v53, %v3523_v20  ;;  %v3525_v43 = vrot.slane %v13045_v57, 1  ;;  %v3412_v18 = vld [vmem:[#allocation9 + $0x18] sm:$0xff]  ;;  %v4364_v44 = vld [vmem:[#allocation9 + $0x40] sm:$0xff] }
 0x367   : > { %v2626_v32 = vsel %vm2487_vm2, %v15310_v47, %v2625_v38  ;;  %v2628_v21 = vsel %vm2487_vm2, %v2625_v38, %v15311_v11  ;;  %v3040_v36 = vmax.f32 %v2944_v52, 0.0  ;;  %v3041_v24 = vmax.f32 %v2945_v22, 0.0  ;;  %9084 = vmatprep.mubr.msk.f32.mxu0 %vm3070_vm3, %v3524_v61  ;;  %v15317_v57 = vld [vmem:[#allocation36_spill] sm:$0xff] }
 0x368   : > { %v2263_v27 = vadd.f32 %v2046_v17, %v1683_v16  ;;  %v2264_v23 = vadd.f32 %v2048_v62, %v1684_v50  ;;  %v3526_v25 = vsel %vm1327_vm0, %v3523_v20, %v3525_v43  ;;  %v3527_v13 = vrot.slane %v13047_v46, 1  ;;  %v4365_v17 = vld [vmem:[#allocation9 + $0x48] sm:$0xff] }
 0x369   : > { %v13076_v8 = vmax.f32 %v3234_v5, %v3330_v1  ;;  %v9706_v55 = vpack.c.bf16 %v3410_v60, %v3409_v12  ;;  %3137 = vst.msk [vmem:[#allocation2 + $0x210] sm:$0xff] %vm3070_vm3, %v3040_v36  ;;  %3138 = vst.msk [vmem:[#allocation2 + $0x218] sm:$0xff] %vm3070_vm3, %v3041_v24  ;;  %9085 = vmatmul.mubr.msk.f32.gmra.mrb[28].mxu0 %vm3070_vm3, %v3526_v25  ;;  %v9710_v48 = vpack.c.bf16 %v3412_v18, %v3411_v6  ;;  %v15033_v16 = vmov 0.0   ;;  %v937_v1 = vpop.permute.xlu1 %936  ;;  %v4366_v18 = vld [vmem:[#allocation9 + $0x50] sm:$0xff]  ;;  %v4367_v36 = vld [vmem:[#allocation9 + $0x58] sm:$0xff] }
 0x36a   : > { %v2843_v38 = vadd.f32 %v2626_v32, %v2263_v27  ;;  %v2844_v53 = vadd.f32 %v2628_v21, %v2264_v23  ;;  %v3528_v10 = vsel %vm1327_vm0, %v3525_v43, %v3527_v13  ;;  %v13087_v22 = vpack.c.bf16 %v4365_v17, %v4364_v44  ;;  %3169 = vst.msk [vmem:[#allocation2 + $0x2fd] sm:$0x7] %vm3168_vm4, %v15033_v16  ;;  %v4913_v24 = vld [vmem:[#allocation9 + $0x60] sm:$0xff] }
 0x36b   : > { %15312 = vst [vmem:[#allocation42_spill] sm:$0xff] %v13076_v8  ;;  %v3529_v20 = vrot.slane %v13076_v8, 1  ;;  %9707 = vmatprep.subr.bf16.mxu0 %v9706_v55  ;;  %9087 = vmatprep.mubr.msk.f32.mxu0 %vm3070_vm3, %v3528_v10  ;;  %v13099_v43 = vmul.f32 %v11037_v34, %v937_v1  ;;  %v13102_v6 = vmul.f32 %v11042_v35, %v937_v1  ;;  %v15321_v28 = vrot.slane %v12972_v31, 2 }
 0x36c   : > { %v2946_v62 = vadd.f32 %v12661_v3, %v2843_v38  ;;  %v2947_v12 = vadd.f32 %v12661_v3, %v2844_v53  ;;  %9709 = vmatpush3.bf16.msra.mxu0 %v9706_v55  ;;  %v13106_v25 = vmul.f32 %v11044_v37, %v937_v1  ;;  %v4914_v55 = vld [vmem:[#allocation9 + $0x68] sm:$0xff]  ;;  %v1105_v38 = vmul.f32 %v11046_v39, %v12249_v42 }
 0x36d   : > { %v3530_v52 = vsel %vm1327_vm0, %v3527_v13, %v3529_v20  ;;  %9711 = vmatprep.subr.bf16.mxu0 %v9710_v48  ;;  %v945_v21 = vpop.permute.xlu1 %944  ;;  %v13122_v10 = vmul.f32 %v11046_v39, %v937_v1 }
 0x36e   : > { %v3042_v50 = vmax.f32 %v2946_v62, 0.0  ;;  %v3043_v5 = vmax.f32 %v2947_v12, 0.0  ;;  %9088 = vmatmul.mubr.msk.f32.gmra.mrb[30].mxu0 %vm3070_vm3, %v3530_v52  ;;  %v13109_v13 = vmul.f32 %v11037_v34, %v945_v21  ;;  %v13119_v44 = vmul.f32 %v11044_v37, %v945_v21  ;;  %v15318_v52 = vld [vmem:[#allocation37_spill] sm:$0xff] }
 0x36f   : > { %v13130_v12 = vpack.c.bf16 %v4367_v36, %v4366_v18  ;;  %v13139_v1 = vmul.f32 %v11046_v39, %v945_v21  ;;  %v15333_v33 = vrot.slane %v13106_v25, 3 }
 0x370   : > { %3139 = vst.msk [vmem:[#allocation2 + $0x220] sm:$0xff] %vm3070_vm3, %v3042_v50  ;;  %3140 = vst.msk [vmem:[#allocation2 + $0x228] sm:$0xff] %vm3070_vm3, %v3043_v5  ;;  %9713 = vmatpush3.bf16.msra.mxu0 %v9710_v48  ;;  %v3236_v60 = vld [vmem:[#allocation2 + $0x210] ss:$2 sm:$0xff]  ;;  %v3332_v47 = vld [vmem:[#allocation2 + $0x211] ss:$2 sm:$0xff]  ;;  %v13116_v48 = vmul.f32 %v11042_v35, %v945_v21  ;;  %v13135_v5 = vpack.c.bf16 %v4914_v55, %v4913_v24 }
 0x371   : > { %9715 = vmatprep.subr.bf16.mxu0 %v13087_v22  ;;  %v13094_v32 = vmax.f32 %v3236_v60, %v3332_v47  ;;  %v953_v17 = vpop.permute.xlu1 %952  ;;  %v15320_v60 = vrot.slane %v13099_v43, 1 }
 0x372   : > { %v13128_v62 = vmul.f32 %v11042_v35, %v953_v17  ;;  %15315 = vst [vmem:[#allocation45_spill] sm:$0xff] %v13135_v5  ;;  %v13151_v24 = vmul.f32 %v11046_v39, %v953_v17 }
 0x373   : > { %15313 = vst [vmem:[#allocation43_spill] sm:$0xff] %v13094_v32  ;;  %v3531_v11 = vrot.slane %v13094_v32, 1 }
 0x375   : > { %v3532_v61 = vsel %vm1327_vm0, %v3529_v20, %v3531_v11  ;;  %v13125_v20 = vmul.f32 %v11037_v34, %v953_v17 }
 0x376   : > { %9090 = vmatprep.mubr.msk.f32.mxu0 %vm3070_vm3, %v3532_v61  ;;  %v13143_v61 = vmul.f32 %v11044_v37, %v953_v17 }
 0x377   : > { %v3238_v27 = vld [vmem:[#allocation2 + $0x220] ss:$2 sm:$0xff]  ;;  %v3334_v23 = vld [vmem:[#allocation2 + $0x221] ss:$2 sm:$0xff] }
 0x378   : > { %v13113_v53 = vmax.f32 %v3238_v27, %v3334_v23  ;;  %v961_v23 = vpop.permute.xlu1 %960 }
 0x379   : > { %v13157_v16 = vmul.f32 %v11037_v34, %v961_v23  ;;  %v13160_v47 = vmul.f32 %v11042_v35, %v961_v23  ;;  %v13165_v17 = vmul.f32 %v11044_v37, %v961_v23  ;;  %v13172_v36 = vmul.f32 %v11046_v39, %v961_v23 }
 0x37a   : > { %15314 = vst [vmem:[#allocation44_spill] sm:$0xff] %v13113_v53  ;;  %v15035_v42 = vrot.slane %v13113_v53, 1 }
 0x37c   : > { %v3534_v18 = vsel %vm1327_vm0, %v3531_v11, %v15035_v42  ;;  %v933_v11 = vpop.permute.xlu0 %932  ;;  %v15316_v42 = vld [vmem:[#allocation35_spill] sm:$0xff]  ;;  %v969_v46 = vpop.permute.xlu1 %968 }
 0x37d   : > { %9091 = vmatmul.mubr.msk.f32.gmra.mrb[32].mxu0 %vm3070_vm3, %v3534_v18  ;;  %v1206_v27 = vmul.f32 %v11037_v34, %v933_v11  ;;  %v1786_v18 = vmul.f32 %v11042_v35, %v933_v11  ;;  %v2366_v21 = vmul.f32 %v11044_v37, %v933_v11  ;;  %v1106_v50 = vmul.f32 %v11046_v39, %v933_v11 }
 0x37e   : > { %9122 = vmatprep.mubr.msk.f32.mxu0 %vm3070_vm3, %v15316_v42  ;;  %v13180_v2 = vmul.f32 %v11046_v39, %v969_v46  ;;  %v13183_v55 = vmul.f32 %v11037_v34, %v969_v46  ;;  %v13186_v23 = vmul.f32 %v11042_v35, %v969_v46  ;;  %v13189_v11 = vmul.f32 %v11044_v37, %v969_v46 }
 0x37f   : > { %v1469_v42 = vrot.slane %v1206_v27, 1  ;;  %v2049_v32 = vrot.slane %v1786_v18, 2  ;;  %v2629_v8 = vrot.slane %v2366_v21, 3  ;;  %v15319_v21 = vrot.slane %v12968_v41, 1 }
 0x380   : > { %v941_v53 = vpop.permute.xlu0 %940  ;;  %v15323_v27 = vrot.slane %v12983_v59, 3 }
 0x381   : > { %9123 = vmatmul.mubr.msk.f32.vlgmr.msra.gmra.mrb[0].mxu0 %vm3070_vm3, %v15317_v57  ;;  %v1470_v18 = vsel %vm1327_vm0, %v15319_v21, %v1469_v42  ;;  %v1472_v57 = vsel %vm1327_vm0, %v1469_v42, %v15320_v60  ;;  %v2050_v46 = vsel %vm1907_vm1, %v15321_v28, %v2049_v32  ;;  %v15324_v21 = vrot.slane %v13106_v25, 3 }
 0x382   : > { %9125 = vmatprep.mubr.msk.f32.mxu0 %vm3070_vm3, %v15318_v52  ;;  %9717 = vmatpush3.bf16.msra.mxu0 %v13087_v22  ;;  %v1685_v49 = vadd.f32 %v1470_v18, %v1105_v38  ;;  %v1686_v58 = vadd.f32 %v1472_v57, %v1106_v50  ;;  %v15322_v52 = vrot.slane %v13102_v6, 2  ;;  %v2630_v41 = vsel %vm2487_vm2, %v15323_v27, %v2629_v8  ;;  %v977_v38 = vpop.permute.xlu1 %976  ;;  %v15325_v50 = vld [vmem:[#allocation24_spill] sm:$0xff] }
 0x383   : > { %9719 = vmatprep.subr.bf16.mxu0 %v13130_v12  ;;  %v2632_v42 = vsel %vm2487_vm2, %v2629_v8, %v15324_v21  ;;  %v1208_v60 = vmul.f32 %v11037_v34, %v941_v53  ;;  %v15326_v27 = vld [vmem:[#allocation20_spill] sm:$0xff]  ;;  %v1788_v8 = vmul.f32 %v11042_v35, %v941_v53  ;;  %v2368_v18 = vmul.f32 %v11044_v37, %v941_v53 }
 0x384   : > { %v2052_v22 = vsel %vm1907_vm1, %v2049_v32, %v15322_v52  ;;  %v2265_v32 = vadd.f32 %v2050_v46, %v1685_v49  ;;  %v1108_v52 = vmul.f32 %v11046_v39, %v941_v53  ;;  %v13226_v21 = vmul.f32 %v11046_v39, %v977_v38 }
 0x385   : > { %9126 = vmatmul.mubr.msk.f32.gmra.mrb[2].mxu0 %vm3070_vm3, %v15325_v50  ;;  %v2266_v59 = vadd.f32 %v2052_v22, %v1686_v58  ;;  %v13229_v57 = vmul.f32 %v11037_v34, %v977_v38  ;;  %v1473_v58 = vrot.slane %v1208_v60, 1  ;;  %v13232_v46 = vmul.f32 %v11042_v35, %v977_v38  ;;  %v15327_v50 = vld [vmem:[#allocation26_spill] sm:$0xff] }
 0x386   : > { %9128 = vmatprep.mubr.msk.f32.mxu0 %vm3070_vm3, %v15326_v27  ;;  %v2845_v28 = vadd.f32 %v2630_v41, %v2265_v32  ;;  %9721 = vmatpush3.bf16.msra.mxu0 %v13130_v12  ;;  %v2053_v22 = vrot.slane %v1788_v8, 2  ;;  %v2633_v31 = vrot.slane %v2368_v18, 3  ;;  %v13237_v53 = vmul.f32 %v11044_v37, %v977_v38  ;;  %v15330_v8 = vld [vmem:[#allocation29_spill] sm:$0xff] }
 0x387   : > { %v2846_v49 = vadd.f32 %v2632_v42, %v2266_v59  ;;  %9723 = vmatprep.subr.bf16.mxu0 %v13135_v5  ;;  %v15328_v32 = vrot.slane %v13099_v43, 1  ;;  %v15329_v59 = vrot.slane %v13109_v13, 1  ;;  %v15331_v27 = vrot.slane %v13102_v6, 2  ;;  %v949_v5 = vpop.permute.xlu0 %948 }
 0x388   : > { %v2948_v41 = vadd.f32 %v12661_v3, %v2845_v28  ;;  %v1210_v25 = vmul.f32 %v11037_v34, %v949_v5 }
 0x389   : > { %9129 = vmatmul.mubr.msk.f32.gmra.mrb[4].mxu0 %vm3070_vm3, %v15327_v50  ;;  %v2949_v42 = vadd.f32 %v12661_v3, %v2846_v49  ;;  %v1474_v12 = vsel %vm1327_vm0, %v15328_v32, %v1473_v58  ;;  %v1476_v60 = vsel %vm1327_vm0, %v1473_v58, %v15329_v59  ;;  %v2054_v28 = vsel %vm1907_vm1, %v15331_v27, %v2053_v22 }
 0x38a   : > { %9131 = vmatprep.mubr.msk.f32.mxu0 %vm3070_vm3, %v15330_v8  ;;  %v1687_v38 = vadd.f32 %v1474_v12, %v13122_v10  ;;  %v1688_v18 = vadd.f32 %v1476_v60, %v1108_v52  ;;  %v15332_v49 = vrot.slane %v13116_v48, 2  ;;  %v3044_v32 = vmax.f32 %v2948_v41, 0.0  ;;  %v985_v52 = vpop.permute.xlu1 %984  ;;  %v15335_v8 = vld [vmem:[#allocation21_spill] sm:$0xff]  ;;  %v15336_v41 = vld [vmem:[#allocation22_spill] sm:$0xff] }
 0x38b   : > { %v3045_v50 = vmax.f32 %v2949_v42, 0.0  ;;  %v2634_v58 = vsel %vm2487_vm2, %v15333_v33, %v2633_v31  ;;  %v15334_v59 = vrot.slane %v13119_v44, 3  ;;  %v1110_v33 = vmul.f32 %v11046_v39, %v949_v5 }
 0x38c   : > { %v2056_v43 = vsel %vm1907_vm1, %v2053_v22, %v15332_v49  ;;  %v2267_v12 = vadd.f32 %v2054_v28, %v1687_v38  ;;  %3141 = vst.msk [vmem:[#allocation2 + $0x230] sm:$0xff] %vm3070_vm3, %v3044_v32  ;;  %v2370_v22 = vmul.f32 %v11044_v37, %v949_v5  ;;  %v13281_v28 = vmul.f32 %v11037_v34, %v985_v52 }
 0x38d   : > { %v2636_v10 = vsel %vm2487_vm2, %v2633_v31, %v15334_v59  ;;  %v2268_v6 = vadd.f32 %v2056_v43, %v1688_v18  ;;  %9132 = vmatmul.mubr.msk.f32.gmra.mrb[6].mxu0 %vm3070_vm3, %v15335_v8  ;;  %3142 = vst.msk [vmem:[#allocation2 + $0x238] sm:$0xff] %vm3070_vm3, %v3045_v50  ;;  %v1790_v31 = vmul.f32 %v11042_v35, %v949_v5  ;;  %v1477_v50 = vrot.slane %v1210_v25, 1 }
 0x38e   : > { %9134 = vmatprep.mubr.msk.f32.mxu0 %vm3070_vm3, %v15336_v41  ;;  %v2847_v42 = vadd.f32 %v2634_v58, %v2267_v12  ;;  %v13278_v18 = vmul.f32 %v11046_v39, %v985_v52  ;;  %v2637_v43 = vrot.slane %v2370_v22, 3  ;;  %v13284_v32 = vmul.f32 %v11042_v35, %v985_v52  ;;  %v993_v27 = vpop.permute.xlu1 %992 }
 0x38f   : > { %v2848_v38 = vadd.f32 %v2636_v10, %v2268_v6  ;;  %v2057_v49 = vrot.slane %v1790_v31, 2  ;;  %v13290_v58 = vmul.f32 %v11044_v37, %v985_v52  ;;  %v15337_v10 = vrot.slane %v13109_v13, 1 }
 0x390   : > { %v2950_v59 = vadd.f32 %v12661_v3, %v2847_v42  ;;  %v15338_v6 = vrot.slane %v13125_v20, 1  ;;  %v15339_v31 = vrot.slane %v13116_v48, 2  ;;  %v15340_v22 = vrot.slane %v13128_v62, 2  ;;  %v957_v42 = vpop.permute.xlu0 %956 }
 0x391   : > { %v2951_v5 = vadd.f32 %v12661_v3, %v2848_v38  ;;  %9135 = vmatmul.mubr.msk.f32.gmra.mrb[8].mxu0 %vm3070_vm3, %v12182_v4  ;;  %v1478_v12 = vsel %vm1327_vm0, %v15337_v10, %v1477_v50 }
 0x392   : > { %v1480_v25 = vsel %vm1327_vm0, %v1477_v50, %v15338_v6  ;;  %v2058_v3 = vsel %vm1907_vm1, %v15339_v31, %v2057_v49  ;;  %v2060_v52 = vsel %vm1907_vm1, %v2057_v49, %v15340_v22  ;;  %9137 = vmatprep.mubr.msk.f32.mxu0 %vm3070_vm3, %v12304_v0  ;;  %v3046_v38 = vmax.f32 %v2950_v59, 0.0 }
 0x393   : > { %v3047_v13 = vmax.f32 %v2951_v5, 0.0  ;;  %v1689_v10 = vadd.f32 %v1478_v12, %v13139_v1  ;;  %v1690_v60 = vadd.f32 %v1480_v25, %v1110_v33  ;;  %v15341_v50 = vrot.slane %v13119_v44, 3 }
 0x394   : > { %v15342_v6 = vrot.slane %v13143_v61, 3  ;;  %3143 = vst.msk [vmem:[#allocation2 + $0x240] sm:$0xff] %vm3070_vm3, %v3046_v38  ;;  %v1112_v33 = vmul.f32 %v11046_v39, %v957_v42  ;;  %v1212_v44 = vmul.f32 %v11037_v34, %v957_v42  ;;  %v1792_v5 = vmul.f32 %v11042_v35, %v957_v42 }
 0x395   : > { %v2638_v48 = vsel %vm2487_vm2, %v15341_v50, %v2637_v43  ;;  %3144 = vst.msk [vmem:[#allocation2 + $0x248] sm:$0xff] %vm3070_vm3, %v3047_v13  ;;  %v2269_v59 = vadd.f32 %v2058_v3, %v1689_v10  ;;  %v2270_v1 = vadd.f32 %v2060_v52, %v1690_v60  ;;  %9138 = vmatmul.mubr.msk.f32.gmra.mrb[10].mxu0 %vm3070_vm3, %v12467_v29  ;;  %v965_v50 = vpop.permute.xlu0 %964 }
 0x396   : > { %v2640_v31 = vsel %vm2487_vm2, %v2637_v43, %v15342_v6  ;;  %v2372_v43 = vmul.f32 %v11044_v37, %v957_v42  ;;  %v13326_v12 = vmul.f32 %v11046_v39, %v993_v27  ;;  %v13329_v25 = vmul.f32 %v11037_v34, %v993_v27  ;;  %9140 = vmatprep.mubr.msk.f32.mxu0 %vm3070_vm3, %v12469_v30  ;;  %v13343_v6 = vld [vmem:[%s14962_s2] ss:$0 sm:$0xff] }
 0x397   : > { %v2849_v60 = vadd.f32 %v2638_v48, %v2269_v59  ;;  %v2850_v3 = vadd.f32 %v2640_v31, %v2270_v1  ;;  %v1481_v52 = vrot.slane %v1212_v44, 1  ;;  %v13334_v38 = vmul.f32 %v11042_v35, %v993_v27 }
 0x398   : > { %v2061_v13 = vrot.slane %v1792_v5, 2  ;;  %v2641_v10 = vrot.slane %v2372_v43, 3  ;;  %v13338_v42 = vmul.f32 %v11044_v37, %v993_v27  ;;  %v15343_v31 = vrot.slane %v13125_v20, 1 }
 0x399   : > { %v2952_v22 = vadd.f32 %v13343_v6, %v2849_v60  ;;  %v2953_v48 = vadd.f32 %v13343_v6, %v2850_v3  ;;  %v15344_v1 = vrot.slane %v13157_v16, 1  ;;  %9141 = vmatmul.mubr.msk.f32.gmra.mrb[12].mxu0 %vm3070_vm3, %v12476_v15  ;;  %v15345_v43 = vrot.slane %v13128_v62, 2 }
 0x39a   : > { %v1482_v59 = vsel %vm1327_vm0, %v15343_v31, %v1481_v52  ;;  %v15346_v3 = vrot.slane %v13160_v47, 2  ;;  %9143 = vmatprep.mubr.msk.f32.mxu0 %vm3070_vm3, %v12538_v51 }
 0x39b   : > { %v1484_v44 = vsel %vm1327_vm0, %v1481_v52, %v15344_v1  ;;  %v1691_v27 = vadd.f32 %v1482_v59, %v13151_v24  ;;  %v2062_v60 = vsel %vm1907_vm1, %v15345_v43, %v2061_v13  ;;  %v3048_v31 = vmax.f32 %v2952_v22, 0.0 }
 0x39c   : > { %v1692_v5 = vadd.f32 %v1484_v44, %v1112_v33  ;;  %v2064_v20 = vsel %vm1907_vm1, %v2061_v13, %v15346_v3  ;;  %v3049_v52 = vmax.f32 %v2953_v48, 0.0  ;;  %v15347_v1 = vrot.slane %v13143_v61, 3  ;;  %v1001_v33 = vpop.permute.xlu1 %1000 }
 0x39d   : > { %v15348_v24 = vrot.slane %v13165_v17, 3  ;;  %v2271_v59 = vadd.f32 %v2062_v60, %v1691_v27  ;;  %3145 = vst.msk [vmem:[#allocation2 + $0x250] sm:$0xff] %vm3070_vm3, %v3048_v31  ;;  %v1114_v22 = vmul.f32 %v11046_v39, %v965_v50  ;;  %v1214_v61 = vmul.f32 %v11037_v34, %v965_v50  ;;  %9144 = vmatmul.mubr.msk.f32.gmra.mrb[14].mxu0 %vm3070_vm3, %v12540_v14 }
 0x39e   : > { %v2642_v49 = vsel %vm2487_vm2, %v15347_v1, %v2641_v10  ;;  %v2272_v44 = vadd.f32 %v2064_v20, %v1692_v5  ;;  %3146 = vst.msk [vmem:[#allocation2 + $0x258] sm:$0xff] %vm3070_vm3, %v3049_v52  ;;  %v1794_v48 = vmul.f32 %v11042_v35, %v965_v50  ;;  %v2374_v3 = vmul.f32 %v11044_v37, %v965_v50 }
 0x39f   : > { %v2644_v62 = vsel %vm2487_vm2, %v2641_v10, %v15348_v24  ;;  %v2851_v10 = vadd.f32 %v2642_v49, %v2271_v59  ;;  %v13381_v5 = vmul.f32 %v11046_v39, %v1001_v33  ;;  %v13384_v60 = vmul.f32 %v11037_v34, %v1001_v33  ;;  %9146 = vmatprep.mubr.msk.f32.mxu0 %vm3070_vm3, %v12596_v9  ;;  %v973_v24 = vpop.permute.xlu0 %972 }
 0x3a0   : > { %v2852_v27 = vadd.f32 %v2644_v62, %v2272_v44  ;;  %v1485_v20 = vrot.slane %v1214_v61, 1  ;;  %v2065_v31 = vrot.slane %v1794_v48, 2  ;;  %v2645_v52 = vrot.slane %v2374_v3, 3  ;;  %v1009_v9 = vpop.permute.xlu1 %1008 }
 0x3a1   : > { %v13389_v1 = vmul.f32 %v11042_v35, %v1001_v33  ;;  %v2954_v50 = vadd.f32 %v13343_v6, %v2851_v10  ;;  %v13395_v62 = vmul.f32 %v11044_v37, %v1001_v33  ;;  %v15349_v59 = vrot.slane %v13157_v16, 1  ;;  %9147 = vmatmul.mubr.msk.f32.gmra.mrb[16].mxu0 %vm3070_vm3, %v12600_v63 }
 0x3a2   : > { %v2955_v49 = vadd.f32 %v13343_v6, %v2852_v27  ;;  %v15350_v61 = vrot.slane %v13183_v55, 1  ;;  %v15351_v3 = vrot.slane %v13160_v47, 2  ;;  %v15352_v10 = vrot.slane %v13186_v23, 2  ;;  %9149 = vmatprep.mubr.msk.f32.mxu0 %vm3070_vm3, %v12656_v7 }
 0x3a3   : > { %v1486_v44 = vsel %vm1327_vm0, %v15349_v59, %v1485_v20  ;;  %v3050_v33 = vmax.f32 %v2954_v50, 0.0  ;;  %v15353_v47 = vrot.slane %v13165_v17, 3  ;;  %v1216_v17 = vmul.f32 %v11037_v34, %v973_v24 }
 0x3a4   : > { %v1488_v48 = vsel %vm1327_vm0, %v1485_v20, %v15350_v61  ;;  %v2066_v13 = vsel %vm1907_vm1, %v15351_v3, %v2065_v31  ;;  %v2068_v27 = vsel %vm1907_vm1, %v2065_v31, %v15352_v10  ;;  %v3051_v16 = vmax.f32 %v2955_v49, 0.0 }
 0x3a5   : > { %v1693_v59 = vadd.f32 %v1486_v44, %v13172_v36  ;;  %v1694_v43 = vadd.f32 %v1488_v48, %v1114_v22  ;;  %v2646_v20 = vsel %vm2487_vm2, %v15353_v47, %v2645_v52  ;;  %v15354_v61 = vrot.slane %v13189_v11, 3  ;;  %3147 = vst.msk [vmem:[#allocation2 + $0x260] sm:$0xff] %vm3070_vm3, %v3050_v33  ;;  %9150 = vmatmul.mubr.msk.f32.gmra.mrb[18].mxu0 %vm3070_vm3, %v12665_v45 }
 0x3a6   : > { %3148 = vst.msk [vmem:[#allocation2 + $0x268] sm:$0xff] %vm3070_vm3, %v3051_v16  ;;  %v1116_v49 = vmul.f32 %v11046_v39, %v973_v24  ;;  %v1796_v44 = vmul.f32 %v11042_v35, %v973_v24  ;;  %v2376_v48 = vmul.f32 %v11044_v37, %v973_v24  ;;  %v13432_v10 = vmul.f32 %v11037_v34, %v1009_v9 }
 0x3a7   : > { %v2648_v31 = vsel %vm2487_vm2, %v2645_v52, %v15354_v61  ;;  %v2273_v36 = vadd.f32 %v2066_v13, %v1693_v59  ;;  %v2274_v22 = vadd.f32 %v2068_v27, %v1694_v43  ;;  %v13429_v52 = vmul.f32 %v11046_v39, %v1009_v9  ;;  %9152 = vmatprep.mubr.msk.f32.mxu0 %vm3070_vm3, %v12723_v19 }
 0x3a8   : > { %v1489_v43 = vrot.slane %v1216_v17, 1  ;;  %v13437_v27 = vmul.f32 %v11042_v35, %v1009_v9  ;;  %v2069_v16 = vrot.slane %v1796_v44, 2  ;;  %v2649_v24 = vrot.slane %v2376_v48, 3 }
 0x3a9   : > { %v2853_v33 = vadd.f32 %v2646_v20, %v2273_v36  ;;  %v2854_v13 = vadd.f32 %v2648_v31, %v2274_v22  ;;  %v13443_v47 = vmul.f32 %v11044_v37, %v1009_v9  ;;  %v15355_v20 = vrot.slane %v13183_v55, 1  ;;  %9153 = vmatmul.mubr.msk.f32.gmra.mrb[20].mxu0 %vm3070_vm3, %v12725_v54  ;;  %v15372_v54 = vld [vmem:[#allocation31_spill] sm:$0xff] }
 0x3aa   : > { %v15356_v36 = vrot.slane %v13229_v57, 1  ;;  %v15357_v48 = vrot.slane %v13186_v23, 2  ;;  %v15358_v59 = vrot.slane %v13232_v46, 2  ;;  %v15359_v3 = vrot.slane %v13189_v11, 3  ;;  %9155 = vmatprep.mubr.msk.f32.mxu0 %vm3070_vm3, %v12781_v56 }
 0x3ab   : > { %v2956_v61 = vadd.f32 %v13343_v6, %v2853_v33  ;;  %v2957_v50 = vadd.f32 %v13343_v6, %v2854_v13  ;;  %v1490_v31 = vsel %vm1327_vm0, %v15355_v20, %v1489_v43  ;;  %v981_v13 = vpop.permute.xlu0 %980 }
 0x3ac   : > { %v1492_v22 = vsel %vm1327_vm0, %v1489_v43, %v15356_v36  ;;  %v1695_v17 = vadd.f32 %v1490_v31, %v13180_v2  ;;  %v2070_v9 = vsel %vm1907_vm1, %v15357_v48, %v2069_v16  ;;  %v2072_v33 = vsel %vm1907_vm1, %v2069_v16, %v15358_v59  ;;  %v3336_v31 = vld [vmem:[#allocation2 + $0x231] ss:$2 sm:$0xff]  ;;  %v1017_v36 = vpop.permute.xlu1 %1016 }
 0x3ad   : > { %v1696_v44 = vadd.f32 %v1492_v22, %v1116_v49  ;;  %v3052_v55 = vmax.f32 %v2956_v61, 0.0  ;;  %v3053_v20 = vmax.f32 %v2957_v50, 0.0  ;;  %v2650_v43 = vsel %vm2487_vm2, %v15359_v3, %v2649_v24  ;;  %v3240_v49 = vld [vmem:[#allocation2 + $0x230] ss:$2 sm:$0xff]  ;;  %9156 = vmatmul.mubr.msk.f32.gmra.mrb[22].mxu0 %vm3070_vm3, %v12836_v26 }
 0x3ae   : > { %v15360_v2 = vrot.slane %v13237_v53, 3  ;;  %v2275_v16 = vadd.f32 %v2070_v9, %v1695_v17  ;;  %v1118_v11 = vmul.f32 %v11046_v39, %v981_v13  ;;  %v1218_v3 = vmul.f32 %v11037_v34, %v981_v13  ;;  %9158 = vmatprep.mubr.msk.f32.mxu0 %vm3070_vm3, %v12892_v40  ;;  %v15365_v26 = vld [vmem:[#allocation28_spill] sm:$0xff] }
 0x3af   : > { %v2276_v59 = vadd.f32 %v2072_v33, %v1696_v44  ;;  %3149 = vst.msk [vmem:[#allocation2 + $0x270] sm:$0xff] %vm3070_vm3, %v3052_v55  ;;  %3150 = vst.msk [vmem:[#allocation2 + $0x278] sm:$0xff] %vm3070_vm3, %v3053_v20  ;;  %v2378_v61 = vmul.f32 %v11044_v37, %v981_v13  ;;  %v13478_v17 = vmax.f32 %v3240_v49, %v3336_v31  ;;  %v15361_v31 = vrot.slane %v13229_v57, 1  ;;  %v989_v50 = vpop.permute.xlu0 %988 }
 0x3b0   : > { %v2652_v23 = vsel %vm2487_vm2, %v2649_v24, %v15360_v2  ;;  %v1798_v24 = vmul.f32 %v11042_v35, %v981_v13  ;;  %v2855_v48 = vadd.f32 %v2650_v43, %v2275_v16  ;;  %v13481_v44 = vmul.f32 %v11046_v39, %v1017_v36 }
 0x3b1   : > { %v2856_v2 = vadd.f32 %v2652_v23, %v2276_v59  ;;  %v1493_v9 = vrot.slane %v1218_v3, 1  ;;  %v2653_v55 = vrot.slane %v2378_v61, 3  ;;  %v13486_v20 = vmul.f32 %v11037_v34, %v1017_v36  ;;  %9159 = vmatmul.mubr.msk.f32.gmra.mrb[24].mxu0 %vm3070_vm3, %v15365_v26 }
 0x3b2   : > { %v2073_v33 = vrot.slane %v1798_v24, 2  ;;  %v2958_v13 = vadd.f32 %v13343_v6, %v2855_v48  ;;  %v13493_v23 = vmul.f32 %v11042_v35, %v1017_v36  ;;  %v13496_v49 = vmul.f32 %v11044_v37, %v1017_v36 }
 0x3b3   : > { %v2959_v43 = vadd.f32 %v13343_v6, %v2856_v2  ;;  %v1494_v16 = vsel %vm1327_vm0, %v15361_v31, %v1493_v9  ;;  %v15362_v59 = vrot.slane %v13281_v28, 1  ;;  %v15363_v24 = vrot.slane %v13232_v46, 2 }
 0x3b4   : > { %v15364_v48 = vrot.slane %v13284_v32, 2  ;;  %v3054_v22 = vmax.f32 %v2958_v13, 0.0  ;;  %v1697_v40 = vadd.f32 %v1494_v16, %v13226_v21  ;;  %v15366_v31 = vrot.slane %v13237_v53, 3  ;;  %v3242_v13 = vld [vmem:[#allocation2 + $0x240] ss:$2 sm:$0xff] }
 0x3b5   : > { %v1496_v3 = vsel %vm1327_vm0, %v1493_v9, %v15362_v59  ;;  %v2074_v61 = vsel %vm1907_vm1, %v15363_v24, %v2073_v33  ;;  %v3055_v36 = vmax.f32 %v2959_v43, 0.0  ;;  %v15367_v46 = vrot.slane %v13290_v58, 3  ;;  %v3338_v43 = vld [vmem:[#allocation2 + $0x241] ss:$2 sm:$0xff] }
 0x3b6   : > { %v2076_v2 = vsel %vm1907_vm1, %v2073_v33, %v15364_v48  ;;  %v1698_v57 = vadd.f32 %v1496_v3, %v1118_v11  ;;  %v2654_v9 = vsel %vm2487_vm2, %v15366_v31, %v2653_v55  ;;  %v1025_v48 = vpop.permute.xlu1 %1024  ;;  %v15368_v21 = vld [vmem:[#allocation30_spill] sm:$0xff]  ;;  %3151 = vst.msk [vmem:[#allocation2 + $0x280] sm:$0xff] %vm3070_vm3, %v3054_v22  ;;  %v2277_v53 = vadd.f32 %v2074_v61, %v1697_v40 }
 0x3b7   : > { %v2656_v59 = vsel %vm2487_vm2, %v2653_v55, %v15367_v46  ;;  %9161 = vmatprep.mubr.msk.f32.mxu0 %vm3070_vm3, %v15368_v21  ;;  %3152 = vst.msk [vmem:[#allocation2 + $0x288] sm:$0xff] %vm3070_vm3, %v3055_v36  ;;  %v1120_v55 = vmul.f32 %v11046_v39, %v989_v50  ;;  %v1220_v3 = vmul.f32 %v11037_v34, %v989_v50  ;;  %v3535_v33 = vrot.slane %v13478_v17, 1  ;;  %v15369_v40 = vld [vmem:[#allocation38_spill] sm:$0xff] }
 0x3b8   : > { %v2278_v11 = vadd.f32 %v2076_v2, %v1698_v57  ;;  %v1800_v31 = vmul.f32 %v11042_v35, %v989_v50  ;;  %v2380_v46 = vmul.f32 %v11044_v37, %v989_v50  ;;  %v2857_v24 = vadd.f32 %v2654_v9, %v2277_v53  ;;  %9162 = vmatmul.mubr.msk.f32.gmra.mrb[26].mxu0 %vm3070_vm3, %v15369_v40  ;;  %v15370_v57 = vld [vmem:[#allocation44_spill] sm:$0xff]  ;;  %v997_v50 = vpop.permute.xlu0 %996 }
 0x3b9   : > { %v13531_v26 = vmax.f32 %v3242_v13, %v3338_v43  ;;  %v13534_v22 = vmul.f32 %v11046_v39, %v1025_v48  ;;  %v1497_v61 = vrot.slane %v1220_v3, 1  ;;  %v15371_v16 = vrot.slane %v15370_v57, 1  ;;  %9164 = vmatprep.mubr.msk.f32.mxu0 %vm3070_vm3, %v15372_v54 }
 0x3ba   : > { %v2858_v21 = vadd.f32 %v2656_v59, %v2278_v11  ;;  %v2077_v2 = vrot.slane %v1800_v31, 2  ;;  %v2657_v36 = vrot.slane %v2380_v46, 3  ;;  %v2960_v9 = vadd.f32 %v13343_v6, %v2857_v24 }
 0x3bb   : > { %v3536_v56 = vsel %vm1327_vm0, %v15371_v16, %v3535_v33  ;;  %v13547_v13 = vmul.f32 %v11037_v34, %v1025_v48  ;;  %v15373_v53 = vrot.slane %v13281_v28, 1  ;;  %v15374_v16 = vrot.slane %v13329_v25, 1  ;;  %v15377_v28 = vld [vmem:[#allocation39_spill] sm:$0xff] }
 0x3bc   : > { %v2961_v59 = vadd.f32 %v13343_v6, %v2858_v21  ;;  %9093 = vmatprep.mubr.msk.f32.mxu1 %vm3070_vm3, %v3536_v56  ;;  %v15375_v31 = vrot.slane %v13284_v32, 2  ;;  %v15376_v21 = vrot.slane %v13334_v38, 2  ;;  %v3056_v46 = vmax.f32 %v2960_v9, 0.0  ;;  %9165 = vmatmul.mubr.msk.f32.gmra.mrb[28].mxu0 %vm3070_vm3, %v15377_v28  ;;  %v15380_v9 = vld [vmem:[#allocation40_spill] sm:$0xff] }
 0x3bd   : > { %v1498_v11 = vsel %vm1327_vm0, %v15373_v53, %v1497_v61  ;;  %v1500_v3 = vsel %vm1327_vm0, %v1497_v61, %v15374_v16  ;;  %v15378_v53 = vrot.slane %v13290_v58, 3  ;;  %v15379_v32 = vrot.slane %v13338_v42, 3  ;;  %9167 = vmatprep.mubr.msk.f32.mxu0 %vm3070_vm3, %v15380_v9 }
 0x3be   : > { %v2078_v24 = vsel %vm1907_vm1, %v15375_v31, %v2077_v2  ;;  %v2080_v56 = vsel %vm1907_vm1, %v2077_v2, %v15376_v21  ;;  %v3057_v54 = vmax.f32 %v2961_v59, 0.0  ;;  %v1699_v43 = vadd.f32 %v1498_v11, %v13278_v18  ;;  %3153 = vst.msk [vmem:[#allocation2 + $0x290] sm:$0xff] %vm3070_vm3, %v3056_v46  ;;  %v3340_v11 = vld [vmem:[#allocation2 + $0x251] ss:$2 sm:$0xff]  ;;  %v1005_v46 = vpop.permute.xlu0 %1004 }
 0x3bf   : > { %v1700_v40 = vadd.f32 %v1500_v3, %v1120_v55  ;;  %v2658_v61 = vsel %vm2487_vm2, %v15378_v53, %v2657_v36  ;;  %v2660_v16 = vsel %vm2487_vm2, %v2657_v36, %v15379_v32  ;;  %v13573_v2 = vmul.f32 %v11042_v35, %v1025_v48  ;;  %v3244_v36 = vld [vmem:[#allocation2 + $0x250] ss:$2 sm:$0xff] }
 0x3c0   : > { %3154 = vst.msk [vmem:[#allocation2 + $0x298] sm:$0xff] %vm3070_vm3, %v3057_v54  ;;  %v2279_v18 = vadd.f32 %v2078_v24, %v1699_v43  ;;  %v13580_v55 = vmul.f32 %v11044_v37, %v1025_v48  ;;  %v1122_v59 = vmul.f32 %v11046_v39, %v997_v50  ;;  %v1222_v21 = vmul.f32 %v11037_v34, %v997_v50  ;;  %v15382_v24 = vld [vmem:[#allocation41_spill] sm:$0xff] }
 0x3c1   : > { %v2280_v58 = vadd.f32 %v2080_v56, %v1700_v40  ;;  %v1802_v53 = vmul.f32 %v11042_v35, %v997_v50  ;;  %v2382_v32 = vmul.f32 %v11044_v37, %v997_v50  ;;  %v15381_v48 = vrot.slane %v13531_v26, 1  ;;  %9168 = vmatmul.mubr.msk.f32.gmra.mrb[30].mxu0 %vm3070_vm3, %v15382_v24  ;;  %v15383_v50 = vld [vmem:[#allocation42_spill] sm:$0xff] }
 0x3c2   : > { %v2859_v31 = vadd.f32 %v2658_v61, %v2279_v18  ;;  %v1501_v56 = vrot.slane %v1222_v21, 1  ;;  %v13594_v28 = vmax.f32 %v3244_v36, %v3340_v11  ;;  %9170 = vmatprep.mubr.msk.f32.mxu0 %vm3070_vm3, %v15383_v50  ;;  %v1124_v18 = vmul.f32 %v11046_v39, %v1005_v46  ;;  %v3342_v24 = vld [vmem:[#allocation2 + $0x261] ss:$2 sm:$0xff] }
 0x3c3   : > { %v2860_v54 = vadd.f32 %v2660_v16, %v2280_v58  ;;  %v3538_v43 = vsel %vm1327_vm0, %v3535_v33, %v15381_v48  ;;  %v2081_v3 = vrot.slane %v1802_v53, 2  ;;  %v2661_v9 = vrot.slane %v2382_v32, 3 }
 0x3c4   : > { %9094 = vmatmul.mubr.msk.f32.vlgmr.msra.gmra.mrb[0].mxu1 %vm3070_vm3, %v3538_v43  ;;  %v2962_v61 = vadd.f32 %v13343_v6, %v2859_v31  ;;  %v1224_v33 = vmul.f32 %v11037_v34, %v1005_v46  ;;  %v15384_v58 = vrot.slane %v13329_v25, 1  ;;  %v15385_v53 = vrot.slane %v13384_v60, 1  ;;  %v3246_v25 = vld [vmem:[#allocation2 + $0x260] ss:$2 sm:$0xff] }
 0x3c5   : > { %v2963_v16 = vadd.f32 %v13343_v6, %v2860_v54  ;;  %v15386_v11 = vrot.slane %v13334_v38, 2  ;;  %v15387_v31 = vrot.slane %v13389_v1, 2 }
 0x3c6   : > { %v1502_v21 = vsel %vm1327_vm0, %v15384_v58, %v1501_v56  ;;  %v1504_v36 = vsel %vm1327_vm0, %v1501_v56, %v15385_v53  ;;  %v3058_v48 = vmax.f32 %v2962_v61, 0.0  ;;  %v15388_v58 = vld [vmem:[#allocation43_spill] sm:$0xff]  ;;  %v15389_v56 = vrot.slane %v13338_v42, 3  ;;  %v1013_v61 = vpop.permute.xlu0 %1012 }
 0x3c7   : > { %v2082_v32 = vsel %vm1907_vm1, %v15386_v11, %v2081_v3  ;;  %v2084_v54 = vsel %vm1907_vm1, %v2081_v3, %v15387_v31  ;;  %v3059_v43 = vmax.f32 %v2963_v16, 0.0  ;;  %v1701_v40 = vadd.f32 %v1502_v21, %v13326_v12  ;;  %9171 = vmatmul.mubr.msk.f32.gmra.mrb[32].mxu0 %vm3070_vm3, %v15388_v58 }
 0x3c8   : > { %v1702_v50 = vadd.f32 %v1504_v36, %v1122_v59  ;;  %v2662_v38 = vsel %vm2487_vm2, %v15389_v56, %v2661_v9  ;;  %v15390_v53 = vrot.slane %v13395_v62, 3  ;;  %v1505_v19 = vrot.slane %v1224_v33, 1  ;;  %9173 = vmatprep.mubr.msk.f32.mxu0 %vm3070_vm3, %v15370_v57  ;;  %3155 = vst.msk [vmem:[#allocation2 + $0x2a0] sm:$0xff] %vm3070_vm3, %v3058_v48 }
 0x3c9   : > { %v1804_v3 = vmul.f32 %v11042_v35, %v1005_v46  ;;  %3156 = vst.msk [vmem:[#allocation2 + $0x2a8] sm:$0xff] %vm3070_vm3, %v3059_v43  ;;  %v2281_v12 = vadd.f32 %v2082_v32, %v1701_v40  ;;  %v2384_v42 = vmul.f32 %v11044_v37, %v1005_v46  ;;  %v3539_v16 = vrot.slane %v13594_v28, 1 }
 0x3ca   : > { %v2664_v11 = vsel %vm2487_vm2, %v2661_v9, %v15390_v53  ;;  %v2282_v59 = vadd.f32 %v2084_v54, %v1702_v50  ;;  %v15391_v21 = vrot.slane %v13384_v60, 1  ;;  %v15392_v33 = vrot.slane %v13432_v10, 1 }
 0x3cb   : > { %v2085_v31 = vrot.slane %v1804_v3, 2  ;;  %v13636_v56 = vmax.f32 %v3246_v25, %v3342_v24  ;;  %v2861_v48 = vadd.f32 %v2662_v38, %v2281_v12  ;;  %9174 = vmatmul.mubr.msk.f32.gmra.mrb[34].mxu0 %vm3070_vm3, %v13478_v17  ;;  %v15393_v46 = vrot.slane %v13389_v1, 2 }
 0x3cc   : > { %v1506_v9 = vsel %vm1327_vm0, %v15391_v21, %v1505_v19  ;;  %v1508_v36 = vsel %vm1327_vm0, %v1505_v19, %v15392_v33  ;;  %v2862_v53 = vadd.f32 %v2664_v11, %v2282_v59  ;;  %v15394_v32 = vrot.slane %v13437_v27, 2  ;;  %9176 = vmatprep.mubr.msk.f32.mxu0 %vm3070_vm3, %v13531_v26  ;;  %v3248_v21 = vld [vmem:[#allocation2 + $0x270] ss:$2 sm:$0xff]  ;;  %v1021_v33 = vpop.permute.xlu0 %1020 }
 0x3cd   : > { %v1703_v40 = vadd.f32 %v1506_v9, %v13381_v5  ;;  %v1704_v50 = vadd.f32 %v1508_v36, %v1124_v18  ;;  %v2086_v60 = vsel %vm1907_vm1, %v15393_v46, %v2085_v31  ;;  %v2665_v19 = vrot.slane %v2384_v42, 3  ;;  %v3344_v9 = vld [vmem:[#allocation2 + $0x271] ss:$2 sm:$0xff] }
 0x3ce   : > { %v2088_v54 = vsel %vm1907_vm1, %v2085_v31, %v15394_v32  ;;  %v15395_v24 = vrot.slane %v13531_v26, 1  ;;  %v2964_v5 = vadd.f32 %v13343_v6, %v2861_v48  ;;  %v2965_v1 = vadd.f32 %v13343_v6, %v2862_v53 }
 0x3cf   : > { %v2283_v18 = vadd.f32 %v2086_v60, %v1703_v40  ;;  %v2284_v25 = vadd.f32 %v2088_v54, %v1704_v50  ;;  %v15396_v38 = vrot.slane %v13395_v62, 3  ;;  %v15397_v3 = vrot.slane %v13443_v47, 3  ;;  %9177 = vmatmul.mubr.msk.f32.gmra.mrb[36].mxu0 %vm3070_vm3, %v13594_v28 }
 0x3d0   : > { %v3540_v43 = vsel %vm1327_vm0, %v15395_v24, %v3539_v16  ;;  %v1126_v59 = vmul.f32 %v11046_v39, %v1013_v61  ;;  %v1226_v42 = vmul.f32 %v11037_v34, %v1013_v61  ;;  %v3060_v36 = vmax.f32 %v2964_v5, 0.0  ;;  %9179 = vmatprep.mubr.msk.f32.mxu0 %vm3070_vm3, %v13636_v56 }
 0x3d1   : > { %v2666_v11 = vsel %vm2487_vm2, %v15396_v38, %v2665_v19  ;;  %v2668_v12 = vsel %vm2487_vm2, %v2665_v19, %v15397_v3  ;;  %9096 = vmatprep.mubr.msk.f32.mxu1 %vm3070_vm3, %v3540_v43  ;;  %v3061_v31 = vmax.f32 %v2965_v1, 0.0  ;;  %v1806_v40 = vmul.f32 %v11042_v35, %v1013_v61 }
 0x3d2   : > { %v2863_v48 = vadd.f32 %v2666_v11, %v2283_v18  ;;  %v2864_v53 = vadd.f32 %v2668_v12, %v2284_v25  ;;  %v1509_v62 = vrot.slane %v1226_v42, 1  ;;  %v2386_v50 = vmul.f32 %v11044_v37, %v1013_v61  ;;  %3157 = vst.msk [vmem:[#allocation2 + $0x2b0] sm:$0xff] %vm3070_vm3, %v3060_v36  ;;  %v3250_v12 = vld [vmem:[#allocation2 + $0x280] ss:$2 sm:$0xff]  ;;  %v3346_v42 = vld [vmem:[#allocation2 + $0x281] ss:$2 sm:$0xff] }
 0x3d3   : > { %v3541_v46 = vrot.slane %v13636_v56, 1  ;;  %3158 = vst.msk [vmem:[#allocation2 + $0x2b8] sm:$0xff] %vm3070_vm3, %v3061_v31  ;;  %v13676_v54 = vmax.f32 %v3248_v21, %v3344_v9  ;;  %v1128_v19 = vmul.f32 %v11046_v39, %v1021_v33  ;;  %v15398_v24 = vrot.slane %v13432_v10, 1 }
 0x3d4   : > { %v2966_v60 = vadd.f32 %v13343_v6, %v2863_v48  ;;  %v2967_v32 = vadd.f32 %v13343_v6, %v2864_v53  ;;  %v15399_v43 = vrot.slane %v13486_v20, 1  ;;  %v2089_v1 = vrot.slane %v1806_v40, 2 }
 0x3d5   : > { %v1510_v61 = vsel %vm1327_vm0, %v15398_v24, %v1509_v62  ;;  %v2669_v18 = vrot.slane %v2386_v50, 3  ;;  %v15400_v21 = vrot.slane %v13437_v27, 2  ;;  %v15401_v10 = vrot.slane %v13493_v23, 2  ;;  %9180 = vmatmul.mubr.msk.f32.gmra.mrb[38].mxu0 %vm3070_vm3, %v13676_v54 }
 0x3d6   : > { %v1512_v5 = vsel %vm1327_vm0, %v1509_v62, %v15399_v43  ;;  %v3062_v25 = vmax.f32 %v2966_v60, 0.0  ;;  %v3063_v38 = vmax.f32 %v2967_v32, 0.0  ;;  %v1705_v11 = vadd.f32 %v1510_v61, %v13429_v52  ;;  %v1029_v52 = vpop.permute.xlu0 %1028 }
 0x3d7   : > { %v1706_v3 = vadd.f32 %v1512_v5, %v1126_v59  ;;  %v2090_v9 = vsel %vm1907_vm1, %v15400_v21, %v2089_v1  ;;  %v2092_v36 = vsel %vm1907_vm1, %v2089_v1, %v15401_v10  ;;  %v15402_v31 = vrot.slane %v13443_v47, 3 }
 0x3d8   : > { %v15403_v53 = vrot.slane %v13496_v49, 3  ;;  %3159 = vst.msk [vmem:[#allocation2 + $0x2c0] sm:$0xff] %vm3070_vm3, %v3062_v25  ;;  %3160 = vst.msk [vmem:[#allocation2 + $0x2c8] sm:$0xff] %vm3070_vm3, %v3063_v38  ;;  %v2285_v27 = vadd.f32 %v2090_v9, %v1705_v11  ;;  %v3542_v47 = vsel %vm1327_vm0, %v3539_v16, %v3541_v46  ;;  %v1228_v40 = vmul.f32 %v11037_v34, %v1021_v33 }
 0x3d9   : > { %v2670_v48 = vsel %vm2487_vm2, %v15402_v31, %v2669_v18  ;;  %v2286_v59 = vadd.f32 %v2092_v36, %v1706_v3  ;;  %9097 = vmatmul.mubr.msk.f32.gmra.mrb[2].mxu1 %vm3070_vm3, %v3542_v47  ;;  %v1808_v50 = vmul.f32 %v11042_v35, %v1021_v33  ;;  %v2388_v60 = vmul.f32 %v11044_v37, %v1021_v33  ;;  %v3348_v31 = vld [vmem:[#allocation2 + $0x291] ss:$2 sm:$0xff] }
 0x3da   : > { %v2672_v62 = vsel %vm2487_vm2, %v2669_v18, %v15403_v53  ;;  %v3543_v32 = vrot.slane %v13676_v54, 1  ;;  %v13710_v24 = vmax.f32 %v3250_v12, %v3346_v42  ;;  %v2865_v61 = vadd.f32 %v2670_v48, %v2285_v27  ;;  %v3254_v48 = vld [vmem:[#allocation2 + $0x2a0] ss:$2 sm:$0xff]  ;;  %v3350_v53 = vld [vmem:[#allocation2 + $0x2a1] ss:$2 sm:$0xff] }
 0x3db   : > { %v2866_v43 = vadd.f32 %v2672_v62, %v2286_v59  ;;  %v1513_v5 = vrot.slane %v1228_v40, 1  ;;  %v1130_v1 = vmul.f32 %v11046_v39, %v1029_v52  ;;  %v2093_v18 = vrot.slane %v1808_v50, 2 }
 0x3dc   : > { %v2673_v25 = vrot.slane %v2388_v60, 3  ;;  %v3544_v16 = vsel %vm1327_vm0, %v3541_v46, %v3543_v32  ;;  %9182 = vmatprep.mubr.msk.f32.mxu0 %vm3070_vm3, %v13710_v24  ;;  %v1230_v38 = vmul.f32 %v11037_v34, %v1029_v52  ;;  %v2968_v33 = vadd.f32 %v13343_v6, %v2865_v61  ;;  %v3252_v46 = vld [vmem:[#allocation2 + $0x290] ss:$2 sm:$0xff] }
 0x3dd   : > { %v2969_v11 = vadd.f32 %v13343_v6, %v2866_v43  ;;  %v15404_v3 = vrot.slane %v13486_v20, 1  ;;  %v15405_v42 = vrot.slane %v13547_v13, 1  ;;  %9099 = vmatprep.mubr.msk.f32.mxu1 %vm3070_vm3, %v3544_v16  ;;  %v15406_v34 = vmov %v15401_v10 }
 0x3de   : > { %v2094_v10 = vsel %vm1907_vm1, %v15406_v34, %v2093_v18  ;;  %v15407_v36 = vrot.slane %v13573_v2, 2  ;;  %v3064_v62 = vmax.f32 %v2968_v33, 0.0  ;;  %v15408_v59 = vrot.slane %v13496_v49, 3 }
 0x3df   : > { %v1514_v12 = vsel %vm1327_vm0, %v15404_v3, %v1513_v5  ;;  %v1516_v39 = vsel %vm1327_vm0, %v1513_v5, %v15405_v42  ;;  %v3065_v27 = vmax.f32 %v2969_v11, 0.0  ;;  %v1517_v50 = vrot.slane %v1230_v38, 1  ;;  %v3352_v11 = vld [vmem:[#allocation2 + $0x2b1] ss:$2 sm:$0xff] }
 0x3e0   : > { %v1707_v21 = vadd.f32 %v1514_v12, %v13481_v44  ;;  %v1708_v9 = vadd.f32 %v1516_v39, %v1128_v19  ;;  %v2096_v20 = vsel %vm1907_vm1, %v2093_v18, %v15407_v36  ;;  %v2674_v47 = vsel %vm2487_vm2, %v15408_v59, %v2673_v25  ;;  %3161 = vst.msk [vmem:[#allocation2 + $0x2d0] sm:$0xff] %vm3070_vm3, %v3064_v62 }
 0x3e1   : > { %v15409_v44 = vrot.slane %v13580_v55, 3  ;;  %v1810_v60 = vmul.f32 %v11042_v35, %v1029_v52  ;;  %3162 = vst.msk [vmem:[#allocation2 + $0x2d8] sm:$0xff] %vm3070_vm3, %v3065_v27  ;;  %v2390_v61 = vmul.f32 %v11044_v37, %v1029_v52  ;;  %v3545_v43 = vrot.slane %v13710_v24, 1  ;;  %v3256_v35 = vld [vmem:[#allocation2 + $0x2b0] ss:$2 sm:$0xff] }
 0x3e2   : > { %v2287_v23 = vadd.f32 %v2094_v10, %v1707_v21  ;;  %v2288_v40 = vadd.f32 %v2096_v20, %v1708_v9  ;;  %v13744_v49 = vmax.f32 %v3252_v46, %v3348_v31  ;;  %v13746_v5 = vmax.f32 %v3254_v48, %v3350_v53  ;;  %v3354_v46 = vld [vmem:[#allocation2 + $0x2c1] ss:$2 sm:$0xff] }
 0x3e3   : > { %v2676_v19 = vsel %vm2487_vm2, %v2673_v25, %v15409_v44  ;;  %v15410_v25 = vmov %v15405_v42  ;;  %v1710_v33 = vadd.f32 %v1517_v50, %v1130_v1  ;;  %v2097_v12 = vrot.slane %v1810_v60, 2  ;;  %v3258_v1 = vld [vmem:[#allocation2 + $0x2c0] ss:$2 sm:$0xff] }
 0x3e4   : > { %v2867_v18 = vadd.f32 %v2674_v47, %v2287_v23  ;;  %v2868_v16 = vadd.f32 %v2676_v19, %v2288_v40  ;;  %v1518_v38 = vsel %vm1327_vm0, %v15410_v25, %v1517_v50  ;;  %v2677_v42 = vrot.slane %v2390_v61, 3  ;;  %9183 = vmatmul.mubr.msk.f32.gmra.mrb[40].mxu0 %vm3070_vm3, %v13744_v49 }
 0x3e5   : > { %v1709_v3 = vadd.f32 %v1518_v38, %v13534_v22  ;;  %v3546_v37 = vsel %vm1327_vm0, %v3543_v32, %v3545_v43  ;;  %v3547_v13 = vrot.slane %v13744_v49, 1  ;;  %9185 = vmatprep.mubr.msk.f32.mxu0 %vm3070_vm3, %v13746_v5  ;;  %v3549_v22 = vrot.slane %v13746_v5, 1 }
 0x3e6   : > { %v2970_v52 = vadd.f32 %v13343_v6, %v2867_v18  ;;  %v2971_v39 = vadd.f32 %v13343_v6, %v2868_v16  ;;  %9100 = vmatmul.mubr.msk.f32.gmra.mrb[4].mxu1 %vm3070_vm3, %v3546_v37  ;;  %v15411_v32 = vmov %v15407_v36  ;;  %v2290_v9 = vadd.f32 %v2097_v12, %v1710_v33 }
 0x3e7   : > { %v2098_v21 = vsel %vm1907_vm1, %v15411_v32, %v2097_v12  ;;  %v15412_v34 = vmov %v15409_v44  ;;  %v13768_v36 = vmax.f32 %v3256_v35, %v3352_v11  ;;  %v3548_v53 = vsel %vm1327_vm0, %v3545_v43, %v3547_v13  ;;  %v4916_v32 = vld [vmem:[#allocation9 + $0x78] sm:$0xff] }
 0x3e8   : > { %v2678_v10 = vsel %vm2487_vm2, %v15412_v34, %v2677_v42  ;;  %v3066_v20 = vmax.f32 %v2970_v52, 0.0  ;;  %v3067_v31 = vmax.f32 %v2971_v39, 0.0  ;;  %v2289_v48 = vadd.f32 %v2098_v21, %v1709_v3  ;;  %9102 = vmatprep.mubr.msk.f32.mxu1 %vm3070_vm3, %v3548_v53  ;;  %v3260_v47 = vld [vmem:[#allocation2 + $0x2d0] ss:$2 sm:$0xff]  ;;  %v3356_v44 = vld [vmem:[#allocation2 + $0x2d1] ss:$2 sm:$0xff] }
 0x3e9   : > { %v2870_v62 = vadd.f32 %v2677_v42, %v2290_v9  ;;  %v3550_v27 = vsel %vm1327_vm0, %v3547_v13, %v3549_v22  ;;  %9186 = vmatmul.mubr.msk.f32.gmra.mrb[42].mxu0 %vm3070_vm3, %v13768_v36  ;;  %v3551_v2 = vrot.slane %v13768_v36, 1  ;;  %v13776_v55 = vmax.f32 %v3258_v1, %v3354_v46  ;;  %v15413_v3 = vld [vmem:[#allocation36_spill] sm:$0xff]  ;;  %v15414_v39 = vld [vmem:[#allocation35_spill] sm:$0xff]  ;;  %v4915_v46 = vld [vmem:[#allocation9 + $0x70] sm:$0xff] }
 0x3ea   : > { %3163 = vst.msk [vmem:[#allocation2 + $0x2e0] sm:$0xff] %vm3070_vm3, %v3066_v20  ;;  %3164 = vst.msk [vmem:[#allocation2 + $0x2e8] sm:$0xff] %vm3070_vm3, %v3067_v31  ;;  %v2869_v59 = vadd.f32 %v2678_v10, %v2289_v48  ;;  %9103 = vmatmul.mubr.msk.f32.gmra.mrb[6].mxu1 %vm3070_vm3, %v3550_v27  ;;  %v13786_v50 = vmax.f32 %v3260_v47, %v3356_v44  ;;  %v4369_v12 = vrot.slane %v15413_v3, 2  ;;  %v4368_v13 = vrot.slane %v15414_v39, 2  ;;  %v15416_v34 = vld [vmem:[#allocation24_spill] sm:$0xff]  ;;  %v15419_v47 = vld [vmem:[#allocation45_spill] sm:$0xff] }
 0x3eb   : > { %v2973_v19 = vadd.f32 %v13343_v6, %v2870_v62  ;;  %v3552_v23 = vsel %vm1327_vm0, %v3549_v22, %v3551_v2  ;;  %9188 = vmatprep.mubr.msk.f32.mxu0 %vm3070_vm3, %v13776_v55  ;;  %v3553_v40 = vrot.slane %v13776_v55, 1  ;;  %v15415_v22 = vld [vmem:[#allocation37_spill] sm:$0xff]  ;;  %v4373_v10 = vrot.slane %v15416_v34, 2  ;;  %v15417_v53 = vld [vmem:[#allocation20_spill] sm:$0xff] }
 0x3ec   : > { %v2972_v60 = vadd.f32 %v13343_v6, %v2869_v59  ;;  %9105 = vmatprep.mubr.msk.f32.mxu1 %vm3070_vm3, %v3552_v23  ;;  %v3555_v18 = vrot.slane %v13786_v50, 1  ;;  %v4371_v1 = vrot.slane %v15415_v22, 2  ;;  %v4370_v21 = vsel %vm1907_vm1, %v4368_v13, %v4369_v12 }
 0x3ed   : > { %v3069_v61 = vmax.f32 %v2973_v19, 0.0  ;;  %v3554_v43 = vsel %vm1327_vm0, %v3551_v2, %v3553_v40  ;;  %9189 = vmatmul.mubr.msk.f32.gmra.mrb[44].mxu0 %vm3070_vm3, %v13786_v50  ;;  %v9726_v31 = vpack.c.bf16 %v4916_v32, %v4915_v46  ;;  %v4375_v62 = vrot.slane %v15417_v53, 2  ;;  %v15418_v2 = vld [vmem:[#allocation26_spill] sm:$0xff]  ;;  %v15420_v19 = vld [vmem:[#allocation29_spill] sm:$0xff] }
 0x3ee   : > { %v3068_v16 = vmax.f32 %v2972_v60, 0.0  ;;  %9106 = vmatmul.mubr.msk.f32.gmra.mrb[8].mxu1 %vm3070_vm3, %v3554_v43  ;;  %v3556_v25 = vsel %vm1327_vm0, %v3553_v40, %v3555_v18  ;;  %v4372_v48 = vsel %vm1907_vm1, %v4369_v12, %v4371_v1  ;;  %v4374_v27 = vsel %vm1907_vm1, %v4371_v1, %v4373_v10 }
 0x3ef   : > { %3167 = vst.msk [vmem:[#allocation2 + $0x2f8] sm:$0x1f] %vm3166_vm5, %v3069_v61  ;;  %9108 = vmatprep.mubr.msk.f32.mxu1 %vm3070_vm3, %v3556_v25  ;;  %v4377_v59 = vrot.slane %v15418_v2, 2  ;;  %v4376_v44 = vsel %vm1907_vm1, %v4373_v10, %v4375_v62  ;;  %v4379_v23 = vrot.slane %v15420_v19, 2  ;;  %v4381_v60 = vrot.slane %v15335_v8, 2 }
 0x3f0   : > { %3165 = vst.msk [vmem:[#allocation2 + $0x2f0] sm:$0xff] %vm3070_vm3, %v3068_v16  ;;  %v4383_v43 = vrot.slane %v15336_v41, 2  ;;  %v4385_v16 = vrot.slane %v12182_v4, 2  ;;  %v4395_v1 = vrot.slane %v12538_v51, 2  ;;  %v4397_v32 = vrot.slane %v12540_v14, 2 }
 0x3f1   : > { %v3262_v6 = vld [vmem:[#allocation2 + $0x2e0] ss:$2 sm:$0xff]  ;;  %v3358_v38 = vld [vmem:[#allocation2 + $0x2e1] ss:$2 sm:$0xff]  ;;  %v4378_v40 = vsel %vm1907_vm1, %v4375_v62, %v4377_v59  ;;  %v4380_v61 = vsel %vm1907_vm1, %v4377_v59, %v4379_v23  ;;  %v4403_v59 = vrot.slane %v12656_v7, 2 }
 0x3f2   : > { %v13798_v33 = vmax.f32 %v3262_v6, %v3358_v38  ;;  %v4384_v25 = vsel %vm1907_vm1, %v4381_v60, %v4383_v43  ;;  %v4387_v6 = vrot.slane %v12304_v0, 2  ;;  %v4386_v38 = vsel %vm1907_vm1, %v4383_v43, %v4385_v16 }
 0x3f4   : > { %9191 = vmatprep.mubr.msk.f32.mxu0 %vm3070_vm3, %v13798_v33  ;;  %v3557_v35 = vrot.slane %v13798_v33, 1 }
 0x3f6   : > { %v3558_v11 = vsel %vm1327_vm0, %v3555_v18, %v3557_v35  ;;  %v4382_v18 = vsel %vm1907_vm1, %v4379_v23, %v4381_v60  ;;  %v15423_v60 = vld [vmem:[#allocation32_spill] sm:$0xff] }
 0x3f7   : > { %9109 = vmatmul.mubr.msk.f32.gmra.mrb[10].mxu1 %vm3070_vm3, %v3558_v11  ;;  %v3264_v42 = vld [vmem:[#allocation2 + $0x2f0] ss:$2 sm:$0xff]  ;;  %v3360_v37 = vld [vmem:[#allocation2 + $0x2f1] ss:$2 sm:$0xff]  ;;  %v4388_v11 = vsel %vm1907_vm1, %v4385_v16, %v4387_v6 }
 0x3f8   : > { %v13806_v52 = vmax.f32 %v3264_v42, %v3360_v37  ;;  %v4393_v42 = vrot.slane %v12476_v15, 2  ;;  %v4391_v37 = vrot.slane %v12469_v30, 2 }
 0x3fa   : > { %9192 = vmatmul.mubr.msk.f32.gmra.mrb[46].mxu0 %vm3070_vm3, %v13806_v52  ;;  %v3559_v9 = vrot.slane %v13806_v52, 1  ;;  %v4394_v46 = vsel %vm1907_vm1, %v4391_v37, %v4393_v42 }
 0x3fb   : > { %9202 = vmatprep.mubr.msk.f32.mxu0 %vm3070_vm3, %v4370_v21  ;;  %v4396_v21 = vsel %vm1907_vm1, %v4393_v42, %v4395_v1 }
 0x3fc   : > { %v3560_v20 = vsel %vm1327_vm0, %v3557_v35, %v3559_v9  ;;  %v4389_v35 = vrot.slane %v12467_v29, 2 }
 0x3fd   : > { %9111 = vmatprep.mubr.msk.f32.mxu1 %vm3070_vm3, %v3560_v20  ;;  %v4398_v20 = vsel %vm1907_vm1, %v4395_v1, %v4397_v32 }
 0x3fe   : > { %9112 = vmatmul.mubr.msk.f32.gmra.mrb[12].mxu1 %vm3070_vm3, %v3559_v9  ;;  %9203 = vmatmul.mubr.msk.f32.vlgmr.msra.gmra.mrb[0].mxu0 %vm3070_vm3, %v4372_v48  ;;  %v4390_v12 = vsel %vm1907_vm1, %v4387_v6, %v4389_v35  ;;  %v4392_v13 = vsel %vm1907_vm1, %v4389_v35, %v4391_v37  ;;  %v15421_v9 = vld [vmem:[#allocation23_spill] sm:$0xff]  ;;  %v15425_v6 = vld [vmem:[#allocation25_spill] sm:$0xff]  ;;  %v15427_v37 = vld [vmem:[#allocation28_spill] sm:$0xff] }
 0x3ff   : > { %9725 = vmatpush3.bf16.msra.mxu0 %v15419_v47  ;;  %9205 = vmatprep.mubr.msk.f32.mxu0 %vm3070_vm3, %v4374_v27  ;;  %v4399_v10 = vrot.slane %v15421_v9, 2  ;;  %v4405_v27 = vrot.slane %v12665_v45, 2 }
 0x400   : > { %9727 = vmatprep.subr.bf16.mxu0 %v9726_v31 }
 0x401   : > { %v4400_v48 = vsel %vm1907_vm1, %v4397_v32, %v4399_v10 }
 0x402   : > { %9206 = vmatmul.mubr.msk.f32.gmra.mrb[2].mxu0 %vm3070_vm3, %v4376_v44  ;;  %v15422_v44 = vld [vmem:[#allocation33_spill] sm:$0xff] }
 0x403   : > { %9208 = vmatprep.mubr.msk.f32.mxu0 %vm3070_vm3, %v4378_v40  ;;  %9729 = vmatpush3.bf16.msra.mxu0 %v9726_v31  ;;  %v4401_v31 = vrot.slane %v12600_v63, 2  ;;  %v4407_v23 = vrot.slane %v15422_v44, 2  ;;  %v4406_v40 = vsel %vm1907_vm1, %v4403_v59, %v4405_v27 }
 0x405   : > { %v4402_v62 = vsel %vm1907_vm1, %v4399_v10, %v4401_v31  ;;  %v4404_v47 = vsel %vm1907_vm1, %v4401_v31, %v4403_v59  ;;  %v4408_v43 = vsel %vm1907_vm1, %v4405_v27, %v4407_v23  ;;  %v15429_v10 = vld [vmem:[#allocation38_spill] sm:$0xff]  ;;  %v15431_v59 = vld [vmem:[#allocation39_spill] sm:$0xff] }
 0x406   : > { %9209 = vmatmul.mubr.msk.f32.gmra.mrb[4].mxu0 %vm3070_vm3, %v4380_v61  ;;  %v4409_v61 = vrot.slane %v15423_v60, 2 }
 0x407   : > { %9211 = vmatprep.mubr.msk.f32.mxu0 %vm3070_vm3, %v4382_v18  ;;  %v15424_v18 = vld [vmem:[#allocation34_spill] sm:$0xff] }
 0x408   : > { %v4411_v16 = vrot.slane %v15424_v18, 2 }
 0x40a   : > { %9212 = vmatmul.mubr.msk.f32.gmra.mrb[6].mxu0 %vm3070_vm3, %v4384_v25  ;;  %v4410_v25 = vsel %vm1907_vm1, %v4407_v23, %v4409_v61  ;;  %v4412_v35 = vsel %vm1907_vm1, %v4409_v61, %v4411_v16 }
 0x40b   : > { %9214 = vmatprep.mubr.msk.f32.mxu0 %vm3070_vm3, %v4386_v38  ;;  %v4413_v38 = vrot.slane %v15425_v6, 2 }
 0x40d   : > { %v4414_v42 = vsel %vm1907_vm1, %v4411_v16, %v4413_v38  ;;  %v15433_v16 = vld [vmem:[#allocation41_spill] sm:$0xff] }
 0x40e   : > { %9215 = vmatmul.mubr.msk.f32.gmra.mrb[8].mxu0 %vm3070_vm3, %v4388_v11  ;;  %v15426_v11 = vld [vmem:[#allocation27_spill] sm:$0xff] }
 0x40f   : > { %9217 = vmatprep.mubr.msk.f32.mxu0 %vm3070_vm3, %v4390_v12  ;;  %v4415_v12 = vrot.slane %v15426_v11, 2 }
 0x411   : > { %v4416_v1 = vsel %vm1907_vm1, %v4413_v38, %v4415_v12 }
 0x412   : > { %9218 = vmatmul.mubr.msk.f32.gmra.mrb[10].mxu0 %vm3070_vm3, %v4392_v13  ;;  %v4417_v13 = vrot.slane %v15427_v37, 2 }
 0x413   : > { %9220 = vmatprep.mubr.msk.f32.mxu0 %vm3070_vm3, %v4394_v46  ;;  %v15428_v46 = vld [vmem:[#allocation30_spill] sm:$0xff] }
 0x414   : > { %v4419_v32 = vrot.slane %v15428_v46, 2 }
 0x416   : > { %9221 = vmatmul.mubr.msk.f32.gmra.mrb[12].mxu0 %vm3070_vm3, %v4396_v21  ;;  %v4418_v21 = vsel %vm1907_vm1, %v4415_v12, %v4417_v13  ;;  %v4420_v31 = vsel %vm1907_vm1, %v4417_v13, %v4419_v32  ;;  %v4433_v13 = vrot.slane %v15388_v58, 2 }
 0x417   : > { %9223 = vmatprep.mubr.msk.f32.mxu0 %vm3070_vm3, %v4398_v20  ;;  %v4421_v20 = vrot.slane %v15429_v10, 2 }
 0x419   : > { %v4422_v27 = vsel %vm1907_vm1, %v4419_v32, %v4421_v20  ;;  %v4435_v32 = vrot.slane %v15370_v57, 2 }
 0x41a   : > { %9224 = vmatmul.mubr.msk.f32.gmra.mrb[14].mxu0 %vm3070_vm3, %v4400_v48  ;;  %v15430_v48 = vld [vmem:[#allocation31_spill] sm:$0xff] }
 0x41b   : > { %9226 = vmatprep.mubr.msk.f32.mxu0 %vm3070_vm3, %v4402_v62  ;;  %v4423_v62 = vrot.slane %v15430_v48, 2 }
 0x41d   : > { %v4424_v23 = vsel %vm1907_vm1, %v4421_v20, %v4423_v62  ;;  %v4437_v20 = vrot.slane %v13478_v17, 2 }
 0x41e   : > { %9227 = vmatmul.mubr.msk.f32.gmra.mrb[16].mxu0 %vm3070_vm3, %v4404_v47  ;;  %v4425_v47 = vrot.slane %v15431_v59, 2 }
 0x41f   : > { %9229 = vmatprep.mubr.msk.f32.mxu0 %vm3070_vm3, %v4406_v40  ;;  %v15432_v40 = vld [vmem:[#allocation40_spill] sm:$0xff] }
 0x420   : > { %v4427_v61 = vrot.slane %v15432_v40, 2 }
 0x422   : > { %9230 = vmatmul.mubr.msk.f32.gmra.mrb[18].mxu0 %vm3070_vm3, %v4408_v43  ;;  %v4426_v43 = vsel %vm1907_vm1, %v4423_v62, %v4425_v47  ;;  %v4428_v38 = vsel %vm1907_vm1, %v4425_v47, %v4427_v61  ;;  %v4439_v62 = vrot.slane %v13531_v26, 2  ;;  %v4441_v47 = vrot.slane %v13594_v28, 2 }
 0x423   : > { %9232 = vmatprep.mubr.msk.f32.mxu0 %vm3070_vm3, %v4410_v25  ;;  %v4429_v25 = vrot.slane %v15433_v16, 2 }
 0x426   : > { %9233 = vmatmul.mubr.msk.f32.gmra.mrb[20].mxu0 %vm3070_vm3, %v4412_v35  ;;  %v15434_v35 = vld [vmem:[#allocation42_spill] sm:$0xff] }
 0x427   : > { %9235 = vmatprep.mubr.msk.f32.mxu0 %vm3070_vm3, %v4414_v42  ;;  %v4431_v12 = vrot.slane %v15434_v35, 2  ;;  %v4430_v42 = vsel %vm1907_vm1, %v4427_v61, %v4429_v25  ;;  %v4443_v61 = vrot.slane %v13636_v56, 2 }
 0x42a   : > { %9236 = vmatmul.mubr.msk.f32.gmra.mrb[22].mxu0 %vm3070_vm3, %v4416_v1  ;;  %v4432_v1 = vsel %vm1907_vm1, %v4429_v25, %v4431_v12  ;;  %v4445_v25 = vrot.slane %v13676_v54, 2 }
 0x42b   : > { %9238 = vmatprep.mubr.msk.f32.mxu0 %vm3070_vm3, %v4418_v21  ;;  %v4434_v21 = vsel %vm1907_vm1, %v4431_v12, %v4433_v13  ;;  %v4447_v12 = vrot.slane %v13710_v24, 2 }
 0x42e   : > { %9239 = vmatmul.mubr.msk.f32.gmra.mrb[24].mxu0 %vm3070_vm3, %v4420_v31  ;;  %v4436_v31 = vsel %vm1907_vm1, %v4433_v13, %v4435_v32  ;;  %v4449_v13 = vrot.slane %v13744_v49, 2 }
 0x42f   : > { %9241 = vmatprep.mubr.msk.f32.mxu0 %vm3070_vm3, %v4422_v27  ;;  %v4438_v27 = vsel %vm1907_vm1, %v4435_v32, %v4437_v20  ;;  %v4451_v32 = vrot.slane %v13746_v5, 2 }
 0x432   : > { %9242 = vmatmul.mubr.msk.f32.gmra.mrb[26].mxu0 %vm3070_vm3, %v4424_v23  ;;  %v4440_v23 = vsel %vm1907_vm1, %v4437_v20, %v4439_v62  ;;  %v4453_v20 = vrot.slane %v13768_v36, 2 }
 0x433   : > { %9244 = vmatprep.mubr.msk.f32.mxu0 %vm3070_vm3, %v4426_v43  ;;  %v4442_v43 = vsel %vm1907_vm1, %v4439_v62, %v4441_v47  ;;  %v4455_v62 = vrot.slane %v13776_v55, 2 }
 0x436   : > { %9245 = vmatmul.mubr.msk.f32.gmra.mrb[28].mxu0 %vm3070_vm3, %v4428_v38  ;;  %v4444_v38 = vsel %vm1907_vm1, %v4441_v47, %v4443_v61  ;;  %v4457_v47 = vrot.slane %v13786_v50, 2 }
 0x437   : > { %9247 = vmatprep.mubr.msk.f32.mxu0 %vm3070_vm3, %v4430_v42  ;;  %v4446_v42 = vsel %vm1907_vm1, %v4443_v61, %v4445_v25  ;;  %v4459_v61 = vrot.slane %v13798_v33, 2 }
 0x43a   : > { %9248 = vmatmul.mubr.msk.f32.gmra.mrb[30].mxu0 %vm3070_vm3, %v4432_v1  ;;  %v4448_v1 = vsel %vm1907_vm1, %v4445_v25, %v4447_v12  ;;  %v4461_v25 = vrot.slane %v13806_v52, 2 }
 0x43b   : > { %9250 = vmatprep.mubr.msk.f32.mxu0 %vm3070_vm3, %v4434_v21  ;;  %v4450_v21 = vsel %vm1907_vm1, %v4447_v12, %v4449_v13 }
 0x43c   : > { %v4462_v12 = vsel %vm1907_vm1, %v4459_v61, %v4461_v25 }
 0x43e   : > { %9251 = vmatmul.mubr.msk.f32.gmra.mrb[32].mxu0 %vm3070_vm3, %v4436_v31  ;;  %v4452_v31 = vsel %vm1907_vm1, %v4449_v13, %v4451_v32  ;;  %v4917_v13 = vrot.slane %v15414_v39, 3  ;;  %v4926_v39 = vrot.slane %v15418_v2, 3 }
 0x43f   : > { %9253 = vmatprep.mubr.msk.f32.mxu0 %vm3070_vm3, %v4438_v27  ;;  %v4454_v27 = vsel %vm1907_vm1, %v4451_v32, %v4453_v20 }
 0x442   : > { %9254 = vmatmul.mubr.msk.f32.gmra.mrb[34].mxu0 %vm3070_vm3, %v4440_v23  ;;  %v4456_v23 = vsel %vm1907_vm1, %v4453_v20, %v4455_v62 }
 0x443   : > { %9256 = vmatprep.mubr.msk.f32.mxu0 %vm3070_vm3, %v4442_v43  ;;  %v4458_v43 = vsel %vm1907_vm1, %v4455_v62, %v4457_v47  ;;  %v4928_v62 = vrot.slane %v15420_v19, 3 }
 0x446   : > { %9257 = vmatmul.mubr.msk.f32.gmra.mrb[36].mxu0 %vm3070_vm3, %v4444_v38  ;;  %v4460_v38 = vsel %vm1907_vm1, %v4457_v47, %v4459_v61  ;;  %v4932_v47 = vrot.slane %v15336_v41, 3  ;;  %v4936_v61 = vrot.slane %v12304_v0, 3  ;;  %v4940_v0 = vrot.slane %v12469_v30, 3 }
 0x447   : > { %9259 = vmatprep.mubr.msk.f32.mxu0 %vm3070_vm3, %v4446_v42  ;;  %v4918_v42 = vrot.slane %v15413_v3, 3 }
 0x449   : > { %v4919_v32 = vsel %vm2487_vm2, %v4917_v13, %v4918_v42 }
 0x44a   : > { %9260 = vmatmul.mubr.msk.f32.gmra.mrb[38].mxu0 %vm3070_vm3, %v4448_v1  ;;  %v4920_v1 = vrot.slane %v15415_v22, 3 }
 0x44b   : > { %9262 = vmatprep.mubr.msk.f32.mxu0 %vm3070_vm3, %v4450_v21  ;;  %v4922_v21 = vrot.slane %v15416_v34, 3 }
 0x44c   : > { %v4921_v20 = vsel %vm2487_vm2, %v4918_v42, %v4920_v1  ;;  %v4946_v42 = vrot.slane %v12540_v14, 3 }
 0x44d   : > { %v4923_v3 = vsel %vm2487_vm2, %v4920_v1, %v4922_v21  ;;  %v4950_v1 = vrot.slane %v12600_v63, 3 }
 0x44e   : > { %9263 = vmatmul.mubr.msk.f32.gmra.mrb[40].mxu0 %vm3070_vm3, %v4452_v31  ;;  %v4924_v31 = vrot.slane %v15417_v53, 3  ;;  %v4929_v53 = vsel %vm2487_vm2, %v4926_v39, %v4928_v62 }
 0x44f   : > { %9265 = vmatprep.mubr.msk.f32.mxu0 %vm3070_vm3, %v4454_v27  ;;  %v4930_v27 = vrot.slane %v15335_v8, 3 }
 0x450   : > { %v4925_v22 = vsel %vm2487_vm2, %v4922_v21, %v4924_v31  ;;  %v4927_v34 = vsel %vm2487_vm2, %v4924_v31, %v4926_v39  ;;  %v4958_v31 = vrot.slane %v15423_v60, 3  ;;  %v4962_v39 = vrot.slane %v15425_v6, 3 }
 0x451   : > { %v4931_v2 = vsel %vm2487_vm2, %v4928_v62, %v4930_v27  ;;  %v4933_v19 = vsel %vm2487_vm2, %v4930_v27, %v4932_v47  ;;  %v4966_v62 = vrot.slane %v15427_v37, 3  ;;  %v4970_v27 = vrot.slane %v15429_v10, 3 }
 0x452   : > { %9266 = vmatmul.mubr.msk.f32.gmra.mrb[42].mxu0 %vm3070_vm3, %v4456_v23  ;;  %v4934_v23 = vrot.slane %v12182_v4, 3 }
 0x453   : > { %9268 = vmatprep.mubr.msk.f32.mxu0 %vm3070_vm3, %v4458_v43  ;;  %v4938_v43 = vrot.slane %v12467_v29, 3 }
 0x454   : > { %v4935_v8 = vsel %vm2487_vm2, %v4932_v47, %v4934_v23  ;;  %v4937_v41 = vsel %vm2487_vm2, %v4934_v23, %v4936_v61  ;;  %v4974_v47 = vrot.slane %v15431_v59, 3  ;;  %v4978_v23 = vrot.slane %v15433_v16, 3 }
 0x455   : > { %v4939_v4 = vsel %vm2487_vm2, %v4936_v61, %v4938_v43  ;;  %v4982_v61 = vrot.slane %v15388_v58, 3 }
 0x456   : > { %9269 = vmatmul.mubr.msk.f32.gmra.mrb[44].mxu0 %vm3070_vm3, %v4460_v38  ;;  %v4941_v38 = vsel %vm2487_vm2, %v4938_v43, %v4940_v0  ;;  %v4986_v43 = vrot.slane %v13478_v17, 3 }
 0x457   : > { %9271 = vmatprep.mubr.msk.f32.mxu0 %vm3070_vm3, %v4462_v12  ;;  %v4944_v12 = vrot.slane %v12538_v51, 3 }
 0x459   : > { %v4947_v30 = vsel %vm2487_vm2, %v4944_v12, %v4946_v42 }
 0x45a   : > { %9272 = vmatmul.mubr.msk.f32.gmra.mrb[46].mxu0 %vm3070_vm3, %v4461_v25  ;;  %v4942_v25 = vrot.slane %v12476_v15, 3  ;;  %v4948_v15 = vrot.slane %v15421_v9, 3  ;;  %v4952_v9 = vrot.slane %v12656_v7, 3 }
 0x45b   : > { %9282 = vmatprep.mubr.msk.f32.mxu0 %vm3070_vm3, %v4919_v32  ;;  %v4954_v32 = vrot.slane %v12665_v45, 3  ;;  %v4960_v45 = vrot.slane %v15424_v18, 3 }
 0x45c   : > { %v4943_v29 = vsel %vm2487_vm2, %v4940_v0, %v4942_v25  ;;  %v4945_v13 = vsel %vm2487_vm2, %v4942_v25, %v4944_v12  ;;  %v4949_v51 = vsel %vm2487_vm2, %v4946_v42, %v4948_v15  ;;  %v4951_v14 = vsel %vm2487_vm2, %v4948_v15, %v4950_v1 }
 0x45d   : > { %v4953_v21 = vsel %vm2487_vm2, %v4950_v1, %v4952_v9  ;;  %v4955_v63 = vsel %vm2487_vm2, %v4952_v9, %v4954_v32  ;;  %v4963_v60 = vsel %vm2487_vm2, %v4960_v45, %v4962_v39  ;;  %v4992_v0 = vrot.slane %v13636_v56, 3 }
 0x45e   : > { %9283 = vmatmul.mubr.msk.f32.vlgmr.msra.gmra.mrb[0].mxu0 %vm3070_vm3, %v4921_v20  ;;  %v4956_v20 = vrot.slane %v15422_v44, 3  ;;  %v4961_v44 = vsel %vm2487_vm2, %v4958_v31, %v4960_v45  ;;  %v4998_v42 = vrot.slane %v13744_v49, 3  ;;  %v5002_v15 = vrot.slane %v13768_v36, 3 }
 0x45f   : > { %9285 = vmatprep.mubr.msk.f32.mxu0 %vm3070_vm3, %v4923_v3  ;;  %v5006_v1 = vrot.slane %v13786_v50, 3 }
 0x460   : > { %v4957_v3 = vsel %vm2487_vm2, %v4954_v32, %v4956_v20  ;;  %v4959_v7 = vsel %vm2487_vm2, %v4956_v20, %v4958_v31  ;;  %v5010_v32 = vrot.slane %v13806_v52, 3  ;;  %v5744_v52 = vld [vmem:[#allocation11 + $0x40] sm:$0xff]  ;;  %v5745_v31 = vld [vmem:[#allocation11 + $0x48] sm:$0xff] }
 0x462   : > { %9286 = vmatmul.mubr.msk.f32.gmra.mrb[2].mxu0 %vm3070_vm3, %v4925_v22  ;;  %v4964_v22 = vrot.slane %v15426_v11, 3 }
 0x463   : > { %9288 = vmatprep.mubr.msk.f32.mxu0 %vm3070_vm3, %v4927_v34  ;;  %v4968_v34 = vrot.slane %v15428_v46, 3 }
 0x464   : > { %v4965_v18 = vsel %vm2487_vm2, %v4962_v39, %v4964_v22  ;;  %v4967_v6 = vsel %vm2487_vm2, %v4964_v22, %v4966_v62  ;;  %v5746_v39 = vld [vmem:[#allocation11 + $0x50] sm:$0xff] }
 0x465   : > { %v4969_v11 = vsel %vm2487_vm2, %v4966_v62, %v4968_v34  ;;  %v4971_v37 = vsel %vm2487_vm2, %v4968_v34, %v4970_v27  ;;  %v5749_v62 = vld [vmem:[#allocation11 + $0x68] sm:$0xff] }
 0x466   : > { %9289 = vmatmul.mubr.msk.f32.gmra.mrb[4].mxu0 %vm3070_vm3, %v4929_v53  ;;  %v4972_v53 = vrot.slane %v15430_v48, 3 }
 0x467   : > { %9291 = vmatprep.mubr.msk.f32.mxu0 %vm3070_vm3, %v4931_v2  ;;  %v4976_v2 = vrot.slane %v15432_v40, 3 }
 0x468   : > { %v4973_v46 = vsel %vm2487_vm2, %v4970_v27, %v4972_v53  ;;  %v4975_v10 = vsel %vm2487_vm2, %v4972_v53, %v4974_v47  ;;  %v5750_v27 = vld [vmem:[#allocation11 + $0x70] sm:$0xff] }
 0x469   : > { %v4977_v48 = vsel %vm2487_vm2, %v4974_v47, %v4976_v2  ;;  %v4979_v59 = vsel %vm2487_vm2, %v4976_v2, %v4978_v23  ;;  %v5736_v2 = vld [vmem:[#allocation11 + $0x8] sm:$0xff] }
 0x46a   : > { %9292 = vmatmul.mubr.msk.f32.gmra.mrb[6].mxu0 %vm3070_vm3, %v4933_v19  ;;  %v4980_v19 = vrot.slane %v15434_v35, 3 }
 0x46b   : > { %9294 = vmatprep.mubr.msk.f32.mxu0 %vm3070_vm3, %v4935_v8  ;;  %v4984_v8 = vrot.slane %v15370_v57, 3  ;;  %v4990_v57 = vrot.slane %v13594_v28, 3  ;;  %v4996_v28 = vrot.slane %v13710_v24, 3 }
 0x46c   : > { %v4981_v40 = vsel %vm2487_vm2, %v4978_v23, %v4980_v19  ;;  %v4983_v16 = vsel %vm2487_vm2, %v4980_v19, %v4982_v61  ;;  %v15435_v23 = vmov 0.0  }
 0x46d   : > { %v4985_v35 = vsel %vm2487_vm2, %v4982_v61, %v4984_v8  ;;  %v4987_v58 = vsel %vm2487_vm2, %v4984_v8, %v4986_v43  ;;  %v4993_v12 = vsel %vm2487_vm2, %v4990_v57, %v4992_v0  ;;  %5615 = vst.msk [vmem:[#allocation3 + $0x17d] sm:$0x7] %vm5614_vm6, %v15435_v23  ;;  %6994 = vst.msk [vmem:[#allocation4 + $0xbd] sm:$0x7] %vm5614_vm6, %v15435_v23 }
 0x46e   : > { %9295 = vmatmul.mubr.msk.f32.gmra.mrb[8].mxu0 %vm3070_vm3, %v4937_v41  ;;  %v4988_v41 = vrot.slane %v13531_v26, 3 }
 0x46f   : > { %9297 = vmatprep.mubr.msk.f32.mxu0 %vm3070_vm3, %v4939_v4 }
 0x470   : > { %v4989_v17 = vsel %vm2487_vm2, %v4986_v43, %v4988_v41  ;;  %v4991_v26 = vsel %vm2487_vm2, %v4988_v41, %v4990_v57 }
 0x472   : > { %9298 = vmatmul.mubr.msk.f32.gmra.mrb[10].mxu0 %vm3070_vm3, %v4941_v38  ;;  %v4994_v38 = vrot.slane %v13676_v54, 3  ;;  %v4999_v54 = vsel %vm2487_vm2, %v4996_v28, %v4998_v42 }
 0x473   : > { %9300 = vmatprep.mubr.msk.f32.mxu0 %vm3070_vm3, %v4943_v29 }
 0x474   : > { %v4995_v29 = vsel %vm2487_vm2, %v4992_v0, %v4994_v38  ;;  %v4997_v56 = vsel %vm2487_vm2, %v4994_v38, %v4996_v28 }
 0x476   : > { %9301 = vmatmul.mubr.msk.f32.gmra.mrb[12].mxu0 %vm3070_vm3, %v4945_v13  ;;  %v5000_v13 = vrot.slane %v13746_v5, 3 }
 0x477   : > { %9303 = vmatprep.mubr.msk.f32.mxu0 %vm3070_vm3, %v4947_v30  ;;  %v5004_v30 = vrot.slane %v13776_v55, 3 }
 0x478   : > { %v5001_v24 = vsel %vm2487_vm2, %v4998_v42, %v5000_v13  ;;  %v5003_v49 = vsel %vm2487_vm2, %v5000_v13, %v5002_v15 }
 0x479   : > { %v5005_v36 = vsel %vm2487_vm2, %v5002_v15, %v5004_v30  ;;  %v5007_v55 = vsel %vm2487_vm2, %v5004_v30, %v5006_v1 }
 0x47a   : > { %9304 = vmatmul.mubr.msk.f32.gmra.mrb[14].mxu0 %vm3070_vm3, %v4949_v51 }
 0x47b   : > { %9306 = vmatprep.mubr.msk.f32.mxu0 %vm3070_vm3, %v4951_v14  ;;  %v5008_v14 = vrot.slane %v13798_v33, 3 }
 0x47d   : > { %v5009_v50 = vsel %vm2487_vm2, %v5006_v1, %v5008_v14  ;;  %v5011_v9 = vsel %vm2487_vm2, %v5008_v14, %v5010_v32 }
 0x47e   : > { %9307 = vmatmul.mubr.msk.f32.gmra.mrb[16].mxu0 %vm3070_vm3, %v4953_v21 }
 0x47f   : > { %9309 = vmatprep.mubr.msk.f32.mxu0 %vm3070_vm3, %v4955_v63 }
 0x482   : > { %9310 = vmatmul.mubr.msk.f32.gmra.mrb[18].mxu0 %vm3070_vm3, %v4957_v3  ;;  %v9730_v3 = vpack.c.bf16 %v5745_v31, %v5744_v52 }
 0x483   : > { %9312 = vmatprep.mubr.msk.f32.mxu0 %vm3070_vm3, %v4959_v7 }
 0x484   : > { %9731 = vmatprep.subr.bf16.mxu1 %v9730_v3 }
 0x485   : > { %9733 = vmatpush3.bf16.msra.mxu1 %v9730_v3 }
 0x486   : > { %9313 = vmatmul.mubr.msk.f32.gmra.mrb[20].mxu0 %vm3070_vm3, %v4961_v44  ;;  %v5747_v44 = vld [vmem:[#allocation11 + $0x58] sm:$0xff] }
 0x487   : > { %9315 = vmatprep.mubr.msk.f32.mxu0 %vm3070_vm3, %v4963_v60  ;;  %v9734_v22 = vpack.c.bf16 %v5747_v44, %v5746_v39  ;;  %v5748_v60 = vld [vmem:[#allocation11 + $0x60] sm:$0xff] }
 0x489   : > { %9735 = vmatprep.subr.bf16.mxu1 %v9734_v22 }
 0x48a   : > { %9316 = vmatmul.mubr.msk.f32.gmra.mrb[22].mxu0 %vm3070_vm3, %v4965_v18  ;;  %9737 = vmatpush3.bf16.msra.mxu1 %v9734_v22  ;;  %v9738_v18 = vpack.c.bf16 %v5749_v62, %v5748_v60 }
 0x48b   : > { %9318 = vmatprep.mubr.msk.f32.mxu0 %vm3070_vm3, %v4967_v6 }
 0x48c   : > { %9739 = vmatprep.subr.bf16.mxu1 %v9738_v18 }
 0x48e   : > { %9319 = vmatmul.mubr.msk.f32.gmra.mrb[24].mxu0 %vm3070_vm3, %v4969_v11  ;;  %9741 = vmatpush3.bf16.msra.mxu1 %v9738_v18  ;;  %v5751_v11 = vld [vmem:[#allocation11 + $0x78] sm:$0xff] }
 0x48f   : > { %9321 = vmatprep.mubr.msk.f32.mxu0 %vm3070_vm3, %v4971_v37  ;;  %v9742_v53 = vpack.c.bf16 %v5751_v11, %v5750_v27 }
 0x491   : > { %9743 = vmatprep.subr.bf16.mxu1 %v9742_v53 }
 0x492   : > { %9322 = vmatmul.mubr.msk.f32.gmra.mrb[26].mxu0 %vm3070_vm3, %v4973_v46  ;;  %9745 = vmatpush3.bf16.msra.mxu1 %v9742_v53  ;;  %v5735_v46 = vld [vmem:[#allocation11] sm:$0xff] }
 0x493   : > { %9324 = vmatprep.mubr.msk.f32.mxu0 %vm3070_vm3, %v4975_v10  ;;  %v14128_v10 = vpack.c.bf16 %v5736_v2, %v5735_v46  ;;  %v5737_v2 = vld [vmem:[#allocation11 + $0x10] sm:$0xff] }
 0x495   : > { %9747 = vmatprep.subr.bf16.mxu1 %v14128_v10 }
 0x496   : > { %9325 = vmatmul.mubr.msk.f32.gmra.mrb[28].mxu0 %vm3070_vm3, %v4977_v48  ;;  %v14136_v48 = vld [vmem:[%s14964_s4] ss:$0 sm:$0xff] }
 0x497   : > { %9327 = vmatprep.mubr.msk.f32.mxu0 %vm3070_vm3, %v4979_v59  ;;  %v14061_v4 = vpop.f32.mrb[0].mxu1 }
 0x498   : > { %v14066_v25 = vpop.f32.mrb[1].mxu1 }
 0x49a   : > { %9328 = vmatmul.mubr.msk.f32.gmra.mrb[30].mxu0 %vm3070_vm3, %v4981_v40 }
 0x49b   : > { %9330 = vmatprep.mubr.msk.f32.mxu0 %vm3070_vm3, %v4983_v16 }
 0x49e   : > { %9331 = vmatmul.mubr.msk.f32.gmra.mrb[32].mxu0 %vm3070_vm3, %v4985_v35 }
 0x49f   : > { %9333 = vmatprep.mubr.msk.f32.mxu0 %vm3070_vm3, %v4987_v58 }
 0x4a2   : > { %9334 = vmatmul.mubr.msk.f32.gmra.mrb[34].mxu0 %vm3070_vm3, %v4989_v17 }
 0x4a3   : > { %9336 = vmatprep.mubr.msk.f32.mxu0 %vm3070_vm3, %v4991_v26 }
 0x4a6   : > { %9337 = vmatmul.mubr.msk.f32.gmra.mrb[36].mxu0 %vm3070_vm3, %v4993_v12 }
 0x4a7   : > { %9339 = vmatprep.mubr.msk.f32.mxu0 %vm3070_vm3, %v4995_v29 }
 0x4aa   : > { %9340 = vmatmul.mubr.msk.f32.gmra.mrb[38].mxu0 %vm3070_vm3, %v4997_v56 }
 0x4ab   : > { %9342 = vmatprep.mubr.msk.f32.mxu0 %vm3070_vm3, %v4999_v54 }
 0x4ac   : > { %v14092_v51 = vpop.f32.mrb[2].mxu1 }
 0x4ad   : > { %v14095_v5 = vpop.f32.mrb[3].mxu1 }
 0x4ae   : > { %9343 = vmatmul.mubr.msk.f32.gmra.mrb[40].mxu0 %vm3070_vm3, %v5001_v24 }
 0x4af   : > { %9345 = vmatprep.mubr.msk.f32.mxu0 %vm3070_vm3, %v5003_v49 }
 0x4b2   : > { %9346 = vmatmul.mubr.msk.f32.gmra.mrb[42].mxu0 %vm3070_vm3, %v5005_v36 }
 0x4b3   : > { %9348 = vmatprep.mubr.msk.f32.mxu0 %vm3070_vm3, %v5007_v55 }
 0x4b6   : > { %9349 = vmatmul.mubr.msk.f32.gmra.mrb[44].mxu0 %vm3070_vm3, %v5009_v50 }
 0x4b7   : > { %9351 = vmatprep.mubr.msk.f32.mxu0 %vm3070_vm3, %v5011_v9 }
 0x4b9   : > { %v14107_v21 = vpop.f32.mrb[4].mxu1 }
 0x4ba   : > { %v14109_v20 = vpop.f32.mrb[5].mxu1  ;;  %9352 = vmatmul.mubr.msk.f32.gmra.mrb[46].mxu0 %vm3070_vm3, %v5010_v32 }
 0x4bd   : > { %v14112_v33 = vpop.f32.mrb[6].mxu1 }
 0x4be   : > { %v14114_v63 = vpop.f32.mrb[7].mxu1 }
 0x4c1   : > { %v14116_v45 = vpop.f32.mrb[8].mxu1 }
 0x4c2   : > { %v14118_v7 = vpop.f32.mrb[9].mxu1 }
 0x4ca   : > { %v14120_v34 = vpop.f32.mrb[10].mxu1 }
 0x4cb   : > { %v14122_v6 = vpop.f32.mrb[11].mxu1 }
 0x4d1   : > { %v14124_v37 = vpop.f32.mrb[12].mxu1 }
 0x4d2   : > { %v14126_v47 = vpop.f32.mrb[13].mxu1 }
 0x531   : > { %v9284_v19 = vpop.f32.mrb[0].mxu0 }
 0x532   : > { %v5469_v59 = vadd.f32 %v9284_v19, %v14136_v48  ;;  %v5174_v61 = vpop.f32.mrb[1].mxu0  ;;  %v5738_v19 = vld [vmem:[#allocation11 + $0x18] sm:$0xff] }
 0x533   : > { %v5468_v40 = vadd.f32 %v14136_v48, %v5174_v61 }
 0x534   : > { %v5517_v8 = vmax.f32 %v5469_v59, 0.0 }
 0x535   : > { %v5516_v16 = vmax.f32 %v5468_v40, 0.0  ;;  %v9287_v43 = vpop.f32.mrb[2].mxu0 }
 0x536   : > { %5566 = vst.msk [vmem:[#allocation3 + $0x8] sm:$0xff] %vm5564_vm7, %v5517_v8  ;;  %v5471_v35 = vadd.f32 %v9287_v43, %v14136_v48  ;;  %v5184_v41 = vpop.f32.mrb[3].mxu0 }
 0x537   : > { %5565 = vst.msk [vmem:[#allocation3] sm:$0xff] %vm5564_vm7, %v5516_v16  ;;  %v5470_v58 = vadd.f32 %v14136_v48, %v5184_v41 }
 0x538   : > { %v5519_v57 = vmax.f32 %v5471_v35, 0.0 }
 0x539   : > { %v5518_v17 = vmax.f32 %v5470_v58, 0.0  ;;  %v9290_v0 = vpop.f32.mrb[4].mxu0  ;;  %v9750_v58 = vpack.c.bf16 %v5738_v19, %v5737_v2 }
 0x53a   : > { %5568 = vst.msk [vmem:[#allocation3 + $0x18] sm:$0xff] %vm5564_vm7, %v5519_v57  ;;  %v5473_v26 = vadd.f32 %v9290_v0, %v14136_v48  ;;  %v5194_v38 = vpop.f32.mrb[5].mxu0 }
 0x53b   : > { %5567 = vst.msk [vmem:[#allocation3 + $0x10] sm:$0xff] %vm5564_vm7, %v5518_v17  ;;  %v5472_v12 = vadd.f32 %v14136_v48, %v5194_v38  ;;  %v5740_v38 = vld [vmem:[#allocation11 + $0x28] sm:$0xff] }
 0x53c   : > { %v5521_v28 = vmax.f32 %v5473_v26, 0.0  ;;  %v5739_v26 = vld [vmem:[#allocation11 + $0x20] sm:$0xff] }
 0x53d   : > { %v5520_v29 = vmax.f32 %v5472_v12, 0.0  ;;  %v9293_v42 = vpop.f32.mrb[6].mxu0 }
 0x53e   : > { %5570 = vst.msk [vmem:[#allocation3 + $0x28] sm:$0xff] %vm5564_vm7, %v5521_v28  ;;  %v5475_v56 = vadd.f32 %v9293_v42, %v14136_v48  ;;  %v5204_v13 = vpop.f32.mrb[7].mxu0  ;;  %v5616_v54 = vld [vmem:[#allocation3] ss:$2 sm:$0xff]  ;;  %v5664_v15 = vld [vmem:[#allocation3 + $0x1] ss:$2 sm:$0xff] }
 0x53f   : > { %5569 = vst.msk [vmem:[#allocation3 + $0x20] sm:$0xff] %vm5564_vm7, %v5520_v29  ;;  %v5474_v24 = vadd.f32 %v14136_v48, %v5204_v13  ;;  %v14152_v36 = vmax.f32 %v5616_v54, %v5664_v15 }
 0x540   : > { %v5523_v30 = vmax.f32 %v5475_v56, 0.0 }
 0x541   : > { %v5522_v49 = vmax.f32 %v5474_v24, 0.0  ;;  %v9296_v1 = vpop.f32.mrb[8].mxu0  ;;  %v5776_v44 = vrot.slane %v14152_v36, 1  ;;  %v9754_v24 = vpack.c.bf16 %v5740_v38, %v5739_v26 }
 0x542   : > { %5572 = vst.msk [vmem:[#allocation3 + $0x38] sm:$0xff] %vm5564_vm7, %v5523_v30  ;;  %v5477_v14 = vadd.f32 %v9296_v1, %v14136_v48  ;;  %v5214_v55 = vpop.f32.mrb[9].mxu0  ;;  %v5618_v32 = vld [vmem:[#allocation3 + $0x10] ss:$2 sm:$0xff]  ;;  %v5666_v50 = vld [vmem:[#allocation3 + $0x11] ss:$2 sm:$0xff] }
 0x543   : > { %5571 = vst.msk [vmem:[#allocation3 + $0x30] sm:$0xff] %vm5564_vm7, %v5522_v49  ;;  %v5476_v9 = vadd.f32 %v14136_v48, %v5214_v55  ;;  %v14158_v52 = vmax.f32 %v5618_v32, %v5666_v50  ;;  %v5742_v55 = vld [vmem:[#allocation11 + $0x38] sm:$0xff] }
 0x544   : > { %v5525_v31 = vmax.f32 %v5477_v14, 0.0  ;;  %v5741_v14 = vld [vmem:[#allocation11 + $0x30] sm:$0xff] }
 0x545   : > { %v5524_v3 = vmax.f32 %v5476_v9, 0.0  ;;  %v9299_v39 = vpop.f32.mrb[10].mxu0  ;;  %v5777_v22 = vrot.slane %v14158_v52, 1 }
 0x546   : > { %5574 = vst.msk [vmem:[#allocation3 + $0x48] sm:$0xff] %vm5564_vm7, %v5525_v31  ;;  %v5479_v60 = vadd.f32 %v9299_v39, %v14136_v48  ;;  %v5224_v62 = vpop.f32.mrb[11].mxu0  ;;  %v5620_v18 = vld [vmem:[#allocation3 + $0x20] ss:$2 sm:$0xff]  ;;  %v5668_v27 = vld [vmem:[#allocation3 + $0x21] ss:$2 sm:$0xff] }
 0x547   : > { %5573 = vst.msk [vmem:[#allocation3 + $0x40] sm:$0xff] %vm5564_vm7, %v5524_v3  ;;  %v5478_v11 = vadd.f32 %v14136_v48, %v5224_v62  ;;  %v5778_v53 = vsel %vm1327_vm0, %v5776_v44, %v5777_v22  ;;  %v14167_v46 = vmax.f32 %v5620_v18, %v5668_v27  ;;  %v6290_v27 = vld [vmem:[#allocation11 + $0x80] sm:$0xff] }
 0x548   : > { %v5527_v59 = vmax.f32 %v5479_v60, 0.0  ;;  %9370 = vmatprep.mubr.msk.f32.mxu1 %vm5564_vm7, %v5778_v53 }
 0x549   : > { %v5526_v61 = vmax.f32 %v5478_v11, 0.0  ;;  %v9302_v40 = vpop.f32.mrb[12].mxu0  ;;  %v5779_v8 = vrot.slane %v14167_v46, 1  ;;  %v6291_v11 = vld [vmem:[#allocation11 + $0x88] sm:$0xff] }
 0x54a   : > { %5576 = vst.msk [vmem:[#allocation3 + $0x58] sm:$0xff] %vm5564_vm7, %v5527_v59  ;;  %v5481_v16 = vadd.f32 %v9302_v40, %v14136_v48  ;;  %v5234_v43 = vpop.f32.mrb[13].mxu0  ;;  %v5622_v35 = vld [vmem:[#allocation3 + $0x30] ss:$2 sm:$0xff]  ;;  %v5670_v41 = vld [vmem:[#allocation3 + $0x31] ss:$2 sm:$0xff] }
 0x54b   : > { %5575 = vst.msk [vmem:[#allocation3 + $0x50] sm:$0xff] %vm5564_vm7, %v5526_v61  ;;  %v5480_v57 = vadd.f32 %v14136_v48, %v5234_v43  ;;  %v5780_v17 = vsel %vm1327_vm0, %v5777_v22, %v5779_v8  ;;  %v14176_v0 = vmax.f32 %v5622_v35, %v5670_v41  ;;  %v9758_v22 = vpack.c.bf16 %v5742_v55, %v5741_v14 }
 0x54c   : > { %v5529_v12 = vmax.f32 %v5481_v16, 0.0  ;;  %9371 = vmatmul.mubr.msk.f32.vlgmr.msra.gmra.mrb[14].mxu1 %vm5564_vm7, %v5780_v17  ;;  %v14201_v43 = vpack.c.bf16 %v6291_v11, %v6290_v27 }
 0x54d   : > { %v5528_v28 = vmax.f32 %v5480_v57, 0.0  ;;  %v9305_v29 = vpop.f32.mrb[14].mxu0  ;;  %v5781_v42 = vrot.slane %v14176_v0, 1  ;;  %9749 = vmatpush3.bf16.msra.mxu1 %v14128_v10 }
 0x54e   : > { %5578 = vst.msk [vmem:[#allocation3 + $0x68] sm:$0xff] %vm5564_vm7, %v5529_v12  ;;  %v5483_v56 = vadd.f32 %v9305_v29, %v14136_v48  ;;  %v5244_v13 = vpop.f32.mrb[15].mxu0  ;;  %v5624_v54 = vld [vmem:[#allocation3 + $0x40] ss:$2 sm:$0xff]  ;;  %v5672_v15 = vld [vmem:[#allocation3 + $0x41] ss:$2 sm:$0xff]  ;;  %9751 = vmatprep.subr.bf16.mxu1 %v9750_v58 }
 0x54f   : > { %5577 = vst.msk [vmem:[#allocation3 + $0x60] sm:$0xff] %vm5564_vm7, %v5528_v28  ;;  %v5482_v30 = vadd.f32 %v14136_v48, %v5244_v13  ;;  %v5782_v49 = vsel %vm1327_vm0, %v5779_v8, %v5781_v42  ;;  %v14186_v1 = vmax.f32 %v5624_v54, %v5672_v15 }
 0x550   : > { %v5531_v10 = vmax.f32 %v5483_v56, 0.0  ;;  %9373 = vmatprep.mubr.msk.f32.mxu1 %vm5564_vm7, %v5782_v49 }
 0x551   : > { %v5530_v32 = vmax.f32 %v5482_v30, 0.0  ;;  %v9308_v50 = vpop.f32.mrb[16].mxu0  ;;  %v5783_v9 = vrot.slane %v14186_v1, 1  ;;  %9753 = vmatpush3.bf16.msra.mxu1 %v9750_v58 }
 0x552   : > { %5580 = vst.msk [vmem:[#allocation3 + $0x78] sm:$0xff] %vm5564_vm7, %v5531_v10  ;;  %v5485_v31 = vadd.f32 %v9308_v50, %v14136_v48  ;;  %v5254_v3 = vpop.f32.mrb[17].mxu0  ;;  %v5626_v39 = vld [vmem:[#allocation3 + $0x50] ss:$2 sm:$0xff]  ;;  %v5674_v44 = vld [vmem:[#allocation3 + $0x51] ss:$2 sm:$0xff]  ;;  %9755 = vmatprep.subr.bf16.mxu1 %v9754_v24 }
 0x553   : > { %5579 = vst.msk [vmem:[#allocation3 + $0x70] sm:$0xff] %vm5564_vm7, %v5530_v32  ;;  %v5484_v60 = vadd.f32 %v14136_v48, %v5254_v3  ;;  %v5784_v62 = vsel %vm1327_vm0, %v5781_v42, %v5783_v9  ;;  %v14195_v18 = vmax.f32 %v5626_v39, %v5674_v44 }
 0x554   : > { %v5533_v53 = vmax.f32 %v5485_v31, 0.0  ;;  %9374 = vmatmul.mubr.msk.f32.gmra.mrb[16].mxu1 %vm5564_vm7, %v5784_v62 }
 0x555   : > { %v5532_v2 = vmax.f32 %v5484_v60, 0.0  ;;  %v9311_v19 = vpop.f32.mrb[18].mxu0  ;;  %v5785_v59 = vrot.slane %v14195_v18, 1  ;;  %9757 = vmatpush3.bf16.msra.mxu1 %v9754_v24 }
 0x556   : > { %5582 = vst.msk [vmem:[#allocation3 + $0x88] sm:$0xff] %vm5564_vm7, %v5533_v53  ;;  %v5487_v61 = vadd.f32 %v9311_v19, %v14136_v48  ;;  %v5264_v40 = vpop.f32.mrb[19].mxu0  ;;  %v5628_v8 = vld [vmem:[#allocation3 + $0x60] ss:$2 sm:$0xff]  ;;  %v5676_v16 = vld [vmem:[#allocation3 + $0x61] ss:$2 sm:$0xff]  ;;  %9759 = vmatprep.subr.bf16.mxu1 %v9758_v22 }
 0x557   : > { %5581 = vst.msk [vmem:[#allocation3 + $0x80] sm:$0xff] %vm5564_vm7, %v5532_v2  ;;  %v5486_v35 = vadd.f32 %v14136_v48, %v5264_v40  ;;  %v5786_v41 = vsel %vm1327_vm0, %v5783_v9, %v5785_v59  ;;  %v14206_v58 = vmax.f32 %v5628_v8, %v5676_v16 }
 0x558   : > { %v5535_v57 = vmax.f32 %v5487_v61, 0.0  ;;  %9376 = vmatprep.mubr.msk.f32.mxu1 %vm5564_vm7, %v5786_v41 }
 0x559   : > { %v5534_v17 = vmax.f32 %v5486_v35, 0.0  ;;  %v9314_v26 = vpop.f32.mrb[20].mxu0  ;;  %v5787_v38 = vrot.slane %v14206_v58, 1  ;;  %9761 = vmatpush3.bf16.msra.mxu1 %v9758_v22 }
 0x55a   : > { %5584 = vst.msk [vmem:[#allocation3 + $0x98] sm:$0xff] %vm5564_vm7, %v5535_v57  ;;  %v5489_v12 = vadd.f32 %v9314_v26, %v14136_v48  ;;  %v5274_v28 = vpop.f32.mrb[21].mxu0  ;;  %v5630_v29 = vld [vmem:[#allocation3 + $0x70] ss:$2 sm:$0xff]  ;;  %v5678_v42 = vld [vmem:[#allocation3 + $0x71] ss:$2 sm:$0xff]  ;;  %9763 = vmatprep.subr.bf16.mxu1 %v14201_v43 }
 0x55b   : > { %5583 = vst.msk [vmem:[#allocation3 + $0x90] sm:$0xff] %vm5564_vm7, %v5534_v17  ;;  %v5488_v56 = vadd.f32 %v14136_v48, %v5274_v28  ;;  %v5788_v13 = vsel %vm1327_vm0, %v5785_v59, %v5787_v38  ;;  %v14216_v54 = vmax.f32 %v5630_v29, %v5678_v42 }
 0x55c   : > { %v5537_v15 = vmax.f32 %v5489_v12, 0.0  ;;  %9377 = vmatmul.mubr.msk.f32.gmra.mrb[18].mxu1 %vm5564_vm7, %v5788_v13 }
 0x55d   : > { %v5536_v24 = vmax.f32 %v5488_v56, 0.0  ;;  %v9317_v30 = vpop.f32.mrb[22].mxu0  ;;  %v5789_v49 = vrot.slane %v14216_v54, 1 }
 0x55e   : > { %5586 = vst.msk [vmem:[#allocation3 + $0xa8] sm:$0xff] %vm5564_vm7, %v5537_v15  ;;  %v5491_v14 = vadd.f32 %v9317_v30, %v14136_v48  ;;  %v5284_v55 = vpop.f32.mrb[23].mxu0  ;;  %v5632_v10 = vld [vmem:[#allocation3 + $0x80] ss:$2 sm:$0xff]  ;;  %v5680_v32 = vld [vmem:[#allocation3 + $0x81] ss:$2 sm:$0xff] }
 0x55f   : > { %5585 = vst.msk [vmem:[#allocation3 + $0xa0] sm:$0xff] %vm5564_vm7, %v5536_v24  ;;  %v5490_v50 = vadd.f32 %v14136_v48, %v5284_v55  ;;  %v5790_v9 = vsel %vm1327_vm0, %v5787_v38, %v5789_v49  ;;  %v14225_v31 = vmax.f32 %v5632_v10, %v5680_v32 }
 0x560   : > { %v5539_v3 = vmax.f32 %v5491_v14, 0.0  ;;  %9379 = vmatprep.mubr.msk.f32.mxu1 %vm5564_vm7, %v5790_v9 }
 0x561   : > { %v5538_v39 = vmax.f32 %v5490_v50, 0.0  ;;  %v9320_v44 = vpop.f32.mrb[24].mxu0  ;;  %v5791_v22 = vrot.slane %v14225_v31, 1 }
 0x562   : > { %5588 = vst.msk [vmem:[#allocation3 + $0xb8] sm:$0xff] %vm5564_vm7, %v5539_v3  ;;  %v5493_v60 = vadd.f32 %v9320_v44, %v14136_v48  ;;  %v5294_v62 = vpop.f32.mrb[25].mxu0  ;;  %v5634_v27 = vld [vmem:[#allocation3 + $0x90] ss:$2 sm:$0xff]  ;;  %v5682_v11 = vld [vmem:[#allocation3 + $0x91] ss:$2 sm:$0xff] }
 0x563   : > { %5587 = vst.msk [vmem:[#allocation3 + $0xb0] sm:$0xff] %vm5564_vm7, %v5538_v39  ;;  %v5492_v53 = vadd.f32 %v14136_v48, %v5294_v62  ;;  %v5792_v2 = vsel %vm1327_vm0, %v5789_v49, %v5791_v22  ;;  %v14234_v19 = vmax.f32 %v5634_v27, %v5682_v11 }
 0x564   : > { %v5541_v59 = vmax.f32 %v5493_v60, 0.0  ;;  %9380 = vmatmul.mubr.msk.f32.gmra.mrb[20].mxu1 %vm5564_vm7, %v5792_v2 }
 0x565   : > { %v5540_v61 = vmax.f32 %v5492_v53, 0.0  ;;  %v9323_v40 = vpop.f32.mrb[26].mxu0  ;;  %v5793_v8 = vrot.slane %v14234_v19, 1 }
 0x566   : > { %5590 = vst.msk [vmem:[#allocation3 + $0xc8] sm:$0xff] %vm5564_vm7, %v5541_v59  ;;  %v5495_v16 = vadd.f32 %v9323_v40, %v14136_v48  ;;  %v5304_v35 = vpop.f32.mrb[27].mxu0  ;;  %v5636_v41 = vld [vmem:[#allocation3 + $0xa0] ss:$2 sm:$0xff]  ;;  %v5684_v57 = vld [vmem:[#allocation3 + $0xa1] ss:$2 sm:$0xff] }
 0x567   : > { %5589 = vst.msk [vmem:[#allocation3 + $0xc0] sm:$0xff] %vm5564_vm7, %v5540_v61  ;;  %v5494_v17 = vadd.f32 %v14136_v48, %v5304_v35  ;;  %v5794_v26 = vsel %vm1327_vm0, %v5791_v22, %v5793_v8  ;;  %v14243_v38 = vmax.f32 %v5636_v41, %v5684_v57 }
 0x568   : > { %v5543_v12 = vmax.f32 %v5495_v16, 0.0  ;;  %9382 = vmatprep.mubr.msk.f32.mxu1 %vm5564_vm7, %v5794_v26 }
 0x569   : > { %v5542_v28 = vmax.f32 %v5494_v17, 0.0  ;;  %v9326_v29 = vpop.f32.mrb[28].mxu0  ;;  %v5795_v42 = vrot.slane %v14243_v38, 1 }
 0x56a   : > { %5592 = vst.msk [vmem:[#allocation3 + $0xd8] sm:$0xff] %vm5564_vm7, %v5543_v12  ;;  %v5497_v56 = vadd.f32 %v9326_v29, %v14136_v48  ;;  %v5314_v13 = vpop.f32.mrb[29].mxu0  ;;  %v5638_v15 = vld [vmem:[#allocation3 + $0xb0] ss:$2 sm:$0xff]  ;;  %v5686_v24 = vld [vmem:[#allocation3 + $0xb1] ss:$2 sm:$0xff] }
 0x56b   : > { %5591 = vst.msk [vmem:[#allocation3 + $0xd0] sm:$0xff] %vm5564_vm7, %v5542_v28  ;;  %v5496_v30 = vadd.f32 %v14136_v48, %v5314_v13  ;;  %v5796_v49 = vsel %vm1327_vm0, %v5793_v8, %v5795_v42  ;;  %v14252_v14 = vmax.f32 %v5638_v15, %v5686_v24 }
 0x56c   : > { %v5545_v55 = vmax.f32 %v5497_v56, 0.0  ;;  %9383 = vmatmul.mubr.msk.f32.gmra.mrb[22].mxu1 %vm5564_vm7, %v5796_v49 }
 0x56d   : > { %v5544_v10 = vmax.f32 %v5496_v30, 0.0  ;;  %v9329_v32 = vpop.f32.mrb[30].mxu0  ;;  %v5797_v50 = vrot.slane %v14252_v14, 1 }
 0x56e   : > { %5594 = vst.msk [vmem:[#allocation3 + $0xe8] sm:$0xff] %vm5564_vm7, %v5545_v55  ;;  %v5499_v9 = vadd.f32 %v9329_v32, %v14136_v48  ;;  %v5324_v3 = vpop.f32.mrb[31].mxu0  ;;  %v5640_v39 = vld [vmem:[#allocation3 + $0xc0] ss:$2 sm:$0xff]  ;;  %v5688_v44 = vld [vmem:[#allocation3 + $0xc1] ss:$2 sm:$0xff] }
 0x56f   : > { %5593 = vst.msk [vmem:[#allocation3 + $0xe0] sm:$0xff] %vm5564_vm7, %v5544_v10  ;;  %v5498_v22 = vadd.f32 %v14136_v48, %v5324_v3  ;;  %v5798_v60 = vsel %vm1327_vm0, %v5795_v42, %v5797_v50  ;;  %v14261_v62 = vmax.f32 %v5640_v39, %v5688_v44 }
 0x570   : > { %v5547_v27 = vmax.f32 %v5499_v9, 0.0  ;;  %9385 = vmatprep.mubr.msk.f32.mxu1 %vm5564_vm7, %v5798_v60 }
 0x571   : > { %v5546_v11 = vmax.f32 %v5498_v22, 0.0  ;;  %v9332_v53 = vpop.f32.mrb[32].mxu0  ;;  %v5799_v2 = vrot.slane %v14261_v62, 1 }
 0x572   : > { %5596 = vst.msk [vmem:[#allocation3 + $0xf8] sm:$0xff] %vm5564_vm7, %v5547_v27  ;;  %v5501_v59 = vadd.f32 %v9332_v53, %v14136_v48  ;;  %v5334_v61 = vpop.f32.mrb[33].mxu0  ;;  %v5642_v40 = vld [vmem:[#allocation3 + $0xd0] ss:$2 sm:$0xff]  ;;  %v5690_v8 = vld [vmem:[#allocation3 + $0xd1] ss:$2 sm:$0xff] }
 0x573   : > { %5595 = vst.msk [vmem:[#allocation3 + $0xf0] sm:$0xff] %vm5564_vm7, %v5546_v11  ;;  %v5500_v16 = vadd.f32 %v14136_v48, %v5334_v61  ;;  %v5800_v35 = vsel %vm1327_vm0, %v5797_v50, %v5799_v2  ;;  %v14270_v41 = vmax.f32 %v5642_v40, %v5690_v8 }
 0x574   : > { %v5549_v57 = vmax.f32 %v5501_v59, 0.0  ;;  %9386 = vmatmul.mubr.msk.f32.gmra.mrb[24].mxu1 %vm5564_vm7, %v5800_v35 }
 0x575   : > { %v5548_v17 = vmax.f32 %v5500_v16, 0.0  ;;  %v9335_v26 = vpop.f32.mrb[34].mxu0  ;;  %v5801_v12 = vrot.slane %v14270_v41, 1 }
 0x576   : > { %5598 = vst.msk [vmem:[#allocation3 + $0x108] sm:$0xff] %vm5564_vm7, %v5549_v57  ;;  %v9910_v28 = vadd.f32 %v9335_v26, %v14061_v4  ;;  %v5344_v29 = vpop.f32.mrb[35].mxu0  ;;  %v5644_v42 = vld [vmem:[#allocation3 + $0xe0] ss:$2 sm:$0xff]  ;;  %v5692_v56 = vld [vmem:[#allocation3 + $0xe1] ss:$2 sm:$0xff] }
 0x577   : > { %5597 = vst.msk [vmem:[#allocation3 + $0x100] sm:$0xff] %vm5564_vm7, %v5548_v17  ;;  %v9911_v13 = vadd.f32 %v5344_v29, %v14066_v25  ;;  %v5802_v15 = vsel %vm1327_vm0, %v5799_v2, %v5801_v12  ;;  %v14279_v24 = vmax.f32 %v5644_v42, %v5692_v56 }
 0x578   : > { %v5503_v30 = vadd.f32 %v9910_v28, %v14136_v48  ;;  %9388 = vmatprep.mubr.msk.f32.mxu1 %vm5564_vm7, %v5802_v15 }
 0x579   : > { %v5502_v49 = vadd.f32 %v9911_v13, %v14136_v48  ;;  %v9338_v55 = vpop.f32.mrb[36].mxu0  ;;  %v5803_v4 = vrot.slane %v14279_v24, 1 }
 0x57a   : > { %v5551_v10 = vmax.f32 %v5503_v30, 0.0  ;;  %v9912_v32 = vadd.f32 %v9338_v55, %v14092_v51  ;;  %v5354_v50 = vpop.f32.mrb[37].mxu0  ;;  %v5646_v9 = vld [vmem:[#allocation3 + $0xf0] ss:$2 sm:$0xff]  ;;  %v5694_v3 = vld [vmem:[#allocation3 + $0xf1] ss:$2 sm:$0xff] }
 0x57b   : > { %v5550_v25 = vmax.f32 %v5502_v49, 0.0  ;;  %v9913_v39 = vadd.f32 %v5354_v50, %v14095_v5  ;;  %v5804_v44 = vsel %vm1327_vm0, %v5801_v12, %v5803_v4  ;;  %v14288_v22 = vmax.f32 %v5646_v9, %v5694_v3 }
 0x57c   : > { %5600 = vst.msk [vmem:[#allocation3 + $0x118] sm:$0xff] %vm5564_vm7, %v5551_v10  ;;  %v5505_v60 = vadd.f32 %v9912_v32, %v14136_v48  ;;  %9389 = vmatmul.mubr.msk.f32.gmra.mrb[26].mxu1 %vm5564_vm7, %v5804_v44 }
 0x57d   : > { %5599 = vst.msk [vmem:[#allocation3 + $0x110] sm:$0xff] %vm5564_vm7, %v5550_v25  ;;  %v5504_v51 = vadd.f32 %v9913_v39, %v14136_v48  ;;  %v9341_v27 = vpop.f32.mrb[38].mxu0  ;;  %v5805_v11 = vrot.slane %v14288_v22, 1 }
 0x57e   : > { %v5553_v53 = vmax.f32 %v5505_v60, 0.0  ;;  %v9914_v5 = vadd.f32 %v9341_v27, %v14107_v21  ;;  %v5364_v2 = vpop.f32.mrb[39].mxu0  ;;  %v5648_v59 = vld [vmem:[#allocation3 + $0x100] ss:$2 sm:$0xff]  ;;  %v5696_v61 = vld [vmem:[#allocation3 + $0x101] ss:$2 sm:$0xff] }
 0x57f   : > { %v5552_v40 = vmax.f32 %v5504_v51, 0.0  ;;  %v9915_v8 = vadd.f32 %v5364_v2, %v14109_v20  ;;  %v5806_v16 = vsel %vm1327_vm0, %v5803_v4, %v5805_v11  ;;  %v14299_v35 = vmax.f32 %v5648_v59, %v5696_v61 }
 0x580   : > { %5602 = vst.msk [vmem:[#allocation3 + $0x128] sm:$0xff] %vm5564_vm7, %v5553_v53  ;;  %v5507_v57 = vadd.f32 %v9914_v5, %v14136_v48  ;;  %9391 = vmatprep.mubr.msk.f32.mxu1 %vm5564_vm7, %v5806_v16 }
 0x581   : > { %5601 = vst.msk [vmem:[#allocation3 + $0x120] sm:$0xff] %vm5564_vm7, %v5552_v40  ;;  %v5506_v21 = vadd.f32 %v9915_v8, %v14136_v48  ;;  %v9344_v17 = vpop.f32.mrb[40].mxu0  ;;  %v5807_v26 = vrot.slane %v14299_v35, 1 }
 0x582   : > { %v5555_v12 = vmax.f32 %v5507_v57, 0.0  ;;  %v9916_v20 = vadd.f32 %v9344_v17, %v14112_v33  ;;  %v5374_v28 = vpop.f32.mrb[41].mxu0 }
 0x583   : > { %v5554_v29 = vmax.f32 %v5506_v21, 0.0  ;;  %v9917_v42 = vadd.f32 %v5374_v28, %v14114_v63  ;;  %v5808_v56 = vsel %vm1327_vm0, %v5805_v11, %v5807_v26 }
 0x584   : > { %5604 = vst.msk [vmem:[#allocation3 + $0x138] sm:$0xff] %vm5564_vm7, %v5555_v12  ;;  %v5509_v13 = vadd.f32 %v9916_v20, %v14136_v48  ;;  %9392 = vmatmul.mubr.msk.f32.gmra.mrb[28].mxu1 %vm5564_vm7, %v5808_v56  ;;  %v5650_v15 = vld [vmem:[#allocation3 + $0x110] ss:$2 sm:$0xff]  ;;  %v5698_v30 = vld [vmem:[#allocation3 + $0x111] ss:$2 sm:$0xff] }
 0x585   : > { %5603 = vst.msk [vmem:[#allocation3 + $0x130] sm:$0xff] %vm5564_vm7, %v5554_v29  ;;  %v5508_v49 = vadd.f32 %v9917_v42, %v14136_v48  ;;  %v9347_v55 = vpop.f32.mrb[42].mxu0  ;;  %v14315_v33 = vmax.f32 %v5650_v15, %v5698_v30 }
 0x586   : > { %v5557_v4 = vmax.f32 %v5509_v13, 0.0  ;;  %v9918_v63 = vadd.f32 %v9347_v55, %v14116_v45  ;;  %v5384_v10 = vpop.f32.mrb[43].mxu0 }
 0x587   : > { %v5556_v32 = vmax.f32 %v5508_v49, 0.0  ;;  %v9919_v50 = vadd.f32 %v5384_v10, %v14118_v7  ;;  %v5809_v9 = vrot.slane %v14315_v33, 1  ;;  %v6331_v53 = vrot.slane %v14315_v33, 2 }
 0x588   : > { %5606 = vst.msk [vmem:[#allocation3 + $0x148] sm:$0xff] %vm5564_vm7, %v5557_v4  ;;  %v5511_v3 = vadd.f32 %v9918_v63, %v14136_v48  ;;  %v5652_v25 = vld [vmem:[#allocation3 + $0x120] ss:$2 sm:$0xff]  ;;  %v5700_v39 = vld [vmem:[#allocation3 + $0x121] ss:$2 sm:$0xff] }
 0x589   : > { %5605 = vst.msk [vmem:[#allocation3 + $0x140] sm:$0xff] %vm5564_vm7, %v5556_v32  ;;  %v5510_v44 = vadd.f32 %v9919_v50, %v14136_v48  ;;  %v9350_v60 = vpop.f32.mrb[44].mxu0  ;;  %v5810_v51 = vsel %vm1327_vm0, %v5807_v26, %v5809_v9  ;;  %v14325_v45 = vmax.f32 %v5652_v25, %v5700_v39 }
 0x58a   : > { %v5559_v27 = vmax.f32 %v5511_v3, 0.0  ;;  %v9920_v7 = vadd.f32 %v9350_v60, %v14120_v34  ;;  %v5394_v11 = vpop.f32.mrb[45].mxu0  ;;  %9394 = vmatprep.mubr.msk.f32.mxu1 %vm5564_vm7, %v5810_v51 }
 0x58b   : > { %v5558_v5 = vmax.f32 %v5510_v44, 0.0  ;;  %v9921_v2 = vadd.f32 %v5394_v11, %v14122_v6  ;;  %v5811_v59 = vrot.slane %v14325_v45, 1  ;;  %v6333_v61 = vrot.slane %v14325_v45, 2 }
 0x58c   : > { %5608 = vst.msk [vmem:[#allocation3 + $0x158] sm:$0xff] %vm5564_vm7, %v5559_v27  ;;  %v5513_v40 = vadd.f32 %v9920_v7, %v14136_v48  ;;  %v5654_v8 = vld [vmem:[#allocation3 + $0x130] ss:$2 sm:$0xff]  ;;  %v5702_v16 = vld [vmem:[#allocation3 + $0x131] ss:$2 sm:$0xff] }
 0x58d   : > { %5607 = vst.msk [vmem:[#allocation3 + $0x150] sm:$0xff] %vm5564_vm7, %v5558_v5  ;;  %v5512_v34 = vadd.f32 %v9921_v2, %v14136_v48  ;;  %v9353_v57 = vpop.f32.mrb[46].mxu0  ;;  %v5812_v21 = vsel %vm1327_vm0, %v5809_v9, %v5811_v59  ;;  %v14338_v17 = vmax.f32 %v5654_v8, %v5702_v16  ;;  %v14343_v6 = vsel %vm1907_vm1, %v6331_v53, %v6333_v61 }
 0x58e   : > { %v5561_v26 = vmax.f32 %v5513_v40, 0.0  ;;  %v9922_v12 = vadd.f32 %v9353_v57, %v14124_v37  ;;  %v5404_v20 = vpop.f32.mrb[47].mxu0  ;;  %9395 = vmatmul.mubr.msk.f32.gmra.mrb[30].mxu1 %vm5564_vm7, %v5812_v21 }
 0x58f   : > { %v5560_v28 = vmax.f32 %v5512_v34, 0.0  ;;  %v9923_v29 = vadd.f32 %v5404_v20, %v14126_v47  ;;  %v5813_v42 = vrot.slane %v14338_v17, 1  ;;  %v6335_v56 = vrot.slane %v14338_v17, 2  ;;  %v6293_v20 = vld [vmem:[#allocation11 + $0x98] sm:$0xff] }
 0x590   : > { %5610 = vst.msk [vmem:[#allocation3 + $0x168] sm:$0xff] %vm5564_vm7, %v5561_v26  ;;  %v5515_v13 = vadd.f32 %v9922_v12, %v14136_v48  ;;  %v5656_v15 = vld [vmem:[#allocation3 + $0x140] ss:$2 sm:$0xff]  ;;  %v5704_v30 = vld [vmem:[#allocation3 + $0x141] ss:$2 sm:$0xff] }
 0x591   : > { %5609 = vst.msk [vmem:[#allocation3 + $0x160] sm:$0xff] %vm5564_vm7, %v5560_v28  ;;  %v5514_v37 = vadd.f32 %v9923_v29, %v14136_v48  ;;  %v5814_v49 = vsel %vm1327_vm0, %v5811_v59, %v5813_v42  ;;  %v14355_v55 = vmax.f32 %v5656_v15, %v5704_v30  ;;  %v14358_v47 = vsel %vm1907_vm1, %v6333_v61, %v6335_v56  ;;  %v6292_v12 = vld [vmem:[#allocation11 + $0x90] sm:$0xff] }
 0x592   : > { %v5563_v4 = vmax.f32 %v5515_v13, 0.0  ;;  %9397 = vmatprep.mubr.msk.f32.mxu1 %vm5564_vm7, %v5814_v49  ;;  %v6644_v28 = vrot.slane %v14315_v33, 3  ;;  %v6646_v29 = vrot.slane %v14325_v45, 3  ;;  %v6295_v13 = vld [vmem:[#allocation11 + $0xa8] sm:$0xff]  ;;  %v6648_v30 = vrot.slane %v14338_v17, 3 }
 0x593   : > { %v5562_v63 = vmax.f32 %v5514_v37, 0.0  ;;  %v5815_v10 = vrot.slane %v14355_v55, 1  ;;  %v6337_v32 = vrot.slane %v14355_v55, 2  ;;  %v6650_v37 = vrot.slane %v14355_v55, 3 }
 0x594   : > { %5613 = vst.msk [vmem:[#allocation3 + $0x178] sm:$0x1f] %vm5612_vm8, %v5563_v4  ;;  %v5658_v50 = vld [vmem:[#allocation3 + $0x150] ss:$2 sm:$0xff]  ;;  %v5706_v9 = vld [vmem:[#allocation3 + $0x151] ss:$2 sm:$0xff]  ;;  %v14407_v15 = vsel %vm2487_vm2, %v6644_v28, %v6646_v29  ;;  %v14417_v4 = vsel %vm2487_vm2, %v6646_v29, %v6648_v30 }
 0x595   : > { %5611 = vst.msk [vmem:[#allocation3 + $0x170] sm:$0xff] %vm5564_vm7, %v5562_v63  ;;  %v5816_v48 = vsel %vm1327_vm0, %v5813_v42, %v5815_v10  ;;  %v14366_v3 = vmax.f32 %v5658_v50, %v5706_v9  ;;  %v14369_v25 = vsel %vm1907_vm1, %v6335_v56, %v6337_v32  ;;  %v9766_v42 = vpack.c.bf16 %v6293_v20, %v6292_v12  ;;  %v6294_v56 = vld [vmem:[#allocation11 + $0xa0] sm:$0xff]  ;;  %v6296_v63 = vld [vmem:[#allocation11 + $0xb0] sm:$0xff]  ;;  %v6608_v12 = vld [vmem:[#allocation11 + $0xe8] sm:$0xff] }
 0x596   : > { %9398 = vmatmul.mubr.msk.f32.gmra.mrb[32].mxu1 %vm5564_vm7, %v5816_v48  ;;  %v9770_v49 = vpack.c.bf16 %v6295_v13, %v6294_v56  ;;  %v6307_v29 = vrot.slane %v14195_v18, 2  ;;  %v6309_v13 = vrot.slane %v14206_v58, 2 }
 0x597   : > { %v5817_v39 = vrot.slane %v14366_v3, 1  ;;  %v6339_v44 = vrot.slane %v14366_v3, 2 }
 0x598   : > { %v5660_v60 = vld [vmem:[#allocation3 + $0x160] ss:$2 sm:$0xff]  ;;  %v5708_v51 = vld [vmem:[#allocation3 + $0x161] ss:$2 sm:$0xff] }
 0x599   : > { %v5818_v27 = vsel %vm1327_vm0, %v5815_v10, %v5817_v39  ;;  %v14375_v7 = vmax.f32 %v5660_v60, %v5708_v51  ;;  %v14378_v11 = vsel %vm1907_vm1, %v6337_v32, %v6339_v44  ;;  %v6297_v10 = vld [vmem:[#allocation11 + $0xb8] sm:$0xff]  ;;  %v14420_v32 = vsel %vm2487_vm2, %v6648_v30, %v6650_v37  ;;  %v6609_v30 = vld [vmem:[#allocation11 + $0xf0] sm:$0xff] }
 0x59a   : > { %9400 = vmatprep.mubr.msk.f32.mxu1 %vm5564_vm7, %v5818_v27  ;;  %v9774_v9 = vpack.c.bf16 %v6297_v10, %v6296_v63  ;;  %v6311_v63 = vrot.slane %v14216_v54, 2 }
 0x59b   : > { %v5819_v5 = vrot.slane %v14375_v7, 1  ;;  %v6341_v2 = vrot.slane %v14375_v7, 2  ;;  %v6654_v50 = vrot.slane %v14375_v7, 3 }
 0x59c   : > { %v5662_v59 = vld [vmem:[#allocation3 + $0x170] ss:$2 sm:$0xff]  ;;  %v5710_v61 = vld [vmem:[#allocation3 + $0x171] ss:$2 sm:$0xff] }
 0x59d   : > { %v5820_v40 = vsel %vm1327_vm0, %v5817_v39, %v5819_v5  ;;  %v14384_v8 = vmax.f32 %v5662_v59, %v5710_v61  ;;  %v14387_v16 = vsel %vm1907_vm1, %v6339_v44, %v6341_v2  ;;  %v6603_v39 = vld [vmem:[#allocation11 + $0xc0] sm:$0xff]  ;;  %v6604_v44 = vld [vmem:[#allocation11 + $0xc8] sm:$0xff]  ;;  %v6298_v59 = vrot.slane %v14152_v36, 2 }
 0x59e   : > { %9401 = vmatmul.mubr.msk.f32.gmra.mrb[34].mxu1 %vm5564_vm7, %v5820_v40  ;;  %v9778_v27 = vpack.c.bf16 %v6604_v44, %v6603_v39  ;;  %v6301_v61 = vrot.slane %v14167_v46, 2  ;;  %v6605_v40 = vld [vmem:[#allocation11 + $0xd0] sm:$0xff]  ;;  %v7064_v39 = vld [vmem:[#allocation12 + $0x48] sm:$0xff]  ;;  %v6312_v44 = vsel %vm1907_vm1, %v6309_v13, %v6311_v63 }
 0x59f   : > { %v5821_v34 = vrot.slane %v14384_v8, 1  ;;  %v6343_v57 = vrot.slane %v14384_v8, 2  ;;  %v6656_v51 = vrot.slane %v14384_v8, 3 }
 0x5a1   : > { %v5822_v21 = vsel %vm1327_vm0, %v5819_v5, %v5821_v34  ;;  %v14396_v26 = vsel %vm1907_vm1, %v6341_v2, %v6343_v57  ;;  %v14442_v5 = vsel %vm2487_vm2, %v6654_v50, %v6656_v51  ;;  %v6299_v2 = vrot.slane %v14158_v52, 2 }
 0x5a2   : > { %9403 = vmatprep.mubr.msk.f32.mxu1 %vm5564_vm7, %v5822_v21  ;;  %v6607_v21 = vld [vmem:[#allocation11 + $0xe0] sm:$0xff] }
 0x5a3   : > { %9404 = vmatmul.mubr.msk.f32.gmra.mrb[36].mxu1 %vm5564_vm7, %v5821_v34  ;;  %v6302_v34 = vsel %vm1907_vm1, %v6299_v2, %v6301_v61 }
 0x5a4   : > { %9422 = vmatprep.mubr.msk.f32.mxu1 %vm5564_vm7, %v14152_v36 }
 0x5a7   : > { %9423 = vmatmul.mubr.msk.f32.vlgmr.msra.gmra.mrb[14].mxu1 %vm5564_vm7, %v14158_v52 }
 0x5a8   : > { %9765 = vmatpush3.bf16.msra.mxu1 %v14201_v43  ;;  %9425 = vmatprep.mubr.msk.f32.mxu1 %vm5564_vm7, %v14167_v46  ;;  %v6652_v43 = vrot.slane %v14366_v3, 3 }
 0x5a9   : > { %9767 = vmatprep.subr.bf16.mxu1 %v9766_v42 }
 0x5aa   : > { %v14429_v48 = vsel %vm2487_vm2, %v6650_v37, %v6652_v43  ;;  %v14432_v60 = vsel %vm2487_vm2, %v6652_v43, %v6654_v50  ;;  %v6610_v37 = vld [vmem:[#allocation11 + $0xf8] sm:$0xff]  ;;  %v6310_v43 = vsel %vm1907_vm1, %v6307_v29, %v6309_v13  ;;  %v6313_v50 = vrot.slane %v14225_v31, 2 }
 0x5ab   : > { %9426 = vmatmul.mubr.msk.f32.gmra.mrb[16].mxu1 %vm5564_vm7, %v14176_v0  ;;  %v9790_v10 = vpack.c.bf16 %v6610_v37, %v6609_v30  ;;  %v6612_v37 = vrot.slane %v14158_v52, 3  ;;  %v6618_v52 = vrot.slane %v14186_v1, 3 }
 0x5ac   : > { %9428 = vmatprep.mubr.msk.f32.mxu1 %vm5564_vm7, %v14186_v1  ;;  %9769 = vmatpush3.bf16.msra.mxu1 %v9766_v42  ;;  %v9786_v42 = vpack.c.bf16 %v6608_v12, %v6607_v21  ;;  %v6325_v21 = vrot.slane %v14279_v24, 2 }
 0x5ad   : > { %9771 = vmatprep.subr.bf16.mxu1 %v9770_v49 }
 0x5af   : > { %9429 = vmatmul.mubr.msk.f32.gmra.mrb[18].mxu1 %vm5564_vm7, %v14195_v18 }
 0x5b0   : > { %9431 = vmatprep.mubr.msk.f32.mxu1 %vm5564_vm7, %v14206_v58  ;;  %9773 = vmatpush3.bf16.msra.mxu1 %v9770_v49 }
 0x5b1   : > { %9775 = vmatprep.subr.bf16.mxu1 %v9774_v9 }
 0x5b3   : > { %9432 = vmatmul.mubr.msk.f32.gmra.mrb[20].mxu1 %vm5564_vm7, %v14216_v54 }
 0x5b4   : > { %9434 = vmatprep.mubr.msk.f32.mxu1 %vm5564_vm7, %v14225_v31  ;;  %9777 = vmatpush3.bf16.msra.mxu1 %v9774_v9  ;;  %v7063_v9 = vld [vmem:[#allocation12 + $0x40] sm:$0xff] }
 0x5b5   : > { %9779 = vmatprep.subr.bf16.mxu1 %v9778_v27 }
 0x5b7   : > { %9435 = vmatmul.mubr.msk.f32.gmra.mrb[22].mxu1 %vm5564_vm7, %v14234_v19 }
 0x5b8   : > { %9437 = vmatprep.mubr.msk.f32.mxu1 %vm5564_vm7, %v14243_v38 }
 0x5bb   : > { %9438 = vmatmul.mubr.msk.f32.gmra.mrb[24].mxu1 %vm5564_vm7, %v14252_v14 }
 0x5bc   : > { %9440 = vmatprep.mubr.msk.f32.mxu1 %vm5564_vm7, %v14261_v62 }
 0x5bf   : > { %9441 = vmatmul.mubr.msk.f32.gmra.mrb[26].mxu1 %vm5564_vm7, %v14270_v41 }
 0x5c0   : > { %9443 = vmatprep.mubr.msk.f32.mxu1 %vm5564_vm7, %v14279_v24 }
 0x5c3   : > { %9444 = vmatmul.mubr.msk.f32.gmra.mrb[28].mxu1 %vm5564_vm7, %v14288_v22 }
 0x5c4   : > { %9446 = vmatprep.mubr.msk.f32.mxu1 %vm5564_vm7, %v14299_v35 }
 0x5c7   : > { %9447 = vmatmul.mubr.msk.f32.gmra.mrb[30].mxu1 %vm5564_vm7, %v14315_v33  ;;  %v7066_v33 = vld [vmem:[#allocation12 + $0x58] sm:$0xff] }
 0x5c8   : > { %9449 = vmatprep.mubr.msk.f32.mxu1 %vm5564_vm7, %v14325_v45  ;;  %v6606_v45 = vld [vmem:[#allocation11 + $0xd8] sm:$0xff] }
 0x5cb   : > { %9450 = vmatmul.mubr.msk.f32.gmra.mrb[32].mxu1 %vm5564_vm7, %v14338_v17  ;;  %v6300_v17 = vsel %vm1907_vm1, %v6298_v59, %v6299_v2  ;;  %v9794_v2 = vpack.c.bf16 %v7064_v39, %v7063_v9  ;;  %v6314_v59 = vsel %vm1907_vm1, %v6311_v63, %v6313_v50  ;;  %v6628_v63 = vrot.slane %v14234_v19, 3 }
 0x5cc   : > { %9452 = vmatprep.mubr.msk.f32.mxu1 %vm5564_vm7, %v14355_v55  ;;  %v6303_v55 = vrot.slane %v14176_v0, 2  ;;  %v6636_v9 = vrot.slane %v14270_v41, 3  ;;  %v6638_v39 = vrot.slane %v14279_v24, 3 }
 0x5ce   : > { %v6304_v20 = vsel %vm1907_vm1, %v6301_v61, %v6303_v55  ;;  %v6317_v61 = vrot.slane %v14243_v38, 2 }
 0x5cf   : > { %9453 = vmatmul.mubr.msk.f32.gmra.mrb[34].mxu1 %vm5564_vm7, %v14366_v3  ;;  %v9782_v3 = vpack.c.bf16 %v6606_v45, %v6605_v40  ;;  %v6319_v45 = vrot.slane %v14252_v14, 2 }
 0x5d0   : > { %9455 = vmatprep.mubr.msk.f32.mxu1 %vm5564_vm7, %v14375_v7  ;;  %v6305_v7 = vrot.slane %v14186_v1, 2 }
 0x5d2   : > { %v6306_v56 = vsel %vm1907_vm1, %v6303_v55, %v6305_v7  ;;  %v6308_v49 = vsel %vm1907_vm1, %v6305_v7, %v6307_v29  ;;  %v6321_v55 = vrot.slane %v14261_v62, 2 }
 0x5d3   : > { %9456 = vmatmul.mubr.msk.f32.gmra.mrb[36].mxu1 %vm5564_vm7, %v14384_v8 }
 0x5d4   : > { %9474 = vmatprep.mubr.msk.f32.mxu1 %vm5564_vm7, %v6300_v17  ;;  %v6322_v7 = vsel %vm1907_vm1, %v6319_v45, %v6321_v55 }
 0x5d7   : > { %9475 = vmatmul.mubr.msk.f32.vlgmr.msra.gmra.mrb[14].mxu1 %vm5564_vm7, %v6302_v34  ;;  %v6323_v34 = vrot.slane %v14270_v41, 2 }
 0x5d8   : > { %9781 = vmatpush3.bf16.msra.mxu1 %v9778_v27  ;;  %9477 = vmatprep.mubr.msk.f32.mxu1 %vm5564_vm7, %v6304_v20  ;;  %v6315_v27 = vrot.slane %v14234_v19, 2  ;;  %v6327_v20 = vrot.slane %v14288_v22, 2 }
 0x5d9   : > { %9783 = vmatprep.subr.bf16.mxu1 %v9782_v3  ;;  %v6324_v12 = vsel %vm1907_vm1, %v6321_v55, %v6323_v34  ;;  %v6326_v29 = vsel %vm1907_vm1, %v6323_v34, %v6325_v21 }
 0x5da   : > { %v6316_v40 = vsel %vm1907_vm1, %v6313_v50, %v6315_v27  ;;  %v6318_v17 = vsel %vm1907_vm1, %v6315_v27, %v6317_v61  ;;  %v6634_v50 = vrot.slane %v14261_v62, 3  ;;  %v6639_v62 = vsel %vm2487_vm2, %v6636_v9, %v6638_v39 }
 0x5db   : > { %9478 = vmatmul.mubr.msk.f32.gmra.mrb[16].mxu1 %vm5564_vm7, %v6306_v56  ;;  %v6328_v56 = vsel %vm1907_vm1, %v6325_v21, %v6327_v20  ;;  %v6642_v27 = vrot.slane %v14299_v35, 3 }
 0x5dc   : > { %9480 = vmatprep.mubr.msk.f32.mxu1 %vm5564_vm7, %v6308_v49  ;;  %9785 = vmatpush3.bf16.msra.mxu1 %v9782_v3  ;;  %v6320_v3 = vsel %vm1907_vm1, %v6317_v61, %v6319_v45  ;;  %v6626_v49 = vrot.slane %v14225_v31, 3 }
 0x5dd   : > { %9787 = vmatprep.subr.bf16.mxu1 %v9786_v42 }
 0x5df   : > { %9481 = vmatmul.mubr.msk.f32.gmra.mrb[18].mxu1 %vm5564_vm7, %v6310_v43  ;;  %v6632_v43 = vrot.slane %v14252_v14, 3  ;;  %v6637_v14 = vsel %vm2487_vm2, %v6634_v50, %v6636_v9 }
 0x5e0   : > { %9483 = vmatprep.mubr.msk.f32.mxu1 %vm5564_vm7, %v6312_v44  ;;  %9789 = vmatpush3.bf16.msra.mxu1 %v9786_v42  ;;  %v6329_v42 = vrot.slane %v14299_v35, 2  ;;  %v6640_v44 = vrot.slane %v14288_v22, 3  ;;  %v6645_v22 = vsel %vm2487_vm2, %v6642_v27, %v6644_v28  ;;  %v7065_v35 = vld [vmem:[#allocation12 + $0x50] sm:$0xff] }
 0x5e1   : > { %9791 = vmatprep.subr.bf16.mxu1 %v9790_v10  ;;  %v9798_v28 = vpack.c.bf16 %v7066_v33, %v7065_v35  ;;  %v7056_v35 = vld [vmem:[#allocation12 + $0x10] sm:$0xff]  ;;  %v7057_v33 = vld [vmem:[#allocation12 + $0x18] sm:$0xff] }
 0x5e2   : > { %v6330_v13 = vsel %vm1907_vm1, %v6327_v20, %v6329_v42  ;;  %v6332_v30 = vsel %vm1907_vm1, %v6329_v42, %v6331_v53  ;;  %v6611_v53 = vrot.slane %v14152_v36, 3  ;;  %v6641_v41 = vsel %vm2487_vm2, %v6638_v39, %v6640_v44 }
 0x5e3   : > { %9484 = vmatmul.mubr.msk.f32.gmra.mrb[20].mxu1 %vm5564_vm7, %v6314_v59  ;;  %v6643_v24 = vsel %vm2487_vm2, %v6640_v44, %v6642_v27  ;;  %v7055_v59 = vld [vmem:[#allocation12 + $0x8] sm:$0xff] }
 0x5e4   : > { %9486 = vmatprep.mubr.msk.f32.mxu1 %vm5564_vm7, %v6316_v40  ;;  %9793 = vmatpush3.bf16.msra.mxu1 %v9790_v10  ;;  %v6630_v10 = vrot.slane %v14243_v38, 3  ;;  %v6635_v38 = vsel %vm2487_vm2, %v6632_v43, %v6634_v50 }
 0x5e5   : > { %9795 = vmatprep.subr.bf16.mxu1 %v9794_v2 }
 0x5e6   : > { %v6631_v31 = vsel %vm2487_vm2, %v6628_v63, %v6630_v10  ;;  %v6633_v19 = vsel %vm2487_vm2, %v6630_v10, %v6632_v43 }
 0x5e7   : > { %9487 = vmatmul.mubr.msk.f32.gmra.mrb[22].mxu1 %vm5564_vm7, %v6318_v17 }
 0x5e8   : > { %9489 = vmatprep.mubr.msk.f32.mxu1 %vm5564_vm7, %v6320_v3 }
 0x5eb   : > { %9490 = vmatmul.mubr.msk.f32.gmra.mrb[24].mxu1 %vm5564_vm7, %v6322_v7 }
 0x5ec   : > { %9492 = vmatprep.mubr.msk.f32.mxu1 %vm5564_vm7, %v6324_v12 }
 0x5ef   : > { %9493 = vmatmul.mubr.msk.f32.gmra.mrb[26].mxu1 %vm5564_vm7, %v6326_v29 }
 0x5f0   : > { %9495 = vmatprep.mubr.msk.f32.mxu1 %vm5564_vm7, %v6328_v56 }
 0x5f3   : > { %9496 = vmatmul.mubr.msk.f32.gmra.mrb[28].mxu1 %vm5564_vm7, %v6330_v13 }
 0x5f4   : > { %9498 = vmatprep.mubr.msk.f32.mxu1 %vm5564_vm7, %v6332_v30 }
 0x5f7   : > { %9499 = vmatmul.mubr.msk.f32.gmra.mrb[30].mxu1 %vm5564_vm7, %v14343_v6  ;;  %v6614_v6 = vrot.slane %v14167_v46, 3  ;;  %v6620_v46 = vrot.slane %v14195_v18, 3 }
 0x5f8   : > { %9501 = vmatprep.mubr.msk.f32.mxu1 %vm5564_vm7, %v14358_v47  ;;  %v6613_v47 = vsel %vm2487_vm2, %v6611_v53, %v6612_v37 }
 0x5fb   : > { %9502 = vmatmul.mubr.msk.f32.gmra.mrb[32].mxu1 %vm5564_vm7, %v14369_v25  ;;  %v6616_v25 = vrot.slane %v14176_v0, 3  ;;  %v6621_v0 = vsel %vm2487_vm2, %v6618_v52, %v6620_v46 }
 0x5fc   : > { %9504 = vmatprep.mubr.msk.f32.mxu1 %vm5564_vm7, %v14378_v11  ;;  %v6615_v11 = vsel %vm2487_vm2, %v6612_v37, %v6614_v6 }
 0x5fd   : > { %v6617_v36 = vsel %vm2487_vm2, %v6614_v6, %v6616_v25 }
 0x5ff   : > { %9505 = vmatmul.mubr.msk.f32.gmra.mrb[34].mxu1 %vm5564_vm7, %v14387_v16  ;;  %v6619_v16 = vsel %vm2487_vm2, %v6616_v25, %v6618_v52 }
 0x600   : > { %9507 = vmatprep.mubr.msk.f32.mxu1 %vm5564_vm7, %v14396_v26  ;;  %v6624_v26 = vrot.slane %v14216_v54, 3  ;;  %v6629_v54 = vsel %vm2487_vm2, %v6626_v49, %v6628_v63 }
 0x603   : > { %9508 = vmatmul.mubr.msk.f32.gmra.mrb[36].mxu1 %vm5564_vm7, %v6343_v57  ;;  %v6622_v57 = vrot.slane %v14206_v58, 3  ;;  %v6627_v58 = vsel %vm2487_vm2, %v6624_v26, %v6626_v49 }
 0x604   : > { %9526 = vmatprep.mubr.msk.f32.mxu1 %vm5564_vm7, %v6613_v47 }
 0x605   : > { %v6623_v1 = vsel %vm2487_vm2, %v6620_v46, %v6622_v57  ;;  %v6625_v18 = vsel %vm2487_vm2, %v6622_v57, %v6624_v26 }
 0x607   : > { %9527 = vmatmul.mubr.msk.f32.vlgmr.msra.gmra.mrb[14].mxu1 %vm5564_vm7, %v6615_v11 }
 0x608   : > { %9529 = vmatprep.mubr.msk.f32.mxu1 %vm5564_vm7, %v6617_v36  ;;  %9797 = vmatpush3.bf16.msra.mxu1 %v9794_v2  ;;  %v7070_v2 = vld [vmem:[#allocation12 + $0x78] sm:$0xff] }
 0x609   : > { %9799 = vmatprep.subr.bf16.mxu1 %v9798_v28 }
 0x60b   : > { %9530 = vmatmul.mubr.msk.f32.gmra.mrb[16].mxu1 %vm5564_vm7, %v6619_v16 }
 0x60c   : > { %9532 = vmatprep.mubr.msk.f32.mxu1 %vm5564_vm7, %v6621_v0  ;;  %9801 = vmatpush3.bf16.msra.mxu1 %v9798_v28 }
 0x60f   : > { %9533 = vmatmul.mubr.msk.f32.gmra.mrb[18].mxu1 %vm5564_vm7, %v6623_v1 }
 0x610   : > { %9535 = vmatprep.mubr.msk.f32.mxu1 %vm5564_vm7, %v6625_v18 }
 0x613   : > { %9536 = vmatmul.mubr.msk.f32.gmra.mrb[20].mxu1 %vm5564_vm7, %v6627_v58 }
 0x614   : > { %9538 = vmatprep.mubr.msk.f32.mxu1 %vm5564_vm7, %v6629_v54 }
 0x617   : > { %9539 = vmatmul.mubr.msk.f32.gmra.mrb[22].mxu1 %vm5564_vm7, %v6631_v31 }
 0x618   : > { %9541 = vmatprep.mubr.msk.f32.mxu1 %vm5564_vm7, %v6633_v19 }
 0x61b   : > { %9542 = vmatmul.mubr.msk.f32.gmra.mrb[24].mxu1 %vm5564_vm7, %v6635_v38 }
 0x61c   : > { %9544 = vmatprep.mubr.msk.f32.mxu1 %vm5564_vm7, %v6637_v14 }
 0x61f   : > { %9545 = vmatmul.mubr.msk.f32.gmra.mrb[26].mxu1 %vm5564_vm7, %v6639_v62 }
 0x620   : > { %9547 = vmatprep.mubr.msk.f32.mxu1 %vm5564_vm7, %v6641_v41 }
 0x623   : > { %9548 = vmatmul.mubr.msk.f32.gmra.mrb[28].mxu1 %vm5564_vm7, %v6643_v24 }
 0x624   : > { %9550 = vmatprep.mubr.msk.f32.mxu1 %vm5564_vm7, %v6645_v22 }
 0x627   : > { %9551 = vmatmul.mubr.msk.f32.gmra.mrb[30].mxu1 %vm5564_vm7, %v14407_v15  ;;  %v7067_v15 = vld [vmem:[#allocation12 + $0x60] sm:$0xff] }
 0x628   : > { %9553 = vmatprep.mubr.msk.f32.mxu1 %vm5564_vm7, %v14417_v4  ;;  %v7068_v4 = vld [vmem:[#allocation12 + $0x68] sm:$0xff] }
 0x62b   : > { %9554 = vmatmul.mubr.msk.f32.gmra.mrb[32].mxu1 %vm5564_vm7, %v14420_v32  ;;  %v9802_v32 = vpack.c.bf16 %v7068_v4, %v7067_v15 }
 0x62c   : > { %9556 = vmatprep.mubr.msk.f32.mxu1 %vm5564_vm7, %v14429_v48  ;;  %v7069_v48 = vld [vmem:[#allocation12 + $0x70] sm:$0xff] }
 0x62d   : > { %9803 = vmatprep.subr.bf16.mxu1 %v9802_v32 }
 0x62e   : > { %9805 = vmatpush3.bf16.msra.mxu1 %v9802_v32 }
 0x62f   : > { %9557 = vmatmul.mubr.msk.f32.gmra.mrb[34].mxu1 %vm5564_vm7, %v14432_v60  ;;  %v9806_v60 = vpack.c.bf16 %v7070_v2, %v7069_v48 }
 0x630   : > { %9559 = vmatprep.mubr.msk.f32.mxu1 %vm5564_vm7, %v14442_v5  ;;  %v7054_v5 = vld [vmem:[#allocation12] sm:$0xff] }
 0x631   : > { %9807 = vmatprep.subr.bf16.mxu1 %v9806_v60  ;;  %v14614_v8 = vpack.c.bf16 %v7055_v59, %v7054_v5 }
 0x632   : > { %9809 = vmatpush3.bf16.msra.mxu1 %v9806_v60 }
 0x633   : > { %9560 = vmatmul.mubr.msk.f32.gmra.mrb[36].mxu1 %vm5564_vm7, %v6656_v51  ;;  %9811 = vmatprep.subr.bf16.mxu1 %v14614_v8  ;;  %v14620_v51 = vld [vmem:[%s14966_s6] ss:$0 sm:$0xff] }
 0x6da   : > { %v9528_v61 = vpop.f32.mrb[14].mxu1 }
 0x6db   : > { %v6923_v40 = vadd.f32 %v9528_v61, %v14620_v51  ;;  %v6772_v45 = vpop.f32.mrb[15].mxu1 }
 0x6dc   : > { %v6922_v17 = vadd.f32 %v14620_v51, %v6772_v45 }
 0x6dd   : > { %v6947_v55 = vmax.f32 %v6923_v40, 0.0 }
 0x6de   : > { %v6946_v3 = vmax.f32 %v6922_v17, 0.0  ;;  %v9531_v34 = vpop.f32.mrb[16].mxu1  ;;  %v9814_v17 = vpack.c.bf16 %v7057_v33, %v7056_v35 }
 0x6df   : > { %6971 = vst.msk [vmem:[#allocation4 + $0x8] sm:$0xff] %vm5564_vm7, %v6947_v55  ;;  %v6925_v7 = vadd.f32 %v9531_v34, %v14620_v51  ;;  %v6782_v21 = vpop.f32.mrb[17].mxu1 }
 0x6e0   : > { %6970 = vst.msk [vmem:[#allocation4] sm:$0xff] %vm5564_vm7, %v6946_v3  ;;  %v6924_v12 = vadd.f32 %v14620_v51, %v6782_v21  ;;  %v7059_v21 = vld [vmem:[#allocation12 + $0x28] sm:$0xff] }
 0x6e1   : > { %v6949_v20 = vmax.f32 %v6925_v7, 0.0  ;;  %v7058_v7 = vld [vmem:[#allocation12 + $0x20] sm:$0xff] }
 0x6e2   : > { %v6948_v29 = vmax.f32 %v6924_v12, 0.0  ;;  %v9534_v42 = vpop.f32.mrb[18].mxu1 }
 0x6e3   : > { %6973 = vst.msk [vmem:[#allocation4 + $0x18] sm:$0xff] %vm5564_vm7, %v6949_v20  ;;  %v6927_v56 = vadd.f32 %v9534_v42, %v14620_v51  ;;  %v6792_v13 = vpop.f32.mrb[19].mxu1 }
 0x6e4   : > { %6972 = vst.msk [vmem:[#allocation4 + $0x10] sm:$0xff] %vm5564_vm7, %v6948_v29  ;;  %v6926_v30 = vadd.f32 %v14620_v51, %v6792_v13 }
 0x6e5   : > { %v6951_v37 = vmax.f32 %v6927_v56, 0.0 }
 0x6e6   : > { %v6950_v53 = vmax.f32 %v6926_v30, 0.0  ;;  %v9537_v6 = vpop.f32.mrb[20].mxu1 }
 0x6e7   : > { %6975 = vst.msk [vmem:[#allocation4 + $0x28] sm:$0xff] %vm5564_vm7, %v6951_v37  ;;  %v6929_v47 = vadd.f32 %v9537_v6, %v14620_v51  ;;  %v6802_v25 = vpop.f32.mrb[21].mxu1  ;;  %v6995_v11 = vld [vmem:[#allocation4] ss:$2 sm:$0xff]  ;;  %v7019_v52 = vld [vmem:[#allocation4 + $0x1] ss:$2 sm:$0xff] }
 0x6e8   : > { %6974 = vst.msk [vmem:[#allocation4 + $0x20] sm:$0xff] %vm5564_vm7, %v6950_v53  ;;  %v6928_v36 = vadd.f32 %v14620_v51, %v6802_v25  ;;  %v14636_v16 = vmax.f32 %v6995_v11, %v7019_v52  ;;  %v9818_v25 = vpack.c.bf16 %v7059_v21, %v7058_v7 }
 0x6e9   : > { %v6953_v46 = vmax.f32 %v6929_v47, 0.0 }
 0x6ea   : > { %v6952_v57 = vmax.f32 %v6928_v36, 0.0  ;;  %v9540_v0 = vpop.f32.mrb[22].mxu1  ;;  %v7083_v54 = vrot.slane %v14636_v16, 1  ;;  %v7413_v43 = vrot.slane %v14636_v16, 2  ;;  %v7606_v27 = vrot.slane %v14636_v16, 3 }
 0x6eb   : > { %6977 = vst.msk [vmem:[#allocation4 + $0x38] sm:$0xff] %vm5564_vm7, %v6953_v46  ;;  %v6931_v26 = vadd.f32 %v9540_v0, %v14620_v51  ;;  %v6812_v1 = vpop.f32.mrb[23].mxu1  ;;  %v6997_v49 = vld [vmem:[#allocation4 + $0x10] ss:$2 sm:$0xff]  ;;  %v7021_v18 = vld [vmem:[#allocation4 + $0x11] ss:$2 sm:$0xff] }
 0x6ec   : > { %6976 = vst.msk [vmem:[#allocation4 + $0x30] sm:$0xff] %vm5564_vm7, %v6952_v57  ;;  %v6930_v63 = vadd.f32 %v14620_v51, %v6812_v1  ;;  %v14642_v58 = vmax.f32 %v6997_v49, %v7021_v18  ;;  %v7061_v46 = vld [vmem:[#allocation12 + $0x38] sm:$0xff] }
 0x6ed   : > { %v6955_v10 = vmax.f32 %v6931_v26, 0.0 }
 0x6ee   : > { %v6954_v31 = vmax.f32 %v6930_v63, 0.0  ;;  %v9543_v50 = vpop.f32.mrb[24].mxu1  ;;  %v7084_v19 = vrot.slane %v14642_v58, 1  ;;  %v7414_v9 = vrot.slane %v14642_v58, 2  ;;  %v7607_v38 = vrot.slane %v14642_v58, 3 }
 0x6ef   : > { %6979 = vst.msk [vmem:[#allocation4 + $0x48] sm:$0xff] %vm5564_vm7, %v6955_v10  ;;  %v6933_v39 = vadd.f32 %v9543_v50, %v14620_v51  ;;  %v6822_v14 = vpop.f32.mrb[25].mxu1  ;;  %v6999_v44 = vld [vmem:[#allocation4 + $0x20] ss:$2 sm:$0xff]  ;;  %v7023_v62 = vld [vmem:[#allocation4 + $0x21] ss:$2 sm:$0xff] }
 0x6f0   : > { %6978 = vst.msk [vmem:[#allocation4 + $0x40] sm:$0xff] %vm5564_vm7, %v6954_v31  ;;  %v6932_v41 = vadd.f32 %v14620_v51, %v6822_v14  ;;  %v7085_v24 = vsel %vm1327_vm0, %v7083_v54, %v7084_v19  ;;  %v14655_v22 = vmax.f32 %v6999_v44, %v7023_v62  ;;  %v14658_v28 = vsel %vm1907_vm1, %v7413_v43, %v7414_v9 }
 0x6f1   : > { %v6957_v15 = vmax.f32 %v6933_v39, 0.0  ;;  %9578 = vmatprep.mubr.msk.f32.mxu1 %vm5564_vm7, %v7085_v24  ;;  %v14662_v4 = vsel %vm2487_vm2, %v7606_v27, %v7607_v38  ;;  %v7406_v39 = vld [vmem:[#allocation12 + $0x88] sm:$0xff] }
 0x6f2   : > { %v6956_v32 = vmax.f32 %v6932_v41, 0.0  ;;  %v9546_v48 = vpop.f32.mrb[26].mxu1  ;;  %v7086_v2 = vrot.slane %v14655_v22, 1  ;;  %v7416_v60 = vrot.slane %v14655_v22, 2  ;;  %v7609_v5 = vrot.slane %v14655_v22, 3 }
 0x6f3   : > { %6981 = vst.msk [vmem:[#allocation4 + $0x58] sm:$0xff] %vm5564_vm7, %v6957_v15  ;;  %v6935_v59 = vadd.f32 %v9546_v48, %v14620_v51  ;;  %v6832_v61 = vpop.f32.mrb[27].mxu1  ;;  %v7001_v40 = vld [vmem:[#allocation4 + $0x30] ss:$2 sm:$0xff]  ;;  %v7025_v45 = vld [vmem:[#allocation4 + $0x31] ss:$2 sm:$0xff] }
 0x6f4   : > { %6980 = vst.msk [vmem:[#allocation4 + $0x50] sm:$0xff] %vm5564_vm7, %v6956_v32  ;;  %v6934_v55 = vadd.f32 %v14620_v51, %v6832_v61  ;;  %v7087_v3 = vsel %vm1327_vm0, %v7084_v19, %v7086_v2  ;;  %v14672_v34 = vmax.f32 %v7001_v40, %v7025_v45  ;;  %v14677_v12 = vsel %vm1907_vm1, %v7414_v9, %v7416_v60 }
 0x6f5   : > { %v6959_v20 = vmax.f32 %v6935_v59, 0.0  ;;  %9579 = vmatmul.mubr.msk.f32.vlgmr.msra.gmra.mrb[38].mxu1 %vm5564_vm7, %v7087_v3  ;;  %v14681_v29 = vsel %vm2487_vm2, %v7607_v38, %v7609_v5  ;;  %v7405_v38 = vld [vmem:[#allocation12 + $0x80] sm:$0xff] }
 0x6f6   : > { %v6958_v42 = vmax.f32 %v6934_v55, 0.0  ;;  %v9549_v56 = vpop.f32.mrb[28].mxu1  ;;  %v7088_v13 = vrot.slane %v14672_v34, 1  ;;  %9813 = vmatpush3.bf16.msra.mxu1 %v14614_v8  ;;  %v7611_v30 = vrot.slane %v14672_v34, 3  ;;  %v7060_v8 = vld [vmem:[#allocation12 + $0x30] sm:$0xff]  ;;  %v14714_v48 = vpack.c.bf16 %v7406_v39, %v7405_v38 }
 0x6f7   : > { %6983 = vst.msk [vmem:[#allocation4 + $0x68] sm:$0xff] %vm5564_vm7, %v6959_v20  ;;  %v6937_v37 = vadd.f32 %v9549_v56, %v14620_v51  ;;  %v6842_v53 = vpop.f32.mrb[29].mxu1  ;;  %v7003_v6 = vld [vmem:[#allocation4 + $0x40] ss:$2 sm:$0xff]  ;;  %v7027_v47 = vld [vmem:[#allocation4 + $0x41] ss:$2 sm:$0xff]  ;;  %9815 = vmatprep.subr.bf16.mxu1 %v9814_v17  ;;  %v9822_v31 = vpack.c.bf16 %v7061_v46, %v7060_v8 }
 0x6f8   : > { %6982 = vst.msk [vmem:[#allocation4 + $0x60] sm:$0xff] %vm5564_vm7, %v6958_v42  ;;  %v6936_v11 = vadd.f32 %v14620_v51, %v6842_v53  ;;  %v7089_v52 = vsel %vm1327_vm0, %v7086_v2, %v7088_v13  ;;  %v14691_v36 = vmax.f32 %v7003_v6, %v7027_v47  ;;  %v14695_v0 = vsel %vm2487_vm2, %v7609_v5, %v7611_v30 }
 0x6f9   : > { %v6961_v57 = vmax.f32 %v6937_v37, 0.0  ;;  %9581 = vmatprep.mubr.msk.f32.mxu1 %vm5564_vm7, %v7089_v52 }
 0x6fa   : > { %v6960_v26 = vmax.f32 %v6936_v11, 0.0  ;;  %v9552_v1 = vpop.f32.mrb[30].mxu1  ;;  %v7090_v49 = vrot.slane %v14691_v36, 1  ;;  %9817 = vmatpush3.bf16.msra.mxu1 %v9814_v17  ;;  %v7613_v18 = vrot.slane %v14691_v36, 3 }
 0x6fb   : > { %6985 = vst.msk [vmem:[#allocation4 + $0x78] sm:$0xff] %vm5564_vm7, %v6961_v57  ;;  %v6939_v63 = vadd.f32 %v9552_v1, %v14620_v51  ;;  %v6852_v10 = vpop.f32.mrb[31].mxu1  ;;  %v7005_v54 = vld [vmem:[#allocation4 + $0x50] ss:$2 sm:$0xff]  ;;  %v7029_v43 = vld [vmem:[#allocation4 + $0x51] ss:$2 sm:$0xff]  ;;  %9819 = vmatprep.subr.bf16.mxu1 %v9818_v25 }
 0x6fc   : > { %6984 = vst.msk [vmem:[#allocation4 + $0x70] sm:$0xff] %vm5564_vm7, %v6960_v26  ;;  %v6938_v50 = vadd.f32 %v14620_v51, %v6852_v10  ;;  %v7091_v19 = vsel %vm1327_vm0, %v7088_v13, %v7090_v49  ;;  %v14704_v9 = vmax.f32 %v7005_v54, %v7029_v43  ;;  %v14708_v44 = vsel %vm2487_vm2, %v7611_v30, %v7613_v18 }
 0x6fd   : > { %v6963_v14 = vmax.f32 %v6939_v63, 0.0  ;;  %9582 = vmatmul.mubr.msk.f32.gmra.mrb[40].mxu1 %vm5564_vm7, %v7091_v19 }
 0x6fe   : > { %v6962_v62 = vmax.f32 %v6938_v50, 0.0  ;;  %v9555_v27 = vpop.f32.mrb[32].mxu1  ;;  %v7092_v41 = vrot.slane %v14704_v9, 1  ;;  %9821 = vmatpush3.bf16.msra.mxu1 %v9818_v25  ;;  %v7615_v24 = vrot.slane %v14704_v9, 3 }
 0x6ff   : > { %6987 = vst.msk [vmem:[#allocation4 + $0x88] sm:$0xff] %vm5564_vm7, %v6963_v14  ;;  %v6941_v35 = vadd.f32 %v9555_v27, %v14620_v51  ;;  %v6862_v33 = vpop.f32.mrb[33].mxu1  ;;  %v7007_v15 = vld [vmem:[#allocation4 + $0x60] ss:$2 sm:$0xff]  ;;  %v7031_v32 = vld [vmem:[#allocation4 + $0x61] ss:$2 sm:$0xff]  ;;  %9823 = vmatprep.subr.bf16.mxu1 %v9822_v31 }
 0x700   : > { %6986 = vst.msk [vmem:[#allocation4 + $0x80] sm:$0xff] %vm5564_vm7, %v6962_v62  ;;  %v6940_v2 = vadd.f32 %v14620_v51, %v6862_v33  ;;  %v7093_v5 = vsel %vm1327_vm0, %v7090_v49, %v7092_v41  ;;  %v14719_v59 = vmax.f32 %v7007_v15, %v7031_v32  ;;  %v14723_v40 = vsel %vm2487_vm2, %v7613_v18, %v7615_v24 }
 0x701   : > { %v6965_v61 = vmax.f32 %v6941_v35, 0.0  ;;  %9584 = vmatprep.mubr.msk.f32.mxu1 %vm5564_vm7, %v7093_v5 }
 0x702   : > { %v6964_v45 = vmax.f32 %v6940_v2, 0.0  ;;  %v9558_v17 = vpop.f32.mrb[34].mxu1  ;;  %v7094_v55 = vrot.slane %v14719_v59, 1  ;;  %9825 = vmatpush3.bf16.msra.mxu1 %v9822_v31  ;;  %v7617_v3 = vrot.slane %v14719_v59, 3 }
 0x703   : > { %6989 = vst.msk [vmem:[#allocation4 + $0x98] sm:$0xff] %vm5564_vm7, %v6965_v61  ;;  %v6943_v7 = vadd.f32 %v9558_v17, %v14620_v51  ;;  %v6872_v21 = vpop.f32.mrb[35].mxu1  ;;  %v7009_v20 = vld [vmem:[#allocation4 + $0x70] ss:$2 sm:$0xff]  ;;  %v7033_v42 = vld [vmem:[#allocation4 + $0x71] ss:$2 sm:$0xff]  ;;  %9827 = vmatprep.subr.bf16.mxu1 %v14714_v48 }
 0x704   : > { %6988 = vst.msk [vmem:[#allocation4 + $0x90] sm:$0xff] %vm5564_vm7, %v6964_v45  ;;  %v6942_v56 = vadd.f32 %v14620_v51, %v6872_v21  ;;  %v7095_v13 = vsel %vm1327_vm0, %v7092_v41, %v7094_v55  ;;  %v14733_v30 = vmax.f32 %v7009_v20, %v7033_v42  ;;  %v14737_v53 = vsel %vm2487_vm2, %v7615_v24, %v7617_v3  ;;  %v7407_v21 = vld [vmem:[#allocation12 + $0x90] sm:$0xff]  ;;  %v7408_v20 = vld [vmem:[#allocation12 + $0x98] sm:$0xff] }
 0x705   : > { %v6967_v37 = vmax.f32 %v6943_v7, 0.0  ;;  %9585 = vmatmul.mubr.msk.f32.gmra.mrb[42].mxu1 %vm5564_vm7, %v7095_v13  ;;  %v9830_v42 = vpack.c.bf16 %v7408_v20, %v7407_v21  ;;  %v7410_v13 = vld [vmem:[#allocation12 + $0xa8] sm:$0xff]  ;;  %v7847_v21 = vld [vmem:[#allocation14 + $0x18] sm:$0xff] }
 0x706   : > { %v6966_v6 = vmax.f32 %v6942_v56, 0.0  ;;  %v9561_v47 = vpop.f32.mrb[36].mxu1  ;;  %v7096_v25 = vrot.slane %v14733_v30, 1  ;;  %v7619_v11 = vrot.slane %v14733_v30, 3  ;;  %v7409_v56 = vld [vmem:[#allocation12 + $0xa0] sm:$0xff] }
 0x707   : > { %6991 = vst.msk [vmem:[#allocation4 + $0xa8] sm:$0xff] %vm5564_vm7, %v6967_v37  ;;  %v6945_v52 = vadd.f32 %v9561_v47, %v14620_v51  ;;  %v6882_v8 = vpop.f32.mrb[37].mxu1  ;;  %v7011_v46 = vld [vmem:[#allocation4 + $0x80] ss:$2 sm:$0xff]  ;;  %v7035_v57 = vld [vmem:[#allocation4 + $0x81] ss:$2 sm:$0xff]  ;;  %v9834_v37 = vpack.c.bf16 %v7410_v13, %v7409_v56 }
 0x708   : > { %6990 = vst.msk [vmem:[#allocation4 + $0xa0] sm:$0xff] %vm5564_vm7, %v6966_v6  ;;  %v6944_v26 = vadd.f32 %v14620_v51, %v6882_v8  ;;  %v7097_v1 = vsel %vm1327_vm0, %v7094_v55, %v7096_v25  ;;  %v14746_v49 = vmax.f32 %v7011_v46, %v7035_v57  ;;  %v14750_v63 = vsel %vm2487_vm2, %v7617_v3, %v7619_v11  ;;  %v7411_v6 = vld [vmem:[#allocation12 + $0xb0] sm:$0xff]  ;;  %v7412_v47 = vld [vmem:[#allocation12 + $0xb8] sm:$0xff] }
 0x709   : > { %v6969_v18 = vmax.f32 %v6945_v52, 0.0  ;;  %9587 = vmatprep.mubr.msk.f32.mxu1 %vm5564_vm7, %v7097_v1  ;;  %v7601_v52 = vld [vmem:[#allocation12 + $0xd8] sm:$0xff]  ;;  %v7418_v8 = vrot.slane %v14672_v34, 2  ;;  %v7420_v57 = vrot.slane %v14691_v36, 2  ;;  %v7603_v1 = vld [vmem:[#allocation12 + $0xe8] sm:$0xff] }
 0x70a   : > { %v6968_v10 = vmax.f32 %v6944_v26, 0.0  ;;  %v7098_v54 = vrot.slane %v14746_v49, 1  ;;  %v7621_v43 = vrot.slane %v14746_v49, 3  ;;  %v7602_v26 = vld [vmem:[#allocation12 + $0xe0] sm:$0xff]  ;;  %v8608_v56 = vld [vmem:[%s15436_s24] ss:$0 sm:$0xff] }
 0x70b   : > { %6993 = vst.msk [vmem:[#allocation4 + $0xb8] sm:$0x1f] %vm5612_vm8, %v6969_v18  ;;  %v7013_v31 = vld [vmem:[#allocation4 + $0x90] ss:$2 sm:$0xff]  ;;  %v7037_v50 = vld [vmem:[#allocation4 + $0x91] ss:$2 sm:$0xff]  ;;  %v7419_v18 = vsel %vm1907_vm1, %v7416_v60, %v7418_v8 }
 0x70c   : > { %6992 = vst.msk [vmem:[#allocation4 + $0xb0] sm:$0xff] %vm5564_vm7, %v6968_v10  ;;  %v7099_v51 = vsel %vm1327_vm0, %v7096_v25, %v7098_v54  ;;  %v14757_v19 = vmax.f32 %v7013_v31, %v7037_v50  ;;  %v14760_v38 = vsel %vm2487_vm2, %v7619_v11, %v7621_v43  ;;  %v7598_v25 = vld [vmem:[#allocation12 + $0xc0] sm:$0xff]  ;;  %v7600_v11 = vld [vmem:[#allocation12 + $0xd0] sm:$0xff]  ;;  %v7422_v10 = vrot.slane %v14704_v9, 2 }
 0x70d   : > { %9588 = vmatmul.mubr.msk.f32.gmra.mrb[44].mxu1 %vm5564_vm7, %v7099_v51  ;;  %v9846_v46 = vpack.c.bf16 %v7601_v52, %v7600_v11  ;;  %v7428_v31 = vrot.slane %v14746_v49, 2 }
 0x70e   : > { %v7100_v39 = vrot.slane %v14757_v19, 1  ;;  %v7623_v14 = vrot.slane %v14757_v19, 3  ;;  %v7430_v50 = vrot.slane %v14757_v19, 2 }
 0x70f   : > { %v7015_v62 = vld [vmem:[#allocation4 + $0xa0] ss:$2 sm:$0xff]  ;;  %v7039_v27 = vld [vmem:[#allocation4 + $0xa1] ss:$2 sm:$0xff] }
 0x710   : > { %v7101_v41 = vsel %vm1327_vm0, %v7098_v54, %v7100_v39  ;;  %v14766_v24 = vmax.f32 %v7015_v62, %v7039_v27  ;;  %v14769_v35 = vsel %vm2487_vm2, %v7621_v43, %v7623_v14  ;;  %v7604_v54 = vld [vmem:[#allocation12 + $0xf0] sm:$0xff]  ;;  %v7605_v43 = vld [vmem:[#allocation12 + $0xf8] sm:$0xff]  ;;  %v7870_v62 = vld [vmem:[#allocation14 + $0xa0] sm:$0xff] }
 0x711   : > { %9590 = vmatprep.mubr.msk.f32.mxu1 %vm5564_vm7, %v7101_v41  ;;  %v9854_v60 = vpack.c.bf16 %v7605_v43, %v7604_v54  ;;  %v7872_v41 = vld [vmem:[#allocation14 + $0xb0] sm:$0xff] }
 0x712   : > { %v7102_v33 = vrot.slane %v14766_v24, 1  ;;  %v7625_v15 = vrot.slane %v14766_v24, 3  ;;  %v7432_v51 = vrot.slane %v14766_v24, 2 }
 0x713   : > { %v7017_v32 = vld [vmem:[#allocation4 + $0xb0] ss:$2 sm:$0xff]  ;;  %v7041_v2 = vld [vmem:[#allocation4 + $0xb1] ss:$2 sm:$0xff] }
 0x714   : > { %v7103_v5 = vsel %vm1327_vm0, %v7100_v39, %v7102_v33  ;;  %v14775_v61 = vmax.f32 %v7017_v32, %v7041_v2  ;;  %v14778_v45 = vsel %vm2487_vm2, %v7623_v14, %v7625_v15  ;;  %v7431_v39 = vsel %vm1907_vm1, %v7428_v31, %v7430_v50  ;;  %v7874_v32 = vld [vmem:[#allocation14 + $0xc0] sm:$0xff]  ;;  %v7876_v2 = vld [vmem:[#allocation14 + $0xd0] sm:$0xff] }
 0x715   : > { %9591 = vmatmul.mubr.msk.f32.gmra.mrb[46].mxu1 %vm5564_vm7, %v7103_v5  ;;  %v7433_v14 = vsel %vm1907_vm1, %v7430_v50, %v7432_v51  ;;  %v7879_v5 = vld [vmem:[#allocation14 + $0xe8] sm:$0xff] }
 0x716   : > { %v7104_v17 = vrot.slane %v14775_v61, 1  ;;  %v7627_v55 = vrot.slane %v14775_v61, 3 }
 0x718   : > { %v7105_v3 = vsel %vm1327_vm0, %v7102_v33, %v7104_v17  ;;  %v14787_v7 = vsel %vm2487_vm2, %v7625_v15, %v7627_v55  ;;  %v9864_v33 = vpack.c.bf16 %v7872_v41, %v7870_v62  ;;  %v7851_v62 = vld [vmem:[#allocation14 + $0x38] sm:$0xff] }
 0x719   : > { %9593 = vmatprep.mubr.msk.f32.mxu1 %vm5564_vm7, %v7105_v3  ;;  %v7880_v3 = vld [vmem:[#allocation14 + $0xf0] sm:$0xff] }
 0x71a   : > { %9594 = vmatmul.mubr.msk.f32.gmra.mrb[48].mxu1 %vm5564_vm7, %v7104_v17 }
 0x71b   : > { %9612 = vmatprep.mubr.msk.f32.mxu1 %vm5564_vm7, %v14636_v16  ;;  %v9838_v16 = vpack.c.bf16 %v7412_v47, %v7411_v6 }
 0x71e   : > { %9613 = vmatmul.mubr.msk.f32.vlgmr.msra.gmra.mrb[38].mxu1 %vm5564_vm7, %v14642_v58  ;;  %v7599_v58 = vld [vmem:[#allocation12 + $0xc8] sm:$0xff] }
 0x71f   : > { %9829 = vmatpush3.bf16.msra.mxu1 %v14714_v48  ;;  %9615 = vmatprep.mubr.msk.f32.mxu1 %vm5564_vm7, %v14655_v22  ;;  %v9842_v48 = vpack.c.bf16 %v7599_v58, %v7598_v25  ;;  %v7426_v22 = vrot.slane %v14733_v30, 2 }
 0x720   : > { %9831 = vmatprep.subr.bf16.mxu1 %v9830_v42 }
 0x722   : > { %9616 = vmatmul.mubr.msk.f32.gmra.mrb[40].mxu1 %vm5564_vm7, %v14672_v34  ;;  %v9850_v34 = vpack.c.bf16 %v7603_v1, %v7602_v26 }
 0x723   : > { %9618 = vmatprep.mubr.msk.f32.mxu1 %vm5564_vm7, %v14691_v36  ;;  %9833 = vmatpush3.bf16.msra.mxu1 %v9830_v42  ;;  %v7424_v36 = vrot.slane %v14719_v59, 2 }
 0x724   : > { %9835 = vmatprep.subr.bf16.mxu1 %v9834_v37 }
 0x726   : > { %9619 = vmatmul.mubr.msk.f32.gmra.mrb[42].mxu1 %vm5564_vm7, %v14704_v9  ;;  %v7425_v9 = vsel %vm1907_vm1, %v7422_v10, %v7424_v36 }
 0x727   : > { %9621 = vmatprep.mubr.msk.f32.mxu1 %vm5564_vm7, %v14719_v59  ;;  %9837 = vmatpush3.bf16.msra.mxu1 %v9834_v37  ;;  %v7427_v59 = vsel %vm1907_vm1, %v7424_v36, %v7426_v22 }
 0x728   : > { %9839 = vmatprep.subr.bf16.mxu1 %v9838_v16 }
 0x72a   : > { %9622 = vmatmul.mubr.msk.f32.gmra.mrb[44].mxu1 %vm5564_vm7, %v14733_v30  ;;  %v7429_v30 = vsel %vm1907_vm1, %v7426_v22, %v7428_v31 }
 0x72b   : > { %9624 = vmatprep.mubr.msk.f32.mxu1 %vm5564_vm7, %v14746_v49  ;;  %9841 = vmatpush3.bf16.msra.mxu1 %v9838_v16  ;;  %v7434_v49 = vrot.slane %v14775_v61, 2 }
 0x72c   : > { %9843 = vmatprep.subr.bf16.mxu1 %v9842_v48 }
 0x72e   : > { %9625 = vmatmul.mubr.msk.f32.gmra.mrb[46].mxu1 %vm5564_vm7, %v14757_v19  ;;  %v7435_v19 = vsel %vm1907_vm1, %v7432_v51, %v7434_v49 }
 0x72f   : > { %9627 = vmatprep.mubr.msk.f32.mxu1 %vm5564_vm7, %v14766_v24  ;;  %v7875_v24 = vld [vmem:[#allocation14 + $0xc8] sm:$0xff] }
 0x732   : > { %9628 = vmatmul.mubr.msk.f32.gmra.mrb[48].mxu1 %vm5564_vm7, %v14775_v61  ;;  %v7881_v61 = vld [vmem:[#allocation14 + $0xf8] sm:$0xff] }
 0x733   : > { %9646 = vmatprep.mubr.msk.f32.mxu1 %vm5564_vm7, %v14658_v28  ;;  %v7421_v28 = vsel %vm1907_vm1, %v7418_v8, %v7420_v57  ;;  %v9870_v17 = vpack.c.bf16 %v7881_v61, %v7879_v5  ;;  %v7855_v5 = vld [vmem:[#allocation14 + $0x58] sm:$0xff] }
 0x736   : > { %9647 = vmatmul.mubr.msk.f32.vlgmr.msra.gmra.mrb[38].mxu1 %vm5564_vm7, %v14677_v12  ;;  %v7423_v12 = vsel %vm1907_vm1, %v7420_v57, %v7422_v10 }
 0x737   : > { %9845 = vmatpush3.bf16.msra.mxu1 %v9842_v48  ;;  %9649 = vmatprep.mubr.msk.f32.mxu1 %vm5564_vm7, %v7419_v18 }
 0x738   : > { %9847 = vmatprep.subr.bf16.mxu1 %v9846_v46 }
 0x73a   : > { %9650 = vmatmul.mubr.msk.f32.gmra.mrb[40].mxu1 %vm5564_vm7, %v7421_v28 }
 0x73b   : > { %9652 = vmatprep.mubr.msk.f32.mxu1 %vm5564_vm7, %v7423_v12  ;;  %9849 = vmatpush3.bf16.msra.mxu1 %v9846_v46 }
 0x73c   : > { %9851 = vmatprep.subr.bf16.mxu1 %v9850_v34 }
 0x73e   : > { %9653 = vmatmul.mubr.msk.f32.gmra.mrb[42].mxu1 %vm5564_vm7, %v7425_v9 }
 0x73f   : > { %9655 = vmatprep.mubr.msk.f32.mxu1 %vm5564_vm7, %v7427_v59  ;;  %9853 = vmatpush3.bf16.msra.mxu1 %v9850_v34 }
 0x740   : > { %9855 = vmatprep.subr.bf16.mxu1 %v9854_v60 }
 0x742   : > { %9656 = vmatmul.mubr.msk.f32.gmra.mrb[44].mxu1 %vm5564_vm7, %v7429_v30 }
 0x743   : > { %9658 = vmatprep.mubr.msk.f32.mxu1 %vm5564_vm7, %v7431_v39  ;;  %9857 = vmatpush3.bf16.msra.mxu1 %v9854_v60 }
 0x746   : > { %9659 = vmatmul.mubr.msk.f32.gmra.mrb[46].mxu1 %vm5564_vm7, %v7433_v14 }
 0x747   : > { %9661 = vmatprep.mubr.msk.f32.mxu1 %vm5564_vm7, %v7435_v19 }
 0x74a   : > { %9662 = vmatmul.mubr.msk.f32.gmra.mrb[48].mxu1 %vm5564_vm7, %v7434_v49 }
 0x74b   : > { %9680 = vmatprep.mubr.msk.f32.mxu1 %vm5564_vm7, %v14662_v4  ;;  %v7867_v4 = vld [vmem:[#allocation14 + $0x88] sm:$0xff] }
 0x74e   : > { %9681 = vmatmul.mubr.msk.f32.vlgmr.msra.gmra.mrb[38].mxu1 %vm5564_vm7, %v14681_v29  ;;  %v7869_v29 = vld [vmem:[#allocation14 + $0x98] sm:$0xff] }
 0x74f   : > { %9683 = vmatprep.mubr.msk.f32.mxu1 %vm5564_vm7, %v14695_v0  ;;  %v9858_v0 = vpack.c.bf16 %v7869_v29, %v7867_v4 }
 0x751   : > { %9859 = vmatprep.subr.bf16.mxu1 %v9858_v0 }
 0x752   : > { %9684 = vmatmul.mubr.msk.f32.gmra.mrb[40].mxu1 %vm5564_vm7, %v14708_v44  ;;  %v7866_v44 = vld [vmem:[#allocation14 + $0x80] sm:$0xff] }
 0x753   : > { %9686 = vmatprep.mubr.msk.f32.mxu1 %vm5564_vm7, %v14723_v40  ;;  %v7868_v40 = vld [vmem:[#allocation14 + $0x90] sm:$0xff] }
 0x756   : > { %9687 = vmatmul.mubr.msk.f32.gmra.mrb[42].mxu1 %vm5564_vm7, %v14737_v53  ;;  %v9860_v53 = vpack.c.bf16 %v7868_v40, %v7866_v44  ;;  %v7844_v40 = vld [vmem:[#allocation14] sm:$0xff] }
 0x757   : > { %9689 = vmatprep.mubr.msk.f32.mxu1 %vm5564_vm7, %v14750_v63  ;;  %v7871_v63 = vld [vmem:[#allocation14 + $0xa8] sm:$0xff] }
 0x758   : > { %9861 = vmatpush1.bf16.msra.mxu1 %v9860_v53  ;;  %v7846_v53 = vld [vmem:[#allocation14 + $0x10] sm:$0xff] }
 0x75a   : > { %9690 = vmatmul.mubr.msk.f32.gmra.mrb[44].mxu1 %vm5564_vm7, %v14760_v38  ;;  %v7873_v38 = vld [vmem:[#allocation14 + $0xb8] sm:$0xff] }
 0x75b   : > { %9692 = vmatprep.mubr.msk.f32.mxu1 %vm5564_vm7, %v14769_v35  ;;  %v9862_v27 = vpack.c.bf16 %v7873_v38, %v7871_v63  ;;  %v7877_v35 = vld [vmem:[#allocation14 + $0xd8] sm:$0xff]  ;;  %v7849_v38 = vld [vmem:[#allocation14 + $0x28] sm:$0xff] }
 0x75c   : > { %v9866_v15 = vpack.c.bf16 %v7877_v35, %v7875_v24  ;;  %v9876_v24 = vpack.c.bf16 %v7846_v53, %v7844_v40 }
 0x75d   : > { %9863 = vmatprep.subr.bf16.mxu1 %v9862_v27 }
 0x75e   : > { %9693 = vmatmul.mubr.msk.f32.gmra.mrb[46].mxu1 %vm5564_vm7, %v14778_v45  ;;  %v9868_v45 = vpack.c.bf16 %v7876_v2, %v7874_v32  ;;  %v7850_v32 = vld [vmem:[#allocation14 + $0x30] sm:$0xff]  ;;  %v7853_v2 = vld [vmem:[#allocation14 + $0x48] sm:$0xff] }
 0x75f   : > { %9695 = vmatprep.mubr.msk.f32.mxu1 %vm5564_vm7, %v14787_v7  ;;  %9865 = vmatpush1.bf16.msra.mxu1 %v9864_v33  ;;  %v7845_v7 = vld [vmem:[#allocation14 + $0x8] sm:$0xff]  ;;  %v9878_v33 = vpack.c.bf16 %v7851_v62, %v7849_v38 }
 0x760   : > { %9867 = vmatprep.subr.bf16.mxu1 %v9866_v15  ;;  %v9874_v42 = vpack.c.bf16 %v7847_v21, %v7845_v7  ;;  %v7848_v15 = vld [vmem:[#allocation14 + $0x20] sm:$0xff]  ;;  %v7859_v7 = vld [vmem:[#allocation14 + $0x78] sm:$0xff] }
 0x761   : > { %v9880_v61 = vpack.c.bf16 %v7850_v32, %v7848_v15 }
 0x762   : > { %9696 = vmatmul.mubr.msk.f32.gmra.mrb[48].mxu1 %vm5564_vm7, %v7627_v55  ;;  %v7878_v55 = vld [vmem:[#allocation14 + $0xe0] sm:$0xff] }
 0x763   : > { %7949 = vmatprep.mubr.f32.mxu1 %v15435_v23  ;;  %9869 = vmatpush1.bf16.msra.mxu1 %v9868_v45  ;;  %v9872_v20 = vpack.c.bf16 %v7880_v3, %v7878_v55  ;;  %v9882_v45 = vpack.c.bf16 %v7855_v5, %v7853_v2  ;;  %v7854_v55 = vld [vmem:[#allocation14 + $0x50] sm:$0xff]  ;;  %v7857_v3 = vld [vmem:[#allocation14 + $0x68] sm:$0xff] }
 0x764   : > { %9871 = vmatprep.subr.bf16.mxu1 %v9870_v17  ;;  %v7852_v17 = vld [vmem:[#allocation14 + $0x40] sm:$0xff] }
 0x767   : > { %9873 = vmatpush1.bf16.msra.mxu1 %v9872_v20  ;;  %v9884_v20 = vpack.c.bf16 %v7854_v55, %v7852_v17 }
 0x768   : > { %9875 = vmatprep.subr.bf16.mxu1 %v9874_v42  ;;  %v9886_v42 = vpack.c.bf16 %v7859_v7, %v7857_v3 }
 0x821   : > { %v9682_v13 = vpop.f32.mrb[38].mxu1 }
 0x822   : > { %v7798_v37 = vadd.f32 %v9682_v13, %v8608_v56  ;;  %v7719_v6 = vpop.f32.mrb[39].mxu1  ;;  %v7858_v13 = vld [vmem:[#allocation14 + $0x70] sm:$0xff] }
 0x823   : > { %v7797_v47 = vadd.f32 %v8608_v56, %v7719_v6  ;;  %v8037_v6 = vld [vmem:[#allocation14 + $0x108] sm:$0xff] }
 0x824   : > { %v7810_v16 = vmax.f32 %v7798_v37, 0.0 }
 0x825   : > { %v7809_v25 = vmax.f32 %v7797_v47, 0.0  ;;  %v9685_v58 = vpop.f32.mrb[40].mxu1  ;;  %v8039_v47 = vld [vmem:[#allocation14 + $0x118] sm:$0xff] }
 0x826   : > { %7822 = vst.msk [vmem:[#allocation5 + $0x8] sm:$0xff] %vm5564_vm7, %v7810_v16  ;;  %v7800_v48 = vadd.f32 %v9685_v58, %v8608_v56  ;;  %v7729_v11 = vpop.f32.mrb[41].mxu1  ;;  %v9890_v58 = vpack.c.bf16 %v8039_v47, %v8037_v6 }
 0x827   : > { %7821 = vst.msk [vmem:[#allocation5] sm:$0xff] %vm5564_vm7, %v7809_v25  ;;  %v7799_v52 = vadd.f32 %v8608_v56, %v7729_v11  ;;  %v8038_v11 = vld [vmem:[#allocation14 + $0x110] sm:$0xff] }
 0x828   : > { %v7812_v8 = vmax.f32 %v7800_v48, 0.0  ;;  %v8036_v48 = vld [vmem:[#allocation14 + $0x100] sm:$0xff] }
 0x829   : > { %v7811_v46 = vmax.f32 %v7799_v52, 0.0  ;;  %v9688_v57 = vpop.f32.mrb[42].mxu1  ;;  %v8041_v52 = vld [vmem:[#allocation14 + $0x128] sm:$0xff] }
 0x82a   : > { %7824 = vst.msk [vmem:[#allocation5 + $0x18] sm:$0xff] %vm5564_vm7, %v7812_v8  ;;  %v7802_v26 = vadd.f32 %v9688_v57, %v8608_v56  ;;  %v7739_v1 = vpop.f32.mrb[43].mxu1  ;;  %v8043_v8 = vld [vmem:[#allocation14 + $0x138] sm:$0xff] }
 0x82b   : > { %7823 = vst.msk [vmem:[#allocation5 + $0x10] sm:$0xff] %vm5564_vm7, %v7811_v46  ;;  %v7801_v18 = vadd.f32 %v8608_v56, %v7739_v1  ;;  %v9892_v46 = vpack.c.bf16 %v8038_v11, %v8036_v48  ;;  %v8040_v1 = vld [vmem:[#allocation14 + $0x120] sm:$0xff] }
 0x82c   : > { %v7814_v10 = vmax.f32 %v7802_v26, 0.0  ;;  %v9894_v26 = vpack.c.bf16 %v8043_v8, %v8041_v52 }
 0x82d   : > { %v7813_v34 = vmax.f32 %v7801_v18, 0.0  ;;  %v9691_v28 = vpop.f32.mrb[44].mxu1  ;;  %v8042_v18 = vld [vmem:[#allocation14 + $0x130] sm:$0xff] }
 0x82e   : > { %7826 = vst.msk [vmem:[#allocation5 + $0x28] sm:$0xff] %vm5564_vm7, %v7814_v10  ;;  %v7804_v36 = vadd.f32 %v9691_v28, %v8608_v56  ;;  %v7749_v54 = vpop.f32.mrb[45].mxu1  ;;  %v8045_v10 = vld [vmem:[#allocation14 + $0x148] sm:$0xff]  ;;  %v9896_v28 = vpack.c.bf16 %v8042_v18, %v8040_v1 }
 0x82f   : > { %7825 = vst.msk [vmem:[#allocation5 + $0x20] sm:$0xff] %vm5564_vm7, %v7813_v34  ;;  %v7803_v43 = vadd.f32 %v8608_v56, %v7749_v54  ;;  %v8047_v34 = vld [vmem:[#allocation14 + $0x158] sm:$0xff]  ;;  %v8044_v54 = vld [vmem:[#allocation14 + $0x140] sm:$0xff] }
 0x830   : > { %v7816_v12 = vmax.f32 %v7804_v36, 0.0  ;;  %v9898_v36 = vpack.c.bf16 %v8047_v34, %v8045_v10 }
 0x831   : > { %v7815_v22 = vmax.f32 %v7803_v43, 0.0  ;;  %v9694_v60 = vpop.f32.mrb[46].mxu1  ;;  %v8046_v43 = vld [vmem:[#allocation14 + $0x150] sm:$0xff] }
 0x832   : > { %7828 = vst.msk [vmem:[#allocation5 + $0x38] sm:$0xff] %vm5564_vm7, %v7816_v12  ;;  %v7806_v9 = vadd.f32 %v9694_v60, %v8608_v56  ;;  %v7759_v31 = vpop.f32.mrb[47].mxu1  ;;  %v8049_v12 = vld [vmem:[#allocation14 + $0x168] sm:$0xff]  ;;  %v9900_v60 = vpack.c.bf16 %v8046_v43, %v8044_v54 }
 0x833   : > { %7827 = vst.msk [vmem:[#allocation5 + $0x30] sm:$0xff] %vm5564_vm7, %v7815_v22  ;;  %v7805_v59 = vadd.f32 %v8608_v56, %v7759_v31  ;;  %v8051_v22 = vld [vmem:[#allocation14 + $0x178] sm:$0xff]  ;;  %v8048_v31 = vld [vmem:[#allocation14 + $0x160] sm:$0xff] }
 0x834   : > { %v7818_v50 = vmax.f32 %v7806_v9, 0.0  ;;  %v9902_v9 = vpack.c.bf16 %v8051_v22, %v8049_v12 }
 0x835   : > { %v7817_v30 = vmax.f32 %v7805_v59, 0.0  ;;  %v9697_v51 = vpop.f32.mrb[48].mxu1  ;;  %v8050_v59 = vld [vmem:[#allocation14 + $0x170] sm:$0xff] }
 0x836   : > { %7830 = vst.msk [vmem:[#allocation5 + $0x48] sm:$0xff] %vm5564_vm7, %v7818_v50  ;;  %v7808_v39 = vadd.f32 %v9697_v51, %v8608_v56  ;;  %v7769_v49 = vpop.f32.mrb[49].mxu1 }
 0x837   : > { %7829 = vst.msk [vmem:[#allocation5 + $0x40] sm:$0xff] %vm5564_vm7, %v7817_v30  ;;  %v7807_v14 = vadd.f32 %v8608_v56, %v7769_v49  ;;  %v7856_v56 = vld [vmem:[#allocation14 + $0x60] sm:$0xff]  ;;  %v9904_v30 = vpack.c.bf16 %v8050_v59, %v8048_v31 }
 0x838   : > { %v7820_v19 = vmax.f32 %v7808_v39, 0.0  ;;  %v9888_v16 = vpack.c.bf16 %v7858_v13, %v7856_v56 }
 0x839   : > { %v7819_v4 = vmax.f32 %v7807_v14, 0.0 }
 0x83a   : > { %7832 = vst.msk [vmem:[#allocation5 + $0x58] sm:$0x1f] %vm5612_vm8, %v7820_v19 }
 0x83b   : > { %7831 = vst.msk [vmem:[#allocation5 + $0x50] sm:$0xff] %vm5564_vm7, %v7819_v4 }
 0x841   : > { %v14897_v41 = vld [vmem:[#allocation5 + $0x4] ss:$12 sm:$0xff]  ;;  %v8033_v51 = vld [vmem:[#allocation5 + $0x5] ss:$12 sm:$0xff] }
 0x842   : > { %v7836_v29 = vld [vmem:[#allocation5 + $0x1] ss:$12 sm:$0xff]  ;;  %v14891_v0 = vld [vmem:[#allocation5 + $0x2] ss:$12 sm:$0xff]  ;;  %v14894_v63 = vld [vmem:[#allocation5 + $0x3] ss:$12 sm:$0xff] }
 0x843   : > { %v7860_v44 = vmax.f32 %v7836_v29, %v14891_v0  ;;  %v7834_v21 = vld [vmem:[#allocation5] ss:$12 sm:$0xff]  ;;  %v8030_v50 = vmax.f32 %v14891_v0, %v14894_v63 }
 0x844   : > { %v7837_v37 = vmax.f32 %v7834_v21, %v7836_v29 }
 0x845   : > { %v7861_v27 = vmax.f32 %v7860_v44, %v14894_v63 }
 0x846   : > { %v7840_v25 = vmax.f32 %v7837_v37, %v14891_v0 }
 0x847   : > { %v7864_v35 = vmax.f32 %v7861_v27, %v14897_v41 }
 0x848   : > { %v7843_v57 = vmax.f32 %v7840_v25, %v14894_v63 }
 0x849   : > { %8609 = vmatmul.mubr.msk.f32.vlgmr.msra.gmra.mrb[50].mxu1 %vm5564_vm7, %v7864_v35 }
 0x84a   : > { %9877 = vmatpush1.bf16.msra.mxu1 %v9876_v24  ;;  %8023 = vmatprep.mubr.f32.mxu1 %v15435_v23 }
 0x84b   : > { %9879 = vmatprep.subr.bf16.mxu1 %v9878_v33 }
 0x84e   : > { %9881 = vmatpush1.bf16.msra.mxu1 %v9880_v61 }
 0x84f   : > { %9883 = vmatprep.subr.bf16.mxu1 %v9882_v45 }
 0x852   : > { %9885 = vmatpush1.bf16.msra.mxu1 %v9884_v20 }
 0x853   : > { %9887 = vmatprep.subr.bf16.mxu1 %v9886_v42 }
 0x856   : > { %9889 = vmatpush1.bf16.msra.mxu1 %v9888_v16 }
 0x857   : > { %9891 = vmatprep.subr.bf16.mxu1 %v9890_v58 }
 0x859   : > { %8610 = vmatmul.mubr.msk.f32.vlgmr.msra.gmra.mrb[50].mxu1 %vm5564_vm7, %v7843_v57 }
 0x85a   : > { %9893 = vmatpush1.bf16.msra.mxu1 %v9892_v46  ;;  %8119 = vmatprep.mubr.f32.mxu1 %v15435_v23  ;;  %v8031_v23 = vmax.f32 %v8030_v50, %v14897_v41 }
 0x85b   : > { %9895 = vmatprep.subr.bf16.mxu1 %v9894_v26 }
 0x85c   : > { %v8034_v39 = vmax.f32 %v8031_v23, %v8033_v51 }
 0x85e   : > { %9897 = vmatpush1.bf16.msra.mxu1 %v9896_v28 }
 0x85f   : > { %9899 = vmatprep.subr.bf16.mxu1 %v9898_v36 }
 0x862   : > { %9901 = vmatpush1.bf16.msra.mxu1 %v9900_v60 }
 0x863   : > { %9903 = vmatprep.subr.bf16.mxu1 %v9902_v9 }
 0x866   : > { %9905 = vmatpush1.bf16.msra.mxu1 %v9904_v30 }
 0x869   : > { %8611 = vmatmul.mubr.msk.f32.vlgmr.msra.gmra.mrb[50].mxu1 %vm5564_vm7, %v8034_v39 }
 0x93c   : > { %v8121_v49 = vpop.f32.mrb[50].mxu1 }
 0x93d   : > { %8128 = vst [vmem:[%s432_s11] sm:$0xff] %v8121_v49  ;;  %v8123_v14 = vpop.f32.mrb[51].mxu1 }
 0x93e   : > { %8129 = vst.msk [vmem:[%s432_s11 + $0x8] sm:$0xff] %vm5564_vm7, %v8123_v14 }
 0x93f   : > { %10426 = shalt.err (!%p10423_p0)
}
 0x940   : > { %s10427_s3 = scalar_lea.hbm %s14917_s29, 256  ;;  %s10431_s11 = scalar_lea.hbm %s15437_s28, 512 }
 0x941   : > { %p10428_p2 = scmp.ne.s32.totalorder %s14917_s29, %s10427_s3  ;;  %p10432_p10 = scmp.lt.u32.totalorder %s14917_s29, %s15437_s28 }
 0x942   : > { %p10433_p11 = scmp.lt.u32.totalorder %s10431_s11, %s10427_s3  ;;  %p10435_p6 = scmp.lt.u32.totalorder %s10427_s3, %s14917_s29 }
 0x943   : > { %p10429_p8 = pnand %p10428_p2, %p15438_p5 }
 0x944   : > { %p10434_p1 = por %p10433_p11, %p10432_p10 }
 0x945   : > { %p10430_p4 = pneg %p10429_p8 }
 0x946   : > { %p10436_p7 = por %p10435_p6, %p10434_p1 }
 0x948   : > { %p10437_p9 = pnand %p10436_p7, %p10430_p4 }
 0x94a   : > { %10440 = shalt.err (!%p10437_p9)
}
 0x94b   : > { %10184 = dma.vmem_to_hbm [thread:$0]  (%p15438_p5), %s14912_s20, 256, %s14917_s29, %s8131_s12  }
 0x94c PF: > { %s8157_s8 = sand.u32 1, %s10475_s13   ;;  %p15439_p12 = scmp.ne.s32.totalorder %s15080_s21, 0 }
 0x94d   : > { %p15440_p3 = scmp.ge.s32.totalorder %s10487_s16, 2  ;;  %s8158_s18 = scalar_lea.sflag [#allocation8], %s8157_s8 }
 0x94f   : > { %p10204_p13 = pnand %p15440_p3, %p15439_p12 }
 0x951   : > { %10470 = dma.done.wait (!%p10204_p13), %s8158_s18, 256  }
 0x952   : > { %10472 = vsyncadd (!%p10204_p13), %s8158_s18, 4294967040  ;;  %p25_p0 = scmp.ge.s32.totalorder %s10712_s10, 4   ;;  %s15441_s13 = smov %s10479_s14 }
 0x953   : > { %s15442_s14 = smov %s10483_s15  ;;  %s15443_s15 = smov %s10723_s30 }
 0x954   : > { %s15444_s16 = smov %s10712_s10  ;;  %27 = sbr.rel (!%p25_p0) target bundleno = 11 (0xb), region = 302 }
 0x95b   :  { %8163 = vsyncpa [#allocation7], 1 }
 0x95c   :  { %8165 = vsyncpa [#allocation7 + $0x1], 1 }
 0x95d   :  { %8166 = vsyncpa [#allocation10], 1 }
 0x95e   :  { %8167 = vsyncpa [#allocation13], 1 }
 0x95f   :  { %8168 = vsyncpa [#allocation8], 1 }
 0x960   :  { %8170 = vsyncpa [#allocation8 + $0x1], 1 }

</bundles_post_ra>
